<compile_context>
chip_gen: v7x
topology: tpu7x:2x2x1
jax: 0.10.0
libtpu: 0.0.40
codegen_flags: <defaults>
</compile_context>

<pallas_src>
import numpy as np
import jax
import jax.numpy as jnp
from jax.experimental import pallas as pl
from jax.experimental.pallas import tpu as pltpu


# ------------------------------ fused kernel --------------------------------

def _lenet_fused_kernel(x_ref, w1_ref, b1_ref, w2_ref, b2_ref,
                        wf1_ref, bf1_ref, wf2_ref, bf2_ref, wf3_ref, bf3_ref,
                        o_ref):
    f32, bf16 = jnp.float32, jnp.bfloat16

    # ---- conv1 (1->6, k=5) + bias + ReLU: one dense bf16 matmul ------------
    # Output lanes: (row parity, col parity, i', j', oc) = 4 quarters x 896
    # (12*12*6 = 864 used + 32 zero-pad so each quarter is 128-aligned).
    h = jnp.dot(x_ref[...], w1_ref[...], preferred_element_type=f32)
    h = jnp.maximum(h + b1_ref[...], 0.0)                        # (bt, 3584)

    # ---- 2x2 max-pool == max over the four 128-aligned lane quarters -------
    h = jnp.maximum(jnp.maximum(h[:, 0:896], h[:, 896:1792]),
                    jnp.maximum(h[:, 1792:2688], h[:, 2688:3584]))  # (bt, 896)

    # ---- conv2 (6->16, k=5) + bias + ReLU: one dense bf16 matmul -----------
    # Output lanes: 4 quarters x 256 (= 4*4*16), exactly 128-aligned.
    h = jnp.dot(h.astype(bf16), w2_ref[...], preferred_element_type=f32)
    h = jnp.maximum(h + b2_ref[...], 0.0)                        # (bt, 1024)
    h = jnp.maximum(jnp.maximum(h[:, 0:256], h[:, 256:512]),
                    jnp.maximum(h[:, 512:768], h[:, 768:1024]))     # (bt, 256)

    # ---- fc1 -> relu -> fc2 -> relu -> fc3 (lanes padded to 128) -----------
    h = jnp.dot(h.astype(bf16), wf1_ref[...], preferred_element_type=f32)
    h = jnp.maximum(h + bf1_ref[...], 0.0)                       # (bt, 128)
    h = jnp.dot(h.astype(bf16), wf2_ref[...], preferred_element_type=f32)
    h = jnp.maximum(h + bf2_ref[...], 0.0)                       # (bt, 128)
    h = jnp.dot(h.astype(bf16), wf3_ref[...], preferred_element_type=f32)
    o_ref[...] = (h + bf3_ref[...]).astype(o_ref.dtype)          # (bt, 128)


# ------------------------------- wrapper -------------------------------------

@jax.jit
def lenet_forward(x, params):
    """x: (B, 1, 28, 28) f32 NCHW -> logits (B, 10) f32."""
    B = x.shape[0]
    # bf16 images: halves per-step input HBM traffic; accumulation stays f32.
    xf = x.reshape(B, 28 * 28).astype(jnp.bfloat16)

    # Batch tile: multiple of 8, capped at 128 (VMEM headroom on v7x's 64 MiB);
    # pad B so the grid always has >= 2 equal steps (bt <= B/2) so the
    # "parallel" grid axis actually shards across v7x's 2 TensorCores.
    half = (B + 1) // 2
    bt = min(128, ((half + 7) // 8) * 8)
    nt = max(2, -(-B // bt))
    Bp = nt * bt
    if Bp != B:
        xf = jnp.pad(xf, ((0, Bp - B), (0, 0)))

    full = lambda b: (0, 0)
    in_specs = [
        pl.BlockSpec((bt, 784), lambda b: (b, 0)),   # images (bf16)
        pl.BlockSpec((784, 3584), full),             # conv1 dense weight (bf16)
        pl.BlockSpec((1, 3584), full),               # conv1 bias (f32)
        pl.BlockSpec((896, 1024), full),             # conv2 dense weight (bf16)
        pl.BlockSpec((1, 1024), full),               # conv2 bias (f32)
        pl.BlockSpec((256, 128), full),              # fc1 (bf16, lane-padded)
        pl.BlockSpec((1, 128), full),
        pl.BlockSpec((128, 128), full),              # fc2 (bf16, padded)
        pl.BlockSpec((1, 128), full),
        pl.BlockSpec((128, 128), full),              # fc3 (bf16, padded)
        pl.BlockSpec((1, 128), full),
    ]
    out = pl.pallas_call(
        _lenet_fused_kernel,
        out_shape=jax.ShapeDtypeStruct((Bp, 128), jnp.float32),
        grid=(nt,),
        in_specs=in_specs,
        out_specs=pl.BlockSpec((bt, 128), lambda b: (b, 0)),
        compiler_params=pltpu.CompilerParams(
            dimension_semantics=("parallel",),
            vmem_limit_bytes=48 * 1024 * 1024),
    )(xf, params["w1d"], params["b1d"], params["w2d"], params["b2d"],
      params["wf1"], params["bf1"], params["wf2"], params["bf2"],
      params["wf3"], params["bf3"])
    return out[:B, :10]


# --------------------------- params: init + packing --------------------------

def init_lenet_params(key):
    """PyTorch-layout LeNet parameters (same init bounds as nn.Conv2d/Linear)."""
    def uniform(k, shape, fan_in):
        bound = 1.0 / np.sqrt(fan_in)
        return jax.random.uniform(k, shape, jnp.float32, -bound, bound)

    ks = jax.random.split(key, 10)
    return dict(
        w1=uniform(ks[0], (6, 1, 5, 5), 25), b1=uniform(ks[1], (6,), 25),
        w2=uniform(ks[2], (16, 6, 5, 5), 150), b2=uniform(ks[3], (16,), 150),
        wf1=uniform(ks[4], (120, 256), 256), bf1=uniform(ks[5], (120,), 256),
        wf2=uniform(ks[6], (84, 120), 120), bf2=uniform(ks[7], (84,), 120),
        wf3=uniform(ks[8], (10, 84), 84), bf3=uniform(ks[9], (10,), 84),
    )


def pack_lenet_params(raw):
    """Repack PyTorch-layout weights for the fused kernel.

    Conv weights become dense "im2col-in-the-weight" matrices whose OUTPUT
    lanes are ordered (row parity, col parity, pooled row, pooled col, out
    channel) in four 128-aligned quarters, so the in-kernel 2x2 max-pool is a
    max of four contiguous lane quarters.  fc1 rows are permuted from PyTorch
    (c, h, w) flatten order to the kernel's (h, w, c) order; fc output lanes
    are zero-padded to 128.
    """
    w1 = np.asarray(raw["w1"], np.float32)    # (6, 1, 5, 5)
    b1 = np.asarray(raw["b1"], np.float32)
    w2 = np.asarray(raw["w2"], np.float32)    # (16, 6, 5, 5)
    b2 = np.asarray(raw["b2"], np.float32)
    wf1 = np.asarray(raw["wf1"], np.float32)  # (120, 256)
    bf1 = np.asarray(raw["bf1"], np.float32)
    wf2 = np.asarray(raw["wf2"], np.float32)  # (84, 120)
    bf2 = np.asarray(raw["bf2"], np.float32)
    wf3 = np.asarray(raw["wf3"], np.float32)  # (10, 84)
    bf3 = np.asarray(raw["bf3"], np.float32)

    # conv1 dense: (784 input pixels, 4 quarters x 896 lanes)
    Q1 = 896                                  # 12*12*6 = 864 -> pad to 7*128
    w1d = np.zeros((784, 4 * Q1), np.float32)
    b1d = np.zeros((1, 4 * Q1), np.float32)
    for ip in range(2):
        for jp in range(2):
            q = 2 * ip + jp
            for i2 in range(12):              # pooled output row i'
                for j2 in range(12):          # pooled output col j'
                    lane = q * Q1 + (i2 * 12 + j2) * 6
                    b1d[0, lane:lane + 6] = b1
                    i, j = 2 * i2 + ip, 2 * j2 + jp   # conv1 output pixel
                    for ki in range(5):
                        for kj in range(5):
                            w1d[(i + ki) * 28 + (j + kj),
                                lane:lane + 6] = w1[:, 0, ki, kj]

    # conv2 dense: input lanes = p1 layout (i'*12 + j')*6 + c (896 wide),
    # output = 4 quarters x 256 lanes (4*4*16, already 128-aligned).
    Q2 = 256
    w2d = np.zeros((Q1, 4 * Q2), np.float32)
    b2d = np.zeros((1, 4 * Q2), np.float32)
    for ip in range(2):
        for jp in range(2):
            q = 2 * ip + jp
            for i2 in range(4):               # pooled output row i''
                for j2 in range(4):           # pooled output col j''
                    lane = q * Q2 + (i2 * 4 + j2) * 16
                    b2d[0, lane:lane + 16] = b2
                    i, j = 2 * i2 + ip, 2 * j2 + jp   # conv2 output pixel
                    for ki in range(5):
                        for kj in range(5):
                            for c in range(6):
                                w2d[((i + ki) * 12 + (j + kj)) * 6 + c,
                                    lane:lane + 16] = w2[:, c, ki, kj]

    # fc1: rows permuted from PyTorch (c, h, w) to kernel (h, w, c); pad lanes.
    wf1r = wf1.reshape(120, 16, 4, 4).transpose(2, 3, 1, 0).reshape(256, 120)
    wf1p = np.zeros((256, 128), np.float32); wf1p[:, :120] = wf1r
    bf1p = np.zeros((1, 128), np.float32);   bf1p[0, :120] = bf1

    wf2p = np.zeros((128, 128), np.float32); wf2p[:120, :84] = wf2.T
    bf2p = np.zeros((1, 128), np.float32);   bf2p[0, :84] = bf2

    wf3p = np.zeros((128, 128), np.float32); wf3p[:84, :10] = wf3.T
    bf3p = np.zeros((1, 128), np.float32);   bf3p[0, :10] = bf3

    bfl = lambda a: jnp.asarray(a, jnp.bfloat16)
    f32 = lambda a: jnp.asarray(a, jnp.float32)
    return dict(
        w1d=bfl(w1d), b1d=f32(b1d), w2d=bfl(w2d), b2d=f32(b2d),
        wf1=bfl(wf1p), bf1=f32(bf1p), wf2=bfl(wf2p), bf2=f32(bf2p),
        wf3=bfl(wf3p), bf3=f32(bf3p),
    )


# --------------------------- plain-JAX reference -----------------------------

def lenet_reference(x, raw):
    """Faithful mirror of the PyTorch LeNet forward (validation only)."""
    B = x.shape[0]

    def conv(h, w, b):
        C, k, OC = h.shape[1], w.shape[-1], w.shape[0]
        Ho, Wo = h.shape[2] - k + 1, h.shape[3] - k + 1
        cols = [h[:, c, ki:ki + Ho, kj:kj + Wo]
                for c in range(C) for ki in range(k) for kj in range(k)]
        p = jnp.stack(cols, axis=-1).reshape(B * Ho * Wo, C * k * k)
        o = p @ w.reshape(OC, C * k * k).T + b
        return o.reshape(B, Ho, Wo, OC).transpose(0, 3, 1, 2)

    def pool(h):
        return jnp.maximum(
            jnp.maximum(h[:, :, 0::2, 0::2], h[:, :, 0::2, 1::2]),
            jnp.maximum(h[:, :, 1::2, 0::2], h[:, :, 1::2, 1::2]))

    h = pool(jnp.maximum(conv(x, raw["w1"], raw["b1"]), 0.0))
    h = pool(jnp.maximum(conv(h, raw["w2"], raw["b2"]), 0.0))
    f = h.reshape(B, -1)
    z = jnp.maximum(f @ raw["wf1"].T + raw["bf1"], 0.0)
    z = jnp.maximum(z @ raw["wf2"].T + raw["bf2"], 0.0)
    return z @ raw["wf3"].T + raw["bf3"]


if __name__ == "__main__":
    key = jax.random.PRNGKey(0)
    kx, kp = jax.random.split(key)
    # fc1 = Linear(16*4*4, 120) implies 1x28x28 inputs.
    x = jax.random.normal(kx, (2, 1, 28, 28), jnp.float32)
    raw = init_lenet_params(kp)
    params = pack_lenet_params(raw)

    out = jax.block_until_ready(lenet_forward(x, params))
    assert out.shape == (2, 10) and out.dtype == jnp.float32

    ref = jax.block_until_ready(lenet_reference(x, raw))
    assert jnp.allclose(out, ref, rtol=5e-2, atol=5e-2), (
        f"mismatch vs reference, max abs err {jnp.max(jnp.abs(out - ref))}")
    print("KERNEL_OK")
</pallas_src>

<mosaic_0001>
module attributes {stable_mosaic.version = 11 : i64} {
  func.func @_lenet_fused_kernel(%arg0: i32, %arg1: memref<8x784xbf16, #tpu.memory_space<vmem>>, %arg2: memref<784x3584xbf16, #tpu.memory_space<vmem>>, %arg3: memref<1x3584xf32, #tpu.memory_space<vmem>>, %arg4: memref<896x1024xbf16, #tpu.memory_space<vmem>>, %arg5: memref<1x1024xf32, #tpu.memory_space<vmem>>, %arg6: memref<256x128xbf16, #tpu.memory_space<vmem>>, %arg7: memref<1x128xf32, #tpu.memory_space<vmem>>, %arg8: memref<128x128xbf16, #tpu.memory_space<vmem>>, %arg9: memref<1x128xf32, #tpu.memory_space<vmem>>, %arg10: memref<128x128xbf16, #tpu.memory_space<vmem>>, %arg11: memref<1x128xf32, #tpu.memory_space<vmem>>, %arg12: memref<8x128xf32, #tpu.memory_space<vmem>>) attributes {dimension_semantics = [#tpu.dimension_semantics<parallel>], iteration_bounds = array<i64: 2>, scalar_prefetch = 0 : i64, scratch_operands = 0 : i64, tpu.core_type = #tpu.core_type<tc>, window_params = [{transform_indices = @transform_0, window_bounds = array<i64: 8, 784>}, {pipeline_mode = #tpu.pipeline_mode<synchronous>, transform_indices = @transform_1, window_bounds = array<i64: 784, 3584>}, {pipeline_mode = #tpu.pipeline_mode<synchronous>, transform_indices = @transform_2, window_bounds = array<i64: 1, 3584>}, {pipeline_mode = #tpu.pipeline_mode<synchronous>, transform_indices = @transform_3, window_bounds = array<i64: 896, 1024>}, {pipeline_mode = #tpu.pipeline_mode<synchronous>, transform_indices = @transform_4, window_bounds = array<i64: 1, 1024>}, {pipeline_mode = #tpu.pipeline_mode<synchronous>, transform_indices = @transform_5, window_bounds = array<i64: 256, 128>}, {pipeline_mode = #tpu.pipeline_mode<synchronous>, transform_indices = @transform_6, window_bounds = array<i64: 1, 128>}, {pipeline_mode = #tpu.pipeline_mode<synchronous>, transform_indices = @transform_7, window_bounds = array<i64: 128, 128>}, {pipeline_mode = #tpu.pipeline_mode<synchronous>, transform_indices = @transform_8, window_bounds = array<i64: 1, 128>}, {pipeline_mode = #tpu.pipeline_mode<synchronous>, transform_indices = @transform_9, window_bounds = array<i64: 128, 128>}, {pipeline_mode = #tpu.pipeline_mode<synchronous>, transform_indices = @transform_10, window_bounds = array<i64: 1, 128>}, {transform_indices = @transform_11, window_bounds = array<i64: 8, 128>}]} {
    %c0 = arith.constant 0 : index
    %c0_0 = arith.constant 0 : index
    %0 = vector.load %arg1[%c0, %c0_0] : memref<8x784xbf16, #tpu.memory_space<vmem>>, vector<8x784xbf16>
    %c0_1 = arith.constant 0 : index
    %c0_2 = arith.constant 0 : index
    %1 = vector.load %arg2[%c0_1, %c0_2] : memref<784x3584xbf16, #tpu.memory_space<vmem>>, vector<784x3584xbf16>
    %cst = arith.constant dense<0.000000e+00> : vector<8x3584xf32>
    %2 = tpu.matmul %0, %1, %cst {dimension_numbers = #tpu.dot_dimension_numbers<[1], [0], [0], [1], [0, 0, 1, 1], [], []>} : vector<8x784xbf16>, vector<784x3584xbf16>, vector<8x3584xf32> -> vector<8x3584xf32>
    %c0_3 = arith.constant 0 : index
    %c0_4 = arith.constant 0 : index
    %3 = vector.load %arg3[%c0_3, %c0_4] : memref<1x3584xf32, #tpu.memory_space<vmem>>, vector<1x3584xf32>
    %4 = vector.broadcast %3 : vector<1x3584xf32> to vector<8x3584xf32>
    %5 = arith.addf %2, %4 : vector<8x3584xf32>
    %cst_5 = arith.constant 0.000000e+00 : f32
    %6 = vector.broadcast %cst_5 : f32 to vector<8x3584xf32>
    %7 = arith.maximumf %5, %6 : vector<8x3584xf32>
    %8 = vector.extract_strided_slice %7 {offsets = [0, 0], sizes = [8, 896], strides = [1, 1]} : vector<8x3584xf32> to vector<8x896xf32>
    %9 = vector.extract_strided_slice %7 {offsets = [0, 896], sizes = [8, 896], strides = [1, 1]} : vector<8x3584xf32> to vector<8x896xf32>
    %10 = arith.maximumf %8, %9 : vector<8x896xf32>
    %11 = vector.extract_strided_slice %7 {offsets = [0, 1792], sizes = [8, 896], strides = [1, 1]} : vector<8x3584xf32> to vector<8x896xf32>
    %12 = vector.extract_strided_slice %7 {offsets = [0, 2688], sizes = [8, 896], strides = [1, 1]} : vector<8x3584xf32> to vector<8x896xf32>
    %13 = arith.maximumf %11, %12 : vector<8x896xf32>
    %14 = arith.maximumf %10, %13 : vector<8x896xf32>
    %15 = arith.truncf %14 : vector<8x896xf32> to vector<8x896xbf16>
    %c0_6 = arith.constant 0 : index
    %c0_7 = arith.constant 0 : index
    %16 = vector.load %arg4[%c0_6, %c0_7] : memref<896x1024xbf16, #tpu.memory_space<vmem>>, vector<896x1024xbf16>
    %cst_8 = arith.constant dense<0.000000e+00> : vector<8x1024xf32>
    %17 = tpu.matmul %15, %16, %cst_8 {dimension_numbers = #tpu.dot_dimension_numbers<[1], [0], [0], [1], [0, 0, 1, 1], [], []>} : vector<8x896xbf16>, vector<896x1024xbf16>, vector<8x1024xf32> -> vector<8x1024xf32>
    %c0_9 = arith.constant 0 : index
    %c0_10 = arith.constant 0 : index
    %18 = vector.load %arg5[%c0_9, %c0_10] : memref<1x1024xf32, #tpu.memory_space<vmem>>, vector<1x1024xf32>
    %19 = vector.broadcast %18 : vector<1x1024xf32> to vector<8x1024xf32>
    %20 = arith.addf %17, %19 : vector<8x1024xf32>
    %cst_11 = arith.constant 0.000000e+00 : f32
    %21 = vector.broadcast %cst_11 : f32 to vector<8x1024xf32>
    %22 = arith.maximumf %20, %21 : vector<8x1024xf32>
    %23 = vector.extract_strided_slice %22 {offsets = [0, 0], sizes = [8, 256], strides = [1, 1]} : vector<8x1024xf32> to vector<8x256xf32>
    %24 = vector.extract_strided_slice %22 {offsets = [0, 256], sizes = [8, 256], strides = [1, 1]} : vector<8x1024xf32> to vector<8x256xf32>
    %25 = arith.maximumf %23, %24 : vector<8x256xf32>
    %26 = vector.extract_strided_slice %22 {offsets = [0, 512], sizes = [8, 256], strides = [1, 1]} : vector<8x1024xf32> to vector<8x256xf32>
    %27 = vector.extract_strided_slice %22 {offsets = [0, 768], sizes = [8, 256], strides = [1, 1]} : vector<8x1024xf32> to vector<8x256xf32>
    %28 = arith.maximumf %26, %27 : vector<8x256xf32>
    %29 = arith.maximumf %25, %28 : vector<8x256xf32>
    %30 = arith.truncf %29 : vector<8x256xf32> to vector<8x256xbf16>
    %c0_12 = arith.constant 0 : index
    %c0_13 = arith.constant 0 : index
    %31 = vector.load %arg6[%c0_12, %c0_13] : memref<256x128xbf16, #tpu.memory_space<vmem>>, vector<256x128xbf16>
    %cst_14 = arith.constant dense<0.000000e+00> : vector<8x128xf32>
    %32 = tpu.matmul %30, %31, %cst_14 {dimension_numbers = #tpu.dot_dimension_numbers<[1], [0], [0], [1], [0, 0, 1, 1], [], []>} : vector<8x256xbf16>, vector<256x128xbf16>, vector<8x128xf32> -> vector<8x128xf32>
    %c0_15 = arith.constant 0 : index
    %c0_16 = arith.constant 0 : index
    %33 = vector.load %arg7[%c0_15, %c0_16] : memref<1x128xf32, #tpu.memory_space<vmem>>, vector<1x128xf32>
    %34 = vector.broadcast %33 : vector<1x128xf32> to vector<8x128xf32>
    %35 = arith.addf %32, %34 : vector<8x128xf32>
    %cst_17 = arith.constant 0.000000e+00 : f32
    %36 = vector.broadcast %cst_17 : f32 to vector<8x128xf32>
    %37 = arith.maximumf %35, %36 : vector<8x128xf32>
    %38 = arith.truncf %37 : vector<8x128xf32> to vector<8x128xbf16>
    %c0_18 = arith.constant 0 : index
    %c0_19 = arith.constant 0 : index
    %39 = vector.load %arg8[%c0_18, %c0_19] : memref<128x128xbf16, #tpu.memory_space<vmem>>, vector<128x128xbf16>
    %cst_20 = arith.constant dense<0.000000e+00> : vector<8x128xf32>
    %40 = tpu.matmul %38, %39, %cst_20 {dimension_numbers = #tpu.dot_dimension_numbers<[1], [0], [0], [1], [0, 0, 1, 1], [], []>} : vector<8x128xbf16>, vector<128x128xbf16>, vector<8x128xf32> -> vector<8x128xf32>
    %c0_21 = arith.constant 0 : index
    %c0_22 = arith.constant 0 : index
    %41 = vector.load %arg9[%c0_21, %c0_22] : memref<1x128xf32, #tpu.memory_space<vmem>>, vector<1x128xf32>
    %42 = vector.broadcast %41 : vector<1x128xf32> to vector<8x128xf32>
    %43 = arith.addf %40, %42 : vector<8x128xf32>
    %cst_23 = arith.constant 0.000000e+00 : f32
    %44 = vector.broadcast %cst_23 : f32 to vector<8x128xf32>
    %45 = arith.maximumf %43, %44 : vector<8x128xf32>
    %46 = arith.truncf %45 : vector<8x128xf32> to vector<8x128xbf16>
    %c0_24 = arith.constant 0 : index
    %c0_25 = arith.constant 0 : index
    %47 = vector.load %arg10[%c0_24, %c0_25] : memref<128x128xbf16, #tpu.memory_space<vmem>>, vector<128x128xbf16>
    %cst_26 = arith.constant dense<0.000000e+00> : vector<8x128xf32>
    %48 = tpu.matmul %46, %47, %cst_26 {dimension_numbers = #tpu.dot_dimension_numbers<[1], [0], [0], [1], [0, 0, 1, 1], [], []>} : vector<8x128xbf16>, vector<128x128xbf16>, vector<8x128xf32> -> vector<8x128xf32>
    %c0_27 = arith.constant 0 : index
    %c0_28 = arith.constant 0 : index
    %49 = vector.load %arg11[%c0_27, %c0_28] : memref<1x128xf32, #tpu.memory_space<vmem>>, vector<1x128xf32>
    %50 = vector.broadcast %49 : vector<1x128xf32> to vector<8x128xf32>
    %51 = arith.addf %48, %50 : vector<8x128xf32>
    %c0_29 = arith.constant 0 : index
    %c0_30 = arith.constant 0 : index
    %52 = vector.load %arg12[%c0_29, %c0_30] : memref<8x128xf32, #tpu.memory_space<vmem>>, vector<8x128xf32>
    tpu.vector_store %arg12[%c0_29, %c0_30], %51 {strides = array<i32>} : memref<8x128xf32, #tpu.memory_space<vmem>>, vector<8x128xf32>,
    return
  }
  func.func @transform_0(%arg0: i32) -> (i32, i32) {
    %c0_i32 = arith.constant 0 : i32
    %c0_i32_0 = arith.constant 0 : i32
    return %arg0, %c0_i32 : i32, i32
  }
  func.func @transform_1(%arg0: i32) -> (i32, i32) {
    %c0_i32 = arith.constant 0 : i32
    %c0_i32_0 = arith.constant 0 : i32
    %c0_i32_1 = arith.constant 0 : i32
    return %c0_i32, %c0_i32_0 : i32, i32
  }
  func.func @transform_2(%arg0: i32) -> (i32, i32) {
    %c0_i32 = arith.constant 0 : i32
    %c0_i32_0 = arith.constant 0 : i32
    %c0_i32_1 = arith.constant 0 : i32
    return %c0_i32, %c0_i32_0 : i32, i32
  }
  func.func @transform_3(%arg0: i32) -> (i32, i32) {
    %c0_i32 = arith.constant 0 : i32
    %c0_i32_0 = arith.constant 0 : i32
    %c0_i32_1 = arith.constant 0 : i32
    return %c0_i32, %c0_i32_0 : i32, i32
  }
  func.func @transform_4(%arg0: i32) -> (i32, i32) {
    %c0_i32 = arith.constant 0 : i32
    %c0_i32_0 = arith.constant 0 : i32
    %c0_i32_1 = arith.constant 0 : i32
    return %c0_i32, %c0_i32_0 : i32, i32
  }
  func.func @transform_5(%arg0: i32) -> (i32, i32) {
    %c0_i32 = arith.constant 0 : i32
    %c0_i32_0 = arith.constant 0 : i32
    %c0_i32_1 = arith.constant 0 : i32
    return %c0_i32, %c0_i32_0 : i32, i32
  }
  func.func @transform_6(%arg0: i32) -> (i32, i32) {
    %c0_i32 = arith.constant 0 : i32
    %c0_i32_0 = arith.constant 0 : i32
    %c0_i32_1 = arith.constant 0 : i32
    return %c0_i32, %c0_i32_0 : i32, i32
  }
  func.func @transform_7(%arg0: i32) -> (i32, i32) {
    %c0_i32 = arith.constant 0 : i32
    %c0_i32_0 = arith.constant 0 : i32
    %c0_i32_1 = arith.constant 0 : i32
    return %c0_i32, %c0_i32_0 : i32, i32
  }
  func.func @transform_8(%arg0: i32) -> (i32, i32) {
    %c0_i32 = arith.constant 0 : i32
    %c0_i32_0 = arith.constant 0 : i32
    %c0_i32_1 = arith.constant 0 : i32
    return %c0_i32, %c0_i32_0 : i32, i32
  }
  func.func @transform_9(%arg0: i32) -> (i32, i32) {
    %c0_i32 = arith.constant 0 : i32
    %c0_i32_0 = arith.constant 0 : i32
    %c0_i32_1 = arith.constant 0 : i32
    return %c0_i32, %c0_i32_0 : i32, i32
  }
  func.func @transform_10(%arg0: i32) -> (i32, i32) {
    %c0_i32 = arith.constant 0 : i32
    %c0_i32_0 = arith.constant 0 : i32
    %c0_i32_1 = arith.constant 0 : i32
    return %c0_i32, %c0_i32_0 : i32, i32
  }
  func.func @transform_11(%arg0: i32) -> (i32, i32) {
    %c0_i32 = arith.constant 0 : i32
    %c0_i32_0 = arith.constant 0 : i32
    return %arg0, %c0_i32 : i32, i32
  }
}

</mosaic_0001>

<bundles_post_ra>
// kernel: lenet_forward.1
= control target key start
LH: loop header
LB: loop body
LE: loop exit
PB: predicated region body
PF: predicated region fallthrough
CT: control target
= control target key end

     0   :  { %16 = vsyncpa [#allocation3], 0  ;;  %s20833_s0 = inlined_call_operand.vmem [shape: bf16[16,784], index: 0, kind: input, shape index: {}]   ;;  %s20834_s1 = inlined_call_operand.hbm [shape: bf16[784,3584], index: 1, kind: input, shape index: {}]   ;;  %s20835_s2 = inlined_call_operand.hbm [shape: f32[1,3584], index: 2, kind: input, shape index: {}]   ;;  %s20836_s3 = inlined_call_operand.hbm [shape: bf16[896,1024], index: 3, kind: input, shape index: {}]   ;;  %s20837_s4 = inlined_call_operand.hbm [shape: f32[1,1024], index: 4, kind: input, shape index: {}]   ;;  %s20838_s5 = inlined_call_operand.hbm [shape: bf16[256,128], index: 5, kind: input, shape index: {}]   ;;  %s20839_s6 = inlined_call_operand.hbm [shape: f32[1,128], index: 6, kind: input, shape index: {}]   ;;  %s20840_s7 = inlined_call_operand.hbm [shape: bf16[128,128], index: 7, kind: input, shape index: {}]   ;;  %s20841_s8 = inlined_call_operand.hbm [shape: f32[1,128], index: 8, kind: input, shape index: {}]   ;;  %s20842_s9 = inlined_call_operand.hbm [shape: bf16[128,128], index: 9, kind: input, shape index: {}]   ;;  %s20843_s10 = inlined_call_operand.hbm [shape: f32[1,128], index: 10, kind: input, shape index: {}]   ;;  %s20844_s11 = inlined_call_operand.vmem [shape: f32[16,128], index: 11, kind: output, shape index: {}]  }
   0x1   :  { %17 = vsyncpa [#allocation5], 0 }
   0x2   :  { %18 = vsyncpa [#allocation8], 0 }
   0x3   :  { %19 = vsyncpa [#allocation11], 0 }
   0x4   :  { %20 = vsyncpa [#allocation14], 0 }
   0x5   :  { %21 = vsyncpa [#allocation17], 0  ;;  %s20091_s17 = smov 0  }
   0x6 LB: > { %s20012_s18 = smov [#allocation4]   ;;  %s20097_s20 = sadd.s32 4294967295, %s20010_s17   ;;  %s20010_s17 = sphi %s20091_s17, %s27_s17  }
   0x7   : > { %s320_s19 = sshll.u32 %s20012_s18, 4  ;;  %p15243_p0 = scmp.ge.s32.totalorder %s20010_s17, 1  ;;  %s20102_s19 = int_to_ptr.vmem [resolvable:$true] %s320_s19 }
   0x8   : > { %p294_p1 = scmp.lt.s32.totalorder %s20010_s17, 3  ;;  %p20845_p2 = scmp.eq.s32.totalorder %s20097_s20, 0 }
   0x9   : > { %s20013_s22 = smov [#allocation7]   ;;  %s20014_s24 = smov [#allocation10]  }
   0xa   : > { %p20104_p3 = pnand %p15243_p0, %p294_p1  ;;  %s344_s23 = sshll.u32 %s20013_s22, 4  ;;  %s20110_s23 = int_to_ptr.vmem [resolvable:$true] %s344_s23 }
   0xb   : > { %s368_s25 = sshll.u32 %s20014_s24, 4  ;;  %s20015_s27 = smov [#allocation13]   ;;  %s20118_s25 = int_to_ptr.vmem [resolvable:$true] %s368_s25 }
   0xc   : > { %s20847_s21 = scalar_select %p20104_p3, 1, 0 }
   0xd   : > { %p17515_p4 = pneg %p20104_p3  ;;  %s392_s28 = sshll.u32 %s20015_s27, 4  ;;  %s20120_s28 = int_to_ptr.vmem [resolvable:$true] %s392_s28 }
   0xe   : > { %s19700_s12 = scalar_lea.hbm %s20835_s2, 448 }
   0xf   : > { %p20114_p5 = pnand %p20845_p2, %p17515_p4  ;;  %p19701_p6 = scmp.ne.s32.totalorder %s20835_s2, %s19700_s12 }
  0x10   : > { %p19707_p10 = scmp.lt.u32.totalorder %s19700_s12, %s20835_s2 }
  0x11   : > { %p20130_p7 = pneg %p20114_p5 }
  0x13   : > { %p19703_p8 = pnand %p20130_p7, %p19701_p6 }
  0x15   : > { %p19704_p9 = pneg %p19703_p8 }
  0x17   : > { %p19709_p11 = pnand %p19707_p10, %p19704_p9 }
  0x19   : > { %19712 = shalt.err (!%p19709_p11)
}
  0x1a   : > { %s19713_s22 = scalar_lea.vmem %s20102_s19, 448  ;;  %p19721_p1 = scmp.lt.s32.totalorder %s20102_s19, %s20102_s19 }
  0x1b   : > { %p19714_p12 = scmp.ne.s32.totalorder %s20102_s19, %s19713_s22  ;;  %p19722_p4 = scmp.lt.s32.totalorder %s19713_s22, %s19713_s22 }
  0x1d   : > { %p19716_p13 = pnand %p19714_p12, %p20130_p7  ;;  %p19723_p6 = por %p19722_p4, %p19721_p1 }
  0x1f   : > { %p19717_p0 = pneg %p19716_p13 }
  0x21   : > { %p19724_p8 = pnand %p19723_p6, %p19717_p0 }
  0x23   : > { %19727 = shalt.err (!%p19724_p8)
}
  0x24   : > { %17521 = dma.hbm_to_vmem [thread:$0]  (!%p20114_p5), %s20835_s2, 448, %s20102_s19, [#allocation5]  }
  0x25   : > { %s19728_s12 = scalar_lea.hbm %s20837_s4, 128 }
  0x26   : > { %p19729_p9 = scmp.ne.s32.totalorder %s20837_s4, %s19728_s12  ;;  %p19735_p12 = scmp.lt.u32.totalorder %s19728_s12, %s20837_s4 }
  0x28   : > { %p19731_p10 = pnand %p19729_p9, %p20130_p7 }
  0x2a   : > { %p19732_p11 = pneg %p19731_p10 }
  0x2c   : > { %p19737_p13 = pnand %p19735_p12, %p19732_p11 }
  0x2e   : > { %19740 = shalt.err (!%p19737_p13)
}
  0x2f   : > { %s19741_s19 = scalar_lea.vmem %s20110_s23, 128  ;;  %p19749_p6 = scmp.lt.s32.totalorder %s20110_s23, %s20110_s23 }
  0x30   : > { %p19742_p0 = scmp.ne.s32.totalorder %s20110_s23, %s19741_s19  ;;  %p19750_p8 = scmp.lt.s32.totalorder %s19741_s19, %s19741_s19 }
  0x32   : > { %p19744_p1 = pnand %p19742_p0, %p20130_p7  ;;  %p19751_p9 = por %p19750_p8, %p19749_p6 }
  0x34   : > { %p19745_p4 = pneg %p19744_p1 }
  0x36   : > { %p19752_p10 = pnand %p19751_p9, %p19745_p4 }
  0x38   : > { %19755 = shalt.err (!%p19752_p10)
}
  0x39   : > { %17527 = dma.hbm_to_vmem [thread:$0]  (!%p20114_p5), %s20837_s4, 128, %s20110_s23, [#allocation8]  }
  0x3a   : > { %s19756_s30 = scalar_lea.hbm %s20839_s6, 16 }
  0x3b   : > { %p19757_p11 = scmp.ne.s32.totalorder %s20839_s6, %s19756_s30  ;;  %p19763_p0 = scmp.lt.u32.totalorder %s19756_s30, %s20839_s6 }
  0x3d   : > { %p19759_p12 = pnand %p19757_p11, %p20130_p7 }
  0x3f   : > { %p19760_p13 = pneg %p19759_p12 }
  0x41   : > { %p19765_p1 = pnand %p19763_p0, %p19760_p13 }
  0x43   : > { %19768 = shalt.err (!%p19765_p1)
}
  0x44   : > { %s19769_s23 = scalar_lea.vmem %s20118_s25, 16  ;;  %s19776_s18 = scalar_lea.vmem %s20118_s25, 32 }
  0x45   : > { %p19770_p4 = scmp.ne.s32.totalorder %s20118_s25, %s19769_s23  ;;  %p19777_p9 = scmp.lt.s32.totalorder %s20118_s25, %s20118_s25 }
  0x46   : > { %p19778_p10 = scmp.lt.s32.totalorder %s19776_s18, %s19769_s23 }
  0x47   : > { %p19772_p6 = pnand %p19770_p4, %p20130_p7 }
  0x48   : > { %p19779_p11 = por %p19778_p10, %p19777_p9 }
  0x49   : > { %p19773_p8 = pneg %p19772_p6 }
  0x4b   : > { %p19780_p12 = pnand %p19779_p11, %p19773_p8 }
  0x4d   : > { %19783 = shalt.err (!%p19780_p12)
}
  0x4e   : > { %17533 = dma.hbm_to_vmem [thread:$0]  (!%p20114_p5), %s20839_s6, 16, %s20118_s25, [#allocation11]  }
  0x4f   : > { %s19784_s29 = scalar_lea.hbm %s20841_s8, 16 }
  0x50   : > { %p19785_p13 = scmp.ne.s32.totalorder %s20841_s8, %s19784_s29  ;;  %p19791_p4 = scmp.lt.u32.totalorder %s19784_s29, %s20841_s8 }
  0x52   : > { %p19787_p0 = pnand %p19785_p13, %p20130_p7 }
  0x54   : > { %p19788_p1 = pneg %p19787_p0 }
  0x56   : > { %p19793_p6 = pnand %p19791_p4, %p19788_p1 }
  0x58   : > { %19796 = shalt.err (!%p19793_p6)
}
  0x59   : > { %s19797_s25 = scalar_lea.vmem %s20120_s28, 16  ;;  %s19804_s16 = scalar_lea.vmem %s20120_s28, 32 }
  0x5a   : > { %p19798_p8 = scmp.ne.s32.totalorder %s20120_s28, %s19797_s25  ;;  %p19805_p11 = scmp.lt.s32.totalorder %s20120_s28, %s20120_s28 }
  0x5b   : > { %p19806_p12 = scmp.lt.s32.totalorder %s19804_s16, %s19797_s25 }
  0x5c   : > { %p19800_p9 = pnand %p19798_p8, %p20130_p7 }
  0x5d   : > { %p19807_p13 = por %p19806_p12, %p19805_p11 }
  0x5e   : > { %p19801_p10 = pneg %p19800_p9 }
  0x60   : > { %p19808_p0 = pnand %p19807_p13, %p19801_p10 }
  0x62   : > { %19811 = shalt.err (!%p19808_p0)
}
  0x63   : > { %17539 = dma.hbm_to_vmem [thread:$0]  (!%p20114_p5), %s20841_s8, 16, %s20120_s28, [#allocation14]  }
  0x64   : > { %s20016_s19 = smov [#allocation2]   ;;  %s19812_s29 = scalar_lea.hbm %s20834_s1, 175616 }
  0x65   : > { %s306_s22 = sshll.u32 %s20016_s19, 4  ;;  %p19813_p1 = scmp.ne.s32.totalorder %s20834_s1, %s19812_s29  ;;  %s307_s22 = int_to_ptr.vmem [resolvable:$true] %s306_s22 }
  0x66   : > { %p19819_p8 = scmp.lt.u32.totalorder %s19812_s29, %s20834_s1 }
  0x67   : > { %p19815_p4 = pnand %p19813_p1, %p20130_p7 }
  0x69   : > { %p19816_p6 = pneg %p19815_p4 }
  0x6b   : > { %p19821_p9 = pnand %p19819_p8, %p19816_p6 }
  0x6d   : > { %19824 = shalt.err (!%p19821_p9)
}
  0x6e   : > { %s19825_s28 = scalar_lea.vmem %s307_s22, 175616  ;;  %p19833_p13 = scmp.lt.s32.totalorder %s307_s22, %s307_s22 }
  0x6f   : > { %p19826_p10 = scmp.ne.s32.totalorder %s307_s22, %s19825_s28  ;;  %p19834_p0 = scmp.lt.s32.totalorder %s19825_s28, %s19825_s28 }
  0x71   : > { %p19828_p11 = pnand %p19826_p10, %p20130_p7  ;;  %p19835_p2 = por %p19834_p0, %p19833_p13 }
  0x73   : > { %p19829_p12 = pneg %p19828_p11 }
  0x75   : > { %p19836_p3 = pnand %p19835_p2, %p19829_p12 }
  0x77   : > { %19839 = shalt.err (!%p19836_p3)
}
  0x78   : > { %s20017_s25 = smov 1792   ;;  %s20018_s16 = smov 112  }
  0x79   : > { %17518 = dma.hbm_to_vmem [thread:$0]  (!%p20114_p5), %s20834_s1, 175616, %s307_s22, [#allocation3], %s20017_s25, %s20017_s25, %s20018_s16  }
  0x7a   : > { %s20019_s19 = smov [#allocation6]   ;;  %s19840_s30 = scalar_lea.hbm %s20836_s3, 57344 }
  0x7b   : > { %s330_s24 = sshll.u32 %s20019_s19, 4  ;;  %p19841_p2 = scmp.ne.s32.totalorder %s20836_s3, %s19840_s30  ;;  %s331_s24 = int_to_ptr.vmem [resolvable:$true] %s330_s24 }
  0x7c   : > { %p19847_p4 = scmp.lt.u32.totalorder %s19840_s30, %s20836_s3 }
  0x7d   : > { %p19843_p3 = pnand %p19841_p2, %p20130_p7 }
  0x7f   : > { %p19844_p1 = pneg %p19843_p3 }
  0x81   : > { %p19849_p6 = pnand %p19847_p4, %p19844_p1 }
  0x83   : > { %19852 = shalt.err (!%p19849_p6)
}
  0x84   : > { %s19853_s22 = scalar_lea.vmem %s331_s24, 57344  ;;  %p19861_p11 = scmp.lt.s32.totalorder %s331_s24, %s331_s24 }
  0x85   : > { %p19854_p8 = scmp.ne.s32.totalorder %s331_s24, %s19853_s22  ;;  %p19862_p12 = scmp.lt.s32.totalorder %s19853_s22, %s19853_s22 }
  0x87   : > { %p19856_p9 = pnand %p19854_p8, %p20130_p7  ;;  %p19863_p13 = por %p19862_p12, %p19861_p11 }
  0x89   : > { %p19857_p10 = pneg %p19856_p9 }
  0x8b   : > { %p19864_p0 = pnand %p19863_p13, %p19857_p10 }
  0x8d   : > { %19867 = shalt.err (!%p19864_p0)
}
  0x8e   : > { %s20020_s25 = smov 512   ;;  %s20021_s16 = smov 32  }
  0x8f   : > { %17524 = dma.hbm_to_vmem [thread:$0]  (!%p20114_p5), %s20836_s3, 57344, %s331_s24, [#allocation5], %s20020_s25, %s20020_s25, %s20021_s16  }
  0x90   : > { %s20022_s19 = smov [#allocation9]   ;;  %s19868_s12 = scalar_lea.hbm %s20838_s5, 2048 }
  0x91   : > { %s354_s27 = sshll.u32 %s20022_s19, 4  ;;  %p19869_p2 = scmp.ne.s32.totalorder %s20838_s5, %s19868_s12  ;;  %s355_s27 = int_to_ptr.vmem [resolvable:$true] %s354_s27 }
  0x92   : > { %p19875_p4 = scmp.lt.u32.totalorder %s19868_s12, %s20838_s5 }
  0x93   : > { %p19871_p3 = pnand %p19869_p2, %p20130_p7 }
  0x95   : > { %p19872_p1 = pneg %p19871_p3 }
  0x97   : > { %p19877_p6 = pnand %p19875_p4, %p19872_p1 }
  0x99   : > { %19880 = shalt.err (!%p19877_p6)
}
  0x9a   : > { %s19881_s24 = scalar_lea.vmem %s355_s27, 2048  ;;  %p19889_p11 = scmp.lt.s32.totalorder %s355_s27, %s355_s27 }
  0x9b   : > { %p19882_p8 = scmp.ne.s32.totalorder %s355_s27, %s19881_s24  ;;  %p19890_p12 = scmp.lt.s32.totalorder %s19881_s24, %s19881_s24 }
  0x9d   : > { %p19884_p9 = pnand %p19882_p8, %p20130_p7  ;;  %p19891_p13 = por %p19890_p12, %p19889_p11 }
  0x9f   : > { %p19885_p10 = pneg %p19884_p9 }
  0xa1   : > { %p19892_p0 = pnand %p19891_p13, %p19885_p10 }
  0xa3   : > { %19895 = shalt.err (!%p19892_p0)
}
  0xa4   : > { %s20023_s25 = smov 64   ;;  %s20024_s16 = smov 4  }
  0xa5   : > { %17530 = dma.hbm_to_vmem [thread:$0]  (!%p20114_p5), %s20838_s5, 2048, %s355_s27, [#allocation8], %s20023_s25, %s20023_s25, %s20024_s16  }
  0xa6   : > { %s20025_s19 = smov [#allocation12]   ;;  %s20026_s30 = smov [#allocation15]  }
  0xa7   : > { %s378_s29 = sshll.u32 %s20025_s19, 4  ;;  %s402_s12 = sshll.u32 %s20026_s30, 4  ;;  %s379_s29 = int_to_ptr.vmem [resolvable:$true] %s378_s29  ;;  %s20279_s12 = int_to_ptr.vmem [resolvable:$true] %s402_s12 }
  0xa8   : > { %s19896_s28 = scalar_lea.hbm %s20840_s7, 1024 }
  0xa9   : > { %p19897_p2 = scmp.ne.s32.totalorder %s20840_s7, %s19896_s28  ;;  %p19903_p4 = scmp.lt.u32.totalorder %s19896_s28, %s20840_s7 }
  0xab   : > { %p19899_p3 = pnand %p19897_p2, %p20130_p7 }
  0xad   : > { %p19900_p1 = pneg %p19899_p3 }
  0xaf   : > { %p19905_p6 = pnand %p19903_p4, %p19900_p1 }
  0xb1   : > { %19908 = shalt.err (!%p19905_p6)
}
  0xb2   : > { %s19909_s18 = scalar_lea.vmem %s379_s29, 1024  ;;  %p19917_p11 = scmp.lt.s32.totalorder %s379_s29, %s379_s29 }
  0xb3   : > { %p19910_p8 = scmp.ne.s32.totalorder %s379_s29, %s19909_s18  ;;  %p19918_p12 = scmp.lt.s32.totalorder %s19909_s18, %s19909_s18 }
  0xb5   : > { %p19912_p9 = pnand %p19910_p8, %p20130_p7  ;;  %p19919_p13 = por %p19918_p12, %p19917_p11 }
  0xb7   : > { %p19913_p10 = pneg %p19912_p9 }
  0xb9   : > { %p19920_p0 = pnand %p19919_p13, %p19913_p10 }
  0xbb   : > { %19923 = shalt.err (!%p19920_p0)
}
  0xbc   : > { %17536 = dma.hbm_to_vmem [thread:$0]  (!%p20114_p5), %s20840_s7, 1024, %s379_s29, [#allocation11], %s20023_s25, %s20023_s25, %s20024_s16  }
  0xbd   : > { %s19924_s28 = scalar_lea.hbm %s20842_s9, 1024 }
  0xbe   : > { %p19925_p2 = scmp.ne.s32.totalorder %s20842_s9, %s19924_s28  ;;  %p19931_p4 = scmp.lt.u32.totalorder %s19924_s28, %s20842_s9 }
  0xc0   : > { %p19927_p3 = pnand %p19925_p2, %p20130_p7 }
  0xc2   : > { %p19928_p1 = pneg %p19927_p3 }
  0xc4   : > { %p19933_p6 = pnand %p19931_p4, %p19928_p1 }
  0xc6   : > { %19936 = shalt.err (!%p19933_p6)
}
  0xc7   : > { %s19937_s29 = scalar_lea.vmem %s20279_s12, 1024  ;;  %p19945_p11 = scmp.lt.s32.totalorder %s20279_s12, %s20279_s12 }
  0xc8   : > { %p19938_p8 = scmp.ne.s32.totalorder %s20279_s12, %s19937_s29  ;;  %p19946_p12 = scmp.lt.s32.totalorder %s19937_s29, %s19937_s29 }
  0xca   : > { %p19940_p9 = pnand %p19938_p8, %p20130_p7  ;;  %p19947_p13 = por %p19946_p12, %p19945_p11 }
  0xcc   : > { %p19941_p10 = pneg %p19940_p9 }
  0xce   : > { %p19948_p0 = pnand %p19947_p13, %p19941_p10 }
  0xd0   : > { %19951 = shalt.err (!%p19948_p0)
}
  0xd1   : > { %17542 = dma.hbm_to_vmem [thread:$0]  (!%p20114_p5), %s20842_s9, 1024, %s20279_s12, [#allocation14], %s20023_s25, %s20023_s25, %s20024_s16  }
  0xd2   : > { %s20027_s30 = smov [#allocation16]   ;;  %s19952_s22 = scalar_lea.hbm %s20843_s10, 16 }
  0xd3   : > { %s416_s13 = sshll.u32 %s20027_s30, 4  ;;  %p19953_p2 = scmp.ne.s32.totalorder %s20843_s10, %s19952_s22  ;;  %s417_s13 = int_to_ptr.vmem [resolvable:$true] %s416_s13 }
  0xd4   : > { %p19959_p4 = scmp.lt.u32.totalorder %s19952_s22, %s20843_s10 }
  0xd5   : > { %p19955_p3 = pnand %p19953_p2, %p20130_p7 }
  0xd7   : > { %p19956_p1 = pneg %p19955_p3 }
  0xd9   : > { %p19961_p6 = pnand %p19959_p4, %p19956_p1 }
  0xdb   : > { %19964 = shalt.err (!%p19961_p6)
}
  0xdc   : > { %s19965_s25 = scalar_lea.vmem %s417_s13, 16  ;;  %s19972_s16 = scalar_lea.vmem %s417_s13, 32 }
  0xdd   : > { %p19966_p8 = scmp.ne.s32.totalorder %s417_s13, %s19965_s25  ;;  %p19973_p11 = scmp.lt.s32.totalorder %s417_s13, %s417_s13 }
  0xde   : > { %p19974_p12 = scmp.lt.s32.totalorder %s19972_s16, %s19965_s25 }
  0xdf   : > { %p19968_p9 = pnand %p19966_p8, %p20130_p7 }
  0xe0   : > { %p19975_p13 = por %p19974_p12, %p19973_p11 }
  0xe1   : > { %p19969_p10 = pneg %p19968_p9 }
  0xe3   : > { %p19976_p0 = pnand %p19975_p13, %p19969_p10 }
  0xe5   : > { %19979 = shalt.err (!%p19976_p0)
}
  0xe6   : > { %17545 = dma.hbm_to_vmem [thread:$0]  (!%p20114_p5), %s20843_s10, 16, %s417_s13, [#allocation17]  }
  0xe7   : > { %p20850_p2 = scmp.ne.s32.totalorder %s20847_s21, 0 }
  0xe8   : > { %p20851_p3 = scmp.eq.s32.totalorder (!%p20850_p2), %s20097_s20, 0 }
  0xe9   : > { %437 = sbr.rel (%p20850_p2) target bundleno = 3084 (0xc0c), region = 64 }
  0xf0   : > { %19985 = dma.done.wait (%p20851_p3), [#allocation3], 175616   ;;  %p20852_p7 = pmov %p20851_p3 }
  0xf1   : > { %p20853_p1 = pmov %p20851_p3 }
  0xf2   : > { %19987 = vsyncadd (%p20852_p7), [#allocation3], 4294791680 }
  0xf3   : > { %19989 = dma.done.wait (%p20853_p1), [#allocation5], 57792   ;;  %p20854_p4 = pmov %p20853_p1 }
  0xf4   : > { %p20855_p6 = pmov %p20853_p1 }
  0xf5   : > { %19991 = vsyncadd (%p20854_p4), [#allocation5], 4294909504 }
  0xf6   : > { %19993 = dma.done.wait (%p20855_p6), [#allocation8], 2176   ;;  %p20856_p5 = pmov %p20853_p1 }
  0xf7   : > { %p20857_p8 = pmov %p20853_p1 }
  0xf8   : > { %19995 = vsyncadd (%p20856_p5), [#allocation8], 4294965120 }
  0xf9   : > { %19997 = dma.done.wait (%p20857_p8), [#allocation11], 1040   ;;  %p20858_p9 = pmov %p20853_p1 }
  0xfa   : > { %p20859_p10 = pmov %p20853_p1 }
  0xfb   : > { %19999 = vsyncadd (%p20858_p9), [#allocation11], 4294966256 }
  0xfc   : > { %20001 = dma.done.wait (%p20859_p10), [#allocation14], 1040   ;;  %p20860_p11 = pmov %p20853_p1 }
  0xfd   : > { %p20861_p12 = pmov %p20853_p1 }
  0xfe   : > { %20003 = vsyncadd (%p20860_p11), [#allocation14], 4294966256 }
  0xff   : > { %20005 = dma.done.wait (%p20861_p12), [#allocation17], 16   ;;  %p20862_p13 = pmov %p20853_p1 }
 0x100   : > { %p512_p0 = scmp.lt.s32.totalorder %s20097_s20, 1  ;;  %v20028_v0 = vmov 0   ;;  %v17593_v1 = vld [vmem:[#allocation2 + $0x4] ss:$112 sps:$4 sm:$0xff]   ;;  %v17597_v3 = vld [vmem:[#allocation2] ss:$112 sps:$4 sm:$0xff]  }
 0x101   : > { %20007 = vsyncadd (%p20862_p13), [#allocation17], 4294967280  ;;  %9089 = vmatprep.mubr.bf16.mxu1 %v20028_v0  ;;  %v17595_v2 = vld [vmem:[#allocation2 + $0x2a04] ss:$112 sps:$4 sm:$0xff]   ;;  %8934 = vmatprep.subr.bf16.mxu0 %v17593_v1  ;;  %v17598_v4 = vld [vmem:[#allocation2 + $0x2a00] ss:$112 sps:$4 sm:$0xff]  }
 0x102   : > { %s20864_s20 = smov (!%p512_p0, %s20097_s20), 1  ;;  %9057 = vmatprep.subr.bf16.mxu1 %v17595_v2  ;;  %v17599_v5 = vld [vmem:[#allocation2 + $0xe4] ss:$112 sps:$4 sm:$0xff]   ;;  %8935 = vmatpush1.bf16.msra.mxu0 %v17597_v3  ;;  %v17601_v6 = vld [vmem:[#allocation2 + $0x8] ss:$112 sps:$4 sm:$0xff]   ;;  %vm8930_vm0 = vcmask 130048  }
 0x103   : > { %s17474_s21 = smul.u32 28, %s20864_s20  ;;  %9058 = vmatpush1.bf16.msra.mxu1 %v17598_v4  ;;  %v17603_v7 = vld [vmem:[#allocation2 + $0xc] ss:$112 sps:$4 sm:$0xff]   ;;  %8936 = vmatprep.subr.bf16.mxu0 %v17599_v5  ;;  %v17604_v8 = vld [vmem:[#allocation2 + $0xe0] ss:$112 sps:$4 sm:$0xff]   ;;  %vm20030_vm1 = vmmov 0  }
 0x104   : > { %9098 = vmatprep.subr.bf16.mxu1 %v17603_v7  ;;  %v17606_v10 = vld [vmem:[#allocation2 + $0x1c4] ss:$112 sps:$4 sm:$0xff]   ;;  %v17608_v11 = vld [vmem:[#allocation2 + $0xe8] ss:$112 sps:$4 sm:$0xff]   ;;  %v17610_v12 = vld [vmem:[#allocation2 + $0xec] ss:$112 sps:$4 sm:$0xff]  }
 0x105   : > { %s20381_s19 = scalar_lea.vmem %s20833_s0, %s17474_s21  ;;  %v17611_v13 = vld [vmem:[#allocation2 + $0x1c0] ss:$112 sps:$4 sm:$0xff]   ;;  %v17612_v14 = vld [vmem:[#allocation2 + $0x2a4] ss:$112 sps:$4 sm:$0xff]   ;;  %v17616_v15 = vld [vmem:[#allocation2 + $0x1cc] ss:$112 sps:$4 sm:$0xff]  }
 0x106   : > { %v17605_v9 = vld [vmem:[%s20381_s19 + $0x18] ss:$0 sps:$4 sm:$0xff]   ;;  %8937 = vmatpush1.bf16.msra.mxu0 %v17604_v8  ;;  %v17617_v17 = vld [vmem:[#allocation2 + $0x2a0] ss:$112 sps:$4 sm:$0xff]   ;;  %v17618_v18 = vld [vmem:[#allocation2 + $0x384] ss:$112 sps:$4 sm:$0xff]  }
 0x107   : > { %16647 = vmatmul.mubr.msk.bf16.vlgmr.msra.gmra.mrb[0].mxu1 %vm8930_vm0, %v17605_v9  ;;  %8938 = vmatprep.subr.bf16.mxu0 %v17606_v10  ;;  %v17614_v16 = vld [vmem:[#allocation2 + $0x1c8] ss:$112 sps:$4 sm:$0xff]   ;;  %v17622_v19 = vld [vmem:[#allocation2 + $0x2ac] ss:$112 sps:$4 sm:$0xff]   ;;  %v17623_v21 = vld [vmem:[#allocation2 + $0x380] ss:$112 sps:$4 sm:$0xff]  }
 0x108   : > { %9099 = vmatpush1.bf16.msra.mxu1 %v17601_v6  ;;  %v17620_v20 = vld [vmem:[#allocation2 + $0x2a8] ss:$112 sps:$4 sm:$0xff]   ;;  %v17624_v22 = vld [vmem:[#allocation2 + $0x464] ss:$112 sps:$4 sm:$0xff]   ;;  %v17628_v23 = vld [vmem:[#allocation2 + $0x38c] ss:$112 sps:$4 sm:$0xff]  }
 0x109   : > { %9100 = vmatprep.subr.bf16.mxu1 %v17610_v12  ;;  %v17626_v24 = vld [vmem:[#allocation2 + $0x388] ss:$112 sps:$4 sm:$0xff]   ;;  %v17629_v25 = vld [vmem:[#allocation2 + $0x460] ss:$112 sps:$4 sm:$0xff]   ;;  %v17630_v26 = vld [vmem:[#allocation2 + $0x544] ss:$112 sps:$4 sm:$0xff]  }
 0x10a   : > { %8939 = vmatpush1.bf16.msra.mxu0 %v17611_v13  ;;  %v17634_v27 = vld [vmem:[#allocation2 + $0x46c] ss:$112 sps:$4 sm:$0xff]   ;;  %v17632_v28 = vld [vmem:[#allocation2 + $0x468] ss:$112 sps:$4 sm:$0xff]   ;;  %v17635_v29 = vld [vmem:[#allocation2 + $0x540] ss:$112 sps:$4 sm:$0xff]  }
 0x10b   : > { %8940 = vmatprep.subr.bf16.mxu0 %v17612_v14  ;;  %v17636_v30 = vld [vmem:[#allocation2 + $0x624] ss:$112 sps:$4 sm:$0xff]   ;;  %v17640_v31 = vld [vmem:[#allocation2 + $0x54c] ss:$112 sps:$4 sm:$0xff]   ;;  %v17638_v32 = vld [vmem:[#allocation2 + $0x548] ss:$112 sps:$4 sm:$0xff]  }
 0x10c   : > { %9101 = vmatpush1.bf16.msra.mxu1 %v17608_v11  ;;  %v17641_v33 = vld [vmem:[#allocation2 + $0x620] ss:$112 sps:$4 sm:$0xff]   ;;  %v17642_v34 = vld [vmem:[#allocation2 + $0x704] ss:$112 sps:$4 sm:$0xff]   ;;  %v17646_v35 = vld [vmem:[#allocation2 + $0x62c] ss:$112 sps:$4 sm:$0xff]  }
 0x10d   : > { %9102 = vmatprep.subr.bf16.mxu1 %v17616_v15  ;;  %v17644_v36 = vld [vmem:[#allocation2 + $0x628] ss:$112 sps:$4 sm:$0xff]   ;;  %v17647_v37 = vld [vmem:[#allocation2 + $0x700] ss:$112 sps:$4 sm:$0xff]   ;;  %v17648_v38 = vld [vmem:[#allocation2 + $0x7e4] ss:$112 sps:$4 sm:$0xff]  }
 0x10e   : > { %8941 = vmatpush1.bf16.msra.mxu0 %v17617_v17  ;;  %v17652_v39 = vld [vmem:[#allocation2 + $0x70c] ss:$112 sps:$4 sm:$0xff]   ;;  %v17650_v40 = vld [vmem:[#allocation2 + $0x708] ss:$112 sps:$4 sm:$0xff]   ;;  %v17653_v41 = vld [vmem:[#allocation2 + $0x7e0] ss:$112 sps:$4 sm:$0xff]  }
 0x10f   : > { %8942 = vmatprep.subr.bf16.mxu0 %v17618_v18  ;;  %v17654_v42 = vld [vmem:[#allocation2 + $0x8c4] ss:$112 sps:$4 sm:$0xff]   ;;  %v17658_v43 = vld [vmem:[#allocation2 + $0x7ec] ss:$112 sps:$4 sm:$0xff]   ;;  %v17656_v44 = vld [vmem:[#allocation2 + $0x7e8] ss:$112 sps:$4 sm:$0xff]  }
 0x110   : > { %9103 = vmatpush1.bf16.msra.mxu1 %v17614_v16  ;;  %v17659_v45 = vld [vmem:[#allocation2 + $0x8c0] ss:$112 sps:$4 sm:$0xff]   ;;  %v17660_v46 = vld [vmem:[#allocation2 + $0x9a4] ss:$112 sps:$4 sm:$0xff]   ;;  %v17664_v47 = vld [vmem:[#allocation2 + $0x8cc] ss:$112 sps:$4 sm:$0xff]  }
 0x111   : > { %9104 = vmatprep.subr.bf16.mxu1 %v17622_v19  ;;  %v17662_v48 = vld [vmem:[#allocation2 + $0x8c8] ss:$112 sps:$4 sm:$0xff]   ;;  %v522_v49 = vld [vmem:[%s20381_s19] sm:$0xff]  ;;  %v17670_v53 = vld [vmem:[#allocation2 + $0x9ac] ss:$112 sps:$4 sm:$0xff]   ;;  %s15267_s30 = sshll.u32 %s20864_s20, 3 }
 0x112   : > { %8943 = vmatpush1.bf16.msra.mxu0 %v17623_v21  ;;  %v17665_v50 = vld [vmem:[#allocation2 + $0x9a0] ss:$112 sps:$4 sm:$0xff]   ;;  %v17666_v51 = vld [vmem:[#allocation2 + $0xa84] ss:$112 sps:$4 sm:$0xff]   ;;  %v20386_v52 = vcombine.high %v522_v49, %v522_v49  ;;  %v17668_v54 = vld [vmem:[#allocation2 + $0x9a8] ss:$112 sps:$4 sm:$0xff]   ;;  %v20390_v8 = vcombine.low %v522_v49, %v522_v49  ;;  %s520_s28 = scalar_lea.vmem %s20844_s11, %s15267_s30 }
 0x113   : > { %8944 = vmatprep.subr.bf16.mxu0 %v17624_v22  ;;  %v17671_v55 = vld [vmem:[#allocation2 + $0xa80] ss:$112 sps:$4 sm:$0xff]   ;;  %v17672_v56 = vld [vmem:[#allocation2 + $0xb64] ss:$112 sps:$4 sm:$0xff]   ;;  %v17676_v57 = vld [vmem:[#allocation2 + $0xa8c] ss:$112 sps:$4 sm:$0xff]  }
 0x114   : > { %9105 = vmatpush1.bf16.msra.mxu1 %v17620_v20  ;;  %8966 = vmatprep.mubr.bf16.mxu0 %v20386_v52  ;;  %v17674_v58 = vld [vmem:[#allocation2 + $0xa88] ss:$112 sps:$4 sm:$0xff]   ;;  %v17677_v59 = vld [vmem:[#allocation2 + $0xb60] ss:$112 sps:$4 sm:$0xff]   ;;  %v17678_v60 = vld [vmem:[#allocation2 + $0xc44] ss:$112 sps:$4 sm:$0xff]  }
 0x115   : > { %9106 = vmatprep.subr.bf16.mxu1 %v17628_v23  ;;  %9130 = vmatprep.mubr.bf16.mxu1 %v20386_v52  ;;  %v17682_v61 = vld [vmem:[#allocation2 + $0xb6c] ss:$112 sps:$4 sm:$0xff]   ;;  %v17680_v62 = vld [vmem:[#allocation2 + $0xb68] ss:$112 sps:$4 sm:$0xff]   ;;  %v17683_v63 = vld [vmem:[#allocation2 + $0xc40] ss:$112 sps:$4 sm:$0xff]  }
 0x116   : > { %8945 = vmatpush1.bf16.msra.mxu0 %v17629_v25  ;;  %v17684_v1 = vld [vmem:[#allocation2 + $0xd24] ss:$112 sps:$4 sm:$0xff]   ;;  %v17688_v2 = vld [vmem:[#allocation2 + $0xc4c] ss:$112 sps:$4 sm:$0xff]   ;;  %v17686_v3 = vld [vmem:[#allocation2 + $0xc48] ss:$112 sps:$4 sm:$0xff]  }
 0x117   : > { %8946 = vmatprep.subr.bf16.mxu0 %v17630_v26  ;;  %v17689_v4 = vld [vmem:[#allocation2 + $0xd20] ss:$112 sps:$4 sm:$0xff]   ;;  %v17693_v5 = vld [vmem:[#allocation2 + $0xe04] ss:$112 sps:$4 sm:$0xff]   ;;  %v17696_v6 = vld [vmem:[#allocation2 + $0xd2c] ss:$112 sps:$4 sm:$0xff]  }
 0x118   : > { %9107 = vmatpush1.bf16.msra.mxu1 %v17626_v24  ;;  %v17691_v7 = vld [vmem:[#allocation2 + $0xe00] ss:$112 sps:$4 sm:$0xff]   ;;  %v17694_v9 = vld [vmem:[#allocation2 + $0xd28] ss:$112 sps:$4 sm:$0xff]   ;;  %v17700_v10 = vld [vmem:[#allocation2 + $0xee4] ss:$112 sps:$4 sm:$0xff]  }
 0x119   : > { %9108 = vmatprep.subr.bf16.mxu1 %v17634_v27  ;;  %v17703_v11 = vld [vmem:[#allocation2 + $0xe0c] ss:$112 sps:$4 sm:$0xff]   ;;  %v17698_v12 = vld [vmem:[#allocation2 + $0xee0] ss:$112 sps:$4 sm:$0xff]   ;;  %v17701_v13 = vld [vmem:[#allocation2 + $0xe08] ss:$112 sps:$4 sm:$0xff]  }
 0x11a   : > { %8947 = vmatpush1.bf16.msra.mxu0 %v17635_v29  ;;  %v17706_v14 = vld [vmem:[#allocation2 + $0xfc4] ss:$112 sps:$4 sm:$0xff]   ;;  %v17709_v15 = vld [vmem:[#allocation2 + $0xeec] ss:$112 sps:$4 sm:$0xff]   ;;  %v17704_v16 = vld [vmem:[#allocation2 + $0xfc0] ss:$112 sps:$4 sm:$0xff]  }
 0x11b   : > { %8948 = vmatprep.subr.bf16.mxu0 %v17636_v30  ;;  %v17707_v17 = vld [vmem:[#allocation2 + $0xee8] ss:$112 sps:$4 sm:$0xff]   ;;  %v17712_v18 = vld [vmem:[#allocation2 + $0x10a4] ss:$112 sps:$4 sm:$0xff]   ;;  %v17715_v19 = vld [vmem:[#allocation2 + $0xfcc] ss:$112 sps:$4 sm:$0xff]  }
 0x11c   : > { %9109 = vmatpush1.bf16.msra.mxu1 %v17632_v28  ;;  %v17710_v20 = vld [vmem:[#allocation2 + $0x10a0] ss:$112 sps:$4 sm:$0xff]   ;;  %v17713_v21 = vld [vmem:[#allocation2 + $0xfc8] ss:$112 sps:$4 sm:$0xff]   ;;  %v17718_v22 = vld [vmem:[#allocation2 + $0x1184] ss:$112 sps:$4 sm:$0xff]  }
 0x11d   : > { %9110 = vmatprep.subr.bf16.mxu1 %v17640_v31  ;;  %v17721_v23 = vld [vmem:[#allocation2 + $0x10ac] ss:$112 sps:$4 sm:$0xff]   ;;  %v17716_v24 = vld [vmem:[#allocation2 + $0x1180] ss:$112 sps:$4 sm:$0xff]   ;;  %v17719_v25 = vld [vmem:[#allocation2 + $0x10a8] ss:$112 sps:$4 sm:$0xff]  }
 0x11e   : > { %8949 = vmatpush1.bf16.msra.mxu0 %v17641_v33  ;;  %v17724_v26 = vld [vmem:[#allocation2 + $0x1264] ss:$112 sps:$4 sm:$0xff]   ;;  %v17727_v27 = vld [vmem:[#allocation2 + $0x118c] ss:$112 sps:$4 sm:$0xff]   ;;  %v17722_v28 = vld [vmem:[#allocation2 + $0x1260] ss:$112 sps:$4 sm:$0xff]  }
 0x11f   : > { %8950 = vmatprep.subr.bf16.mxu0 %v17642_v34  ;;  %v17725_v29 = vld [vmem:[#allocation2 + $0x1188] ss:$112 sps:$4 sm:$0xff]   ;;  %v17730_v30 = vld [vmem:[#allocation2 + $0x1344] ss:$112 sps:$4 sm:$0xff]   ;;  %v17733_v31 = vld [vmem:[#allocation2 + $0x126c] ss:$112 sps:$4 sm:$0xff]  }
 0x120   : > { %9111 = vmatpush1.bf16.msra.mxu1 %v17638_v32  ;;  %v20395_v32 = vld [vmem:[%s20381_s19 + $0x8] sm:$0xff]  ;;  %v17728_v33 = vld [vmem:[#allocation2 + $0x1340] ss:$112 sps:$4 sm:$0xff]  }
 0x121   : > { %9112 = vmatprep.subr.bf16.mxu1 %v17646_v35  ;;  %v17731_v34 = vld [vmem:[#allocation2 + $0x1268] ss:$112 sps:$4 sm:$0xff]   ;;  %v20399_v35 = vcombine.high %v20395_v32, %v20395_v32  ;;  %v17757_v49 = vld [vmem:[#allocation2 + $0x15ec] ss:$112 sps:$4 sm:$0xff]  }
 0x122   : > { %8951 = vmatpush1.bf16.msra.mxu0 %v17647_v37  ;;  %v17739_v37 = vld [vmem:[#allocation2 + $0x134c] ss:$112 sps:$4 sm:$0xff]  }
 0x123   : > { %8952 = vmatprep.subr.bf16.mxu0 %v17648_v38  ;;  %v17734_v38 = vld [vmem:[#allocation2 + $0x1420] ss:$112 sps:$4 sm:$0xff]  }
 0x124   : > { %9113 = vmatpush1.bf16.msra.mxu1 %v17644_v36  ;;  %v17736_v36 = vld [vmem:[#allocation2 + $0x1424] ss:$112 sps:$4 sm:$0xff]  }
 0x125   : > { %9114 = vmatprep.subr.bf16.mxu1 %v17652_v39  ;;  %v17737_v39 = vld [vmem:[#allocation2 + $0x1348] ss:$112 sps:$4 sm:$0xff]  }
 0x126   : > { %8953 = vmatpush1.bf16.msra.mxu0 %v17653_v41  ;;  %v17745_v41 = vld [vmem:[#allocation2 + $0x142c] ss:$112 sps:$4 sm:$0xff]  }
 0x127   : > { %8954 = vmatprep.subr.bf16.mxu0 %v17654_v42  ;;  %v17740_v42 = vld [vmem:[#allocation2 + $0x1500] ss:$112 sps:$4 sm:$0xff]  }
 0x128   : > { %9115 = vmatpush1.bf16.msra.mxu1 %v17650_v40  ;;  %v17742_v40 = vld [vmem:[#allocation2 + $0x1504] ss:$112 sps:$4 sm:$0xff]  }
 0x129   : > { %9116 = vmatprep.subr.bf16.mxu1 %v17658_v43  ;;  %v17743_v43 = vld [vmem:[#allocation2 + $0x1428] ss:$112 sps:$4 sm:$0xff]  }
 0x12a   : > { %8955 = vmatpush1.bf16.msra.mxu0 %v17659_v45  ;;  %v17751_v45 = vld [vmem:[#allocation2 + $0x150c] ss:$112 sps:$4 sm:$0xff]  }
 0x12b   : > { %8956 = vmatprep.subr.bf16.mxu0 %v17660_v46  ;;  %v17746_v46 = vld [vmem:[#allocation2 + $0x15e0] ss:$112 sps:$4 sm:$0xff]  }
 0x12c   : > { %9117 = vmatpush1.bf16.msra.mxu1 %v17656_v44  ;;  %v17748_v44 = vld [vmem:[#allocation2 + $0x15e4] ss:$112 sps:$4 sm:$0xff]  }
 0x12d   : > { %9118 = vmatprep.subr.bf16.mxu1 %v17664_v47  ;;  %v17749_v47 = vld [vmem:[#allocation2 + $0x1508] ss:$112 sps:$4 sm:$0xff]  }
 0x12e   : > { %8957 = vmatpush1.bf16.msra.mxu0 %v17665_v50  ;;  %v17752_v50 = vld [vmem:[#allocation2 + $0x16c0] ss:$112 sps:$4 sm:$0xff]  }
 0x12f   : > { %8958 = vmatprep.subr.bf16.mxu0 %v17666_v51  ;;  %v17755_v51 = vld [vmem:[#allocation2 + $0x15e8] ss:$112 sps:$4 sm:$0xff]  }
 0x130   : > { %9119 = vmatpush1.bf16.msra.mxu1 %v17662_v48  ;;  %v17754_v48 = vld [vmem:[#allocation2 + $0x16c4] ss:$112 sps:$4 sm:$0xff]  }
 0x131   : > { %9120 = vmatprep.subr.bf16.mxu1 %v17670_v53  ;;  %v17760_v53 = vld [vmem:[#allocation2 + $0x17a4] ss:$112 sps:$4 sm:$0xff]  }
 0x132   : > { %8959 = vmatpush1.bf16.msra.mxu0 %v17671_v55  ;;  %v17758_v55 = vld [vmem:[#allocation2 + $0x17a0] ss:$112 sps:$4 sm:$0xff]  }
 0x133   : > { %8960 = vmatprep.subr.bf16.mxu0 %v17672_v56  ;;  %v17761_v56 = vld [vmem:[#allocation2 + $0x16c8] ss:$112 sps:$4 sm:$0xff]  }
 0x134   : > { %9121 = vmatpush1.bf16.msra.mxu1 %v17668_v54  ;;  %v17763_v54 = vld [vmem:[#allocation2 + $0x16cc] ss:$112 sps:$4 sm:$0xff]  }
 0x135   : > { %9122 = vmatprep.subr.bf16.mxu1 %v17676_v57  ;;  %v17766_v57 = vld [vmem:[#allocation2 + $0x1884] ss:$112 sps:$4 sm:$0xff]  }
 0x136   : > { %8961 = vmatpush1.bf16.msra.mxu0 %v17677_v59  ;;  %v17764_v59 = vld [vmem:[#allocation2 + $0x1880] ss:$112 sps:$4 sm:$0xff]  }
 0x137   : > { %8962 = vmatprep.subr.bf16.mxu0 %v17678_v60  ;;  %v17767_v60 = vld [vmem:[#allocation2 + $0x17a8] ss:$112 sps:$4 sm:$0xff]  }
 0x138   : > { %9123 = vmatpush1.bf16.msra.mxu1 %v17674_v58  ;;  %v17769_v58 = vld [vmem:[#allocation2 + $0x17ac] ss:$112 sps:$4 sm:$0xff]  }
 0x139   : > { %9124 = vmatprep.subr.bf16.mxu1 %v17682_v61  ;;  %v17772_v61 = vld [vmem:[#allocation2 + $0x1964] ss:$112 sps:$4 sm:$0xff]  }
 0x13a   : > { %8963 = vmatpush1.bf16.msra.mxu0 %v17683_v63  ;;  %v17770_v63 = vld [vmem:[#allocation2 + $0x1960] ss:$112 sps:$4 sm:$0xff]  }
 0x13b   : > { %8964 = vmatprep.subr.bf16.mxu0 %v17684_v1  ;;  %v17773_v1 = vld [vmem:[#allocation2 + $0x1888] ss:$112 sps:$4 sm:$0xff]  }
 0x13c   : > { %9125 = vmatpush1.bf16.msra.mxu1 %v17680_v62  ;;  %v17775_v62 = vld [vmem:[#allocation2 + $0x188c] ss:$112 sps:$4 sm:$0xff]  }
 0x13d   : > { %9126 = vmatprep.subr.bf16.mxu1 %v17688_v2  ;;  %v17778_v2 = vld [vmem:[#allocation2 + $0x1a44] ss:$112 sps:$4 sm:$0xff]  }
 0x13e   : > { %8965 = vmatpush1.bf16.msra.mxu0 %v17689_v4  ;;  %v17776_v4 = vld [vmem:[#allocation2 + $0x1a40] ss:$112 sps:$4 sm:$0xff]  }
 0x13f   : > { %8975 = vmatprep.subr.bf16.mxu0 %v17693_v5  ;;  %v17779_v5 = vld [vmem:[#allocation2 + $0x1968] ss:$112 sps:$4 sm:$0xff]  }
 0x140   : > { %9127 = vmatpush1.bf16.msra.mxu1 %v17686_v3  ;;  %v17781_v3 = vld [vmem:[#allocation2 + $0x196c] ss:$112 sps:$4 sm:$0xff]  }
 0x141   : > { %9128 = vmatprep.subr.bf16.mxu1 %v17696_v6  ;;  %8967 = vmatmul.mubr.bf16.vlgmr.msra.gmra.mrb[0].mxu0 %v20390_v8  ;;  %v17784_v6 = vld [vmem:[#allocation2 + $0x1b24] ss:$112 sps:$4 sm:$0xff]  }
 0x142   : > { %8976 = vmatpush1.bf16.msra.mxu0 %v17691_v7  ;;  %9007 = vmatprep.mubr.bf16.mxu0 %v20399_v35  ;;  %v17787_v7 = vld [vmem:[#allocation2 + $0x1a4c] ss:$112 sps:$4 sm:$0xff]  }
 0x143   : > { %8977 = vmatprep.subr.bf16.mxu0 %v17700_v10  ;;  %v17785_v10 = vld [vmem:[#allocation2 + $0x1a48] ss:$112 sps:$4 sm:$0xff]  }
 0x144   : > { %9129 = vmatpush1.bf16.msra.mxu1 %v17694_v9  ;;  %v17782_v9 = vld [vmem:[#allocation2 + $0x1b20] ss:$112 sps:$4 sm:$0xff]  }
 0x145   : > { %9139 = vmatprep.subr.bf16.mxu1 %v17703_v11  ;;  %v17791_v11 = vld [vmem:[#allocation2 + $0x1c04] ss:$112 sps:$4 sm:$0xff]  }
 0x146   : > { %8978 = vmatpush1.bf16.msra.mxu0 %v17698_v12  ;;  %v17794_v12 = vld [vmem:[#allocation2 + $0x1b2c] ss:$112 sps:$4 sm:$0xff]  }
 0x147   : > { %9131 = vmatmul.mubr.bf16.vlgmr.msra.gmra.mrb[4].mxu1 %v20390_v8  ;;  %8979 = vmatprep.subr.bf16.mxu0 %v17706_v14  ;;  %v17792_v14 = vld [vmem:[#allocation2 + $0x1b28] ss:$112 sps:$4 sm:$0xff]  }
 0x148   : > { %9140 = vmatpush1.bf16.msra.mxu1 %v17701_v13  ;;  %9171 = vmatprep.mubr.bf16.mxu1 %v20399_v35  ;;  %v17789_v13 = vld [vmem:[#allocation2 + $0x1c00] ss:$112 sps:$4 sm:$0xff]  }
 0x149   : > { %9141 = vmatprep.subr.bf16.mxu1 %v17709_v15  ;;  %v20405_v15 = vcombine.low %v20395_v32, %v20395_v32  ;;  %v17814_v32 = vld [vmem:[#allocation2 + $0x1f80] ss:$112 sps:$4 sm:$0xff]  }
 0x14a   : > { %8980 = vmatpush1.bf16.msra.mxu0 %v17704_v16  ;;  %v17798_v16 = vld [vmem:[#allocation2 + $0x1ce4] ss:$112 sps:$4 sm:$0xff]  }
 0x14b   : > { %8981 = vmatprep.subr.bf16.mxu0 %v17712_v18  ;;  %v20408_v18 = vld [vmem:[%s20381_s19 + $0x10] sm:$0xff] }
 0x14c   : > { %9142 = vmatpush1.bf16.msra.mxu1 %v17707_v17  ;;  %v17801_v17 = vld [vmem:[#allocation2 + $0x1c0c] ss:$112 sps:$4 sm:$0xff]  }
 0x14d   : > { %9143 = vmatprep.subr.bf16.mxu1 %v17715_v19  ;;  %v20412_v19 = vcombine.high %v20408_v18, %v20408_v18 }
 0x14e   : > { %8982 = vmatpush1.bf16.msra.mxu0 %v17710_v20  ;;  %v17796_v20 = vld [vmem:[#allocation2 + $0x1ce0] ss:$112 sps:$4 sm:$0xff]  }
 0x14f   : > { %8983 = vmatprep.subr.bf16.mxu0 %v17718_v22  ;;  %v17804_v22 = vld [vmem:[#allocation2 + $0x1dc4] ss:$112 sps:$4 sm:$0xff]  }
 0x150   : > { %9144 = vmatpush1.bf16.msra.mxu1 %v17713_v21  ;;  %v17799_v21 = vld [vmem:[#allocation2 + $0x1c08] ss:$112 sps:$4 sm:$0xff]  }
 0x151   : > { %9145 = vmatprep.subr.bf16.mxu1 %v17721_v23  ;;  %v17807_v23 = vld [vmem:[#allocation2 + $0x1cec] ss:$112 sps:$4 sm:$0xff]  }
 0x152   : > { %8984 = vmatpush1.bf16.msra.mxu0 %v17716_v24  ;;  %v17802_v24 = vld [vmem:[#allocation2 + $0x1dc0] ss:$112 sps:$4 sm:$0xff]  }
 0x153   : > { %8985 = vmatprep.subr.bf16.mxu0 %v17724_v26  ;;  %v17810_v26 = vld [vmem:[#allocation2 + $0x1ea4] ss:$112 sps:$4 sm:$0xff]  }
 0x154   : > { %9146 = vmatpush1.bf16.msra.mxu1 %v17719_v25  ;;  %v17805_v25 = vld [vmem:[#allocation2 + $0x1ce8] ss:$112 sps:$4 sm:$0xff]  }
 0x155   : > { %9147 = vmatprep.subr.bf16.mxu1 %v17727_v27  ;;  %v17813_v27 = vld [vmem:[#allocation2 + $0x1dcc] ss:$112 sps:$4 sm:$0xff]  }
 0x156   : > { %8986 = vmatpush1.bf16.msra.mxu0 %v17722_v28  ;;  %v17808_v28 = vld [vmem:[#allocation2 + $0x1ea0] ss:$112 sps:$4 sm:$0xff]  }
 0x157   : > { %8987 = vmatprep.subr.bf16.mxu0 %v17730_v30  ;;  %v17816_v30 = vld [vmem:[#allocation2 + $0x1f84] ss:$112 sps:$4 sm:$0xff]  }
 0x158   : > { %9148 = vmatpush1.bf16.msra.mxu1 %v17725_v29  ;;  %v17811_v29 = vld [vmem:[#allocation2 + $0x1dc8] ss:$112 sps:$4 sm:$0xff]  }
 0x159   : > { %9149 = vmatprep.subr.bf16.mxu1 %v17733_v31  ;;  %v17819_v31 = vld [vmem:[#allocation2 + $0x1eac] ss:$112 sps:$4 sm:$0xff]  }
 0x15a   : > { %8988 = vmatpush1.bf16.msra.mxu0 %v17728_v33  ;;  %v17817_v33 = vld [vmem:[#allocation2 + $0x1ea8] ss:$112 sps:$4 sm:$0xff]  }
 0x15b   : > { %8989 = vmatprep.subr.bf16.mxu0 %v17736_v36  ;;  %v17825_v36 = vld [vmem:[#allocation2 + $0x1f8c] ss:$112 sps:$4 sm:$0xff]  }
 0x15c   : > { %9150 = vmatpush1.bf16.msra.mxu1 %v17731_v34  ;;  %v17822_v34 = vld [vmem:[#allocation2 + $0x2064] ss:$112 sps:$4 sm:$0xff]  }
 0x15d   : > { %9151 = vmatprep.subr.bf16.mxu1 %v17739_v37  ;;  %v17820_v37 = vld [vmem:[#allocation2 + $0x2060] ss:$112 sps:$4 sm:$0xff]  }
 0x15e   : > { %8990 = vmatpush1.bf16.msra.mxu0 %v17734_v38  ;;  %v17823_v38 = vld [vmem:[#allocation2 + $0x1f88] ss:$112 sps:$4 sm:$0xff]  }
 0x15f   : > { %8991 = vmatprep.subr.bf16.mxu0 %v17742_v40  ;;  %v17831_v40 = vld [vmem:[#allocation2 + $0x206c] ss:$112 sps:$4 sm:$0xff]  }
 0x160   : > { %9152 = vmatpush1.bf16.msra.mxu1 %v17737_v39  ;;  %v17828_v39 = vld [vmem:[#allocation2 + $0x2144] ss:$112 sps:$4 sm:$0xff]  }
 0x161   : > { %9153 = vmatprep.subr.bf16.mxu1 %v17745_v41  ;;  %v17826_v41 = vld [vmem:[#allocation2 + $0x2140] ss:$112 sps:$4 sm:$0xff]  }
 0x162   : > { %8992 = vmatpush1.bf16.msra.mxu0 %v17740_v42  ;;  %v17829_v42 = vld [vmem:[#allocation2 + $0x2068] ss:$112 sps:$4 sm:$0xff]  }
 0x163   : > { %8993 = vmatprep.subr.bf16.mxu0 %v17748_v44  ;;  %v17837_v44 = vld [vmem:[#allocation2 + $0x214c] ss:$112 sps:$4 sm:$0xff]  }
 0x164   : > { %9154 = vmatpush1.bf16.msra.mxu1 %v17743_v43  ;;  %v17834_v43 = vld [vmem:[#allocation2 + $0x2224] ss:$112 sps:$4 sm:$0xff]  }
 0x165   : > { %9155 = vmatprep.subr.bf16.mxu1 %v17751_v45  ;;  %v17832_v45 = vld [vmem:[#allocation2 + $0x2220] ss:$112 sps:$4 sm:$0xff]  }
 0x166   : > { %8994 = vmatpush1.bf16.msra.mxu0 %v17746_v46  ;;  %v17835_v46 = vld [vmem:[#allocation2 + $0x2148] ss:$112 sps:$4 sm:$0xff]  }
 0x167   : > { %8995 = vmatprep.subr.bf16.mxu0 %v17754_v48  ;;  %v17843_v48 = vld [vmem:[#allocation2 + $0x222c] ss:$112 sps:$4 sm:$0xff]  }
 0x168   : > { %9156 = vmatpush1.bf16.msra.mxu1 %v17749_v47  ;;  %v17840_v47 = vld [vmem:[#allocation2 + $0x2304] ss:$112 sps:$4 sm:$0xff]  }
 0x169   : > { %9157 = vmatprep.subr.bf16.mxu1 %v17757_v49  ;;  %v17838_v49 = vld [vmem:[#allocation2 + $0x2300] ss:$112 sps:$4 sm:$0xff]  }
 0x16a   : > { %8996 = vmatpush1.bf16.msra.mxu0 %v17752_v50  ;;  %v17841_v50 = vld [vmem:[#allocation2 + $0x2228] ss:$112 sps:$4 sm:$0xff]  }
 0x16b   : > { %8997 = vmatprep.subr.bf16.mxu0 %v17760_v53  ;;  %v17849_v53 = vld [vmem:[#allocation2 + $0x230c] ss:$112 sps:$4 sm:$0xff]  }
 0x16c   : > { %9158 = vmatpush1.bf16.msra.mxu1 %v17755_v51  ;;  %v17846_v51 = vld [vmem:[#allocation2 + $0x23e4] ss:$112 sps:$4 sm:$0xff]  }
 0x16d   : > { %9159 = vmatprep.subr.bf16.mxu1 %v17763_v54  ;;  %v17844_v54 = vld [vmem:[#allocation2 + $0x23e0] ss:$112 sps:$4 sm:$0xff]  }
 0x16e   : > { %8998 = vmatpush1.bf16.msra.mxu0 %v17758_v55  ;;  %v17847_v55 = vld [vmem:[#allocation2 + $0x2308] ss:$112 sps:$4 sm:$0xff]  }
 0x16f   : > { %8999 = vmatprep.subr.bf16.mxu0 %v17766_v57  ;;  %v17855_v57 = vld [vmem:[#allocation2 + $0x23ec] ss:$112 sps:$4 sm:$0xff]  }
 0x170   : > { %9160 = vmatpush1.bf16.msra.mxu1 %v17761_v56  ;;  %v17852_v56 = vld [vmem:[#allocation2 + $0x24c4] ss:$112 sps:$4 sm:$0xff]  }
 0x171   : > { %9161 = vmatprep.subr.bf16.mxu1 %v17769_v58  ;;  %v17850_v58 = vld [vmem:[#allocation2 + $0x24c0] ss:$112 sps:$4 sm:$0xff]  }
 0x172   : > { %9000 = vmatpush1.bf16.msra.mxu0 %v17764_v59  ;;  %v17853_v59 = vld [vmem:[#allocation2 + $0x23e8] ss:$112 sps:$4 sm:$0xff]  }
 0x173   : > { %9001 = vmatprep.subr.bf16.mxu0 %v17772_v61  ;;  %v17861_v61 = vld [vmem:[#allocation2 + $0x24cc] ss:$112 sps:$4 sm:$0xff]  }
 0x174   : > { %9162 = vmatpush1.bf16.msra.mxu1 %v17767_v60  ;;  %v17858_v60 = vld [vmem:[#allocation2 + $0x25a4] ss:$112 sps:$4 sm:$0xff]  }
 0x175   : > { %9163 = vmatprep.subr.bf16.mxu1 %v17775_v62  ;;  %v17856_v62 = vld [vmem:[#allocation2 + $0x25a0] ss:$112 sps:$4 sm:$0xff]  }
 0x176   : > { %9002 = vmatpush1.bf16.msra.mxu0 %v17770_v63  ;;  %v17859_v63 = vld [vmem:[#allocation2 + $0x24c8] ss:$112 sps:$4 sm:$0xff]  }
 0x177   : > { %9003 = vmatprep.subr.bf16.mxu0 %v17778_v2  ;;  %v17867_v2 = vld [vmem:[#allocation2 + $0x25ac] ss:$112 sps:$4 sm:$0xff]  }
 0x178   : > { %9164 = vmatpush1.bf16.msra.mxu1 %v17773_v1  ;;  %v17864_v1 = vld [vmem:[#allocation2 + $0x2684] ss:$112 sps:$4 sm:$0xff]  }
 0x179   : > { %9165 = vmatprep.subr.bf16.mxu1 %v17781_v3  ;;  %v17862_v3 = vld [vmem:[#allocation2 + $0x2680] ss:$112 sps:$4 sm:$0xff]  }
 0x17a   : > { %9004 = vmatpush1.bf16.msra.mxu0 %v17776_v4  ;;  %v17865_v4 = vld [vmem:[#allocation2 + $0x25a8] ss:$112 sps:$4 sm:$0xff]  }
 0x17b   : > { %9005 = vmatprep.subr.bf16.mxu0 %v17784_v6  ;;  %v17873_v6 = vld [vmem:[#allocation2 + $0x268c] ss:$112 sps:$4 sm:$0xff]  }
 0x17c   : > { %9166 = vmatpush1.bf16.msra.mxu1 %v17779_v5  ;;  %v17870_v5 = vld [vmem:[#allocation2 + $0x2764] ss:$112 sps:$4 sm:$0xff]  }
 0x17d   : > { %9167 = vmatprep.subr.bf16.mxu1 %v17787_v7  ;;  %v17868_v7 = vld [vmem:[#allocation2 + $0x2760] ss:$112 sps:$4 sm:$0xff]  }
 0x17e   : > { %9006 = vmatpush1.bf16.msra.mxu0 %v17782_v9  ;;  %v17871_v9 = vld [vmem:[#allocation2 + $0x2688] ss:$112 sps:$4 sm:$0xff]  }
 0x17f   : > { %9016 = vmatprep.subr.bf16.mxu0 %v17791_v11  ;;  %v17879_v11 = vld [vmem:[#allocation2 + $0x276c] ss:$112 sps:$4 sm:$0xff]  }
 0x180   : > { %9168 = vmatpush1.bf16.msra.mxu1 %v17785_v10  ;;  %v17876_v10 = vld [vmem:[#allocation2 + $0x2844] ss:$112 sps:$4 sm:$0xff]  }
 0x181   : > { %9169 = vmatprep.subr.bf16.mxu1 %v17794_v12  ;;  %9008 = vmatmul.mubr.bf16.vlgmr.msra.gmra.mrb[0].mxu0 %v20405_v15  ;;  %v17874_v12 = vld [vmem:[#allocation2 + $0x2840] ss:$112 sps:$4 sm:$0xff]  }
 0x182   : > { %9017 = vmatpush1.bf16.msra.mxu0 %v17789_v13  ;;  %9048 = vmatprep.mubr.bf16.mxu0 %v20412_v19  ;;  %v17877_v13 = vld [vmem:[#allocation2 + $0x2768] ss:$112 sps:$4 sm:$0xff]  }
 0x183   : > { %9018 = vmatprep.subr.bf16.mxu0 %v17798_v16  ;;  %v17885_v16 = vld [vmem:[#allocation2 + $0x284c] ss:$112 sps:$4 sm:$0xff]  }
 0x184   : > { %9170 = vmatpush1.bf16.msra.mxu1 %v17792_v14  ;;  %v17882_v14 = vld [vmem:[#allocation2 + $0x2924] ss:$112 sps:$4 sm:$0xff]  }
 0x185   : > { %9180 = vmatprep.subr.bf16.mxu1 %v17801_v17  ;;  %v17880_v17 = vld [vmem:[#allocation2 + $0x2920] ss:$112 sps:$4 sm:$0xff]  }
 0x186   : > { %9019 = vmatpush1.bf16.msra.mxu0 %v17796_v20  ;;  %v17883_v20 = vld [vmem:[#allocation2 + $0x2848] ss:$112 sps:$4 sm:$0xff]  }
 0x187   : > { %9172 = vmatmul.mubr.bf16.vlgmr.msra.gmra.mrb[4].mxu1 %v20405_v15  ;;  %9020 = vmatprep.subr.bf16.mxu0 %v17804_v22  ;;  %v17893_v22 = vld [vmem:[#allocation2 + $0x14] ss:$112 sps:$4 sm:$0xff]  }
 0x188   : > { %9181 = vmatpush1.bf16.msra.mxu1 %v17799_v21  ;;  %9212 = vmatprep.mubr.bf16.mxu1 %v20412_v19  ;;  %v17890_v21 = vld [vmem:[#allocation2 + $0x292c] ss:$112 sps:$4 sm:$0xff]  }
 0x189   : > { %9182 = vmatprep.subr.bf16.mxu1 %v17807_v23  ;;  %v20420_v23 = vcombine.low %v20408_v18, %v20408_v18  ;;  %v17897_v18 = vld [vmem:[#allocation2 + $0x1d0] ss:$112 sps:$4 sm:$0xff]  }
 0x18a   : > { %9021 = vmatpush1.bf16.msra.mxu0 %v17802_v24  ;;  %v17888_v24 = vld [vmem:[#allocation2 + $0x2928] ss:$112 sps:$4 sm:$0xff]  }
 0x18b   : > { %9022 = vmatprep.subr.bf16.mxu0 %v17810_v26  ;;  %v17896_v26 = vld [vmem:[#allocation2 + $0xf4] ss:$112 sps:$4 sm:$0xff]  }
 0x18c   : > { %9183 = vmatpush1.bf16.msra.mxu1 %v17805_v25  ;;  %v17891_v25 = vld [vmem:[#allocation2 + $0x10] ss:$112 sps:$4 sm:$0xff]  }
 0x18d   : > { %9184 = vmatprep.subr.bf16.mxu1 %v17813_v27  ;;  %v17902_v27 = vld [vmem:[#allocation2 + $0x2a0c] ss:$112 sps:$4 sm:$0xff]  }
 0x18e   : > { %9023 = vmatpush1.bf16.msra.mxu0 %v17808_v28  ;;  %v17894_v28 = vld [vmem:[#allocation2 + $0xf0] ss:$112 sps:$4 sm:$0xff]  }
 0x18f   : > { %9024 = vmatprep.subr.bf16.mxu0 %v17816_v30  ;;  %v17899_v30 = vld [vmem:[#allocation2 + $0x1d4] ss:$112 sps:$4 sm:$0xff]  }
 0x190   : > { %9185 = vmatpush1.bf16.msra.mxu1 %v17811_v29  ;;  %v17900_v29 = vld [vmem:[#allocation2 + $0x2a08] ss:$112 sps:$4 sm:$0xff]  }
 0x191   : > { %9186 = vmatprep.subr.bf16.mxu1 %v17819_v31  ;;  %v17911_v31 = vld [vmem:[#allocation2 + $0x2a14] ss:$112 sps:$4 sm:$0xff]  }
 0x192   : > { %9025 = vmatpush1.bf16.msra.mxu0 %v17814_v32  ;;  %v17905_v32 = vld [vmem:[#allocation2 + $0x2b4] ss:$112 sps:$4 sm:$0xff]  }
 0x193   : > { %9026 = vmatprep.subr.bf16.mxu0 %v17822_v34  ;;  %v17908_v34 = vld [vmem:[#allocation2 + $0x394] ss:$112 sps:$4 sm:$0xff]  }
 0x194   : > { %9187 = vmatpush1.bf16.msra.mxu1 %v17817_v33  ;;  %v17903_v33 = vld [vmem:[#allocation2 + $0x2b0] ss:$112 sps:$4 sm:$0xff]  }
 0x195   : > { %9188 = vmatprep.subr.bf16.mxu1 %v17825_v36  ;;  %v17906_v36 = vld [vmem:[#allocation2 + $0x390] ss:$112 sps:$4 sm:$0xff]  }
 0x196   : > { %9027 = vmatpush1.bf16.msra.mxu0 %v17820_v37  ;;  %v17909_v37 = vld [vmem:[#allocation2 + $0x2a10] ss:$112 sps:$4 sm:$0xff]  }
 0x197   : > { %9028 = vmatprep.subr.bf16.mxu0 %v17828_v39  ;;  %v17917_v39 = vld [vmem:[#allocation2 + $0x1c] ss:$112 sps:$4 sm:$0xff]  }
 0x198   : > { %9189 = vmatpush1.bf16.msra.mxu1 %v17823_v38  ;;  %v17914_v38 = vld [vmem:[#allocation2 + $0x474] ss:$112 sps:$4 sm:$0xff]  }
 0x199   : > { %9190 = vmatprep.subr.bf16.mxu1 %v17831_v40  ;;  %v19690_v40 = vld [vmem:[%s20381_s19 + $0x18] ss:$0 sps:$4 sm:$0xff]  }
 0x19a   : > { %9029 = vmatpush1.bf16.msra.mxu0 %v17826_v41  ;;  %v17912_v41 = vld [vmem:[#allocation2 + $0x470] ss:$112 sps:$4 sm:$0xff]  }
 0x19b   : > { %9030 = vmatprep.subr.bf16.mxu0 %v17834_v43  ;;  %v17915_v43 = vld [vmem:[#allocation2 + $0x18] ss:$112 sps:$4 sm:$0xff]  }
 0x19c   : > { %9191 = vmatpush1.bf16.msra.mxu1 %v17829_v42  ;;  %v17920_v42 = vld [vmem:[#allocation2 + $0x554] ss:$112 sps:$4 sm:$0xff]  }
 0x19d   : > { %9192 = vmatprep.subr.bf16.mxu1 %v17837_v44  ;;  %v17918_v44 = vld [vmem:[#allocation2 + $0x550] ss:$112 sps:$4 sm:$0xff]  }
 0x19e   : > { %9031 = vmatpush1.bf16.msra.mxu0 %v17832_v45  ;;  %v17923_v45 = vld [vmem:[#allocation2 + $0xfc] ss:$112 sps:$4 sm:$0xff]  }
 0x19f   : > { %9032 = vmatprep.subr.bf16.mxu0 %v17840_v47 }
 0x1a0   : > { %9193 = vmatpush1.bf16.msra.mxu1 %v17835_v46  ;;  %v17926_v46 = vld [vmem:[#allocation2 + $0x634] ss:$112 sps:$4 sm:$0xff]  }
 0x1a1   : > { %9194 = vmatprep.subr.bf16.mxu1 %v17843_v48  ;;  %v17921_v48 = vld [vmem:[#allocation2 + $0xf8] ss:$112 sps:$4 sm:$0xff]  }
 0x1a2   : > { %9033 = vmatpush1.bf16.msra.mxu0 %v17838_v49 }
 0x1a3   : > { %9034 = vmatprep.subr.bf16.mxu0 %v17846_v51 }
 0x1a4   : > { %9195 = vmatpush1.bf16.msra.mxu1 %v17841_v50  ;;  %v17924_v50 = vld [vmem:[#allocation2 + $0x630] ss:$112 sps:$4 sm:$0xff]  }
 0x1a5   : > { %9196 = vmatprep.subr.bf16.mxu1 %v17849_v53  ;;  %v17929_v53 = vld [vmem:[#allocation2 + $0x1dc] ss:$112 sps:$4 sm:$0xff]  }
 0x1a6   : > { %9035 = vmatpush1.bf16.msra.mxu0 %v17844_v54  ;;  %v17932_v54 = vld [vmem:[#allocation2 + $0x714] ss:$112 sps:$4 sm:$0xff]  }
 0x1a7   : > { %9036 = vmatprep.subr.bf16.mxu0 %v17852_v56  ;;  %v17927_v56 = vld [vmem:[#allocation2 + $0x1d8] ss:$112 sps:$4 sm:$0xff]  }
 0x1a8   : > { %9197 = vmatpush1.bf16.msra.mxu1 %v17847_v55 }
 0x1a9   : > { %9198 = vmatprep.subr.bf16.mxu1 %v17855_v57  ;;  %v17930_v57 = vld [vmem:[#allocation2 + $0x710] ss:$112 sps:$4 sm:$0xff]  }
 0x1aa   : > { %9037 = vmatpush1.bf16.msra.mxu0 %v17850_v58  ;;  %v17935_v58 = vld [vmem:[#allocation2 + $0x2bc] ss:$112 sps:$4 sm:$0xff]  }
 0x1ab   : > { %9038 = vmatprep.subr.bf16.mxu0 %v17858_v60  ;;  %v17933_v60 = vld [vmem:[#allocation2 + $0x2b8] ss:$112 sps:$4 sm:$0xff]  }
 0x1ac   : > { %9199 = vmatpush1.bf16.msra.mxu1 %v17853_v59  ;;  %v17938_v59 = vld [vmem:[#allocation2 + $0x7f4] ss:$112 sps:$4 sm:$0xff]  }
 0x1ad   : > { %9200 = vmatprep.subr.bf16.mxu1 %v17861_v61  ;;  %v17936_v61 = vld [vmem:[#allocation2 + $0x7f0] ss:$112 sps:$4 sm:$0xff]  }
 0x1ae   : > { %9039 = vmatpush1.bf16.msra.mxu0 %v17856_v62  ;;  %v17941_v62 = vld [vmem:[#allocation2 + $0x39c] ss:$112 sps:$4 sm:$0xff]  }
 0x1af   : > { %9040 = vmatprep.subr.bf16.mxu0 %v17864_v1  ;;  %v17939_v1 = vld [vmem:[#allocation2 + $0x398] ss:$112 sps:$4 sm:$0xff]  }
 0x1b0   : > { %9201 = vmatpush1.bf16.msra.mxu1 %v17859_v63  ;;  %v17944_v63 = vld [vmem:[#allocation2 + $0x8d4] ss:$112 sps:$4 sm:$0xff]  }
 0x1b1   : > { %9202 = vmatprep.subr.bf16.mxu1 %v17867_v2  ;;  %v17942_v2 = vld [vmem:[#allocation2 + $0x8d0] ss:$112 sps:$4 sm:$0xff]  }
 0x1b2   : > { %9041 = vmatpush1.bf16.msra.mxu0 %v17862_v3  ;;  %v17947_v3 = vld [vmem:[#allocation2 + $0x47c] ss:$112 sps:$4 sm:$0xff]  }
 0x1b3   : > { %9042 = vmatprep.subr.bf16.mxu0 %v17870_v5  ;;  %v17945_v5 = vld [vmem:[#allocation2 + $0x478] ss:$112 sps:$4 sm:$0xff]  }
 0x1b4   : > { %9203 = vmatpush1.bf16.msra.mxu1 %v17865_v4  ;;  %v17950_v4 = vld [vmem:[#allocation2 + $0x9b4] ss:$112 sps:$4 sm:$0xff]  }
 0x1b5   : > { %9204 = vmatprep.subr.bf16.mxu1 %v17873_v6  ;;  %v17948_v6 = vld [vmem:[#allocation2 + $0x9b0] ss:$112 sps:$4 sm:$0xff]  }
 0x1b6   : > { %9043 = vmatpush1.bf16.msra.mxu0 %v17868_v7  ;;  %v17953_v7 = vld [vmem:[#allocation2 + $0x55c] ss:$112 sps:$4 sm:$0xff]  }
 0x1b7   : > { %9044 = vmatprep.subr.bf16.mxu0 %v17876_v10  ;;  %v17951_v10 = vld [vmem:[#allocation2 + $0x558] ss:$112 sps:$4 sm:$0xff]  }
 0x1b8   : > { %9205 = vmatpush1.bf16.msra.mxu1 %v17871_v9  ;;  %v17956_v9 = vld [vmem:[#allocation2 + $0xa94] ss:$112 sps:$4 sm:$0xff]  }
 0x1b9   : > { %9206 = vmatprep.subr.bf16.mxu1 %v17879_v11  ;;  %v17954_v11 = vld [vmem:[#allocation2 + $0xa90] ss:$112 sps:$4 sm:$0xff]  }
 0x1ba   : > { %9045 = vmatpush1.bf16.msra.mxu0 %v17874_v12  ;;  %v17959_v12 = vld [vmem:[#allocation2 + $0x63c] ss:$112 sps:$4 sm:$0xff]  }
 0x1bb   : > { %9046 = vmatprep.subr.bf16.mxu0 %v17882_v14  ;;  %v17957_v14 = vld [vmem:[#allocation2 + $0x638] ss:$112 sps:$4 sm:$0xff]  }
 0x1bc   : > { %9207 = vmatpush1.bf16.msra.mxu1 %v17877_v13  ;;  %v17962_v13 = vld [vmem:[#allocation2 + $0xb74] ss:$112 sps:$4 sm:$0xff]  }
 0x1bd   : > { %9208 = vmatprep.subr.bf16.mxu1 %v17885_v16  ;;  %v17960_v16 = vld [vmem:[#allocation2 + $0xb70] ss:$112 sps:$4 sm:$0xff]  }
 0x1be   : > { %9047 = vmatpush1.bf16.msra.mxu0 %v17880_v17  ;;  %v17965_v17 = vld [vmem:[#allocation2 + $0x71c] ss:$112 sps:$4 sm:$0xff]  }
 0x1bf   : > { %9262 = vmatprep.subr.bf16.mxu0 %v17893_v22  ;;  %v17966_v22 = vld [vmem:[#allocation2 + $0xc50] ss:$112 sps:$4 sm:$0xff]  }
 0x1c0   : > { %9209 = vmatpush1.bf16.msra.mxu1 %v17883_v20  ;;  %v17968_v20 = vld [vmem:[#allocation2 + $0xc54] ss:$112 sps:$4 sm:$0xff]  }
 0x1c1   : > { %9210 = vmatprep.subr.bf16.mxu1 %v17890_v21  ;;  %9049 = vmatmul.mubr.bf16.vlgmr.msra.gmra.mrb[0].mxu0 %v20420_v23  ;;  %v17963_v21 = vld [vmem:[#allocation2 + $0x718] ss:$112 sps:$4 sm:$0xff]  }
 0x1c2   : > { %9263 = vmatpush1.bf16.msra.mxu0 %v17891_v25  ;;  %9294 = vmatprep.mubr.bf16.mxu0 %v20386_v52  ;;  %v17974_v25 = vld [vmem:[#allocation2 + $0xd34] ss:$112 sps:$4 sm:$0xff]  }
 0x1c3   : > { %9264 = vmatprep.subr.bf16.mxu0 %v17896_v26  ;;  %v17969_v26 = vld [vmem:[#allocation2 + $0x7f8] ss:$112 sps:$4 sm:$0xff]  }
 0x1c4   : > { %9211 = vmatpush1.bf16.msra.mxu1 %v17888_v24  ;;  %v17971_v24 = vld [vmem:[#allocation2 + $0x7fc] ss:$112 sps:$4 sm:$0xff]  }
 0x1c5   : > { %9221 = vmatprep.subr.bf16.mxu1 %v17902_v27  ;;  %v17972_v27 = vld [vmem:[#allocation2 + $0xd30] ss:$112 sps:$4 sm:$0xff]  }
 0x1c6   : > { %9265 = vmatpush1.bf16.msra.mxu0 %v17894_v28  ;;  %v17977_v28 = vld [vmem:[#allocation2 + $0x8dc] ss:$112 sps:$4 sm:$0xff]  }
 0x1c7   : > { %9213 = vmatmul.mubr.bf16.vlgmr.msra.gmra.mrb[4].mxu1 %v20420_v23  ;;  %9266 = vmatprep.subr.bf16.mxu0 %v17899_v30  ;;  %v17975_v30 = vld [vmem:[#allocation2 + $0x8d8] ss:$112 sps:$4 sm:$0xff]  }
 0x1c8   : > { %9222 = vmatpush1.bf16.msra.mxu1 %v17900_v29  ;;  %9253 = vmatprep.mubr.bf16.mxu1 %v20028_v0  ;;  %v17980_v29 = vld [vmem:[#allocation2 + $0xe14] ss:$112 sps:$4 sm:$0xff]  }
 0x1c9   : > { %9385 = vmatprep.subr.bf16.mxu1 %v17911_v31  ;;  %v17978_v31 = vld [vmem:[#allocation2 + $0xe10] ss:$112 sps:$4 sm:$0xff]  }
 0x1ca   : > { %9267 = vmatpush1.bf16.msra.mxu0 %v17897_v18  ;;  %v17983_v18 = vld [vmem:[#allocation2 + $0x9bc] ss:$112 sps:$4 sm:$0xff]  }
 0x1cb   : > { %9268 = vmatprep.subr.bf16.mxu0 %v17905_v32  ;;  %v17986_v32 = vld [vmem:[#allocation2 + $0xef4] ss:$112 sps:$4 sm:$0xff]  }
 0x1ce   : > { %9269 = vmatpush1.bf16.msra.mxu0 %v17903_v33  ;;  %v17981_v33 = vld [vmem:[#allocation2 + $0x9b8] ss:$112 sps:$4 sm:$0xff]  }
 0x1cf   : > { %9270 = vmatprep.subr.bf16.mxu0 %v17908_v34  ;;  %v17984_v34 = vld [vmem:[#allocation2 + $0xef0] ss:$112 sps:$4 sm:$0xff]  }
 0x1d2   : > { %9271 = vmatpush1.bf16.msra.mxu0 %v17906_v36  ;;  %v17989_v36 = vld [vmem:[#allocation2 + $0xa9c] ss:$112 sps:$4 sm:$0xff]  }
 0x1d3   : > { %16648 = vmatmul.mubr.msk.bf16.vlgmr.msra.gmra.mrb[4].mxu1 %vm8930_vm0, %v19690_v40  ;;  %9272 = vmatprep.subr.bf16.mxu0 %v17914_v38  ;;  %v17987_v38 = vld [vmem:[#allocation2 + $0xa98] ss:$112 sps:$4 sm:$0xff]  }
 0x1d4   : > { %9386 = vmatpush1.bf16.msra.mxu1 %v17909_v37  ;;  %9417 = vmatprep.mubr.bf16.mxu1 %v20028_v0  ;;  %v17992_v37 = vld [vmem:[#allocation2 + $0xfd4] ss:$112 sps:$4 sm:$0xff]  }
 0x1d5   : > { %9426 = vmatprep.subr.bf16.mxu1 %v17917_v39  ;;  %v17990_v39 = vld [vmem:[#allocation2 + $0xfd0] ss:$112 sps:$4 sm:$0xff]  }
 0x1d6   : > { %9273 = vmatpush1.bf16.msra.mxu0 %v17912_v41  ;;  %v17998_v41 = vld [vmem:[#allocation2 + $0x10b4] ss:$112 sps:$4 sm:$0xff]  }
 0x1d7   : > { %9274 = vmatprep.subr.bf16.mxu0 %v17920_v42  ;;  %v17993_v42 = vld [vmem:[#allocation2 + $0xb78] ss:$112 sps:$4 sm:$0xff]  }
 0x1da   : > { %v20429_v47 = vpop.f32.mrb[0].mxu1  ;;  %9275 = vmatpush1.bf16.msra.mxu0 %v17918_v44  ;;  %v18001_v44 = vld [vmem:[#allocation2 + $0xc5c] ss:$112 sps:$4 sm:$0xff]  }
 0x1db   : > { %16649 = vmatmul.mubr.msk.bf16.vlgmr.msra.gmra.mrb[8].mxu1 %vm8930_vm0, %v19690_v40  ;;  %v20432_v49 = vpop.f32.mrb[1].mxu1  ;;  %9276 = vmatprep.subr.bf16.mxu0 %v17926_v46  ;;  %v17995_v40 = vld [vmem:[#allocation2 + $0xb7c] ss:$112 sps:$4 sm:$0xff]   ;;  %v17999_v46 = vld [vmem:[#allocation2 + $0xc58] ss:$112 sps:$4 sm:$0xff]  }
 0x1dc   : > { %9427 = vmatpush1.bf16.msra.mxu1 %v17915_v43  ;;  %v9095_v51 = vpop.f32.mrb[2].mxu1  ;;  %9458 = vmatprep.mubr.bf16.mxu1 %v20386_v52  ;;  %v17996_v43 = vld [vmem:[#allocation2 + $0x10b0] ss:$112 sps:$4 sm:$0xff]  }
 0x1dd   : > { %9428 = vmatprep.subr.bf16.mxu1 %v17923_v45  ;;  %v9096_v55 = vpop.f32.mrb[3].mxu1  ;;  %v18004_v45 = vld [vmem:[#allocation2 + $0x1194] ss:$112 sps:$4 sm:$0xff]  }
 0x1de   : > { %9277 = vmatpush1.bf16.msra.mxu0 %v17924_v50  ;;  %v18007_v50 = vld [vmem:[#allocation2 + $0xd3c] ss:$112 sps:$4 sm:$0xff]   ;;  %v18010_v51 = vld [vmem:[#allocation2 + $0x1274] ss:$112 sps:$4 sm:$0xff]  }
 0x1df   : > { %9278 = vmatprep.subr.bf16.mxu0 %v17932_v54  ;;  %v18008_v54 = vld [vmem:[#allocation2 + $0x1270] ss:$112 sps:$4 sm:$0xff]   ;;  %v18013_v55 = vld [vmem:[#allocation2 + $0xe1c] ss:$112 sps:$4 sm:$0xff]  }
 0x1e0   : > { %9429 = vmatpush1.bf16.msra.mxu1 %v17921_v48  ;;  %v18002_v48 = vld [vmem:[#allocation2 + $0x1190] ss:$112 sps:$4 sm:$0xff]  }
 0x1e1   : > { %9430 = vmatprep.subr.bf16.mxu1 %v17929_v53  ;;  %v18005_v53 = vld [vmem:[#allocation2 + $0xd38] ss:$112 sps:$4 sm:$0xff]  }
 0x1e2   : > { %9279 = vmatpush1.bf16.msra.mxu0 %v17930_v57  ;;  %v18011_v57 = vld [vmem:[#allocation2 + $0xe18] ss:$112 sps:$4 sm:$0xff]  }
 0x1e3   : > { %9280 = vmatprep.subr.bf16.mxu0 %v17938_v59  ;;  %v18019_v59 = vld [vmem:[#allocation2 + $0xefc] ss:$112 sps:$4 sm:$0xff]  }
 0x1e4   : > { %9431 = vmatpush1.bf16.msra.mxu1 %v17927_v56  ;;  %v18016_v56 = vld [vmem:[#allocation2 + $0x1354] ss:$112 sps:$4 sm:$0xff]  }
 0x1e5   : > { %9432 = vmatprep.subr.bf16.mxu1 %v17935_v58  ;;  %v18014_v58 = vld [vmem:[#allocation2 + $0x1350] ss:$112 sps:$4 sm:$0xff]  }
 0x1e6   : > { %9281 = vmatpush1.bf16.msra.mxu0 %v17936_v61  ;;  %v18017_v61 = vld [vmem:[#allocation2 + $0xef8] ss:$112 sps:$4 sm:$0xff]  }
 0x1e7   : > { %9282 = vmatprep.subr.bf16.mxu0 %v17944_v63  ;;  %v18025_v63 = vld [vmem:[#allocation2 + $0xfdc] ss:$112 sps:$4 sm:$0xff]  }
 0x1e8   : > { %9433 = vmatpush1.bf16.msra.mxu1 %v17933_v60  ;;  %v18022_v60 = vld [vmem:[#allocation2 + $0x1434] ss:$112 sps:$4 sm:$0xff]  }
 0x1e9   : > { %9434 = vmatprep.subr.bf16.mxu1 %v17941_v62  ;;  %v18020_v62 = vld [vmem:[#allocation2 + $0x1430] ss:$112 sps:$4 sm:$0xff]  }
 0x1ea   : > { %9283 = vmatpush1.bf16.msra.mxu0 %v17942_v2  ;;  %v18023_v2 = vld [vmem:[#allocation2 + $0xfd8] ss:$112 sps:$4 sm:$0xff]  }
 0x1eb   : > { %9284 = vmatprep.subr.bf16.mxu0 %v17950_v4  ;;  %v18031_v4 = vld [vmem:[#allocation2 + $0x10bc] ss:$112 sps:$4 sm:$0xff]  }
 0x1ec   : > { %9435 = vmatpush1.bf16.msra.mxu1 %v17939_v1  ;;  %v18028_v1 = vld [vmem:[#allocation2 + $0x1514] ss:$112 sps:$4 sm:$0xff]  }
 0x1ed   : > { %9436 = vmatprep.subr.bf16.mxu1 %v17947_v3  ;;  %v18026_v3 = vld [vmem:[#allocation2 + $0x1510] ss:$112 sps:$4 sm:$0xff]  }
 0x1ee   : > { %9285 = vmatpush1.bf16.msra.mxu0 %v17948_v6  ;;  %v18029_v6 = vld [vmem:[#allocation2 + $0x10b8] ss:$112 sps:$4 sm:$0xff]  }
 0x1ef   : > { %9286 = vmatprep.subr.bf16.mxu0 %v17956_v9  ;;  %v18037_v9 = vld [vmem:[#allocation2 + $0x119c] ss:$112 sps:$4 sm:$0xff]  }
 0x1f0   : > { %9437 = vmatpush1.bf16.msra.mxu1 %v17945_v5  ;;  %v18034_v5 = vld [vmem:[#allocation2 + $0x15f4] ss:$112 sps:$4 sm:$0xff]  }
 0x1f1   : > { %9438 = vmatprep.subr.bf16.mxu1 %v17953_v7  ;;  %v18032_v7 = vld [vmem:[#allocation2 + $0x15f0] ss:$112 sps:$4 sm:$0xff]  }
 0x1f2   : > { %9287 = vmatpush1.bf16.msra.mxu0 %v17954_v11  ;;  %v18035_v11 = vld [vmem:[#allocation2 + $0x1198] ss:$112 sps:$4 sm:$0xff]  }
 0x1f3   : > { %9288 = vmatprep.subr.bf16.mxu0 %v17962_v13  ;;  %v18043_v13 = vld [vmem:[#allocation2 + $0x127c] ss:$112 sps:$4 sm:$0xff]  }
 0x1f4   : > { %9439 = vmatpush1.bf16.msra.mxu1 %v17951_v10  ;;  %v18040_v10 = vld [vmem:[#allocation2 + $0x16d4] ss:$112 sps:$4 sm:$0xff]  }
 0x1f5   : > { %9440 = vmatprep.subr.bf16.mxu1 %v17959_v12  ;;  %v18038_v12 = vld [vmem:[#allocation2 + $0x16d0] ss:$112 sps:$4 sm:$0xff]  }
 0x1f6   : > { %9289 = vmatpush1.bf16.msra.mxu0 %v17960_v16  ;;  %v18041_v16 = vld [vmem:[#allocation2 + $0x1278] ss:$112 sps:$4 sm:$0xff]  }
 0x1f7   : > { %9290 = vmatprep.subr.bf16.mxu0 %v17968_v20  ;;  %v18049_v20 = vld [vmem:[#allocation2 + $0x135c] ss:$112 sps:$4 sm:$0xff]  }
 0x1f8   : > { %9441 = vmatpush1.bf16.msra.mxu1 %v17957_v14  ;;  %v18046_v14 = vld [vmem:[#allocation2 + $0x17b4] ss:$112 sps:$4 sm:$0xff]  }
 0x1f9   : > { %9442 = vmatprep.subr.bf16.mxu1 %v17965_v17  ;;  %v18044_v17 = vld [vmem:[#allocation2 + $0x17b0] ss:$112 sps:$4 sm:$0xff]  }
 0x1fa   : > { %9291 = vmatpush1.bf16.msra.mxu0 %v17966_v22  ;;  %v18047_v22 = vld [vmem:[#allocation2 + $0x1358] ss:$112 sps:$4 sm:$0xff]  }
 0x1fb   : > { %9292 = vmatprep.subr.bf16.mxu0 %v17974_v25  ;;  %v18055_v25 = vld [vmem:[#allocation2 + $0x143c] ss:$112 sps:$4 sm:$0xff]  }
 0x1fc   : > { %9443 = vmatpush1.bf16.msra.mxu1 %v17963_v21  ;;  %v18052_v21 = vld [vmem:[#allocation2 + $0x1894] ss:$112 sps:$4 sm:$0xff]  }
 0x1fd   : > { %9444 = vmatprep.subr.bf16.mxu1 %v17971_v24  ;;  %v18050_v24 = vld [vmem:[#allocation2 + $0x1890] ss:$112 sps:$4 sm:$0xff]  }
 0x1fe   : > { %9293 = vmatpush1.bf16.msra.mxu0 %v17972_v27  ;;  %v18053_v27 = vld [vmem:[#allocation2 + $0x1438] ss:$112 sps:$4 sm:$0xff]  }
 0x1ff   : > { %9303 = vmatprep.subr.bf16.mxu0 %v17980_v29  ;;  %v18061_v29 = vld [vmem:[#allocation2 + $0x151c] ss:$112 sps:$4 sm:$0xff]  }
 0x200   : > { %9445 = vmatpush1.bf16.msra.mxu1 %v17969_v26  ;;  %v18058_v26 = vld [vmem:[#allocation2 + $0x1974] ss:$112 sps:$4 sm:$0xff]  }
 0x201   : > { %9446 = vmatprep.subr.bf16.mxu1 %v17977_v28  ;;  %9295 = vmatmul.mubr.bf16.vlgmr.msra.gmra.mrb[4].mxu0 %v20390_v8  ;;  %v18056_v28 = vld [vmem:[#allocation2 + $0x1970] ss:$112 sps:$4 sm:$0xff]  }
 0x202   : > { %9304 = vmatpush1.bf16.msra.mxu0 %v17978_v31  ;;  %9335 = vmatprep.mubr.bf16.mxu0 %v20399_v35  ;;  %v18059_v31 = vld [vmem:[#allocation2 + $0x1518] ss:$112 sps:$4 sm:$0xff]  }
 0x203   : > { %9305 = vmatprep.subr.bf16.mxu0 %v17986_v32  ;;  %v18067_v32 = vld [vmem:[#allocation2 + $0x15fc] ss:$112 sps:$4 sm:$0xff]  }
 0x204   : > { %9447 = vmatpush1.bf16.msra.mxu1 %v17975_v30  ;;  %v18064_v30 = vld [vmem:[#allocation2 + $0x1a54] ss:$112 sps:$4 sm:$0xff]  }
 0x205   : > { %9448 = vmatprep.subr.bf16.mxu1 %v17983_v18  ;;  %v18062_v18 = vld [vmem:[#allocation2 + $0x1a50] ss:$112 sps:$4 sm:$0xff]  }
 0x206   : > { %9306 = vmatpush1.bf16.msra.mxu0 %v17984_v34  ;;  %v18065_v34 = vld [vmem:[#allocation2 + $0x15f8] ss:$112 sps:$4 sm:$0xff]  }
 0x207   : > { %9307 = vmatprep.subr.bf16.mxu0 %v17992_v37  ;;  %v18073_v37 = vld [vmem:[#allocation2 + $0x16dc] ss:$112 sps:$4 sm:$0xff]  }
 0x208   : > { %9449 = vmatpush1.bf16.msra.mxu1 %v17981_v33  ;;  %v18070_v33 = vld [vmem:[#allocation2 + $0x1b34] ss:$112 sps:$4 sm:$0xff]  }
 0x209   : > { %9450 = vmatprep.subr.bf16.mxu1 %v17989_v36  ;;  %v18068_v36 = vld [vmem:[#allocation2 + $0x1b30] ss:$112 sps:$4 sm:$0xff]  }
 0x20a   : > { %9308 = vmatpush1.bf16.msra.mxu0 %v17990_v39  ;;  %v18071_v39 = vld [vmem:[#allocation2 + $0x16d8] ss:$112 sps:$4 sm:$0xff]  }
 0x20b   : > { %9309 = vmatprep.subr.bf16.mxu0 %v17998_v41  ;;  %v18079_v41 = vld [vmem:[#allocation2 + $0x17bc] ss:$112 sps:$4 sm:$0xff]  }
 0x20c   : > { %9451 = vmatpush1.bf16.msra.mxu1 %v17987_v38  ;;  %v18076_v38 = vld [vmem:[#allocation2 + $0x1c14] ss:$112 sps:$4 sm:$0xff]  }
 0x20d   : > { %9452 = vmatprep.subr.bf16.mxu1 %v17995_v40  ;;  %v18074_v40 = vld [vmem:[#allocation2 + $0x1c10] ss:$112 sps:$4 sm:$0xff]  }
 0x20e   : > { %9310 = vmatpush1.bf16.msra.mxu0 %v17996_v43  ;;  %v18077_v43 = vld [vmem:[#allocation2 + $0x17b8] ss:$112 sps:$4 sm:$0xff]  }
 0x20f   : > { %9311 = vmatprep.subr.bf16.mxu0 %v18004_v45  ;;  %v18085_v45 = vld [vmem:[#allocation2 + $0x189c] ss:$112 sps:$4 sm:$0xff]  }
 0x210   : > { %9453 = vmatpush1.bf16.msra.mxu1 %v17993_v42  ;;  %v18082_v42 = vld [vmem:[#allocation2 + $0x1cf4] ss:$112 sps:$4 sm:$0xff]  }
 0x211   : > { %9454 = vmatprep.subr.bf16.mxu1 %v18001_v44  ;;  %v18080_v44 = vld [vmem:[#allocation2 + $0x1cf0] ss:$112 sps:$4 sm:$0xff]  }
 0x212   : > { %9312 = vmatpush1.bf16.msra.mxu0 %v18002_v48  ;;  %v18083_v48 = vld [vmem:[#allocation2 + $0x1898] ss:$112 sps:$4 sm:$0xff]  }
 0x213   : > { %9313 = vmatprep.subr.bf16.mxu0 %v18010_v51  ;;  %v18091_v51 = vld [vmem:[#allocation2 + $0x197c] ss:$112 sps:$4 sm:$0xff]  }
 0x214   : > { %9455 = vmatpush1.bf16.msra.mxu1 %v17999_v46  ;;  %v18088_v46 = vld [vmem:[#allocation2 + $0x1dd4] ss:$112 sps:$4 sm:$0xff]  }
 0x215   : > { %9456 = vmatprep.subr.bf16.mxu1 %v18007_v50  ;;  %v18086_v50 = vld [vmem:[#allocation2 + $0x1dd0] ss:$112 sps:$4 sm:$0xff]  }
 0x216   : > { %9314 = vmatpush1.bf16.msra.mxu0 %v18008_v54  ;;  %v18089_v54 = vld [vmem:[#allocation2 + $0x1978] ss:$112 sps:$4 sm:$0xff]  }
 0x217   : > { %9315 = vmatprep.subr.bf16.mxu0 %v18016_v56  ;;  %v18097_v56 = vld [vmem:[#allocation2 + $0x1a5c] ss:$112 sps:$4 sm:$0xff]  }
 0x218   : > { %9457 = vmatpush1.bf16.msra.mxu1 %v18005_v53  ;;  %v18094_v53 = vld [vmem:[#allocation2 + $0x1eb4] ss:$112 sps:$4 sm:$0xff]  }
 0x219   : > { %9467 = vmatprep.subr.bf16.mxu1 %v18013_v55  ;;  %v18092_v55 = vld [vmem:[#allocation2 + $0x1eb0] ss:$112 sps:$4 sm:$0xff]  }
 0x21a   : > { %9316 = vmatpush1.bf16.msra.mxu0 %v18014_v58  ;;  %v18095_v58 = vld [vmem:[#allocation2 + $0x1a58] ss:$112 sps:$4 sm:$0xff]  }
 0x21b   : > { %9459 = vmatmul.mubr.bf16.vlgmr.msra.gmra.mrb[12].mxu1 %v20390_v8  ;;  %9317 = vmatprep.subr.bf16.mxu0 %v18022_v60  ;;  %v18103_v60 = vld [vmem:[#allocation2 + $0x1b3c] ss:$112 sps:$4 sm:$0xff]  }
 0x21c   : > { %9468 = vmatpush1.bf16.msra.mxu1 %v18011_v57  ;;  %9499 = vmatprep.mubr.bf16.mxu1 %v20399_v35  ;;  %v18100_v57 = vld [vmem:[#allocation2 + $0x1f94] ss:$112 sps:$4 sm:$0xff]  }
 0x21d   : > { %9469 = vmatprep.subr.bf16.mxu1 %v18019_v59  ;;  %v18098_v59 = vld [vmem:[#allocation2 + $0x1f90] ss:$112 sps:$4 sm:$0xff]  }
 0x21e   : > { %9318 = vmatpush1.bf16.msra.mxu0 %v18020_v62  ;;  %v18101_v62 = vld [vmem:[#allocation2 + $0x1b38] ss:$112 sps:$4 sm:$0xff]  }
 0x21f   : > { %9319 = vmatprep.subr.bf16.mxu0 %v18028_v1  ;;  %v18109_v1 = vld [vmem:[#allocation2 + $0x1c1c] ss:$112 sps:$4 sm:$0xff]  }
 0x220   : > { %9470 = vmatpush1.bf16.msra.mxu1 %v18017_v61  ;;  %v18106_v61 = vld [vmem:[#allocation2 + $0x2074] ss:$112 sps:$4 sm:$0xff]  }
 0x221   : > { %9471 = vmatprep.subr.bf16.mxu1 %v18025_v63  ;;  %v18104_v63 = vld [vmem:[#allocation2 + $0x2070] ss:$112 sps:$4 sm:$0xff]  }
 0x222   : > { %9320 = vmatpush1.bf16.msra.mxu0 %v18026_v3  ;;  %v18107_v3 = vld [vmem:[#allocation2 + $0x1c18] ss:$112 sps:$4 sm:$0xff]  }
 0x223   : > { %9321 = vmatprep.subr.bf16.mxu0 %v18034_v5  ;;  %v18115_v5 = vld [vmem:[#allocation2 + $0x1cfc] ss:$112 sps:$4 sm:$0xff]  }
 0x224   : > { %9472 = vmatpush1.bf16.msra.mxu1 %v18023_v2  ;;  %v18112_v2 = vld [vmem:[#allocation2 + $0x2154] ss:$112 sps:$4 sm:$0xff]  }
 0x225   : > { %9473 = vmatprep.subr.bf16.mxu1 %v18031_v4  ;;  %v18110_v4 = vld [vmem:[#allocation2 + $0x2150] ss:$112 sps:$4 sm:$0xff]  }
 0x226   : > { %9322 = vmatpush1.bf16.msra.mxu0 %v18032_v7  ;;  %v18113_v7 = vld [vmem:[#allocation2 + $0x1cf8] ss:$112 sps:$4 sm:$0xff]  }
 0x227   : > { %9323 = vmatprep.subr.bf16.mxu0 %v18040_v10  ;;  %v18121_v10 = vld [vmem:[#allocation2 + $0x1ddc] ss:$112 sps:$4 sm:$0xff]  }
 0x228   : > { %9474 = vmatpush1.bf16.msra.mxu1 %v18029_v6  ;;  %v18118_v6 = vld [vmem:[#allocation2 + $0x2234] ss:$112 sps:$4 sm:$0xff]  }
 0x229   : > { %9475 = vmatprep.subr.bf16.mxu1 %v18037_v9  ;;  %v18116_v9 = vld [vmem:[#allocation2 + $0x2230] ss:$112 sps:$4 sm:$0xff]  }
 0x22a   : > { %9324 = vmatpush1.bf16.msra.mxu0 %v18038_v12  ;;  %v18119_v12 = vld [vmem:[#allocation2 + $0x1dd8] ss:$112 sps:$4 sm:$0xff]  }
 0x22b   : > { %9325 = vmatprep.subr.bf16.mxu0 %v18046_v14  ;;  %v18127_v14 = vld [vmem:[#allocation2 + $0x1ebc] ss:$112 sps:$4 sm:$0xff]  }
 0x22c   : > { %9476 = vmatpush1.bf16.msra.mxu1 %v18035_v11  ;;  %v18124_v11 = vld [vmem:[#allocation2 + $0x2314] ss:$112 sps:$4 sm:$0xff]  }
 0x22d   : > { %9477 = vmatprep.subr.bf16.mxu1 %v18043_v13  ;;  %v18122_v13 = vld [vmem:[#allocation2 + $0x2310] ss:$112 sps:$4 sm:$0xff]  }
 0x22e   : > { %9326 = vmatpush1.bf16.msra.mxu0 %v18044_v17  ;;  %v18125_v17 = vld [vmem:[#allocation2 + $0x1eb8] ss:$112 sps:$4 sm:$0xff]  }
 0x22f   : > { %9327 = vmatprep.subr.bf16.mxu0 %v18052_v21  ;;  %v18133_v21 = vld [vmem:[#allocation2 + $0x1f9c] ss:$112 sps:$4 sm:$0xff]  }
 0x230   : > { %9478 = vmatpush1.bf16.msra.mxu1 %v18041_v16  ;;  %v18130_v16 = vld [vmem:[#allocation2 + $0x23f4] ss:$112 sps:$4 sm:$0xff]  }
 0x231   : > { %9479 = vmatprep.subr.bf16.mxu1 %v18049_v20  ;;  %v18128_v20 = vld [vmem:[#allocation2 + $0x23f0] ss:$112 sps:$4 sm:$0xff]  }
 0x232   : > { %9328 = vmatpush1.bf16.msra.mxu0 %v18050_v24  ;;  %v18131_v24 = vld [vmem:[#allocation2 + $0x1f98] ss:$112 sps:$4 sm:$0xff]  }
 0x233   : > { %9329 = vmatprep.subr.bf16.mxu0 %v18058_v26  ;;  %v18139_v26 = vld [vmem:[#allocation2 + $0x207c] ss:$112 sps:$4 sm:$0xff]  }
 0x234   : > { %9480 = vmatpush1.bf16.msra.mxu1 %v18047_v22  ;;  %v18136_v22 = vld [vmem:[#allocation2 + $0x24d4] ss:$112 sps:$4 sm:$0xff]  }
 0x235   : > { %9481 = vmatprep.subr.bf16.mxu1 %v18055_v25  ;;  %v18134_v25 = vld [vmem:[#allocation2 + $0x24d0] ss:$112 sps:$4 sm:$0xff]  }
 0x236   : > { %9330 = vmatpush1.bf16.msra.mxu0 %v18056_v28  ;;  %v18137_v28 = vld [vmem:[#allocation2 + $0x2078] ss:$112 sps:$4 sm:$0xff]  }
 0x237   : > { %9331 = vmatprep.subr.bf16.mxu0 %v18064_v30  ;;  %v18145_v30 = vld [vmem:[#allocation2 + $0x215c] ss:$112 sps:$4 sm:$0xff]  }
 0x238   : > { %9482 = vmatpush1.bf16.msra.mxu1 %v18053_v27  ;;  %v18142_v27 = vld [vmem:[#allocation2 + $0x25b4] ss:$112 sps:$4 sm:$0xff]  }
 0x239   : > { %9483 = vmatprep.subr.bf16.mxu1 %v18061_v29  ;;  %v18140_v29 = vld [vmem:[#allocation2 + $0x25b0] ss:$112 sps:$4 sm:$0xff]  }
 0x23a   : > { %9332 = vmatpush1.bf16.msra.mxu0 %v18062_v18  ;;  %v18143_v18 = vld [vmem:[#allocation2 + $0x2158] ss:$112 sps:$4 sm:$0xff]  }
 0x23b   : > { %9333 = vmatprep.subr.bf16.mxu0 %v18070_v33  ;;  %v18151_v33 = vld [vmem:[#allocation2 + $0x223c] ss:$112 sps:$4 sm:$0xff]  }
 0x23c   : > { %9484 = vmatpush1.bf16.msra.mxu1 %v18059_v31  ;;  %v18148_v31 = vld [vmem:[#allocation2 + $0x2694] ss:$112 sps:$4 sm:$0xff]  }
 0x23d   : > { %9485 = vmatprep.subr.bf16.mxu1 %v18067_v32  ;;  %v18146_v32 = vld [vmem:[#allocation2 + $0x2690] ss:$112 sps:$4 sm:$0xff]  }
 0x23e   : > { %9334 = vmatpush1.bf16.msra.mxu0 %v18068_v36  ;;  %v18149_v36 = vld [vmem:[#allocation2 + $0x2238] ss:$112 sps:$4 sm:$0xff]  }
 0x23f   : > { %9344 = vmatprep.subr.bf16.mxu0 %v18076_v38  ;;  %v18157_v38 = vld [vmem:[#allocation2 + $0x231c] ss:$112 sps:$4 sm:$0xff]  }
 0x240   : > { %9486 = vmatpush1.bf16.msra.mxu1 %v18065_v34  ;;  %v18154_v34 = vld [vmem:[#allocation2 + $0x2774] ss:$112 sps:$4 sm:$0xff]  }
 0x241   : > { %9487 = vmatprep.subr.bf16.mxu1 %v18073_v37  ;;  %9336 = vmatmul.mubr.bf16.vlgmr.msra.gmra.mrb[4].mxu0 %v20405_v15  ;;  %v18152_v37 = vld [vmem:[#allocation2 + $0x2770] ss:$112 sps:$4 sm:$0xff]  }
 0x242   : > { %9345 = vmatpush1.bf16.msra.mxu0 %v18074_v40  ;;  %9376 = vmatprep.mubr.bf16.mxu0 %v20412_v19  ;;  %v18155_v40 = vld [vmem:[#allocation2 + $0x2318] ss:$112 sps:$4 sm:$0xff]  }
 0x243   : > { %9346 = vmatprep.subr.bf16.mxu0 %v18082_v42  ;;  %v18163_v42 = vld [vmem:[#allocation2 + $0x23fc] ss:$112 sps:$4 sm:$0xff]  }
 0x244   : > { %9488 = vmatpush1.bf16.msra.mxu1 %v18071_v39  ;;  %v18160_v39 = vld [vmem:[#allocation2 + $0x2854] ss:$112 sps:$4 sm:$0xff]  }
 0x245   : > { %9489 = vmatprep.subr.bf16.mxu1 %v18079_v41  ;;  %v18158_v41 = vld [vmem:[#allocation2 + $0x2850] ss:$112 sps:$4 sm:$0xff]  }
 0x246   : > { %9347 = vmatpush1.bf16.msra.mxu0 %v18080_v44  ;;  %v18161_v44 = vld [vmem:[#allocation2 + $0x23f8] ss:$112 sps:$4 sm:$0xff]  }
 0x247   : > { %9348 = vmatprep.subr.bf16.mxu0 %v18088_v46  ;;  %v18169_v46 = vld [vmem:[#allocation2 + $0x24dc] ss:$112 sps:$4 sm:$0xff]  }
 0x248   : > { %9490 = vmatpush1.bf16.msra.mxu1 %v18077_v43  ;;  %v18166_v43 = vld [vmem:[#allocation2 + $0x2934] ss:$112 sps:$4 sm:$0xff]  }
 0x249   : > { %9491 = vmatprep.subr.bf16.mxu1 %v18085_v45  ;;  %v18164_v45 = vld [vmem:[#allocation2 + $0x2930] ss:$112 sps:$4 sm:$0xff]  }
 0x24a   : > { %9349 = vmatpush1.bf16.msra.mxu0 %v18086_v50  ;;  %v18167_v50 = vld [vmem:[#allocation2 + $0x24d8] ss:$112 sps:$4 sm:$0xff]  }
 0x24b   : > { %9350 = vmatprep.subr.bf16.mxu0 %v18094_v53  ;;  %v18175_v53 = vld [vmem:[#allocation2 + $0x25bc] ss:$112 sps:$4 sm:$0xff]  }
 0x24c   : > { %9492 = vmatpush1.bf16.msra.mxu1 %v18083_v48  ;;  %v18172_v48 = vld [vmem:[#allocation2 + $0x24] ss:$112 sps:$4 sm:$0xff]  }
 0x24d   : > { %9493 = vmatprep.subr.bf16.mxu1 %v18091_v51  ;;  %v18170_v51 = vld [vmem:[#allocation2 + $0x20] ss:$112 sps:$4 sm:$0xff]  }
 0x24e   : > { %9351 = vmatpush1.bf16.msra.mxu0 %v18092_v55  ;;  %v18173_v55 = vld [vmem:[#allocation2 + $0x25b8] ss:$112 sps:$4 sm:$0xff]  }
 0x24f   : > { %9352 = vmatprep.subr.bf16.mxu0 %v18100_v57  ;;  %v18181_v57 = vld [vmem:[#allocation2 + $0x269c] ss:$112 sps:$4 sm:$0xff]  }
 0x250   : > { %9494 = vmatpush1.bf16.msra.mxu1 %v18089_v54  ;;  %v18178_v54 = vld [vmem:[#allocation2 + $0x104] ss:$112 sps:$4 sm:$0xff]  }
 0x251   : > { %9495 = vmatprep.subr.bf16.mxu1 %v18097_v56  ;;  %v18176_v56 = vld [vmem:[#allocation2 + $0x100] ss:$112 sps:$4 sm:$0xff]  }
 0x252   : > { %9353 = vmatpush1.bf16.msra.mxu0 %v18098_v59  ;;  %v18179_v59 = vld [vmem:[#allocation2 + $0x2698] ss:$112 sps:$4 sm:$0xff]  }
 0x253   : > { %9354 = vmatprep.subr.bf16.mxu0 %v18106_v61  ;;  %v18182_v61 = vld [vmem:[#allocation2 + $0x1e0] ss:$112 sps:$4 sm:$0xff]  }
 0x254   : > { %9496 = vmatpush1.bf16.msra.mxu1 %v18095_v58  ;;  %v18184_v58 = vld [vmem:[#allocation2 + $0x1e4] ss:$112 sps:$4 sm:$0xff]  }
 0x255   : > { %9497 = vmatprep.subr.bf16.mxu1 %v18103_v60  ;;  %v1906_v60 = vlaneseq }
 0x256   : > { %9355 = vmatpush1.bf16.msra.mxu0 %v18104_v63  ;;  %v18190_v63 = vld [vmem:[#allocation2 + $0x2c4] ss:$112 sps:$4 sm:$0xff]  }
 0x257   : > { %9356 = vmatprep.subr.bf16.mxu0 %v18112_v2  ;;  %v20445_v2 = vshrl.u32 %v1906_v60, 7 }
 0x258   : > { %9498 = vmatpush1.bf16.msra.mxu1 %v18101_v62  ;;  %v18187_v62 = vld [vmem:[#allocation2 + $0x277c] ss:$112 sps:$4 sm:$0xff]  }
 0x259   : > { %9508 = vmatprep.subr.bf16.mxu1 %v18109_v1  ;;  %v18185_v1 = vld [vmem:[#allocation2 + $0x2778] ss:$112 sps:$4 sm:$0xff]  }
 0x25a   : > { %9357 = vmatpush1.bf16.msra.mxu0 %v18110_v4  ;;  %v18193_v4 = vld [vmem:[#allocation2 + $0x285c] ss:$112 sps:$4 sm:$0xff]  }
 0x25b   : > { %9500 = vmatmul.mubr.bf16.vlgmr.msra.gmra.mrb[12].mxu1 %v20405_v15  ;;  %9358 = vmatprep.subr.bf16.mxu0 %v18118_v6  ;;  %v18191_v6 = vld [vmem:[#allocation2 + $0x2858] ss:$112 sps:$4 sm:$0xff]  }
 0x25c   : > { %9509 = vmatpush1.bf16.msra.mxu1 %v18107_v3  ;;  %9540 = vmatprep.mubr.bf16.mxu1 %v20412_v19  ;;  %v18188_v3 = vld [vmem:[#allocation2 + $0x2c0] ss:$112 sps:$4 sm:$0xff]  }
 0x25d   : > { %9510 = vmatprep.subr.bf16.mxu1 %v18115_v5  ;;  %v18196_v5 = vld [vmem:[#allocation2 + $0x3a4] ss:$112 sps:$4 sm:$0xff]  }
 0x25e   : > { %9359 = vmatpush1.bf16.msra.mxu0 %v18116_v9  ;;  %v20448_v9 = vsub.s32 0, %v20445_v2 }
 0x25f   : > { %9360 = vmatprep.subr.bf16.mxu0 %v18124_v11  ;;  %v18199_v11 = vld [vmem:[#allocation2 + $0x293c] ss:$112 sps:$4 sm:$0xff]  }
 0x260   : > { %9511 = vmatpush1.bf16.msra.mxu1 %v18113_v7  ;;  %v18194_v7 = vld [vmem:[#allocation2 + $0x3a0] ss:$112 sps:$4 sm:$0xff]  }
 0x261   : > { %9512 = vmatprep.subr.bf16.mxu1 %v18121_v10  ;;  %v1898_v10 = vld [vmem:[#allocation4] sm:$0xff] }
 0x262   : > { %9361 = vmatpush1.bf16.msra.mxu0 %v18122_v13  ;;  %v18202_v13 = vld [vmem:[#allocation2 + $0x484] ss:$112 sps:$4 sm:$0xff]  }
 0x263   : > { %9362 = vmatprep.subr.bf16.mxu0 %v18130_v16  ;;  %v18197_v16 = vld [vmem:[#allocation2 + $0x2938] ss:$112 sps:$4 sm:$0xff]  }
 0x264   : > { %9513 = vmatpush1.bf16.msra.mxu1 %v18119_v12  ;;  %v20451_v12 = vsub.s32 1, %v20445_v2 }
 0x265   : > { %9514 = vmatprep.subr.bf16.mxu1 %v18127_v14  ;;  %v1909_v14 = vrot.slane %v1898_v10, %v20448_v9 }
 0x266   : > { %9363 = vmatpush1.bf16.msra.mxu0 %v18128_v20  ;;  %v18200_v20 = vld [vmem:[#allocation2 + $0x480] ss:$112 sps:$4 sm:$0xff]  }
 0x267   : > { %9364 = vmatprep.subr.bf16.mxu0 %v18136_v22  ;;  %v18211_v22 = vld [vmem:[#allocation2 + $0x2a1c] ss:$112 sps:$4 sm:$0xff]  }
 0x268   : > { %9515 = vmatpush1.bf16.msra.mxu1 %v18125_v17  ;;  %v1913_v17 = vrot.slane %v1898_v10, %v20451_v12  ;;  %v18245_v10 = vld [vmem:[#allocation2 + $0x488] ss:$112 sps:$4 sm:$0xff]  }
 0x269   : > { %9516 = vmatprep.subr.bf16.mxu1 %v18133_v21  ;;  %v18205_v21 = vld [vmem:[#allocation2 + $0x564] ss:$112 sps:$4 sm:$0xff]  }
 0x26a   : > { %9365 = vmatpush1.bf16.msra.mxu0 %v18134_v25 }
 0x26b   : > { %9366 = vmatprep.subr.bf16.mxu0 %v18142_v27  ;;  %v18203_v27 = vld [vmem:[#allocation2 + $0x560] ss:$112 sps:$4 sm:$0xff]  }
 0x26c   : > { %9517 = vmatpush1.bf16.msra.mxu1 %v18131_v24 }
 0x26d   : > { %9518 = vmatprep.subr.bf16.mxu1 %v18139_v26 }
 0x26e   : > { %9367 = vmatpush1.bf16.msra.mxu0 %v18140_v29 }
 0x26f   : > { %9368 = vmatprep.subr.bf16.mxu0 %v18148_v31  ;;  %v18209_v31 = vld [vmem:[#allocation2 + $0x2a18] ss:$112 sps:$4 sm:$0xff]  }
 0x270   : > { %9519 = vmatpush1.bf16.msra.mxu1 %v18137_v28 }
 0x271   : > { %9520 = vmatprep.subr.bf16.mxu1 %v18145_v30  ;;  %v18208_v30 = vld [vmem:[#allocation2 + $0x644] ss:$112 sps:$4 sm:$0xff]  }
 0x272   : > { %9369 = vmatpush1.bf16.msra.mxu0 %v18146_v32 }
 0x273   : > { %9370 = vmatprep.subr.bf16.mxu0 %v18154_v34 }
 0x274   : > { %9521 = vmatpush1.bf16.msra.mxu1 %v18143_v18 }
 0x275   : > { %9522 = vmatprep.subr.bf16.mxu1 %v18151_v33  ;;  %v18217_v33 = vld [vmem:[#allocation2 + $0x2c] ss:$112 sps:$4 sm:$0xff]  }
 0x276   : > { %9371 = vmatpush1.bf16.msra.mxu0 %v18152_v37  ;;  %v18214_v37 = vld [vmem:[#allocation2 + $0x724] ss:$112 sps:$4 sm:$0xff]  }
 0x277   : > { %9372 = vmatprep.subr.bf16.mxu0 %v18160_v39  ;;  %v18215_v39 = vld [vmem:[#allocation2 + $0x28] ss:$112 sps:$4 sm:$0xff]  }
 0x278   : > { %9523 = vmatpush1.bf16.msra.mxu1 %v18149_v36  ;;  %v18206_v36 = vld [vmem:[#allocation2 + $0x640] ss:$112 sps:$4 sm:$0xff]  }
 0x279   : > { %9524 = vmatprep.subr.bf16.mxu1 %v18157_v38  ;;  %v18220_v38 = vld [vmem:[#allocation2 + $0x804] ss:$112 sps:$4 sm:$0xff]  }
 0x27a   : > { %9373 = vmatpush1.bf16.msra.mxu0 %v18158_v41  ;;  %v18226_v41 = vld [vmem:[#allocation2 + $0x8e4] ss:$112 sps:$4 sm:$0xff]  }
 0x27b   : > { %9374 = vmatprep.subr.bf16.mxu0 %v18166_v43  ;;  %v19691_v43 = vld [vmem:[%s20381_s19 + $0x18] ss:$0 sps:$4 sm:$0xff]  }
 0x27c   : > { %9525 = vmatpush1.bf16.msra.mxu1 %v18155_v40  ;;  %v18218_v40 = vld [vmem:[#allocation2 + $0x800] ss:$112 sps:$4 sm:$0xff]  }
 0x27d   : > { %9526 = vmatprep.subr.bf16.mxu1 %v18163_v42 }
 0x27e   : > { %9375 = vmatpush1.bf16.msra.mxu0 %v18164_v45  ;;  %v18221_v45 = vld [vmem:[#allocation2 + $0x108] ss:$112 sps:$4 sm:$0xff]  }
 0x27f   : > { %9590 = vmatprep.subr.bf16.mxu0 %v18172_v48  ;;  %v18224_v48 = vld [vmem:[#allocation2 + $0x8e0] ss:$112 sps:$4 sm:$0xff]  }
 0x280   : > { %9527 = vmatpush1.bf16.msra.mxu1 %v18161_v44 }
 0x281   : > { %9528 = vmatprep.subr.bf16.mxu1 %v18169_v46  ;;  %9377 = vmatmul.mubr.bf16.vlgmr.msra.gmra.mrb[4].mxu0 %v20420_v23 }
 0x282   : > { %9591 = vmatpush1.bf16.msra.mxu0 %v18170_v51  ;;  %9622 = vmatprep.mubr.bf16.mxu0 %v20386_v52 }
 0x283   : > { %9592 = vmatprep.subr.bf16.mxu0 %v18178_v54  ;;  %v18227_v54 = vld [vmem:[#allocation2 + $0x1e8] ss:$112 sps:$4 sm:$0xff]  }
 0x284   : > { %9529 = vmatpush1.bf16.msra.mxu1 %v18167_v50  ;;  %v18229_v50 = vld [vmem:[#allocation2 + $0x1ec] ss:$112 sps:$4 sm:$0xff]  }
 0x285   : > { %9530 = vmatprep.subr.bf16.mxu1 %v18175_v53  ;;  %v18232_v53 = vld [vmem:[#allocation2 + $0x9c4] ss:$112 sps:$4 sm:$0xff]  }
 0x286   : > { %9593 = vmatpush1.bf16.msra.mxu0 %v18176_v56  ;;  %v18235_v56 = vld [vmem:[#allocation2 + $0x2cc] ss:$112 sps:$4 sm:$0xff]  }
 0x287   : > { %9594 = vmatprep.subr.bf16.mxu0 %v18184_v58 }
 0x288   : > { %9531 = vmatpush1.bf16.msra.mxu1 %v18173_v55  ;;  %v18230_v55 = vld [vmem:[#allocation2 + $0x9c0] ss:$112 sps:$4 sm:$0xff]  }
 0x289   : > { %9532 = vmatprep.subr.bf16.mxu1 %v18181_v57  ;;  %v18238_v57 = vld [vmem:[#allocation2 + $0xaa4] ss:$112 sps:$4 sm:$0xff]  }
 0x28a   : > { %9595 = vmatpush1.bf16.msra.mxu0 %v18182_v61  ;;  %v18236_v61 = vld [vmem:[#allocation2 + $0xaa0] ss:$112 sps:$4 sm:$0xff]  }
 0x28b   : > { %9596 = vmatprep.subr.bf16.mxu0 %v18190_v63 }
 0x28c   : > { %9533 = vmatpush1.bf16.msra.mxu1 %v18179_v59  ;;  %v18233_v59 = vld [vmem:[#allocation2 + $0x2c8] ss:$112 sps:$4 sm:$0xff]  }
 0x28d   : > { %9534 = vmatprep.subr.bf16.mxu1 %v18187_v62  ;;  %v18241_v62 = vld [vmem:[#allocation2 + $0x3ac] ss:$112 sps:$4 sm:$0xff]  }
 0x28e   : > { %9597 = vmatpush1.bf16.msra.mxu0 %v18188_v3 }
 0x28f   : > { %9598 = vmatprep.subr.bf16.mxu0 %v18196_v5  ;;  %v18242_v5 = vld [vmem:[#allocation2 + $0xb80] ss:$112 sps:$4 sm:$0xff]  }
 0x290   : > { %9535 = vmatpush1.bf16.msra.mxu1 %v18185_v1  ;;  %v18244_v1 = vld [vmem:[#allocation2 + $0xb84] ss:$112 sps:$4 sm:$0xff]  }
 0x291   : > { %9536 = vmatprep.subr.bf16.mxu1 %v18193_v4  ;;  %v18239_v4 = vld [vmem:[#allocation2 + $0x3a8] ss:$112 sps:$4 sm:$0xff]  }
 0x292   : > { %9599 = vmatpush1.bf16.msra.mxu0 %v18194_v7  ;;  %v18250_v7 = vld [vmem:[#allocation2 + $0xc64] ss:$112 sps:$4 sm:$0xff]  }
 0x293   : > { %9600 = vmatprep.subr.bf16.mxu0 %v18202_v13  ;;  %v18253_v13 = vld [vmem:[#allocation2 + $0x56c] ss:$112 sps:$4 sm:$0xff]  }
 0x294   : > { %9537 = vmatpush1.bf16.msra.mxu1 %v18191_v6  ;;  %v9050_v24 = vpop.f32.mrb[0].mxu0  ;;  %v18247_v6 = vld [vmem:[#allocation2 + $0x48c] ss:$112 sps:$4 sm:$0xff]  }
 0x295   : > { %9538 = vmatprep.subr.bf16.mxu1 %v18199_v11  ;;  %v17226_v25 = vadd.f32 %v9050_v24, %v1909_v14  ;;  %v9052_v26 = vpop.f32.mrb[1].mxu0  ;;  %v18248_v11 = vld [vmem:[#allocation2 + $0xc60] ss:$112 sps:$4 sm:$0xff]   ;;  %v18256_v14 = vld [vmem:[#allocation2 + $0xd44] ss:$112 sps:$4 sm:$0xff]  }
 0x296   : > { %v17228_v28 = vadd.f32 %v9052_v26, %v1913_v17  ;;  %v9054_v29 = vpop.f32.mrb[2].mxu0  ;;  %9601 = vmatpush1.bf16.msra.mxu0 %v18200_v20  ;;  %v18254_v17 = vld [vmem:[#allocation2 + $0xd40] ss:$112 sps:$4 sm:$0xff]   ;;  %v18259_v20 = vld [vmem:[#allocation2 + $0x64c] ss:$112 sps:$4 sm:$0xff]  }
 0x297   : > { %v20456_v18 = vadd.f32 %v17226_v25, %v20429_v47  ;;  %v9055_v32 = vpop.f32.mrb[3].mxu0  ;;  %9602 = vmatprep.subr.bf16.mxu0 %v18205_v21  ;;  %v18212_v47 = vld [vmem:[#allocation2 + $0x720] ss:$112 sps:$4 sm:$0xff]   ;;  %v18262_v21 = vld [vmem:[#allocation2 + $0xe24] ss:$112 sps:$4 sm:$0xff]  }
 0x298   : > { %9539 = vmatpush1.bf16.msra.mxu1 %v18197_v16  ;;  %v20459_v34 = vadd.f32 %v17228_v28, %v20432_v49  ;;  %v18223_v49 = vld [vmem:[#allocation2 + $0x10c] ss:$112 sps:$4 sm:$0xff]   ;;  %v18251_v16 = vld [vmem:[#allocation2 + $0x568] ss:$112 sps:$4 sm:$0xff]   ;;  %v18260_v24 = vld [vmem:[#allocation2 + $0xe20] ss:$112 sps:$4 sm:$0xff]  }
 0x299   : > { %9549 = vmatprep.subr.bf16.mxu1 %v18211_v22  ;;  %v18257_v22 = vld [vmem:[#allocation2 + $0x648] ss:$112 sps:$4 sm:$0xff]   ;;  %v18265_v25 = vld [vmem:[#allocation2 + $0x72c] ss:$112 sps:$4 sm:$0xff]   ;;  %v18268_v26 = vld [vmem:[#allocation2 + $0xf04] ss:$112 sps:$4 sm:$0xff]  }
 0x29a   : > { %9603 = vmatpush1.bf16.msra.mxu0 %v18203_v27  ;;  %v18263_v27 = vld [vmem:[#allocation2 + $0x728] ss:$112 sps:$4 sm:$0xff]   ;;  %v18266_v28 = vld [vmem:[#allocation2 + $0xf00] ss:$112 sps:$4 sm:$0xff]   ;;  %v18271_v29 = vld [vmem:[#allocation2 + $0x80c] ss:$112 sps:$4 sm:$0xff]  }
 0x29b   : > { %9541 = vmatmul.mubr.bf16.vlgmr.msra.gmra.mrb[12].mxu1 %v20420_v23  ;;  %9604 = vmatprep.subr.bf16.mxu0 %v18208_v30  ;;  %v18274_v30 = vld [vmem:[#allocation2 + $0xfe4] ss:$112 sps:$4 sm:$0xff]   ;;  %v18272_v32 = vld [vmem:[#allocation2 + $0xfe0] ss:$112 sps:$4 sm:$0xff]  }
 0x29c   : > { %9550 = vmatpush1.bf16.msra.mxu1 %v18209_v31  ;;  %9581 = vmatprep.mubr.bf16.mxu1 %v20028_v0  ;;  %v18269_v31 = vld [vmem:[#allocation2 + $0x808] ss:$112 sps:$4 sm:$0xff]  }
 0x29d   : > { %9754 = vmatprep.subr.bf16.mxu1 %v18217_v33  ;;  %v18277_v33 = vld [vmem:[#allocation2 + $0x8ec] ss:$112 sps:$4 sm:$0xff]  }
 0x29e   : > { %9605 = vmatpush1.bf16.msra.mxu0 %v18206_v36  ;;  %v18280_v36 = vld [vmem:[#allocation2 + $0x10c4] ss:$112 sps:$4 sm:$0xff]  }
 0x29f   : > { %9606 = vmatprep.subr.bf16.mxu0 %v18214_v37  ;;  %v18275_v37 = vld [vmem:[#allocation2 + $0x8e8] ss:$112 sps:$4 sm:$0xff]  }
 0x2a2   : > { %9607 = vmatpush1.bf16.msra.mxu0 %v18212_v47  ;;  %v18278_v47 = vld [vmem:[#allocation2 + $0x10c0] ss:$112 sps:$4 sm:$0xff]  }
 0x2a3   : > { %9608 = vmatprep.subr.bf16.mxu0 %v18220_v38  ;;  %v18283_v38 = vld [vmem:[#allocation2 + $0x9cc] ss:$112 sps:$4 sm:$0xff]  }
 0x2a6   : > { %v20463_v42 = vpop.f32.mrb[4].mxu1  ;;  %9609 = vmatpush1.bf16.msra.mxu0 %v18218_v40  ;;  %v18281_v40 = vld [vmem:[#allocation2 + $0x9c8] ss:$112 sps:$4 sm:$0xff]  }
 0x2a7   : > { %16650 = vmatmul.mubr.msk.bf16.vlgmr.msra.gmra.mrb[12].mxu1 %vm8930_vm0, %v19691_v43  ;;  %v20467_v44 = vpop.f32.mrb[5].mxu1  ;;  %9610 = vmatprep.subr.bf16.mxu0 %v18226_v41  ;;  %v18289_v41 = vld [vmem:[#allocation2 + $0xaac] ss:$112 sps:$4 sm:$0xff]   ;;  %v18292_v43 = vld [vmem:[#allocation2 + $0x1284] ss:$112 sps:$4 sm:$0xff]  }
 0x2a8   : > { %9755 = vmatpush1.bf16.msra.mxu1 %v18215_v39  ;;  %v9259_v46 = vpop.f32.mrb[6].mxu1  ;;  %9786 = vmatprep.mubr.bf16.mxu1 %v20386_v52  ;;  %v18286_v39 = vld [vmem:[#allocation2 + $0x11a4] ss:$112 sps:$4 sm:$0xff]  }
 0x2a9   : > { %v9260_v51 = vpop.f32.mrb[7].mxu1  ;;  %9756 = vmatprep.subr.bf16.mxu1 %v18223_v49  ;;  %v18284_v49 = vld [vmem:[#allocation2 + $0x11a0] ss:$112 sps:$4 sm:$0xff]  }
 0x2aa   : > { %9611 = vmatpush1.bf16.msra.mxu0 %v18224_v48  ;;  %v18290_v46 = vld [vmem:[#allocation2 + $0x1280] ss:$112 sps:$4 sm:$0xff]   ;;  %v18295_v48 = vld [vmem:[#allocation2 + $0xb8c] ss:$112 sps:$4 sm:$0xff]   ;;  %v18293_v51 = vld [vmem:[#allocation2 + $0xb88] ss:$112 sps:$4 sm:$0xff]  }
 0x2ab   : > { %9612 = vmatprep.subr.bf16.mxu0 %v18232_v53  ;;  %v18296_v53 = vld [vmem:[#allocation2 + $0x1360] ss:$112 sps:$4 sm:$0xff]  }
 0x2ac   : > { %9757 = vmatpush1.bf16.msra.mxu1 %v18221_v45  ;;  %v18287_v45 = vld [vmem:[#allocation2 + $0xaa8] ss:$112 sps:$4 sm:$0xff]  }
 0x2ad   : > { %9758 = vmatprep.subr.bf16.mxu1 %v18229_v50  ;;  %v18298_v50 = vld [vmem:[#allocation2 + $0x1364] ss:$112 sps:$4 sm:$0xff]  }
 0x2ae   : > { %v20470_v58 = vpop.f32.mrb[8].mxu1  ;;  %9613 = vmatpush1.bf16.msra.mxu0 %v18230_v55  ;;  %v18304_v55 = vld [vmem:[#allocation2 + $0x1444] ss:$112 sps:$4 sm:$0xff]  }
 0x2af   : > { %v20472_v60 = vpop.f32.mrb[9].mxu1  ;;  %9614 = vmatprep.subr.bf16.mxu0 %v18238_v57  ;;  %v18302_v57 = vld [vmem:[#allocation2 + $0x1440] ss:$112 sps:$4 sm:$0xff]  }
 0x2b0   : > { %9759 = vmatpush1.bf16.msra.mxu1 %v18227_v54  ;;  %v9423_v63 = vpop.f32.mrb[10].mxu1  ;;  %v18301_v54 = vld [vmem:[#allocation2 + $0xc6c] ss:$112 sps:$4 sm:$0xff]  }
 0x2b1   : > { %9760 = vmatprep.subr.bf16.mxu1 %v18235_v56  ;;  %v9424_v3 = vpop.f32.mrb[11].mxu1  ;;  %v18299_v56 = vld [vmem:[#allocation2 + $0xc68] ss:$112 sps:$4 sm:$0xff]   ;;  %v18308_v63 = vld [vmem:[#allocation2 + $0x1520] ss:$112 sps:$4 sm:$0xff]  }
 0x2b2   : > { %9615 = vmatpush1.bf16.msra.mxu0 %v18236_v61  ;;  %v18310_v61 = vld [vmem:[#allocation2 + $0x1524] ss:$112 sps:$4 sm:$0xff]  }
 0x2b3   : > { %9616 = vmatprep.subr.bf16.mxu0 %v18244_v1  ;;  %v18313_v1 = vld [vmem:[#allocation2 + $0xe2c] ss:$112 sps:$4 sm:$0xff]   ;;  %v18316_v3 = vld [vmem:[#allocation2 + $0x1604] ss:$112 sps:$4 sm:$0xff]  }
 0x2b4   : > { %9761 = vmatpush1.bf16.msra.mxu1 %v18233_v59  ;;  %v18307_v59 = vld [vmem:[#allocation2 + $0xd4c] ss:$112 sps:$4 sm:$0xff]  }
 0x2b5   : > { %9762 = vmatprep.subr.bf16.mxu1 %v18241_v62  ;;  %v18305_v62 = vld [vmem:[#allocation2 + $0xd48] ss:$112 sps:$4 sm:$0xff]  }
 0x2b6   : > { %9617 = vmatpush1.bf16.msra.mxu0 %v18242_v5  ;;  %v18314_v5 = vld [vmem:[#allocation2 + $0x1600] ss:$112 sps:$4 sm:$0xff]  }
 0x2b7   : > { %9618 = vmatprep.subr.bf16.mxu0 %v18250_v7  ;;  %v18322_v7 = vld [vmem:[#allocation2 + $0x16e4] ss:$112 sps:$4 sm:$0xff]  }
 0x2b8   : > { %9763 = vmatpush1.bf16.msra.mxu1 %v18239_v4  ;;  %v18311_v4 = vld [vmem:[#allocation2 + $0xe28] ss:$112 sps:$4 sm:$0xff]  }
 0x2b9   : > { %9764 = vmatprep.subr.bf16.mxu1 %v18247_v6  ;;  %v18319_v6 = vld [vmem:[#allocation2 + $0xf0c] ss:$112 sps:$4 sm:$0xff]  }
 0x2ba   : > { %9619 = vmatpush1.bf16.msra.mxu0 %v18248_v11  ;;  %v18320_v11 = vld [vmem:[#allocation2 + $0x16e0] ss:$112 sps:$4 sm:$0xff]  }
 0x2bb   : > { %9620 = vmatprep.subr.bf16.mxu0 %v18256_v14  ;;  %v18328_v14 = vld [vmem:[#allocation2 + $0x17c4] ss:$112 sps:$4 sm:$0xff]  }
 0x2bc   : > { %9765 = vmatpush1.bf16.msra.mxu1 %v18245_v10  ;;  %v18317_v10 = vld [vmem:[#allocation2 + $0xf08] ss:$112 sps:$4 sm:$0xff]  }
 0x2bd   : > { %9766 = vmatprep.subr.bf16.mxu1 %v18253_v13  ;;  %v18325_v13 = vld [vmem:[#allocation2 + $0xfec] ss:$112 sps:$4 sm:$0xff]  }
 0x2be   : > { %9621 = vmatpush1.bf16.msra.mxu0 %v18254_v17  ;;  %v18326_v17 = vld [vmem:[#allocation2 + $0x17c0] ss:$112 sps:$4 sm:$0xff]  }
 0x2bf   : > { %9631 = vmatprep.subr.bf16.mxu0 %v18262_v21  ;;  %v18334_v21 = vld [vmem:[#allocation2 + $0x18a4] ss:$112 sps:$4 sm:$0xff]  }
 0x2c0   : > { %9767 = vmatpush1.bf16.msra.mxu1 %v18251_v16  ;;  %v18323_v16 = vld [vmem:[#allocation2 + $0xfe8] ss:$112 sps:$4 sm:$0xff]  }
 0x2c1   : > { %9768 = vmatprep.subr.bf16.mxu1 %v18259_v20  ;;  %9623 = vmatmul.mubr.bf16.vlgmr.msra.gmra.mrb[8].mxu0 %v20390_v8  ;;  %v18331_v20 = vld [vmem:[#allocation2 + $0x10cc] ss:$112 sps:$4 sm:$0xff]  }
 0x2c2   : > { %9632 = vmatpush1.bf16.msra.mxu0 %v18260_v24  ;;  %9663 = vmatprep.mubr.bf16.mxu0 %v20399_v35  ;;  %v18332_v24 = vld [vmem:[#allocation2 + $0x18a0] ss:$112 sps:$4 sm:$0xff]  }
 0x2c3   : > { %9633 = vmatprep.subr.bf16.mxu0 %v18268_v26  ;;  %v18340_v26 = vld [vmem:[#allocation2 + $0x1984] ss:$112 sps:$4 sm:$0xff]  }
 0x2c4   : > { %9769 = vmatpush1.bf16.msra.mxu1 %v18257_v22  ;;  %v18329_v22 = vld [vmem:[#allocation2 + $0x10c8] ss:$112 sps:$4 sm:$0xff]  }
 0x2c5   : > { %9770 = vmatprep.subr.bf16.mxu1 %v18265_v25  ;;  %v18337_v25 = vld [vmem:[#allocation2 + $0x11ac] ss:$112 sps:$4 sm:$0xff]  }
 0x2c6   : > { %9634 = vmatpush1.bf16.msra.mxu0 %v18266_v28  ;;  %v18338_v28 = vld [vmem:[#allocation2 + $0x1980] ss:$112 sps:$4 sm:$0xff]  }
 0x2c7   : > { %9635 = vmatprep.subr.bf16.mxu0 %v18274_v30  ;;  %v18346_v30 = vld [vmem:[#allocation2 + $0x1a64] ss:$112 sps:$4 sm:$0xff]  }
 0x2c8   : > { %9771 = vmatpush1.bf16.msra.mxu1 %v18263_v27  ;;  %v18335_v27 = vld [vmem:[#allocation2 + $0x11a8] ss:$112 sps:$4 sm:$0xff]  }
 0x2c9   : > { %9772 = vmatprep.subr.bf16.mxu1 %v18271_v29  ;;  %v18343_v29 = vld [vmem:[#allocation2 + $0x128c] ss:$112 sps:$4 sm:$0xff]  }
 0x2ca   : > { %9636 = vmatpush1.bf16.msra.mxu0 %v18272_v32  ;;  %v18344_v32 = vld [vmem:[#allocation2 + $0x1a60] ss:$112 sps:$4 sm:$0xff]  }
 0x2cb   : > { %9637 = vmatprep.subr.bf16.mxu0 %v18280_v36  ;;  %v18352_v36 = vld [vmem:[#allocation2 + $0x1b44] ss:$112 sps:$4 sm:$0xff]  }
 0x2cc   : > { %9773 = vmatpush1.bf16.msra.mxu1 %v18269_v31  ;;  %v18341_v31 = vld [vmem:[#allocation2 + $0x1288] ss:$112 sps:$4 sm:$0xff]  }
 0x2cd   : > { %9774 = vmatprep.subr.bf16.mxu1 %v18277_v33  ;;  %v18349_v33 = vld [vmem:[#allocation2 + $0x136c] ss:$112 sps:$4 sm:$0xff]  }
 0x2ce   : > { %9638 = vmatpush1.bf16.msra.mxu0 %v18278_v47  ;;  %v18350_v47 = vld [vmem:[#allocation2 + $0x1b40] ss:$112 sps:$4 sm:$0xff]  }
 0x2cf   : > { %9639 = vmatprep.subr.bf16.mxu0 %v18286_v39  ;;  %v18358_v39 = vld [vmem:[#allocation2 + $0x1c24] ss:$112 sps:$4 sm:$0xff]  }
 0x2d0   : > { %9775 = vmatpush1.bf16.msra.mxu1 %v18275_v37  ;;  %v18347_v37 = vld [vmem:[#allocation2 + $0x1368] ss:$112 sps:$4 sm:$0xff]  }
 0x2d1   : > { %9776 = vmatprep.subr.bf16.mxu1 %v18283_v38  ;;  %v18355_v38 = vld [vmem:[#allocation2 + $0x144c] ss:$112 sps:$4 sm:$0xff]  }
 0x2d2   : > { %9640 = vmatpush1.bf16.msra.mxu0 %v18284_v49  ;;  %v18356_v49 = vld [vmem:[#allocation2 + $0x1c20] ss:$112 sps:$4 sm:$0xff]  }
 0x2d3   : > { %9641 = vmatprep.subr.bf16.mxu0 %v18292_v43  ;;  %v18364_v43 = vld [vmem:[#allocation2 + $0x1d04] ss:$112 sps:$4 sm:$0xff]  }
 0x2d4   : > { %9777 = vmatpush1.bf16.msra.mxu1 %v18281_v40  ;;  %v18353_v40 = vld [vmem:[#allocation2 + $0x1448] ss:$112 sps:$4 sm:$0xff]  }
 0x2d5   : > { %9778 = vmatprep.subr.bf16.mxu1 %v18289_v41  ;;  %v18361_v41 = vld [vmem:[#allocation2 + $0x152c] ss:$112 sps:$4 sm:$0xff]  }
 0x2d6   : > { %9642 = vmatpush1.bf16.msra.mxu0 %v18290_v46  ;;  %v18362_v46 = vld [vmem:[#allocation2 + $0x1d00] ss:$112 sps:$4 sm:$0xff]  }
 0x2d7   : > { %9643 = vmatprep.subr.bf16.mxu0 %v18298_v50  ;;  %v18370_v50 = vld [vmem:[#allocation2 + $0x1de4] ss:$112 sps:$4 sm:$0xff]  }
 0x2d8   : > { %9779 = vmatpush1.bf16.msra.mxu1 %v18287_v45  ;;  %v18359_v45 = vld [vmem:[#allocation2 + $0x1528] ss:$112 sps:$4 sm:$0xff]  }
 0x2d9   : > { %9780 = vmatprep.subr.bf16.mxu1 %v18295_v48  ;;  %v18367_v48 = vld [vmem:[#allocation2 + $0x160c] ss:$112 sps:$4 sm:$0xff]  }
 0x2da   : > { %9644 = vmatpush1.bf16.msra.mxu0 %v18296_v53  ;;  %v18368_v53 = vld [vmem:[#allocation2 + $0x1de0] ss:$112 sps:$4 sm:$0xff]  }
 0x2db   : > { %9645 = vmatprep.subr.bf16.mxu0 %v18304_v55  ;;  %v18376_v55 = vld [vmem:[#allocation2 + $0x1ec4] ss:$112 sps:$4 sm:$0xff]  }
 0x2dc   : > { %9781 = vmatpush1.bf16.msra.mxu1 %v18293_v51  ;;  %v18365_v51 = vld [vmem:[#allocation2 + $0x1608] ss:$112 sps:$4 sm:$0xff]  }
 0x2dd   : > { %9782 = vmatprep.subr.bf16.mxu1 %v18301_v54  ;;  %v18373_v54 = vld [vmem:[#allocation2 + $0x16ec] ss:$112 sps:$4 sm:$0xff]  }
 0x2de   : > { %9646 = vmatpush1.bf16.msra.mxu0 %v18302_v57  ;;  %v18374_v57 = vld [vmem:[#allocation2 + $0x1ec0] ss:$112 sps:$4 sm:$0xff]  }
 0x2df   : > { %9647 = vmatprep.subr.bf16.mxu0 %v18310_v61  ;;  %v18382_v61 = vld [vmem:[#allocation2 + $0x1fa4] ss:$112 sps:$4 sm:$0xff]  }
 0x2e0   : > { %9783 = vmatpush1.bf16.msra.mxu1 %v18299_v56  ;;  %v18371_v56 = vld [vmem:[#allocation2 + $0x16e8] ss:$112 sps:$4 sm:$0xff]  }
 0x2e1   : > { %9784 = vmatprep.subr.bf16.mxu1 %v18307_v59  ;;  %v18379_v59 = vld [vmem:[#allocation2 + $0x17cc] ss:$112 sps:$4 sm:$0xff]  }
 0x2e2   : > { %9648 = vmatpush1.bf16.msra.mxu0 %v18308_v63  ;;  %v18380_v63 = vld [vmem:[#allocation2 + $0x1fa0] ss:$112 sps:$4 sm:$0xff]  }
 0x2e3   : > { %9649 = vmatprep.subr.bf16.mxu0 %v18316_v3  ;;  %v18388_v3 = vld [vmem:[#allocation2 + $0x2084] ss:$112 sps:$4 sm:$0xff]  }
 0x2e4   : > { %9785 = vmatpush1.bf16.msra.mxu1 %v18305_v62  ;;  %v18377_v62 = vld [vmem:[#allocation2 + $0x17c8] ss:$112 sps:$4 sm:$0xff]  }
 0x2e5   : > { %9795 = vmatprep.subr.bf16.mxu1 %v18313_v1  ;;  %v18385_v1 = vld [vmem:[#allocation2 + $0x18ac] ss:$112 sps:$4 sm:$0xff]  }
 0x2e6   : > { %9650 = vmatpush1.bf16.msra.mxu0 %v18314_v5  ;;  %v18386_v5 = vld [vmem:[#allocation2 + $0x2080] ss:$112 sps:$4 sm:$0xff]  }
 0x2e7   : > { %9787 = vmatmul.mubr.bf16.vlgmr.msra.gmra.mrb[16].mxu1 %v20390_v8  ;;  %9651 = vmatprep.subr.bf16.mxu0 %v18322_v7  ;;  %v18394_v7 = vld [vmem:[#allocation2 + $0x2164] ss:$112 sps:$4 sm:$0xff]  }
 0x2e8   : > { %9796 = vmatpush1.bf16.msra.mxu1 %v18311_v4  ;;  %9827 = vmatprep.mubr.bf16.mxu1 %v20399_v35  ;;  %v18383_v4 = vld [vmem:[#allocation2 + $0x18a8] ss:$112 sps:$4 sm:$0xff]  }
 0x2e9   : > { %9797 = vmatprep.subr.bf16.mxu1 %v18319_v6  ;;  %v18391_v6 = vld [vmem:[#allocation2 + $0x198c] ss:$112 sps:$4 sm:$0xff]  }
 0x2ea   : > { %9652 = vmatpush1.bf16.msra.mxu0 %v18320_v11  ;;  %v18392_v11 = vld [vmem:[#allocation2 + $0x2160] ss:$112 sps:$4 sm:$0xff]  }
 0x2eb   : > { %9653 = vmatprep.subr.bf16.mxu0 %v18328_v14  ;;  %v18400_v14 = vld [vmem:[#allocation2 + $0x2244] ss:$112 sps:$4 sm:$0xff]  }
 0x2ec   : > { %9798 = vmatpush1.bf16.msra.mxu1 %v18317_v10  ;;  %v18389_v10 = vld [vmem:[#allocation2 + $0x1988] ss:$112 sps:$4 sm:$0xff]  }
 0x2ed   : > { %9799 = vmatprep.subr.bf16.mxu1 %v18325_v13  ;;  %v18397_v13 = vld [vmem:[#allocation2 + $0x1a6c] ss:$112 sps:$4 sm:$0xff]  }
 0x2ee   : > { %9654 = vmatpush1.bf16.msra.mxu0 %v18326_v17  ;;  %v18398_v17 = vld [vmem:[#allocation2 + $0x2240] ss:$112 sps:$4 sm:$0xff]  }
 0x2ef   : > { %9655 = vmatprep.subr.bf16.mxu0 %v18334_v21  ;;  %v18406_v21 = vld [vmem:[#allocation2 + $0x2324] ss:$112 sps:$4 sm:$0xff]  }
 0x2f0   : > { %9800 = vmatpush1.bf16.msra.mxu1 %v18323_v16  ;;  %v18395_v16 = vld [vmem:[#allocation2 + $0x1a68] ss:$112 sps:$4 sm:$0xff]  }
 0x2f1   : > { %9801 = vmatprep.subr.bf16.mxu1 %v18331_v20  ;;  %v18403_v20 = vld [vmem:[#allocation2 + $0x1b4c] ss:$112 sps:$4 sm:$0xff]  }
 0x2f2   : > { %9656 = vmatpush1.bf16.msra.mxu0 %v18332_v24  ;;  %v18404_v24 = vld [vmem:[#allocation2 + $0x2320] ss:$112 sps:$4 sm:$0xff]  }
 0x2f3   : > { %9657 = vmatprep.subr.bf16.mxu0 %v18340_v26  ;;  %v18412_v26 = vld [vmem:[#allocation2 + $0x2404] ss:$112 sps:$4 sm:$0xff]  }
 0x2f4   : > { %9802 = vmatpush1.bf16.msra.mxu1 %v18329_v22  ;;  %v18401_v22 = vld [vmem:[#allocation2 + $0x1b48] ss:$112 sps:$4 sm:$0xff]  }
 0x2f5   : > { %9803 = vmatprep.subr.bf16.mxu1 %v18337_v25  ;;  %v18409_v25 = vld [vmem:[#allocation2 + $0x1c2c] ss:$112 sps:$4 sm:$0xff]  }
 0x2f6   : > { %9658 = vmatpush1.bf16.msra.mxu0 %v18338_v28  ;;  %v18410_v28 = vld [vmem:[#allocation2 + $0x2400] ss:$112 sps:$4 sm:$0xff]  }
 0x2f7   : > { %9659 = vmatprep.subr.bf16.mxu0 %v18346_v30  ;;  %v18418_v30 = vld [vmem:[#allocation2 + $0x24e4] ss:$112 sps:$4 sm:$0xff]  }
 0x2f8   : > { %9804 = vmatpush1.bf16.msra.mxu1 %v18335_v27  ;;  %v18407_v27 = vld [vmem:[#allocation2 + $0x1c28] ss:$112 sps:$4 sm:$0xff]  }
 0x2f9   : > { %9805 = vmatprep.subr.bf16.mxu1 %v18343_v29  ;;  %v18415_v29 = vld [vmem:[#allocation2 + $0x1d0c] ss:$112 sps:$4 sm:$0xff]  }
 0x2fa   : > { %9660 = vmatpush1.bf16.msra.mxu0 %v18344_v32  ;;  %v18416_v32 = vld [vmem:[#allocation2 + $0x24e0] ss:$112 sps:$4 sm:$0xff]  }
 0x2fb   : > { %9661 = vmatprep.subr.bf16.mxu0 %v18352_v36  ;;  %v18424_v36 = vld [vmem:[#allocation2 + $0x25c4] ss:$112 sps:$4 sm:$0xff]  }
 0x2fc   : > { %9806 = vmatpush1.bf16.msra.mxu1 %v18341_v31  ;;  %v18413_v31 = vld [vmem:[#allocation2 + $0x1d08] ss:$112 sps:$4 sm:$0xff]  }
 0x2fd   : > { %9807 = vmatprep.subr.bf16.mxu1 %v18349_v33  ;;  %v18421_v33 = vld [vmem:[#allocation2 + $0x1dec] ss:$112 sps:$4 sm:$0xff]  }
 0x2fe   : > { %9662 = vmatpush1.bf16.msra.mxu0 %v18350_v47  ;;  %v18422_v47 = vld [vmem:[#allocation2 + $0x25c0] ss:$112 sps:$4 sm:$0xff]  }
 0x2ff   : > { %9672 = vmatprep.subr.bf16.mxu0 %v18358_v39  ;;  %v18430_v39 = vld [vmem:[#allocation2 + $0x26a4] ss:$112 sps:$4 sm:$0xff]  }
 0x300   : > { %9808 = vmatpush1.bf16.msra.mxu1 %v18347_v37  ;;  %v18419_v37 = vld [vmem:[#allocation2 + $0x1de8] ss:$112 sps:$4 sm:$0xff]  }
 0x301   : > { %9809 = vmatprep.subr.bf16.mxu1 %v18355_v38  ;;  %9664 = vmatmul.mubr.bf16.vlgmr.msra.gmra.mrb[8].mxu0 %v20405_v15  ;;  %v18427_v38 = vld [vmem:[#allocation2 + $0x1ecc] ss:$112 sps:$4 sm:$0xff]  }
 0x302   : > { %9673 = vmatpush1.bf16.msra.mxu0 %v18356_v49  ;;  %9704 = vmatprep.mubr.bf16.mxu0 %v20412_v19  ;;  %v18428_v49 = vld [vmem:[#allocation2 + $0x26a0] ss:$112 sps:$4 sm:$0xff]  }
 0x303   : > { %9674 = vmatprep.subr.bf16.mxu0 %v18364_v43  ;;  %v18436_v43 = vld [vmem:[#allocation2 + $0x2784] ss:$112 sps:$4 sm:$0xff]  }
 0x304   : > { %9810 = vmatpush1.bf16.msra.mxu1 %v18353_v40  ;;  %v18425_v40 = vld [vmem:[#allocation2 + $0x1ec8] ss:$112 sps:$4 sm:$0xff]  }
 0x305   : > { %9811 = vmatprep.subr.bf16.mxu1 %v18361_v41  ;;  %v18433_v41 = vld [vmem:[#allocation2 + $0x1fac] ss:$112 sps:$4 sm:$0xff]  }
 0x306   : > { %9675 = vmatpush1.bf16.msra.mxu0 %v18362_v46  ;;  %v18434_v46 = vld [vmem:[#allocation2 + $0x2780] ss:$112 sps:$4 sm:$0xff]  }
 0x307   : > { %9676 = vmatprep.subr.bf16.mxu0 %v18370_v50  ;;  %v18442_v50 = vld [vmem:[#allocation2 + $0x2864] ss:$112 sps:$4 sm:$0xff]  }
 0x308   : > { %9812 = vmatpush1.bf16.msra.mxu1 %v18359_v45  ;;  %v18431_v45 = vld [vmem:[#allocation2 + $0x1fa8] ss:$112 sps:$4 sm:$0xff]  }
 0x309   : > { %9813 = vmatprep.subr.bf16.mxu1 %v18367_v48  ;;  %v18439_v48 = vld [vmem:[#allocation2 + $0x208c] ss:$112 sps:$4 sm:$0xff]  }
 0x30a   : > { %9677 = vmatpush1.bf16.msra.mxu0 %v18368_v53  ;;  %v18440_v53 = vld [vmem:[#allocation2 + $0x2860] ss:$112 sps:$4 sm:$0xff]  }
 0x30b   : > { %9678 = vmatprep.subr.bf16.mxu0 %v18376_v55  ;;  %v18448_v55 = vld [vmem:[#allocation2 + $0x2944] ss:$112 sps:$4 sm:$0xff]  }
 0x30c   : > { %9814 = vmatpush1.bf16.msra.mxu1 %v18365_v51  ;;  %v18437_v51 = vld [vmem:[#allocation2 + $0x2088] ss:$112 sps:$4 sm:$0xff]  }
 0x30d   : > { %9815 = vmatprep.subr.bf16.mxu1 %v18373_v54  ;;  %v18445_v54 = vld [vmem:[#allocation2 + $0x216c] ss:$112 sps:$4 sm:$0xff]  }
 0x30e   : > { %9679 = vmatpush1.bf16.msra.mxu0 %v18374_v57  ;;  %v18446_v57 = vld [vmem:[#allocation2 + $0x2940] ss:$112 sps:$4 sm:$0xff]  }
 0x30f   : > { %9680 = vmatprep.subr.bf16.mxu0 %v18382_v61  ;;  %v18454_v61 = vld [vmem:[#allocation2 + $0x2a24] ss:$112 sps:$4 sm:$0xff]  }
 0x310   : > { %9816 = vmatpush1.bf16.msra.mxu1 %v18371_v56  ;;  %v18443_v56 = vld [vmem:[#allocation2 + $0x2168] ss:$112 sps:$4 sm:$0xff]  }
 0x311   : > { %9817 = vmatprep.subr.bf16.mxu1 %v18379_v59  ;;  %v18451_v59 = vld [vmem:[#allocation2 + $0x224c] ss:$112 sps:$4 sm:$0xff]  }
 0x312   : > { %9681 = vmatpush1.bf16.msra.mxu0 %v18380_v63  ;;  %v18452_v63 = vld [vmem:[#allocation2 + $0x2a20] ss:$112 sps:$4 sm:$0xff]  }
 0x313   : > { %9682 = vmatprep.subr.bf16.mxu0 %v18388_v3  ;;  %v18466_v3 = vld [vmem:[#allocation2 + $0x34] ss:$112 sps:$4 sm:$0xff]  }
 0x314   : > { %9818 = vmatpush1.bf16.msra.mxu1 %v18377_v62  ;;  %v18449_v62 = vld [vmem:[#allocation2 + $0x2248] ss:$112 sps:$4 sm:$0xff]  }
 0x315   : > { %9819 = vmatprep.subr.bf16.mxu1 %v18385_v1  ;;  %v18457_v1 = vld [vmem:[#allocation2 + $0x232c] ss:$112 sps:$4 sm:$0xff]  }
 0x316   : > { %9683 = vmatpush1.bf16.msra.mxu0 %v18386_v5  ;;  %v18460_v5 = vld [vmem:[#allocation2 + $0x240c] ss:$112 sps:$4 sm:$0xff]  }
 0x317   : > { %9684 = vmatprep.subr.bf16.mxu0 %v18394_v7  ;;  %v18463_v7 = vld [vmem:[#allocation2 + $0x24ec] ss:$112 sps:$4 sm:$0xff]  }
 0x318   : > { %9820 = vmatpush1.bf16.msra.mxu1 %v18383_v4  ;;  %v18455_v4 = vld [vmem:[#allocation2 + $0x2328] ss:$112 sps:$4 sm:$0xff]  }
 0x319   : > { %9821 = vmatprep.subr.bf16.mxu1 %v18391_v6  ;;  %v18458_v6 = vld [vmem:[#allocation2 + $0x2408] ss:$112 sps:$4 sm:$0xff]  }
 0x31a   : > { %9685 = vmatpush1.bf16.msra.mxu0 %v18392_v11  ;;  %v18464_v11 = vld [vmem:[#allocation2 + $0x30] ss:$112 sps:$4 sm:$0xff]  }
 0x31b   : > { %9686 = vmatprep.subr.bf16.mxu0 %v18400_v14  ;;  %v18472_v14 = vld [vmem:[#allocation2 + $0x114] ss:$112 sps:$4 sm:$0xff]  }
 0x31c   : > { %9822 = vmatpush1.bf16.msra.mxu1 %v18389_v10  ;;  %v18461_v10 = vld [vmem:[#allocation2 + $0x24e8] ss:$112 sps:$4 sm:$0xff]  }
 0x31d   : > { %9823 = vmatprep.subr.bf16.mxu1 %v18397_v13  ;;  %v18469_v13 = vld [vmem:[#allocation2 + $0x25cc] ss:$112 sps:$4 sm:$0xff]  }
 0x31e   : > { %9687 = vmatpush1.bf16.msra.mxu0 %v18398_v17  ;;  %v20485_v17 = vld [vmem:[%s20381_s19 + $0x18] ss:$0 sps:$4 sm:$0xff]  }
 0x31f   : > { %9688 = vmatprep.subr.bf16.mxu0 %v18406_v21  ;;  %v20490_v21 = vsub.s32 4, %v20445_v2 }
 0x320   : > { %9824 = vmatpush1.bf16.msra.mxu1 %v18395_v16  ;;  %v18467_v16 = vld [vmem:[#allocation2 + $0x25c8] ss:$112 sps:$4 sm:$0xff]  }
 0x321   : > { %9825 = vmatprep.subr.bf16.mxu1 %v18403_v20  ;;  %v18470_v20 = vld [vmem:[#allocation2 + $0x110] ss:$112 sps:$4 sm:$0xff]  }
 0x322   : > { %9689 = vmatpush1.bf16.msra.mxu0 %v18404_v24  ;;  %v18478_v24 = vld [vmem:[#allocation2 + $0x1f4] ss:$112 sps:$4 sm:$0xff]  }
 0x323   : > { %9690 = vmatprep.subr.bf16.mxu0 %v18412_v26  ;;  %v18473_v26 = vld [vmem:[#allocation2 + $0x26a8] ss:$112 sps:$4 sm:$0xff]  }
 0x324   : > { %9826 = vmatpush1.bf16.msra.mxu1 %v18401_v22  ;;  %v18475_v22 = vld [vmem:[#allocation2 + $0x26ac] ss:$112 sps:$4 sm:$0xff]  }
 0x325   : > { %9836 = vmatprep.subr.bf16.mxu1 %v18409_v25  ;;  %v20493_v25 = vsub.s32 5, %v20445_v2 }
 0x326   : > { %9691 = vmatpush1.bf16.msra.mxu0 %v18410_v28 }
 0x327   : > { %9828 = vmatmul.mubr.bf16.vlgmr.msra.gmra.mrb[16].mxu1 %v20405_v15  ;;  %9692 = vmatprep.subr.bf16.mxu0 %v18418_v30 }
 0x328   : > { %9837 = vmatpush1.bf16.msra.mxu1 %v18407_v27  ;;  %9868 = vmatprep.mubr.bf16.mxu1 %v20412_v19  ;;  %v20496_v27 = vld [vmem:[#allocation4] sm:$0xff] }
 0x329   : > { %9838 = vmatprep.subr.bf16.mxu1 %v18415_v29  ;;  %v1925_v28 = vrot.slane %v20496_v27, %v20490_v21  ;;  %v18476_v29 = vld [vmem:[#allocation2 + $0x1f0] ss:$112 sps:$4 sm:$0xff]   ;;  %v1929_v30 = vrot.slane %v20496_v27, %v20493_v25 }
 0x32a   : > { %9693 = vmatpush1.bf16.msra.mxu0 %v18416_v32  ;;  %v18484_v32 = vld [vmem:[#allocation2 + $0x2d4] ss:$112 sps:$4 sm:$0xff]  }
 0x32b   : > { %9694 = vmatprep.subr.bf16.mxu0 %v18424_v36 }
 0x32c   : > { %9839 = vmatpush1.bf16.msra.mxu1 %v18413_v31  ;;  %v18481_v31 = vld [vmem:[#allocation2 + $0x278c] ss:$112 sps:$4 sm:$0xff]  }
 0x32d   : > { %9840 = vmatprep.subr.bf16.mxu1 %v18421_v33 }
 0x32e   : > { %9695 = vmatpush1.bf16.msra.mxu0 %v18422_v47  ;;  %v18479_v47 = vld [vmem:[#allocation2 + $0x2788] ss:$112 sps:$4 sm:$0xff]  }
 0x32f   : > { %9696 = vmatprep.subr.bf16.mxu0 %v18430_v39 }
 0x330   : > { %9841 = vmatpush1.bf16.msra.mxu1 %v18419_v37 }
 0x331   : > { %9842 = vmatprep.subr.bf16.mxu1 %v18427_v38 }
 0x332   : > { %9697 = vmatpush1.bf16.msra.mxu0 %v18428_v49  ;;  %v18487_v49 = vld [vmem:[#allocation2 + $0x286c] ss:$112 sps:$4 sm:$0xff]  }
 0x333   : > { %9698 = vmatprep.subr.bf16.mxu0 %v18436_v43 }
 0x334   : > { %9843 = vmatpush1.bf16.msra.mxu1 %v18425_v40  ;;  %v18482_v40 = vld [vmem:[#allocation2 + $0x2d0] ss:$112 sps:$4 sm:$0xff]  }
 0x335   : > { %9844 = vmatprep.subr.bf16.mxu1 %v18433_v41 }
 0x336   : > { %9699 = vmatpush1.bf16.msra.mxu0 %v18434_v46 }
 0x337   : > { %9700 = vmatprep.subr.bf16.mxu0 %v18442_v50  ;;  %v18488_v50 = vld [vmem:[#allocation2 + $0x3b0] ss:$112 sps:$4 sm:$0xff]  }
 0x338   : > { %9845 = vmatpush1.bf16.msra.mxu1 %v18431_v45  ;;  %v18490_v45 = vld [vmem:[#allocation2 + $0x3b4] ss:$112 sps:$4 sm:$0xff]  }
 0x339   : > { %9846 = vmatprep.subr.bf16.mxu1 %v18439_v48  ;;  %v18485_v48 = vld [vmem:[#allocation2 + $0x2868] ss:$112 sps:$4 sm:$0xff]  }
 0x33a   : > { %9701 = vmatpush1.bf16.msra.mxu0 %v18440_v53  ;;  %v18496_v53 = vld [vmem:[#allocation2 + $0x494] ss:$112 sps:$4 sm:$0xff]  }
 0x33b   : > { %9702 = vmatprep.subr.bf16.mxu0 %v18448_v55  ;;  %v18499_v55 = vld [vmem:[#allocation2 + $0x574] ss:$112 sps:$4 sm:$0xff]  }
 0x33c   : > { %9847 = vmatpush1.bf16.msra.mxu1 %v18437_v51  ;;  %v18493_v51 = vld [vmem:[#allocation2 + $0x294c] ss:$112 sps:$4 sm:$0xff]  }
 0x33d   : > { %9848 = vmatprep.subr.bf16.mxu1 %v18445_v54  ;;  %v18491_v54 = vld [vmem:[#allocation2 + $0x2948] ss:$112 sps:$4 sm:$0xff]  }
 0x33e   : > { %9703 = vmatpush1.bf16.msra.mxu0 %v18446_v57  ;;  %v18497_v57 = vld [vmem:[#allocation2 + $0x570] ss:$112 sps:$4 sm:$0xff]  }
 0x33f   : > { %9713 = vmatprep.subr.bf16.mxu0 %v18454_v61  ;;  %v18511_v61 = vld [vmem:[#allocation2 + $0x3c] ss:$112 sps:$4 sm:$0xff]  }
 0x340   : > { %9849 = vmatpush1.bf16.msra.mxu1 %v18443_v56  ;;  %v18505_v56 = vld [vmem:[#allocation2 + $0x2a2c] ss:$112 sps:$4 sm:$0xff]  }
 0x341   : > { %9850 = vmatprep.subr.bf16.mxu1 %v18451_v59  ;;  %9705 = vmatmul.mubr.bf16.vlgmr.msra.gmra.mrb[8].mxu0 %v20420_v23  ;;  %v18503_v59 = vld [vmem:[#allocation2 + $0x2a28] ss:$112 sps:$4 sm:$0xff]  }
 0x342   : > { %9714 = vmatpush1.bf16.msra.mxu0 %v18452_v63  ;;  %9745 = vmatprep.mubr.bf16.mxu0 %v20028_v0  ;;  %v18508_v63 = vld [vmem:[#allocation2 + $0x734] ss:$112 sps:$4 sm:$0xff]  }
 0x343   : > { %9918 = vmatprep.subr.bf16.mxu0 %v18466_v3  ;;  %v18514_v3 = vld [vmem:[#allocation2 + $0x814] ss:$112 sps:$4 sm:$0xff]  }
 0x344   : > { %9851 = vmatpush1.bf16.msra.mxu1 %v18449_v62  ;;  %v18500_v62 = vld [vmem:[#allocation2 + $0x650] ss:$112 sps:$4 sm:$0xff]  }
 0x345   : > { %9852 = vmatprep.subr.bf16.mxu1 %v18457_v1  ;;  %v18506_v1 = vld [vmem:[#allocation2 + $0x730] ss:$112 sps:$4 sm:$0xff]  }
 0x348   : > { %9853 = vmatpush1.bf16.msra.mxu1 %v18455_v4  ;;  %v18509_v4 = vld [vmem:[#allocation2 + $0x38] ss:$112 sps:$4 sm:$0xff]  }
 0x349   : > { %9854 = vmatprep.subr.bf16.mxu1 %v18460_v5  ;;  %v18512_v5 = vld [vmem:[#allocation2 + $0x810] ss:$112 sps:$4 sm:$0xff]  }
 0x34c   : > { %9855 = vmatpush1.bf16.msra.mxu1 %v18458_v6  ;;  %v18517_v6 = vld [vmem:[#allocation2 + $0x11c] ss:$112 sps:$4 sm:$0xff]  }
 0x34d   : > { %9856 = vmatprep.subr.bf16.mxu1 %v18463_v7  ;;  %16651 = vmatmul.mubr.msk.bf16.vlgmr.msra.gmra.mrb[8].mxu0 %vm8930_vm0, %v20485_v17  ;;  %v18520_v7 = vld [vmem:[#allocation2 + $0x8f4] ss:$112 sps:$4 sm:$0xff]  }
 0x34e   : > { %9919 = vmatpush1.bf16.msra.mxu0 %v18464_v11  ;;  %9950 = vmatprep.mubr.bf16.mxu0 %v20386_v52  ;;  %v18518_v11 = vld [vmem:[#allocation2 + $0x8f0] ss:$112 sps:$4 sm:$0xff]  }
 0x34f   : > { %9920 = vmatprep.subr.bf16.mxu0 %v18472_v14  ;;  %v20513_v14 = vsub.s32 7, %v20445_v2 }
 0x350   : > { %9857 = vmatpush1.bf16.msra.mxu1 %v18461_v10  ;;  %v18515_v10 = vld [vmem:[#allocation2 + $0x118] ss:$112 sps:$4 sm:$0xff]  }
 0x351   : > { %9858 = vmatprep.subr.bf16.mxu1 %v18469_v13  ;;  %v18523_v13 = vld [vmem:[#allocation2 + $0x1fc] ss:$112 sps:$4 sm:$0xff]  }
 0x352   : > { %9921 = vmatpush1.bf16.msra.mxu0 %v18470_v20  ;;  %v18521_v20 = vld [vmem:[#allocation2 + $0x1f8] ss:$112 sps:$4 sm:$0xff]  }
 0x353   : > { %9922 = vmatprep.subr.bf16.mxu0 %v18478_v24  ;;  %v18524_v24 = vld [vmem:[#allocation2 + $0x9d0] ss:$112 sps:$4 sm:$0xff]  }
 0x354   : > { %9859 = vmatpush1.bf16.msra.mxu1 %v18467_v16  ;;  %v9378_v33 = vpop.f32.mrb[4].mxu0  ;;  %v18526_v16 = vld [vmem:[#allocation2 + $0x9d4] ss:$112 sps:$4 sm:$0xff]  }
 0x355   : > { %9860 = vmatprep.subr.bf16.mxu1 %v18475_v22  ;;  %v17232_v36 = vadd.f32 %v9378_v33, %v1925_v28  ;;  %v9380_v37 = vpop.f32.mrb[5].mxu0  ;;  %v1937_v22 = vrot.slane %v20496_v27, %v20513_v14  ;;  %v18530_v33 = vld [vmem:[#allocation2 + $0xab0] ss:$112 sps:$4 sm:$0xff]   ;;  %v11230_v27 = vmax.f32 %v20456_v18, 0.0  ;;  %v18545_v18 = vld [vmem:[#allocation2 + $0x578] ss:$112 sps:$4 sm:$0xff]  }
 0x356   : > { %v17234_v38 = vadd.f32 %v9380_v37, %v1929_v30  ;;  %9923 = vmatpush1.bf16.msra.mxu0 %v18476_v29  ;;  %v9382_v39 = vpop.f32.mrb[6].mxu0  ;;  %v18527_v30 = vld [vmem:[#allocation2 + $0x2d8] ss:$112 sps:$4 sm:$0xff]  }
 0x357   : > { %v20503_v41 = vadd.f32 %v17232_v36, %v20470_v58  ;;  %v9383_v43 = vpop.f32.mrb[7].mxu0  ;;  %9924 = vmatprep.subr.bf16.mxu0 %v18484_v32  ;;  %v18494_v58 = vld [vmem:[#allocation2 + $0x490] ss:$112 sps:$4 sm:$0xff]   ;;  %v18535_v36 = vld [vmem:[#allocation2 + $0x3bc] ss:$112 sps:$4 sm:$0xff]  }
 0x358   : > { %9861 = vmatpush1.bf16.msra.mxu1 %v18473_v26  ;;  %v20506_v46 = vadd.f32 %v17234_v38, %v20472_v60  ;;  %v18502_v60 = vld [vmem:[#allocation2 + $0x654] ss:$112 sps:$4 sm:$0xff]   ;;  %v18533_v39 = vld [vmem:[#allocation2 + $0x3b8] ss:$112 sps:$4 sm:$0xff]   ;;  %v18541_v43 = vld [vmem:[#allocation2 + $0x49c] ss:$112 sps:$4 sm:$0xff]  }
 0x359   : > { %9862 = vmatprep.subr.bf16.mxu1 %v18481_v31  ;;  %v18532_v26 = vld [vmem:[#allocation2 + $0xab4] ss:$112 sps:$4 sm:$0xff]  }
 0x35a   : > { %9925 = vmatpush1.bf16.msra.mxu0 %v18482_v40 }
 0x35b   : > { %9926 = vmatprep.subr.bf16.mxu0 %v18490_v45  ;;  %v18544_v45 = vld [vmem:[#allocation2 + $0xc74] ss:$112 sps:$4 sm:$0xff]  }
 0x35c   : > { %9863 = vmatpush1.bf16.msra.mxu1 %v18479_v47  ;;  %v18538_v47 = vld [vmem:[#allocation2 + $0xb94] ss:$112 sps:$4 sm:$0xff]  }
 0x35d   : > { %9864 = vmatprep.subr.bf16.mxu1 %v18487_v49  ;;  %v18536_v49 = vld [vmem:[#allocation2 + $0xb90] ss:$112 sps:$4 sm:$0xff]  }
 0x35e   : > { %9927 = vmatpush1.bf16.msra.mxu0 %v18488_v50  ;;  %v18542_v50 = vld [vmem:[#allocation2 + $0xc70] ss:$112 sps:$4 sm:$0xff]  }
 0x35f   : > { %9928 = vmatprep.subr.bf16.mxu0 %v18496_v53  ;;  %v18550_v53 = vld [vmem:[#allocation2 + $0xd54] ss:$112 sps:$4 sm:$0xff]  }
 0x360   : > { %9865 = vmatpush1.bf16.msra.mxu1 %v18485_v48  ;;  %v18539_v48 = vld [vmem:[#allocation2 + $0x498] ss:$112 sps:$4 sm:$0xff]  }
 0x361   : > { %9866 = vmatprep.subr.bf16.mxu1 %v18493_v51  ;;  %v18547_v51 = vld [vmem:[#allocation2 + $0x57c] ss:$112 sps:$4 sm:$0xff]  }
 0x362   : > { %9929 = vmatpush1.bf16.msra.mxu0 %v18494_v58  ;;  %v18553_v58 = vld [vmem:[#allocation2 + $0x65c] ss:$112 sps:$4 sm:$0xff]  }
 0x363   : > { %9930 = vmatprep.subr.bf16.mxu0 %v18499_v55  ;;  %v18556_v55 = vld [vmem:[#allocation2 + $0xe34] ss:$112 sps:$4 sm:$0xff]  }
 0x364   : > { %9867 = vmatpush1.bf16.msra.mxu1 %v18491_v54  ;;  %v18548_v54 = vld [vmem:[#allocation2 + $0xd50] ss:$112 sps:$4 sm:$0xff]  }
 0x365   : > { %9877 = vmatprep.subr.bf16.mxu1 %v18505_v56  ;;  %v18551_v56 = vld [vmem:[#allocation2 + $0x658] ss:$112 sps:$4 sm:$0xff]  }
 0x366   : > { %9931 = vmatpush1.bf16.msra.mxu0 %v18497_v57  ;;  %v18554_v57 = vld [vmem:[#allocation2 + $0xe30] ss:$112 sps:$4 sm:$0xff]  }
 0x367   : > { %9869 = vmatmul.mubr.bf16.vlgmr.msra.gmra.mrb[16].mxu1 %v20420_v23  ;;  %9932 = vmatprep.subr.bf16.mxu0 %v18502_v60  ;;  %v18559_v60 = vld [vmem:[#allocation2 + $0x73c] ss:$112 sps:$4 sm:$0xff]  }
 0x368   : > { %9878 = vmatpush1.bf16.msra.mxu1 %v18503_v59  ;;  %9909 = vmatprep.mubr.bf16.mxu1 %v20028_v0  ;;  %v18562_v59 = vld [vmem:[#allocation2 + $0xf14] ss:$112 sps:$4 sm:$0xff]  }
 0x369   : > { %10082 = vmatprep.subr.bf16.mxu1 %v18511_v61  ;;  %v18557_v61 = vld [vmem:[#allocation2 + $0x738] ss:$112 sps:$4 sm:$0xff]  }
 0x36a   : > { %9933 = vmatpush1.bf16.msra.mxu0 %v18500_v62  ;;  %v18560_v62 = vld [vmem:[#allocation2 + $0xf10] ss:$112 sps:$4 sm:$0xff]  }
 0x36b   : > { %9934 = vmatprep.subr.bf16.mxu0 %v18508_v63  ;;  %v18565_v63 = vld [vmem:[#allocation2 + $0x81c] ss:$112 sps:$4 sm:$0xff]  }
 0x36e   : > { %9935 = vmatpush1.bf16.msra.mxu0 %v18506_v1  ;;  %v18568_v1 = vld [vmem:[#allocation2 + $0xff4] ss:$112 sps:$4 sm:$0xff]  }
 0x36f   : > { %9936 = vmatprep.subr.bf16.mxu0 %v18514_v3  ;;  %v18563_v3 = vld [vmem:[#allocation2 + $0x818] ss:$112 sps:$4 sm:$0xff]  }
 0x372   : > { %9937 = vmatpush1.bf16.msra.mxu0 %v18512_v5  ;;  %v18571_v5 = vld [vmem:[#allocation2 + $0x8fc] ss:$112 sps:$4 sm:$0xff]  }
 0x373   : > { %16652 = vmatmul.mubr.msk.bf16.vlgmr.msra.gmra.mrb[16].mxu1 %vm8930_vm0, %v20485_v17  ;;  %9938 = vmatprep.subr.bf16.mxu0 %v18520_v7  ;;  %v18529_v17 = vld [vmem:[#allocation2 + $0x2dc] ss:$112 sps:$4 sm:$0xff]   ;;  %v18569_v7 = vld [vmem:[#allocation2 + $0x8f8] ss:$112 sps:$4 sm:$0xff]  }
 0x374   : > { %10083 = vmatpush1.bf16.msra.mxu1 %v18509_v4  ;;  %10114 = vmatprep.mubr.bf16.mxu1 %v20386_v52  ;;  %v18566_v4 = vld [vmem:[#allocation2 + $0xff0] ss:$112 sps:$4 sm:$0xff]  }
 0x375   : > { %10084 = vmatprep.subr.bf16.mxu1 %v18517_v6  ;;  %v18574_v6 = vld [vmem:[#allocation2 + $0x10d4] ss:$112 sps:$4 sm:$0xff]  }
 0x376   : > { %9939 = vmatpush1.bf16.msra.mxu0 %v18518_v11  ;;  %v18577_v11 = vld [vmem:[#allocation2 + $0x9dc] ss:$112 sps:$4 sm:$0xff]  }
 0x377   : > { %9940 = vmatprep.subr.bf16.mxu0 %v18526_v16  ;;  %v18575_v16 = vld [vmem:[#allocation2 + $0x9d8] ss:$112 sps:$4 sm:$0xff]  }
 0x378   : > { %10085 = vmatpush1.bf16.msra.mxu1 %v18515_v10  ;;  %v18572_v10 = vld [vmem:[#allocation2 + $0x10d0] ss:$112 sps:$4 sm:$0xff]  }
 0x379   : > { %10086 = vmatprep.subr.bf16.mxu1 %v18523_v13  ;;  %v18580_v13 = vld [vmem:[#allocation2 + $0x11b4] ss:$112 sps:$4 sm:$0xff]  }
 0x37a   : > { %v20518_v28 = vpop.f32.mrb[12].mxu1  ;;  %9941 = vmatpush1.bf16.msra.mxu0 %v18524_v24  ;;  %v18586_v24 = vld [vmem:[#allocation2 + $0x1294] ss:$112 sps:$4 sm:$0xff]  }
 0x37b   : > { %v9585_v29 = vpop.f32.mrb[13].mxu1  ;;  %9942 = vmatprep.subr.bf16.mxu0 %v18532_v26  ;;  %v18584_v26 = vld [vmem:[#allocation2 + $0x1290] ss:$112 sps:$4 sm:$0xff]  }
 0x37c   : > { %10087 = vmatpush1.bf16.msra.mxu1 %v18521_v20  ;;  %v17237_v31 = vadd.f32 %v9585_v29, %v1937_v22  ;;  %v9587_v32 = vpop.f32.mrb[14].mxu1  ;;  %v18578_v20 = vld [vmem:[#allocation2 + $0x11b0] ss:$112 sps:$4 sm:$0xff]   ;;  %v18583_v22 = vld [vmem:[#allocation2 + $0xabc] ss:$112 sps:$4 sm:$0xff]  }
 0x37d   : > { %v9588_v37 = vpop.f32.mrb[15].mxu1  ;;  %10088 = vmatprep.subr.bf16.mxu1 %v18529_v17  ;;  %v18581_v17 = vld [vmem:[#allocation2 + $0xab8] ss:$112 sps:$4 sm:$0xff]   ;;  %v18589_v29 = vld [vmem:[#allocation2 + $0xb9c] ss:$112 sps:$4 sm:$0xff]  }
 0x37e   : > { %v11237_v38 = vmax.f32 %v17237_v31, 0.0  ;;  %9943 = vmatpush1.bf16.msra.mxu0 %v18530_v33  ;;  %v18587_v31 = vld [vmem:[#allocation2 + $0xb98] ss:$112 sps:$4 sm:$0xff]   ;;  %v18590_v32 = vld [vmem:[#allocation2 + $0x1370] ss:$112 sps:$4 sm:$0xff]  }
 0x37f   : > { %9944 = vmatprep.subr.bf16.mxu0 %v18538_v47  ;;  %v18595_v33 = vld [vmem:[#allocation2 + $0xc7c] ss:$112 sps:$4 sm:$0xff]   ;;  %v18593_v37 = vld [vmem:[#allocation2 + $0xc78] ss:$112 sps:$4 sm:$0xff]   ;;  %v18596_v47 = vld [vmem:[#allocation2 + $0x1450] ss:$112 sps:$4 sm:$0xff]  }
 0x380   : > { %v20521_v40 = vmax.f32 %v11230_v27, %v11237_v38  ;;  %10089 = vmatpush1.bf16.msra.mxu1 %v18527_v30  ;;  %v18592_v30 = vld [vmem:[#allocation2 + $0x1374] ss:$112 sps:$4 sm:$0xff]   ;;  %v18601_v27 = vld [vmem:[#allocation2 + $0xd5c] ss:$112 sps:$4 sm:$0xff]  }
 0x381   : > { %10090 = vmatprep.subr.bf16.mxu1 %v18535_v36  ;;  %v18598_v36 = vld [vmem:[#allocation2 + $0x1454] ss:$112 sps:$4 sm:$0xff]  }
 0x382   : > { %9945 = vmatpush1.bf16.msra.mxu0 %v18536_v49  ;;  %v18604_v38 = vld [vmem:[#allocation2 + $0x1534] ss:$112 sps:$4 sm:$0xff]   ;;  %v18602_v49 = vld [vmem:[#allocation2 + $0x1530] ss:$112 sps:$4 sm:$0xff]  }
 0x383   : > { %9946 = vmatprep.subr.bf16.mxu0 %v18544_v45  ;;  %v18610_v45 = vld [vmem:[#allocation2 + $0x1614] ss:$112 sps:$4 sm:$0xff]  }
 0x384   : > { %10091 = vmatpush1.bf16.msra.mxu1 %v18533_v39  ;;  %v18599_v39 = vld [vmem:[#allocation2 + $0xd58] ss:$112 sps:$4 sm:$0xff]  }
 0x385   : > { %10092 = vmatprep.subr.bf16.mxu1 %v18541_v43  ;;  %v18607_v43 = vld [vmem:[#allocation2 + $0xe3c] ss:$112 sps:$4 sm:$0xff]  }
 0x386   : > { %9947 = vmatpush1.bf16.msra.mxu0 %v18542_v50  ;;  %v18608_v50 = vld [vmem:[#allocation2 + $0x1610] ss:$112 sps:$4 sm:$0xff]  }
 0x387   : > { %9948 = vmatprep.subr.bf16.mxu0 %v18550_v53  ;;  %v18616_v53 = vld [vmem:[#allocation2 + $0x16f4] ss:$112 sps:$4 sm:$0xff]  }
 0x388   : > { %10093 = vmatpush1.bf16.msra.mxu1 %v18539_v48  ;;  %v18605_v48 = vld [vmem:[#allocation2 + $0xe38] ss:$112 sps:$4 sm:$0xff]  }
 0x389   : > { %10094 = vmatprep.subr.bf16.mxu1 %v18547_v51  ;;  %v18613_v51 = vld [vmem:[#allocation2 + $0xf1c] ss:$112 sps:$4 sm:$0xff]  }
 0x38a   : > { %9949 = vmatpush1.bf16.msra.mxu0 %v18548_v54  ;;  %v18614_v54 = vld [vmem:[#allocation2 + $0x16f0] ss:$112 sps:$4 sm:$0xff]  }
 0x38b   : > { %9959 = vmatprep.subr.bf16.mxu0 %v18556_v55  ;;  %v18622_v55 = vld [vmem:[#allocation2 + $0x17d4] ss:$112 sps:$4 sm:$0xff]  }
 0x38c   : > { %10095 = vmatpush1.bf16.msra.mxu1 %v18545_v18  ;;  %v18611_v18 = vld [vmem:[#allocation2 + $0xf18] ss:$112 sps:$4 sm:$0xff]  }
 0x38d   : > { %10096 = vmatprep.subr.bf16.mxu1 %v18553_v58  ;;  %9951 = vmatmul.mubr.bf16.vlgmr.msra.gmra.mrb[12].mxu0 %v20390_v8  ;;  %v18619_v58 = vld [vmem:[#allocation2 + $0xffc] ss:$112 sps:$4 sm:$0xff]  }
 0x38e   : > { %9960 = vmatpush1.bf16.msra.mxu0 %v18554_v57  ;;  %9991 = vmatprep.mubr.bf16.mxu0 %v20399_v35  ;;  %v18620_v57 = vld [vmem:[#allocation2 + $0x17d0] ss:$112 sps:$4 sm:$0xff]  }
 0x38f   : > { %9961 = vmatprep.subr.bf16.mxu0 %v18562_v59  ;;  %v18628_v59 = vld [vmem:[#allocation2 + $0x18b4] ss:$112 sps:$4 sm:$0xff]  }
 0x390   : > { %10097 = vmatpush1.bf16.msra.mxu1 %v18551_v56  ;;  %v18617_v56 = vld [vmem:[#allocation2 + $0xff8] ss:$112 sps:$4 sm:$0xff]  }
 0x391   : > { %10098 = vmatprep.subr.bf16.mxu1 %v18559_v60  ;;  %v18625_v60 = vld [vmem:[#allocation2 + $0x10dc] ss:$112 sps:$4 sm:$0xff]  }
 0x392   : > { %9962 = vmatpush1.bf16.msra.mxu0 %v18560_v62  ;;  %v18626_v62 = vld [vmem:[#allocation2 + $0x18b0] ss:$112 sps:$4 sm:$0xff]  }
 0x393   : > { %9963 = vmatprep.subr.bf16.mxu0 %v18568_v1  ;;  %v18634_v1 = vld [vmem:[#allocation2 + $0x1994] ss:$112 sps:$4 sm:$0xff]  }
 0x394   : > { %10099 = vmatpush1.bf16.msra.mxu1 %v18557_v61  ;;  %v18623_v61 = vld [vmem:[#allocation2 + $0x10d8] ss:$112 sps:$4 sm:$0xff]  }
 0x395   : > { %10100 = vmatprep.subr.bf16.mxu1 %v18565_v63  ;;  %v18631_v63 = vld [vmem:[#allocation2 + $0x11bc] ss:$112 sps:$4 sm:$0xff]  }
 0x396   : > { %9964 = vmatpush1.bf16.msra.mxu0 %v18566_v4  ;;  %v18632_v4 = vld [vmem:[#allocation2 + $0x1990] ss:$112 sps:$4 sm:$0xff]  }
 0x397   : > { %9965 = vmatprep.subr.bf16.mxu0 %v18574_v6  ;;  %v18640_v6 = vld [vmem:[#allocation2 + $0x1a74] ss:$112 sps:$4 sm:$0xff]  }
 0x398   : > { %10101 = vmatpush1.bf16.msra.mxu1 %v18563_v3  ;;  %v18629_v3 = vld [vmem:[#allocation2 + $0x11b8] ss:$112 sps:$4 sm:$0xff]  }
 0x399   : > { %10102 = vmatprep.subr.bf16.mxu1 %v18571_v5  ;;  %v18637_v5 = vld [vmem:[#allocation2 + $0x129c] ss:$112 sps:$4 sm:$0xff]  }
 0x39a   : > { %9966 = vmatpush1.bf16.msra.mxu0 %v18572_v10  ;;  %v18638_v10 = vld [vmem:[#allocation2 + $0x1a70] ss:$112 sps:$4 sm:$0xff]  }
 0x39b   : > { %9967 = vmatprep.subr.bf16.mxu0 %v18580_v13  ;;  %v18646_v13 = vld [vmem:[#allocation2 + $0x1b54] ss:$112 sps:$4 sm:$0xff]  }
 0x39c   : > { %10103 = vmatpush1.bf16.msra.mxu1 %v18569_v7  ;;  %v18635_v7 = vld [vmem:[#allocation2 + $0x1298] ss:$112 sps:$4 sm:$0xff]  }
 0x39d   : > { %10104 = vmatprep.subr.bf16.mxu1 %v18577_v11  ;;  %v18643_v11 = vld [vmem:[#allocation2 + $0x137c] ss:$112 sps:$4 sm:$0xff]  }
 0x39e   : > { %9968 = vmatpush1.bf16.msra.mxu0 %v18578_v20  ;;  %v18644_v20 = vld [vmem:[#allocation2 + $0x1b50] ss:$112 sps:$4 sm:$0xff]  }
 0x39f   : > { %9969 = vmatprep.subr.bf16.mxu0 %v18586_v24  ;;  %v18652_v24 = vld [vmem:[#allocation2 + $0x1c34] ss:$112 sps:$4 sm:$0xff]  }
 0x3a0   : > { %10105 = vmatpush1.bf16.msra.mxu1 %v18575_v16  ;;  %v18641_v16 = vld [vmem:[#allocation2 + $0x1378] ss:$112 sps:$4 sm:$0xff]  }
 0x3a1   : > { %10106 = vmatprep.subr.bf16.mxu1 %v18583_v22  ;;  %v18649_v22 = vld [vmem:[#allocation2 + $0x145c] ss:$112 sps:$4 sm:$0xff]  }
 0x3a2   : > { %9970 = vmatpush1.bf16.msra.mxu0 %v18584_v26  ;;  %v18650_v26 = vld [vmem:[#allocation2 + $0x1c30] ss:$112 sps:$4 sm:$0xff]  }
 0x3a3   : > { %9971 = vmatprep.subr.bf16.mxu0 %v18592_v30  ;;  %v18658_v30 = vld [vmem:[#allocation2 + $0x1d14] ss:$112 sps:$4 sm:$0xff]  }
 0x3a4   : > { %10107 = vmatpush1.bf16.msra.mxu1 %v18581_v17  ;;  %v18647_v17 = vld [vmem:[#allocation2 + $0x1458] ss:$112 sps:$4 sm:$0xff]  }
 0x3a5   : > { %10108 = vmatprep.subr.bf16.mxu1 %v18589_v29  ;;  %v18655_v29 = vld [vmem:[#allocation2 + $0x153c] ss:$112 sps:$4 sm:$0xff]  }
 0x3a6   : > { %9972 = vmatpush1.bf16.msra.mxu0 %v18590_v32  ;;  %v18656_v32 = vld [vmem:[#allocation2 + $0x1d10] ss:$112 sps:$4 sm:$0xff]  }
 0x3a7   : > { %9973 = vmatprep.subr.bf16.mxu0 %v18598_v36  ;;  %v18664_v36 = vld [vmem:[#allocation2 + $0x1df4] ss:$112 sps:$4 sm:$0xff]  }
 0x3a8   : > { %10109 = vmatpush1.bf16.msra.mxu1 %v18587_v31  ;;  %v18653_v31 = vld [vmem:[#allocation2 + $0x1538] ss:$112 sps:$4 sm:$0xff]  }
 0x3a9   : > { %10110 = vmatprep.subr.bf16.mxu1 %v18595_v33  ;;  %v18661_v33 = vld [vmem:[#allocation2 + $0x161c] ss:$112 sps:$4 sm:$0xff]  }
 0x3aa   : > { %9974 = vmatpush1.bf16.msra.mxu0 %v18596_v47  ;;  %v18662_v47 = vld [vmem:[#allocation2 + $0x1df0] ss:$112 sps:$4 sm:$0xff]  }
 0x3ab   : > { %9975 = vmatprep.subr.bf16.mxu0 %v18604_v38  ;;  %v18670_v38 = vld [vmem:[#allocation2 + $0x1ed4] ss:$112 sps:$4 sm:$0xff]  }
 0x3ac   : > { %10111 = vmatpush1.bf16.msra.mxu1 %v18593_v37  ;;  %v18659_v37 = vld [vmem:[#allocation2 + $0x1618] ss:$112 sps:$4 sm:$0xff]  }
 0x3ad   : > { %10112 = vmatprep.subr.bf16.mxu1 %v18601_v27  ;;  %v18667_v27 = vld [vmem:[#allocation2 + $0x16fc] ss:$112 sps:$4 sm:$0xff]  }
 0x3ae   : > { %9976 = vmatpush1.bf16.msra.mxu0 %v18602_v49  ;;  %v18668_v49 = vld [vmem:[#allocation2 + $0x1ed0] ss:$112 sps:$4 sm:$0xff]  }
 0x3af   : > { %9977 = vmatprep.subr.bf16.mxu0 %v18610_v45  ;;  %v18676_v45 = vld [vmem:[#allocation2 + $0x1fb4] ss:$112 sps:$4 sm:$0xff]  }
 0x3b0   : > { %10113 = vmatpush1.bf16.msra.mxu1 %v18599_v39  ;;  %v18665_v39 = vld [vmem:[#allocation2 + $0x16f8] ss:$112 sps:$4 sm:$0xff]  }
 0x3b1   : > { %10123 = vmatprep.subr.bf16.mxu1 %v18607_v43  ;;  %v18673_v43 = vld [vmem:[#allocation2 + $0x17dc] ss:$112 sps:$4 sm:$0xff]  }
 0x3b2   : > { %9978 = vmatpush1.bf16.msra.mxu0 %v18608_v50  ;;  %v18674_v50 = vld [vmem:[#allocation2 + $0x1fb0] ss:$112 sps:$4 sm:$0xff]  }
 0x3b3   : > { %10115 = vmatmul.mubr.bf16.vlgmr.msra.gmra.mrb[20].mxu1 %v20390_v8  ;;  %9979 = vmatprep.subr.bf16.mxu0 %v18616_v53  ;;  %v18682_v53 = vld [vmem:[#allocation2 + $0x2094] ss:$112 sps:$4 sm:$0xff]  }
 0x3b4   : > { %10124 = vmatpush1.bf16.msra.mxu1 %v18605_v48  ;;  %10155 = vmatprep.mubr.bf16.mxu1 %v20399_v35  ;;  %v18671_v48 = vld [vmem:[#allocation2 + $0x17d8] ss:$112 sps:$4 sm:$0xff]  }
 0x3b5   : > { %10125 = vmatprep.subr.bf16.mxu1 %v18613_v51  ;;  %v18679_v51 = vld [vmem:[#allocation2 + $0x18bc] ss:$112 sps:$4 sm:$0xff]  }
 0x3b6   : > { %9980 = vmatpush1.bf16.msra.mxu0 %v18614_v54  ;;  %v18680_v54 = vld [vmem:[#allocation2 + $0x2090] ss:$112 sps:$4 sm:$0xff]  }
 0x3b7   : > { %9981 = vmatprep.subr.bf16.mxu0 %v18622_v55  ;;  %v18688_v55 = vld [vmem:[#allocation2 + $0x2174] ss:$112 sps:$4 sm:$0xff]  }
 0x3b8   : > { %10126 = vmatpush1.bf16.msra.mxu1 %v18611_v18  ;;  %v18677_v18 = vld [vmem:[#allocation2 + $0x18b8] ss:$112 sps:$4 sm:$0xff]  }
 0x3b9   : > { %10127 = vmatprep.subr.bf16.mxu1 %v18619_v58  ;;  %v18685_v58 = vld [vmem:[#allocation2 + $0x199c] ss:$112 sps:$4 sm:$0xff]  }
 0x3ba   : > { %9982 = vmatpush1.bf16.msra.mxu0 %v18620_v57  ;;  %v18686_v57 = vld [vmem:[#allocation2 + $0x2170] ss:$112 sps:$4 sm:$0xff]  }
 0x3bb   : > { %9983 = vmatprep.subr.bf16.mxu0 %v18628_v59  ;;  %v18694_v59 = vld [vmem:[#allocation2 + $0x2254] ss:$112 sps:$4 sm:$0xff]  }
 0x3bc   : > { %10128 = vmatpush1.bf16.msra.mxu1 %v18617_v56  ;;  %v18683_v56 = vld [vmem:[#allocation2 + $0x1998] ss:$112 sps:$4 sm:$0xff]  }
 0x3bd   : > { %10129 = vmatprep.subr.bf16.mxu1 %v18625_v60  ;;  %v18691_v60 = vld [vmem:[#allocation2 + $0x1a7c] ss:$112 sps:$4 sm:$0xff]  }
 0x3be   : > { %9984 = vmatpush1.bf16.msra.mxu0 %v18626_v62  ;;  %v18692_v62 = vld [vmem:[#allocation2 + $0x2250] ss:$112 sps:$4 sm:$0xff]  }
 0x3bf   : > { %9985 = vmatprep.subr.bf16.mxu0 %v18634_v1  ;;  %v18700_v1 = vld [vmem:[#allocation2 + $0x2334] ss:$112 sps:$4 sm:$0xff]  }
 0x3c0   : > { %10130 = vmatpush1.bf16.msra.mxu1 %v18623_v61  ;;  %v18689_v61 = vld [vmem:[#allocation2 + $0x1a78] ss:$112 sps:$4 sm:$0xff]  }
 0x3c1   : > { %10131 = vmatprep.subr.bf16.mxu1 %v18631_v63  ;;  %v18697_v63 = vld [vmem:[#allocation2 + $0x1b5c] ss:$112 sps:$4 sm:$0xff]  }
 0x3c2   : > { %9986 = vmatpush1.bf16.msra.mxu0 %v18632_v4  ;;  %v18698_v4 = vld [vmem:[#allocation2 + $0x2330] ss:$112 sps:$4 sm:$0xff]  }
 0x3c3   : > { %9987 = vmatprep.subr.bf16.mxu0 %v18640_v6  ;;  %v18706_v6 = vld [vmem:[#allocation2 + $0x2414] ss:$112 sps:$4 sm:$0xff]  }
 0x3c4   : > { %10132 = vmatpush1.bf16.msra.mxu1 %v18629_v3  ;;  %v18695_v3 = vld [vmem:[#allocation2 + $0x1b58] ss:$112 sps:$4 sm:$0xff]  }
 0x3c5   : > { %10133 = vmatprep.subr.bf16.mxu1 %v18637_v5  ;;  %v18703_v5 = vld [vmem:[#allocation2 + $0x1c3c] ss:$112 sps:$4 sm:$0xff]  }
 0x3c6   : > { %9988 = vmatpush1.bf16.msra.mxu0 %v18638_v10  ;;  %v18704_v10 = vld [vmem:[#allocation2 + $0x2410] ss:$112 sps:$4 sm:$0xff]  }
 0x3c7   : > { %9989 = vmatprep.subr.bf16.mxu0 %v18646_v13  ;;  %v18712_v13 = vld [vmem:[#allocation2 + $0x24f4] ss:$112 sps:$4 sm:$0xff]  }
 0x3c8   : > { %10134 = vmatpush1.bf16.msra.mxu1 %v18635_v7  ;;  %v18701_v7 = vld [vmem:[#allocation2 + $0x1c38] ss:$112 sps:$4 sm:$0xff]  }
 0x3c9   : > { %10135 = vmatprep.subr.bf16.mxu1 %v18643_v11  ;;  %v18709_v11 = vld [vmem:[#allocation2 + $0x1d1c] ss:$112 sps:$4 sm:$0xff]  }
 0x3ca   : > { %9990 = vmatpush1.bf16.msra.mxu0 %v18644_v20  ;;  %v18710_v20 = vld [vmem:[#allocation2 + $0x24f0] ss:$112 sps:$4 sm:$0xff]  }
 0x3cb   : > { %10000 = vmatprep.subr.bf16.mxu0 %v18652_v24  ;;  %v18718_v24 = vld [vmem:[#allocation2 + $0x25d4] ss:$112 sps:$4 sm:$0xff]  }
 0x3cc   : > { %10136 = vmatpush1.bf16.msra.mxu1 %v18641_v16  ;;  %v18707_v16 = vld [vmem:[#allocation2 + $0x1d18] ss:$112 sps:$4 sm:$0xff]  }
 0x3cd   : > { %10137 = vmatprep.subr.bf16.mxu1 %v18649_v22  ;;  %9992 = vmatmul.mubr.bf16.vlgmr.msra.gmra.mrb[12].mxu0 %v20405_v15  ;;  %v18715_v22 = vld [vmem:[#allocation2 + $0x1dfc] ss:$112 sps:$4 sm:$0xff]  }
 0x3ce   : > { %10001 = vmatpush1.bf16.msra.mxu0 %v18650_v26  ;;  %10032 = vmatprep.mubr.bf16.mxu0 %v20412_v19  ;;  %v18716_v26 = vld [vmem:[#allocation2 + $0x25d0] ss:$112 sps:$4 sm:$0xff]  }
 0x3cf   : > { %10002 = vmatprep.subr.bf16.mxu0 %v18658_v30  ;;  %v18724_v30 = vld [vmem:[#allocation2 + $0x26b4] ss:$112 sps:$4 sm:$0xff]  }
 0x3d0   : > { %10138 = vmatpush1.bf16.msra.mxu1 %v18647_v17  ;;  %v18713_v17 = vld [vmem:[#allocation2 + $0x1df8] ss:$112 sps:$4 sm:$0xff]  }
 0x3d1   : > { %10139 = vmatprep.subr.bf16.mxu1 %v18655_v29  ;;  %v18721_v29 = vld [vmem:[#allocation2 + $0x1edc] ss:$112 sps:$4 sm:$0xff]  }
 0x3d2   : > { %10003 = vmatpush1.bf16.msra.mxu0 %v18656_v32  ;;  %v18722_v32 = vld [vmem:[#allocation2 + $0x26b0] ss:$112 sps:$4 sm:$0xff]  }
 0x3d3   : > { %10004 = vmatprep.subr.bf16.mxu0 %v18664_v36  ;;  %v18730_v36 = vld [vmem:[#allocation2 + $0x2794] ss:$112 sps:$4 sm:$0xff]  }
 0x3d4   : > { %10140 = vmatpush1.bf16.msra.mxu1 %v18653_v31  ;;  %v18719_v31 = vld [vmem:[#allocation2 + $0x1ed8] ss:$112 sps:$4 sm:$0xff]  }
 0x3d5   : > { %10141 = vmatprep.subr.bf16.mxu1 %v18661_v33  ;;  %v18727_v33 = vld [vmem:[#allocation2 + $0x1fbc] ss:$112 sps:$4 sm:$0xff]  }
 0x3d6   : > { %10005 = vmatpush1.bf16.msra.mxu0 %v18662_v47  ;;  %v18728_v47 = vld [vmem:[#allocation2 + $0x2790] ss:$112 sps:$4 sm:$0xff]  }
 0x3d7   : > { %10006 = vmatprep.subr.bf16.mxu0 %v18670_v38  ;;  %v18736_v38 = vld [vmem:[#allocation2 + $0x2874] ss:$112 sps:$4 sm:$0xff]  }
 0x3d8   : > { %10142 = vmatpush1.bf16.msra.mxu1 %v18659_v37  ;;  %v18725_v37 = vld [vmem:[#allocation2 + $0x1fb8] ss:$112 sps:$4 sm:$0xff]  }
 0x3d9   : > { %10143 = vmatprep.subr.bf16.mxu1 %v18667_v27  ;;  %v18733_v27 = vld [vmem:[#allocation2 + $0x209c] ss:$112 sps:$4 sm:$0xff]  }
 0x3da   : > { %10007 = vmatpush1.bf16.msra.mxu0 %v18668_v49  ;;  %v18734_v49 = vld [vmem:[#allocation2 + $0x2870] ss:$112 sps:$4 sm:$0xff]  }
 0x3db   : > { %10008 = vmatprep.subr.bf16.mxu0 %v18676_v45  ;;  %v18742_v45 = vld [vmem:[#allocation2 + $0x2954] ss:$112 sps:$4 sm:$0xff]  }
 0x3dc   : > { %10144 = vmatpush1.bf16.msra.mxu1 %v18665_v39  ;;  %v18731_v39 = vld [vmem:[#allocation2 + $0x2098] ss:$112 sps:$4 sm:$0xff]  }
 0x3dd   : > { %10145 = vmatprep.subr.bf16.mxu1 %v18673_v43  ;;  %v18739_v43 = vld [vmem:[#allocation2 + $0x217c] ss:$112 sps:$4 sm:$0xff]  }
 0x3de   : > { %10009 = vmatpush1.bf16.msra.mxu0 %v18674_v50  ;;  %v18740_v50 = vld [vmem:[#allocation2 + $0x2950] ss:$112 sps:$4 sm:$0xff]  }
 0x3df   : > { %10010 = vmatprep.subr.bf16.mxu0 %v18682_v53  ;;  %v18748_v53 = vld [vmem:[#allocation2 + $0x2a34] ss:$112 sps:$4 sm:$0xff]  }
 0x3e0   : > { %10146 = vmatpush1.bf16.msra.mxu1 %v18671_v48  ;;  %v18737_v48 = vld [vmem:[#allocation2 + $0x2178] ss:$112 sps:$4 sm:$0xff]  }
 0x3e1   : > { %10147 = vmatprep.subr.bf16.mxu1 %v18679_v51  ;;  %v18745_v51 = vld [vmem:[#allocation2 + $0x225c] ss:$112 sps:$4 sm:$0xff]  }
 0x3e2   : > { %10011 = vmatpush1.bf16.msra.mxu0 %v18680_v54  ;;  %v18746_v54 = vld [vmem:[#allocation2 + $0x2a30] ss:$112 sps:$4 sm:$0xff]  }
 0x3e3   : > { %10012 = vmatprep.subr.bf16.mxu0 %v18688_v55  ;;  %v18760_v55 = vld [vmem:[#allocation2 + $0x44] ss:$112 sps:$4 sm:$0xff]  }
 0x3e4   : > { %10148 = vmatpush1.bf16.msra.mxu1 %v18677_v18  ;;  %v18743_v18 = vld [vmem:[#allocation2 + $0x2258] ss:$112 sps:$4 sm:$0xff]  }
 0x3e5   : > { %10149 = vmatprep.subr.bf16.mxu1 %v18685_v58  ;;  %v18751_v58 = vld [vmem:[#allocation2 + $0x233c] ss:$112 sps:$4 sm:$0xff]  }
 0x3e6   : > { %10013 = vmatpush1.bf16.msra.mxu0 %v18686_v57  ;;  %v18754_v57 = vld [vmem:[#allocation2 + $0x241c] ss:$112 sps:$4 sm:$0xff]  }
 0x3e7   : > { %10014 = vmatprep.subr.bf16.mxu0 %v18694_v59  ;;  %v18757_v59 = vld [vmem:[#allocation2 + $0x24fc] ss:$112 sps:$4 sm:$0xff]  }
 0x3e8   : > { %10150 = vmatpush1.bf16.msra.mxu1 %v18683_v56  ;;  %v18749_v56 = vld [vmem:[#allocation2 + $0x2338] ss:$112 sps:$4 sm:$0xff]  }
 0x3e9   : > { %10151 = vmatprep.subr.bf16.mxu1 %v18691_v60  ;;  %v18752_v60 = vld [vmem:[#allocation2 + $0x2418] ss:$112 sps:$4 sm:$0xff]  }
 0x3ea   : > { %10015 = vmatpush1.bf16.msra.mxu0 %v18692_v62  ;;  %v18758_v62 = vld [vmem:[#allocation2 + $0x40] ss:$112 sps:$4 sm:$0xff]  }
 0x3eb   : > { %10016 = vmatprep.subr.bf16.mxu0 %v18700_v1  ;;  %v18766_v1 = vld [vmem:[#allocation2 + $0x124] ss:$112 sps:$4 sm:$0xff]  }
 0x3ec   : > { %10152 = vmatpush1.bf16.msra.mxu1 %v18689_v61  ;;  %v18755_v61 = vld [vmem:[#allocation2 + $0x24f8] ss:$112 sps:$4 sm:$0xff]  }
 0x3ed   : > { %10153 = vmatprep.subr.bf16.mxu1 %v18697_v63  ;;  %v18763_v63 = vld [vmem:[#allocation2 + $0x25dc] ss:$112 sps:$4 sm:$0xff]  }
 0x3ee   : > { %10017 = vmatpush1.bf16.msra.mxu0 %v18698_v4  ;;  %v20537_v4 = vld [vmem:[%s20381_s19 + $0x18] ss:$0 sps:$4 sm:$0xff]  }
 0x3ef   : > { %10018 = vmatprep.subr.bf16.mxu0 %v18706_v6  ;;  %v18764_v6 = vld [vmem:[#allocation2 + $0x120] ss:$112 sps:$4 sm:$0xff]  }
 0x3f0   : > { %10154 = vmatpush1.bf16.msra.mxu1 %v18695_v3  ;;  %v20534_v3 = vsub.s32 2, %v20445_v2 }
 0x3f1   : > { %10164 = vmatprep.subr.bf16.mxu1 %v18703_v5  ;;  %v18761_v5 = vld [vmem:[#allocation2 + $0x25d8] ss:$112 sps:$4 sm:$0xff]  }
 0x3f2   : > { %10019 = vmatpush1.bf16.msra.mxu0 %v18704_v10  ;;  %v18769_v10 = vld [vmem:[#allocation2 + $0x26bc] ss:$112 sps:$4 sm:$0xff]  }
 0x3f3   : > { %10156 = vmatmul.mubr.bf16.vlgmr.msra.gmra.mrb[20].mxu1 %v20405_v15  ;;  %10020 = vmatprep.subr.bf16.mxu0 %v18712_v13  ;;  %v20543_v13 = vld [vmem:[#allocation4] sm:$0xff] }
 0x3f4   : > { %10165 = vmatpush1.bf16.msra.mxu1 %v18701_v7  ;;  %10196 = vmatprep.mubr.bf16.mxu1 %v20412_v19  ;;  %v20541_v7 = vld [vmem:[#allocation4 + $0x8] sm:$0xff] }
 0x3f5   : > { %10166 = vmatprep.subr.bf16.mxu1 %v18709_v11  ;;  %v18772_v11 = vld [vmem:[#allocation2 + $0x204] ss:$112 sps:$4 sm:$0xff]  }
 0x3f6   : > { %10021 = vmatpush1.bf16.msra.mxu0 %v18710_v20  ;;  %v1941_v20 = vrot.slane %v20541_v7, %v20448_v9 }
 0x3f7   : > { %10022 = vmatprep.subr.bf16.mxu0 %v18718_v24  ;;  %v18770_v24 = vld [vmem:[#allocation2 + $0x200] ss:$112 sps:$4 sm:$0xff]  }
 0x3f8   : > { %10167 = vmatpush1.bf16.msra.mxu1 %v18707_v16  ;;  %v1917_v16 = vrot.slane %v20543_v13, %v20534_v3 }
 0x3f9   : > { %10168 = vmatprep.subr.bf16.mxu1 %v18715_v22  ;;  %v18767_v22 = vld [vmem:[#allocation2 + $0x26b8] ss:$112 sps:$4 sm:$0xff]  }
 0x3fa   : > { %10023 = vmatpush1.bf16.msra.mxu0 %v18716_v26  ;;  %v18775_v26 = vld [vmem:[#allocation2 + $0x279c] ss:$112 sps:$4 sm:$0xff]  }
 0x3fb   : > { %10024 = vmatprep.subr.bf16.mxu0 %v18724_v30  ;;  %v17230_v30 = vadd.f32 %v20463_v42, %v1917_v16  ;;  %v18806_v16 = vld [vmem:[#allocation2 + $0x820] ss:$112 sps:$4 sm:$0xff]  }
 0x3fc   : > { %10169 = vmatpush1.bf16.msra.mxu1 %v18713_v17  ;;  %v1945_v17 = vrot.slane %v20541_v7, %v20451_v12 }
 0x3fd   : > { %10170 = vmatprep.subr.bf16.mxu1 %v18721_v29  ;;  %v18778_v29 = vld [vmem:[#allocation2 + $0x2e4] ss:$112 sps:$4 sm:$0xff]  }
 0x3fe   : > { %10025 = vmatpush1.bf16.msra.mxu0 %v18722_v32 }
 0x3ff   : > { %10026 = vmatprep.subr.bf16.mxu0 %v18730_v36  ;;  %v11231_v36 = vmax.f32 %v20459_v34, 0.0  ;;  %v18779_v34 = vld [vmem:[#allocation2 + $0x2878] ss:$112 sps:$4 sm:$0xff]  }
 0x400   : > { %10171 = vmatpush1.bf16.msra.mxu1 %v18719_v31 }
 0x401   : > { %10172 = vmatprep.subr.bf16.mxu1 %v18727_v33 }
 0x402   : > { %10027 = vmatpush1.bf16.msra.mxu0 %v18728_v47 }
 0x403   : > { %10028 = vmatprep.subr.bf16.mxu0 %v18736_v38  ;;  %v18776_v38 = vld [vmem:[#allocation2 + $0x2e0] ss:$112 sps:$4 sm:$0xff]  }
 0x404   : > { %10173 = vmatpush1.bf16.msra.mxu1 %v18725_v37 }
 0x405   : > { %10174 = vmatprep.subr.bf16.mxu1 %v18733_v27  ;;  %v18773_v27 = vld [vmem:[#allocation2 + $0x2798] ss:$112 sps:$4 sm:$0xff]  }
 0x406   : > { %10029 = vmatpush1.bf16.msra.mxu0 %v18734_v49 }
 0x407   : > { %10030 = vmatprep.subr.bf16.mxu0 %v18742_v45  ;;  %v18784_v45 = vld [vmem:[#allocation2 + $0x3c4] ss:$112 sps:$4 sm:$0xff]  }
 0x408   : > { %10175 = vmatpush1.bf16.msra.mxu1 %v18731_v39 }
 0x409   : > { %10176 = vmatprep.subr.bf16.mxu1 %v18739_v43  ;;  %v18781_v43 = vld [vmem:[#allocation2 + $0x287c] ss:$112 sps:$4 sm:$0xff]  }
 0x40a   : > { %10031 = vmatpush1.bf16.msra.mxu0 %v18740_v50 }
 0x40b   : > { %10041 = vmatprep.subr.bf16.mxu0 %v18748_v53  ;;  %v18782_v53 = vld [vmem:[#allocation2 + $0x3c0] ss:$112 sps:$4 sm:$0xff]  }
 0x40c   : > { %10177 = vmatpush1.bf16.msra.mxu1 %v18737_v48  ;;  %v11232_v48 = vmax.f32 %v17230_v30, 0.0  ;;  %v18820_v30 = vld [vmem:[#allocation2 + $0x9e4] ss:$112 sps:$4 sm:$0xff]  }
 0x40d   : > { %10178 = vmatprep.subr.bf16.mxu1 %v18745_v51  ;;  %10033 = vmatmul.mubr.bf16.vlgmr.msra.gmra.mrb[12].mxu0 %v20420_v23 }
 0x40e   : > { %10042 = vmatpush1.bf16.msra.mxu0 %v18746_v54  ;;  %10073 = vmatprep.mubr.bf16.mxu0 %v20028_v0  ;;  %v18790_v54 = vld [vmem:[#allocation2 + $0x4a4] ss:$112 sps:$4 sm:$0xff]  }
 0x40f   : > { %10246 = vmatprep.subr.bf16.mxu0 %v18760_v55  ;;  %v18788_v55 = vld [vmem:[#allocation2 + $0x4a0] ss:$112 sps:$4 sm:$0xff]  }
 0x410   : > { %10179 = vmatpush1.bf16.msra.mxu1 %v18743_v18  ;;  %v18787_v18 = vld [vmem:[#allocation2 + $0x295c] ss:$112 sps:$4 sm:$0xff]  }
 0x411   : > { %10180 = vmatprep.subr.bf16.mxu1 %v18751_v58  ;;  %v18785_v58 = vld [vmem:[#allocation2 + $0x2958] ss:$112 sps:$4 sm:$0xff]  }
 0x414   : > { %10181 = vmatpush1.bf16.msra.mxu1 %v18749_v56  ;;  %v18793_v56 = vld [vmem:[#allocation2 + $0x584] ss:$112 sps:$4 sm:$0xff]  }
 0x415   : > { %10182 = vmatprep.subr.bf16.mxu1 %v18754_v57  ;;  %v18799_v57 = vld [vmem:[#allocation2 + $0x2a3c] ss:$112 sps:$4 sm:$0xff]  }
 0x418   : > { %10183 = vmatpush1.bf16.msra.mxu1 %v18752_v60  ;;  %v18791_v60 = vld [vmem:[#allocation2 + $0x580] ss:$112 sps:$4 sm:$0xff]  }
 0x419   : > { %10184 = vmatprep.subr.bf16.mxu1 %v18757_v59  ;;  %16653 = vmatmul.mubr.msk.bf16.vlgmr.msra.gmra.mrb[12].mxu0 %vm8930_vm0, %v20537_v4  ;;  %v18797_v59 = vld [vmem:[#allocation2 + $0x2a38] ss:$112 sps:$4 sm:$0xff]  }
 0x41a   : > { %10247 = vmatpush1.bf16.msra.mxu0 %v18758_v62  ;;  %10278 = vmatprep.mubr.bf16.mxu0 %v20386_v52  ;;  %v18805_v62 = vld [vmem:[#allocation2 + $0x4c] ss:$112 sps:$4 sm:$0xff]  }
 0x41b   : > { %10248 = vmatprep.subr.bf16.mxu0 %v18766_v1  ;;  %v18802_v1 = vld [vmem:[#allocation2 + $0x744] ss:$112 sps:$4 sm:$0xff]  }
 0x41c   : > { %10185 = vmatpush1.bf16.msra.mxu1 %v18755_v61  ;;  %v18796_v61 = vld [vmem:[#allocation2 + $0x664] ss:$112 sps:$4 sm:$0xff]  }
 0x41d   : > { %10186 = vmatprep.subr.bf16.mxu1 %v18763_v63  ;;  %v18794_v63 = vld [vmem:[#allocation2 + $0x660] ss:$112 sps:$4 sm:$0xff]  }
 0x41e   : > { %10249 = vmatpush1.bf16.msra.mxu0 %v18764_v6  ;;  %v18808_v6 = vld [vmem:[#allocation2 + $0x824] ss:$112 sps:$4 sm:$0xff]  }
 0x41f   : > { %10250 = vmatprep.subr.bf16.mxu0 %v18772_v11  ;;  %v18803_v11 = vld [vmem:[#allocation2 + $0x48] ss:$112 sps:$4 sm:$0xff]  }
 0x420   : > { %10187 = vmatpush1.bf16.msra.mxu1 %v18761_v5  ;;  %v9747_v31 = vpop.f32.mrb[8].mxu0  ;;  %v18800_v5 = vld [vmem:[#allocation2 + $0x740] ss:$112 sps:$4 sm:$0xff]  }
 0x421   : > { %10188 = vmatprep.subr.bf16.mxu1 %v18769_v10  ;;  %v17238_v32 = vadd.f32 %v9747_v31, %v1941_v20  ;;  %v9749_v33 = vpop.f32.mrb[9].mxu0  ;;  %v20561_v10 = vsub.s32 3, %v20445_v2  ;;  %v18811_v20 = vld [vmem:[#allocation2 + $0x12c] ss:$112 sps:$4 sm:$0xff]   ;;  %v1949_v31 = vrot.slane %v20541_v7, %v20534_v3 }
 0x422   : > { %10251 = vmatpush1.bf16.msra.mxu0 %v18770_v24  ;;  %v17239_v37 = vadd.f32 %v9749_v33, %v1945_v17  ;;  %v9751_v47 = vpop.f32.mrb[10].mxu0  ;;  %v18809_v17 = vld [vmem:[#allocation2 + $0x128] ss:$112 sps:$4 sm:$0xff]  }
 0x423   : > { %v11238_v39 = vmax.f32 %v17238_v32, 0.0  ;;  %v9752_v49 = vpop.f32.mrb[11].mxu0  ;;  %10252 = vmatprep.subr.bf16.mxu0 %v18778_v29  ;;  %v1921_v24 = vrot.slane %v20543_v13, %v20561_v10  ;;  %v18817_v29 = vld [vmem:[#allocation2 + $0x20c] ss:$112 sps:$4 sm:$0xff]   ;;  %v18815_v33 = vld [vmem:[#allocation2 + $0x208] ss:$112 sps:$4 sm:$0xff]  }
 0x424   : > { %10189 = vmatpush1.bf16.msra.mxu1 %v18767_v22  ;;  %v11239_v50 = vmax.f32 %v17239_v37, 0.0  ;;  %v18814_v22 = vld [vmem:[#allocation2 + $0x904] ss:$112 sps:$4 sm:$0xff]   ;;  %v18818_v37 = vld [vmem:[#allocation2 + $0x9e0] ss:$112 sps:$4 sm:$0xff]  }
 0x425   : > { %10190 = vmatprep.subr.bf16.mxu1 %v18775_v26  ;;  %v20554_v42 = vmax.f32 %v11231_v36, %v11238_v39  ;;  %v18812_v26 = vld [vmem:[#allocation2 + $0x900] ss:$112 sps:$4 sm:$0xff]   ;;  %v17231_v32 = vadd.f32 %v20467_v44, %v1921_v24  ;;  %v1953_v36 = vrot.slane %v20541_v7, %v20561_v10  ;;  %v18823_v47 = vld [vmem:[#allocation2 + $0x2ec] ss:$112 sps:$4 sm:$0xff]   ;;  %v18821_v44 = vld [vmem:[#allocation2 + $0x2e8] ss:$112 sps:$4 sm:$0xff]  }
 0x426   : > { %v20556_v51 = vmax.f32 %v11232_v48, %v11239_v50  ;;  %10253 = vmatpush1.bf16.msra.mxu0 %v18776_v38  ;;  %v18824_v50 = vld [vmem:[#allocation2 + $0xac0] ss:$112 sps:$4 sm:$0xff]  }
 0x427   : > { %10254 = vmatprep.subr.bf16.mxu0 %v18784_v45  ;;  %v18848_v24 = vld [vmem:[#allocation2 + $0xe40] ss:$112 sps:$4 sm:$0xff]  }
 0x428   : > { %10191 = vmatpush1.bf16.msra.mxu1 %v18773_v27  ;;  %v18826_v27 = vld [vmem:[#allocation2 + $0xac4] ss:$112 sps:$4 sm:$0xff]  }
 0x429   : > { %10192 = vmatprep.subr.bf16.mxu1 %v18781_v43  ;;  %v11233_v43 = vmax.f32 %v17231_v32, 0.0  ;;  %v18862_v32 = vld [vmem:[#allocation2 + $0x1004] ss:$112 sps:$4 sm:$0xff]  }
 0x42a   : > { %10255 = vmatpush1.bf16.msra.mxu0 %v18782_v53 }
 0x42b   : > { %10256 = vmatprep.subr.bf16.mxu0 %v18790_v54  ;;  %v18832_v54 = vld [vmem:[#allocation2 + $0xba4] ss:$112 sps:$4 sm:$0xff]  }
 0x42c   : > { %10193 = vmatpush1.bf16.msra.mxu1 %v18779_v34 }
 0x42d   : > { %10194 = vmatprep.subr.bf16.mxu1 %v18787_v18  ;;  %v18829_v18 = vld [vmem:[#allocation2 + $0x3cc] ss:$112 sps:$4 sm:$0xff]  }
 0x42e   : > { %10257 = vmatpush1.bf16.msra.mxu0 %v18788_v55 }
 0x42f   : > { %10258 = vmatprep.subr.bf16.mxu0 %v18793_v56 }
 0x430   : > { %10195 = vmatpush1.bf16.msra.mxu1 %v18785_v58  ;;  %v11234_v58 = vmax.f32 %v20503_v41, 0.0  ;;  %v18841_v41 = vld [vmem:[#allocation2 + $0x58c] ss:$112 sps:$4 sm:$0xff]  }
 0x431   : > { %10205 = vmatprep.subr.bf16.mxu1 %v18799_v57 }
 0x432   : > { %10259 = vmatpush1.bf16.msra.mxu0 %v18791_v60  ;;  %v18827_v60 = vld [vmem:[#allocation2 + $0x3c8] ss:$112 sps:$4 sm:$0xff]  }
 0x433   : > { %10197 = vmatmul.mubr.bf16.vlgmr.msra.gmra.mrb[20].mxu1 %v20420_v23  ;;  %10260 = vmatprep.subr.bf16.mxu0 %v18796_v61  ;;  %v18835_v61 = vld [vmem:[#allocation2 + $0x4ac] ss:$112 sps:$4 sm:$0xff]  }
 0x434   : > { %10206 = vmatpush1.bf16.msra.mxu1 %v18797_v59  ;;  %10237 = vmatprep.mubr.bf16.mxu1 %v20028_v0  ;;  %v18830_v59 = vld [vmem:[#allocation2 + $0xba0] ss:$112 sps:$4 sm:$0xff]  }
 0x435   : > { %10410 = vmatprep.subr.bf16.mxu1 %v18805_v62  ;;  %v18838_v62 = vld [vmem:[#allocation2 + $0xc84] ss:$112 sps:$4 sm:$0xff]  }
 0x436   : > { %10261 = vmatpush1.bf16.msra.mxu0 %v18794_v63  ;;  %v18833_v63 = vld [vmem:[#allocation2 + $0x4a8] ss:$112 sps:$4 sm:$0xff]  }
 0x437   : > { %10262 = vmatprep.subr.bf16.mxu0 %v18802_v1  ;;  %v18836_v1 = vld [vmem:[#allocation2 + $0xc80] ss:$112 sps:$4 sm:$0xff]  }
 0x43a   : > { %10263 = vmatpush1.bf16.msra.mxu0 %v18800_v5  ;;  %v18844_v5 = vld [vmem:[#allocation2 + $0xd64] ss:$112 sps:$4 sm:$0xff]  }
 0x43b   : > { %10264 = vmatprep.subr.bf16.mxu0 %v18808_v6  ;;  %v18839_v6 = vld [vmem:[#allocation2 + $0x588] ss:$112 sps:$4 sm:$0xff]  }
 0x43e   : > { %10265 = vmatpush1.bf16.msra.mxu0 %v18806_v16  ;;  %v18847_v16 = vld [vmem:[#allocation2 + $0x66c] ss:$112 sps:$4 sm:$0xff]  }
 0x43f   : > { %16654 = vmatmul.mubr.msk.bf16.vlgmr.msra.gmra.mrb[20].mxu1 %vm8930_vm0, %v20537_v4  ;;  %10266 = vmatprep.subr.bf16.mxu0 %v18814_v22  ;;  %v18845_v22 = vld [vmem:[#allocation2 + $0x668] ss:$112 sps:$4 sm:$0xff]  }
 0x440   : > { %10411 = vmatpush1.bf16.msra.mxu1 %v18803_v11  ;;  %10442 = vmatprep.mubr.bf16.mxu1 %v20386_v52  ;;  %v18842_v11 = vld [vmem:[#allocation2 + $0xd60] ss:$112 sps:$4 sm:$0xff]  }
 0x441   : > { %10412 = vmatprep.subr.bf16.mxu1 %v18811_v20  ;;  %v18850_v20 = vld [vmem:[#allocation2 + $0xe44] ss:$112 sps:$4 sm:$0xff]  }
 0x442   : > { %10267 = vmatpush1.bf16.msra.mxu0 %v18812_v26  ;;  %v18856_v26 = vld [vmem:[#allocation2 + $0xf24] ss:$112 sps:$4 sm:$0xff]  }
 0x443   : > { %10268 = vmatprep.subr.bf16.mxu0 %v18820_v30  ;;  %v18854_v30 = vld [vmem:[#allocation2 + $0xf20] ss:$112 sps:$4 sm:$0xff]  }
 0x444   : > { %10413 = vmatpush1.bf16.msra.mxu1 %v18809_v17  ;;  %v18853_v17 = vld [vmem:[#allocation2 + $0x74c] ss:$112 sps:$4 sm:$0xff]  }
 0x445   : > { %10414 = vmatprep.subr.bf16.mxu1 %v18817_v29  ;;  %v18851_v29 = vld [vmem:[#allocation2 + $0x748] ss:$112 sps:$4 sm:$0xff]  }
 0x446   : > { %v9911_v38 = vpop.f32.mrb[16].mxu1  ;;  %10269 = vmatpush1.bf16.msra.mxu0 %v18818_v37  ;;  %v18865_v37 = vld [vmem:[#allocation2 + $0x90c] ss:$112 sps:$4 sm:$0xff]  }
 0x447   : > { %v17240_v39 = vadd.f32 %v9911_v38, %v1949_v31  ;;  %v9913_v49 = vpop.f32.mrb[17].mxu1  ;;  %10270 = vmatprep.subr.bf16.mxu0 %v18826_v27  ;;  %v18859_v31 = vld [vmem:[#allocation2 + $0x82c] ss:$112 sps:$4 sm:$0xff]   ;;  %v18863_v27 = vld [vmem:[#allocation2 + $0x908] ss:$112 sps:$4 sm:$0xff]  }
 0x448   : > { %10415 = vmatpush1.bf16.msra.mxu1 %v18815_v33  ;;  %v17241_v45 = vadd.f32 %v9913_v49, %v1953_v36  ;;  %v9915_v48 = vpop.f32.mrb[18].mxu1  ;;  %v18857_v33 = vld [vmem:[#allocation2 + $0x828] ss:$112 sps:$4 sm:$0xff]   ;;  %v18860_v36 = vld [vmem:[#allocation2 + $0x1000] ss:$112 sps:$4 sm:$0xff]  }
 0x449   : > { %v11240_v34 = vmax.f32 %v17240_v39, 0.0  ;;  %v9916_v53 = vpop.f32.mrb[19].mxu1  ;;  %10416 = vmatprep.subr.bf16.mxu1 %v18823_v47  ;;  %v18868_v47 = vld [vmem:[#allocation2 + $0x10e4] ss:$112 sps:$4 sm:$0xff]   ;;  %v18866_v38 = vld [vmem:[#allocation2 + $0x10e0] ss:$112 sps:$4 sm:$0xff]  }
 0x44a   : > { %v11241_v55 = vmax.f32 %v17241_v45, 0.0  ;;  %10271 = vmatpush1.bf16.msra.mxu0 %v18824_v50  ;;  %v18871_v39 = vld [vmem:[#allocation2 + $0x9ec] ss:$112 sps:$4 sm:$0xff]   ;;  %v18874_v49 = vld [vmem:[#allocation2 + $0x11c4] ss:$112 sps:$4 sm:$0xff]  }
 0x44b   : > { %v20574_v56 = vmax.f32 %v11233_v43, %v11240_v34  ;;  %10272 = vmatprep.subr.bf16.mxu0 %v18832_v54  ;;  %v18869_v43 = vld [vmem:[#allocation2 + $0x9e8] ss:$112 sps:$4 sm:$0xff]   ;;  %v18872_v45 = vld [vmem:[#allocation2 + $0x11c0] ss:$112 sps:$4 sm:$0xff]   ;;  %v18877_v48 = vld [vmem:[#allocation2 + $0xacc] ss:$112 sps:$4 sm:$0xff]  }
 0x44c   : > { %v20576_v57 = vmax.f32 %v11234_v58, %v11241_v55  ;;  %10417 = vmatpush1.bf16.msra.mxu1 %v18821_v44  ;;  %v18880_v44 = vld [vmem:[#allocation2 + $0x12a4] ss:$112 sps:$4 sm:$0xff]   ;;  %v18875_v50 = vld [vmem:[#allocation2 + $0xac8] ss:$112 sps:$4 sm:$0xff]   ;;  %v18878_v34 = vld [vmem:[#allocation2 + $0x12a0] ss:$112 sps:$4 sm:$0xff]  }
 0x44d   : > { %10418 = vmatprep.subr.bf16.mxu1 %v18829_v18  ;;  %v18883_v53 = vld [vmem:[#allocation2 + $0xbac] ss:$112 sps:$4 sm:$0xff]   ;;  %v18886_v18 = vld [vmem:[#allocation2 + $0x1384] ss:$112 sps:$4 sm:$0xff]   ;;  %v18881_v54 = vld [vmem:[#allocation2 + $0xba8] ss:$112 sps:$4 sm:$0xff]  }
 0x44e   : > { %10273 = vmatpush1.bf16.msra.mxu0 %v18830_v59  ;;  %v18884_v58 = vld [vmem:[#allocation2 + $0x1380] ss:$112 sps:$4 sm:$0xff]   ;;  %v18889_v55 = vld [vmem:[#allocation2 + $0xc8c] ss:$112 sps:$4 sm:$0xff]   ;;  %v18887_v59 = vld [vmem:[#allocation2 + $0xc88] ss:$112 sps:$4 sm:$0xff]  }
 0x44f   : > { %10274 = vmatprep.subr.bf16.mxu0 %v18838_v62  ;;  %v18895_v62 = vld [vmem:[#allocation2 + $0xd6c] ss:$112 sps:$4 sm:$0xff]  }
 0x450   : > { %10419 = vmatpush1.bf16.msra.mxu1 %v18827_v60  ;;  %v18892_v60 = vld [vmem:[#allocation2 + $0x1464] ss:$112 sps:$4 sm:$0xff]  }
 0x451   : > { %10420 = vmatprep.subr.bf16.mxu1 %v18835_v61  ;;  %v18890_v61 = vld [vmem:[#allocation2 + $0x1460] ss:$112 sps:$4 sm:$0xff]  }
 0x452   : > { %10275 = vmatpush1.bf16.msra.mxu0 %v18836_v1  ;;  %v18893_v1 = vld [vmem:[#allocation2 + $0xd68] ss:$112 sps:$4 sm:$0xff]  }
 0x453   : > { %10276 = vmatprep.subr.bf16.mxu0 %v18844_v5  ;;  %v18901_v5 = vld [vmem:[#allocation2 + $0xe4c] ss:$112 sps:$4 sm:$0xff]  }
 0x454   : > { %10421 = vmatpush1.bf16.msra.mxu1 %v18833_v63  ;;  %v18898_v63 = vld [vmem:[#allocation2 + $0x1544] ss:$112 sps:$4 sm:$0xff]  }
 0x455   : > { %10422 = vmatprep.subr.bf16.mxu1 %v18841_v41  ;;  %v18896_v41 = vld [vmem:[#allocation2 + $0x1540] ss:$112 sps:$4 sm:$0xff]  }
 0x456   : > { %10277 = vmatpush1.bf16.msra.mxu0 %v18842_v11  ;;  %v18899_v11 = vld [vmem:[#allocation2 + $0xe48] ss:$112 sps:$4 sm:$0xff]  }
 0x457   : > { %10287 = vmatprep.subr.bf16.mxu0 %v18850_v20  ;;  %v18907_v20 = vld [vmem:[#allocation2 + $0xf2c] ss:$112 sps:$4 sm:$0xff]  }
 0x458   : > { %10423 = vmatpush1.bf16.msra.mxu1 %v18839_v6  ;;  %v18904_v6 = vld [vmem:[#allocation2 + $0x1624] ss:$112 sps:$4 sm:$0xff]  }
 0x459   : > { %10424 = vmatprep.subr.bf16.mxu1 %v18847_v16  ;;  %10279 = vmatmul.mubr.bf16.vlgmr.msra.gmra.mrb[16].mxu0 %v20390_v8  ;;  %v18902_v16 = vld [vmem:[#allocation2 + $0x1620] ss:$112 sps:$4 sm:$0xff]  }
 0x45a   : > { %10288 = vmatpush1.bf16.msra.mxu0 %v18848_v24  ;;  %10319 = vmatprep.mubr.bf16.mxu0 %v20399_v35  ;;  %v18905_v24 = vld [vmem:[#allocation2 + $0xf28] ss:$112 sps:$4 sm:$0xff]  }
 0x45b   : > { %10289 = vmatprep.subr.bf16.mxu0 %v18856_v26  ;;  %v18913_v26 = vld [vmem:[#allocation2 + $0x100c] ss:$112 sps:$4 sm:$0xff]  }
 0x45c   : > { %10425 = vmatpush1.bf16.msra.mxu1 %v18845_v22  ;;  %v18910_v22 = vld [vmem:[#allocation2 + $0x1704] ss:$112 sps:$4 sm:$0xff]  }
 0x45d   : > { %10426 = vmatprep.subr.bf16.mxu1 %v18853_v17  ;;  %v18908_v17 = vld [vmem:[#allocation2 + $0x1700] ss:$112 sps:$4 sm:$0xff]  }
 0x45e   : > { %10290 = vmatpush1.bf16.msra.mxu0 %v18854_v30  ;;  %v18911_v30 = vld [vmem:[#allocation2 + $0x1008] ss:$112 sps:$4 sm:$0xff]  }
 0x45f   : > { %10291 = vmatprep.subr.bf16.mxu0 %v18862_v32  ;;  %v18919_v32 = vld [vmem:[#allocation2 + $0x10ec] ss:$112 sps:$4 sm:$0xff]  }
 0x460   : > { %10427 = vmatpush1.bf16.msra.mxu1 %v18851_v29  ;;  %v18916_v29 = vld [vmem:[#allocation2 + $0x17e4] ss:$112 sps:$4 sm:$0xff]  }
 0x461   : > { %10428 = vmatprep.subr.bf16.mxu1 %v18859_v31  ;;  %v18914_v31 = vld [vmem:[#allocation2 + $0x17e0] ss:$112 sps:$4 sm:$0xff]  }
 0x462   : > { %10292 = vmatpush1.bf16.msra.mxu0 %v18860_v36  ;;  %v18917_v36 = vld [vmem:[#allocation2 + $0x10e8] ss:$112 sps:$4 sm:$0xff]  }
 0x463   : > { %10293 = vmatprep.subr.bf16.mxu0 %v18868_v47  ;;  %v18925_v47 = vld [vmem:[#allocation2 + $0x11cc] ss:$112 sps:$4 sm:$0xff]  }
 0x464   : > { %10429 = vmatpush1.bf16.msra.mxu1 %v18857_v33  ;;  %v18922_v33 = vld [vmem:[#allocation2 + $0x18c4] ss:$112 sps:$4 sm:$0xff]  }
 0x465   : > { %10430 = vmatprep.subr.bf16.mxu1 %v18865_v37  ;;  %v18920_v37 = vld [vmem:[#allocation2 + $0x18c0] ss:$112 sps:$4 sm:$0xff]  }
 0x466   : > { %10294 = vmatpush1.bf16.msra.mxu0 %v18866_v38  ;;  %v18923_v38 = vld [vmem:[#allocation2 + $0x11c8] ss:$112 sps:$4 sm:$0xff]  }
 0x467   : > { %10295 = vmatprep.subr.bf16.mxu0 %v18874_v49  ;;  %v18931_v49 = vld [vmem:[#allocation2 + $0x12ac] ss:$112 sps:$4 sm:$0xff]  }
 0x468   : > { %10431 = vmatpush1.bf16.msra.mxu1 %v18863_v27  ;;  %v18928_v27 = vld [vmem:[#allocation2 + $0x19a4] ss:$112 sps:$4 sm:$0xff]  }
 0x469   : > { %10432 = vmatprep.subr.bf16.mxu1 %v18871_v39  ;;  %v18926_v39 = vld [vmem:[#allocation2 + $0x19a0] ss:$112 sps:$4 sm:$0xff]  }
 0x46a   : > { %10296 = vmatpush1.bf16.msra.mxu0 %v18872_v45  ;;  %v18929_v45 = vld [vmem:[#allocation2 + $0x12a8] ss:$112 sps:$4 sm:$0xff]  }
 0x46b   : > { %10297 = vmatprep.subr.bf16.mxu0 %v18880_v44  ;;  %v18937_v44 = vld [vmem:[#allocation2 + $0x138c] ss:$112 sps:$4 sm:$0xff]  }
 0x46c   : > { %10433 = vmatpush1.bf16.msra.mxu1 %v18869_v43  ;;  %v18934_v43 = vld [vmem:[#allocation2 + $0x1a84] ss:$112 sps:$4 sm:$0xff]  }
 0x46d   : > { %10434 = vmatprep.subr.bf16.mxu1 %v18877_v48  ;;  %v18932_v48 = vld [vmem:[#allocation2 + $0x1a80] ss:$112 sps:$4 sm:$0xff]  }
 0x46e   : > { %10298 = vmatpush1.bf16.msra.mxu0 %v18878_v34  ;;  %v18935_v34 = vld [vmem:[#allocation2 + $0x1388] ss:$112 sps:$4 sm:$0xff]  }
 0x46f   : > { %10299 = vmatprep.subr.bf16.mxu0 %v18886_v18  ;;  %v18943_v18 = vld [vmem:[#allocation2 + $0x146c] ss:$112 sps:$4 sm:$0xff]  }
 0x470   : > { %10435 = vmatpush1.bf16.msra.mxu1 %v18875_v50  ;;  %v18940_v50 = vld [vmem:[#allocation2 + $0x1b64] ss:$112 sps:$4 sm:$0xff]  }
 0x471   : > { %10436 = vmatprep.subr.bf16.mxu1 %v18883_v53  ;;  %v18938_v53 = vld [vmem:[#allocation2 + $0x1b60] ss:$112 sps:$4 sm:$0xff]  }
 0x472   : > { %10300 = vmatpush1.bf16.msra.mxu0 %v18884_v58  ;;  %v18941_v58 = vld [vmem:[#allocation2 + $0x1468] ss:$112 sps:$4 sm:$0xff]  }
 0x473   : > { %10301 = vmatprep.subr.bf16.mxu0 %v18892_v60  ;;  %v18949_v60 = vld [vmem:[#allocation2 + $0x154c] ss:$112 sps:$4 sm:$0xff]  }
 0x474   : > { %10437 = vmatpush1.bf16.msra.mxu1 %v18881_v54  ;;  %v18946_v54 = vld [vmem:[#allocation2 + $0x1c44] ss:$112 sps:$4 sm:$0xff]  }
 0x475   : > { %10438 = vmatprep.subr.bf16.mxu1 %v18889_v55  ;;  %v18944_v55 = vld [vmem:[#allocation2 + $0x1c40] ss:$112 sps:$4 sm:$0xff]  }
 0x476   : > { %10302 = vmatpush1.bf16.msra.mxu0 %v18890_v61  ;;  %v18947_v61 = vld [vmem:[#allocation2 + $0x1548] ss:$112 sps:$4 sm:$0xff]  }
 0x477   : > { %10303 = vmatprep.subr.bf16.mxu0 %v18898_v63  ;;  %v18955_v63 = vld [vmem:[#allocation2 + $0x162c] ss:$112 sps:$4 sm:$0xff]  }
 0x478   : > { %10439 = vmatpush1.bf16.msra.mxu1 %v18887_v59  ;;  %v18952_v59 = vld [vmem:[#allocation2 + $0x1d24] ss:$112 sps:$4 sm:$0xff]  }
 0x479   : > { %10440 = vmatprep.subr.bf16.mxu1 %v18895_v62  ;;  %v18950_v62 = vld [vmem:[#allocation2 + $0x1d20] ss:$112 sps:$4 sm:$0xff]  }
 0x47a   : > { %10304 = vmatpush1.bf16.msra.mxu0 %v18896_v41  ;;  %v18953_v41 = vld [vmem:[#allocation2 + $0x1628] ss:$112 sps:$4 sm:$0xff]  }
 0x47b   : > { %10305 = vmatprep.subr.bf16.mxu0 %v18904_v6  ;;  %v18961_v6 = vld [vmem:[#allocation2 + $0x170c] ss:$112 sps:$4 sm:$0xff]  }
 0x47c   : > { %10441 = vmatpush1.bf16.msra.mxu1 %v18893_v1  ;;  %v18958_v1 = vld [vmem:[#allocation2 + $0x1e04] ss:$112 sps:$4 sm:$0xff]  }
 0x47d   : > { %10451 = vmatprep.subr.bf16.mxu1 %v18901_v5  ;;  %v18956_v5 = vld [vmem:[#allocation2 + $0x1e00] ss:$112 sps:$4 sm:$0xff]  }
 0x47e   : > { %10306 = vmatpush1.bf16.msra.mxu0 %v18902_v16  ;;  %v18959_v16 = vld [vmem:[#allocation2 + $0x1708] ss:$112 sps:$4 sm:$0xff]  }
 0x47f   : > { %10443 = vmatmul.mubr.bf16.vlgmr.msra.gmra.mrb[24].mxu1 %v20390_v8  ;;  %10307 = vmatprep.subr.bf16.mxu0 %v18910_v22  ;;  %v18967_v22 = vld [vmem:[#allocation2 + $0x17ec] ss:$112 sps:$4 sm:$0xff]  }
 0x480   : > { %10452 = vmatpush1.bf16.msra.mxu1 %v18899_v11  ;;  %10483 = vmatprep.mubr.bf16.mxu1 %v20399_v35  ;;  %v18964_v11 = vld [vmem:[#allocation2 + $0x1ee4] ss:$112 sps:$4 sm:$0xff]  }
 0x481   : > { %10453 = vmatprep.subr.bf16.mxu1 %v18907_v20  ;;  %v18962_v20 = vld [vmem:[#allocation2 + $0x1ee0] ss:$112 sps:$4 sm:$0xff]  }
 0x482   : > { %10308 = vmatpush1.bf16.msra.mxu0 %v18908_v17  ;;  %v18965_v17 = vld [vmem:[#allocation2 + $0x17e8] ss:$112 sps:$4 sm:$0xff]  }
 0x483   : > { %10309 = vmatprep.subr.bf16.mxu0 %v18916_v29  ;;  %v18973_v29 = vld [vmem:[#allocation2 + $0x18cc] ss:$112 sps:$4 sm:$0xff]  }
 0x484   : > { %10454 = vmatpush1.bf16.msra.mxu1 %v18905_v24  ;;  %v18970_v24 = vld [vmem:[#allocation2 + $0x1fc4] ss:$112 sps:$4 sm:$0xff]  }
 0x485   : > { %10455 = vmatprep.subr.bf16.mxu1 %v18913_v26  ;;  %v18968_v26 = vld [vmem:[#allocation2 + $0x1fc0] ss:$112 sps:$4 sm:$0xff]  }
 0x486   : > { %10310 = vmatpush1.bf16.msra.mxu0 %v18914_v31  ;;  %v18971_v31 = vld [vmem:[#allocation2 + $0x18c8] ss:$112 sps:$4 sm:$0xff]  }
 0x487   : > { %10311 = vmatprep.subr.bf16.mxu0 %v18922_v33  ;;  %v18979_v33 = vld [vmem:[#allocation2 + $0x19ac] ss:$112 sps:$4 sm:$0xff]  }
 0x488   : > { %10456 = vmatpush1.bf16.msra.mxu1 %v18911_v30  ;;  %v18976_v30 = vld [vmem:[#allocation2 + $0x20a4] ss:$112 sps:$4 sm:$0xff]  }
 0x489   : > { %10457 = vmatprep.subr.bf16.mxu1 %v18919_v32  ;;  %v18974_v32 = vld [vmem:[#allocation2 + $0x20a0] ss:$112 sps:$4 sm:$0xff]  }
 0x48a   : > { %10312 = vmatpush1.bf16.msra.mxu0 %v18920_v37  ;;  %v18977_v37 = vld [vmem:[#allocation2 + $0x19a8] ss:$112 sps:$4 sm:$0xff]  }
 0x48b   : > { %10313 = vmatprep.subr.bf16.mxu0 %v18928_v27  ;;  %v18985_v27 = vld [vmem:[#allocation2 + $0x1a8c] ss:$112 sps:$4 sm:$0xff]  }
 0x48c   : > { %10458 = vmatpush1.bf16.msra.mxu1 %v18917_v36  ;;  %v18982_v36 = vld [vmem:[#allocation2 + $0x2184] ss:$112 sps:$4 sm:$0xff]  }
 0x48d   : > { %10459 = vmatprep.subr.bf16.mxu1 %v18925_v47  ;;  %v18980_v47 = vld [vmem:[#allocation2 + $0x2180] ss:$112 sps:$4 sm:$0xff]  }
 0x48e   : > { %10314 = vmatpush1.bf16.msra.mxu0 %v18926_v39  ;;  %v18983_v39 = vld [vmem:[#allocation2 + $0x1a88] ss:$112 sps:$4 sm:$0xff]  }
 0x48f   : > { %10315 = vmatprep.subr.bf16.mxu0 %v18934_v43  ;;  %v18991_v43 = vld [vmem:[#allocation2 + $0x1b6c] ss:$112 sps:$4 sm:$0xff]  }
 0x490   : > { %10460 = vmatpush1.bf16.msra.mxu1 %v18923_v38  ;;  %v18988_v38 = vld [vmem:[#allocation2 + $0x2264] ss:$112 sps:$4 sm:$0xff]  }
 0x491   : > { %10461 = vmatprep.subr.bf16.mxu1 %v18931_v49  ;;  %v18986_v49 = vld [vmem:[#allocation2 + $0x2260] ss:$112 sps:$4 sm:$0xff]  }
 0x492   : > { %10316 = vmatpush1.bf16.msra.mxu0 %v18932_v48  ;;  %v18989_v48 = vld [vmem:[#allocation2 + $0x1b68] ss:$112 sps:$4 sm:$0xff]  }
 0x493   : > { %10317 = vmatprep.subr.bf16.mxu0 %v18940_v50  ;;  %v18997_v50 = vld [vmem:[#allocation2 + $0x1c4c] ss:$112 sps:$4 sm:$0xff]  }
 0x494   : > { %10462 = vmatpush1.bf16.msra.mxu1 %v18929_v45  ;;  %v18994_v45 = vld [vmem:[#allocation2 + $0x2344] ss:$112 sps:$4 sm:$0xff]  }
 0x495   : > { %10463 = vmatprep.subr.bf16.mxu1 %v18937_v44  ;;  %v18992_v44 = vld [vmem:[#allocation2 + $0x2340] ss:$112 sps:$4 sm:$0xff]  }
 0x496   : > { %10318 = vmatpush1.bf16.msra.mxu0 %v18938_v53  ;;  %v18995_v53 = vld [vmem:[#allocation2 + $0x1c48] ss:$112 sps:$4 sm:$0xff]  }
 0x497   : > { %10328 = vmatprep.subr.bf16.mxu0 %v18946_v54  ;;  %v19003_v54 = vld [vmem:[#allocation2 + $0x1d2c] ss:$112 sps:$4 sm:$0xff]  }
 0x498   : > { %10464 = vmatpush1.bf16.msra.mxu1 %v18935_v34  ;;  %v19000_v34 = vld [vmem:[#allocation2 + $0x2424] ss:$112 sps:$4 sm:$0xff]  }
 0x499   : > { %10465 = vmatprep.subr.bf16.mxu1 %v18943_v18  ;;  %10320 = vmatmul.mubr.bf16.vlgmr.msra.gmra.mrb[16].mxu0 %v20405_v15  ;;  %v18998_v18 = vld [vmem:[#allocation2 + $0x2420] ss:$112 sps:$4 sm:$0xff]  }
 0x49a   : > { %10329 = vmatpush1.bf16.msra.mxu0 %v18944_v55  ;;  %10360 = vmatprep.mubr.bf16.mxu0 %v20412_v19  ;;  %v19001_v55 = vld [vmem:[#allocation2 + $0x1d28] ss:$112 sps:$4 sm:$0xff]  }
 0x49b   : > { %10330 = vmatprep.subr.bf16.mxu0 %v18952_v59  ;;  %v19009_v59 = vld [vmem:[#allocation2 + $0x1e0c] ss:$112 sps:$4 sm:$0xff]  }
 0x49c   : > { %10466 = vmatpush1.bf16.msra.mxu1 %v18941_v58  ;;  %v19006_v58 = vld [vmem:[#allocation2 + $0x2504] ss:$112 sps:$4 sm:$0xff]  }
 0x49d   : > { %10467 = vmatprep.subr.bf16.mxu1 %v18949_v60  ;;  %v19004_v60 = vld [vmem:[#allocation2 + $0x2500] ss:$112 sps:$4 sm:$0xff]  }
 0x49e   : > { %10331 = vmatpush1.bf16.msra.mxu0 %v18950_v62  ;;  %v19007_v62 = vld [vmem:[#allocation2 + $0x1e08] ss:$112 sps:$4 sm:$0xff]  }
 0x49f   : > { %10332 = vmatprep.subr.bf16.mxu0 %v18958_v1  ;;  %v19015_v1 = vld [vmem:[#allocation2 + $0x1eec] ss:$112 sps:$4 sm:$0xff]  }
 0x4a0   : > { %10468 = vmatpush1.bf16.msra.mxu1 %v18947_v61  ;;  %v19012_v61 = vld [vmem:[#allocation2 + $0x25e4] ss:$112 sps:$4 sm:$0xff]  }
 0x4a1   : > { %10469 = vmatprep.subr.bf16.mxu1 %v18955_v63  ;;  %v19010_v63 = vld [vmem:[#allocation2 + $0x25e0] ss:$112 sps:$4 sm:$0xff]  }
 0x4a2   : > { %10333 = vmatpush1.bf16.msra.mxu0 %v18956_v5  ;;  %v19013_v5 = vld [vmem:[#allocation2 + $0x1ee8] ss:$112 sps:$4 sm:$0xff]  }
 0x4a3   : > { %10334 = vmatprep.subr.bf16.mxu0 %v18964_v11  ;;  %v19021_v11 = vld [vmem:[#allocation2 + $0x1fcc] ss:$112 sps:$4 sm:$0xff]  }
 0x4a4   : > { %10470 = vmatpush1.bf16.msra.mxu1 %v18953_v41  ;;  %v19018_v41 = vld [vmem:[#allocation2 + $0x26c4] ss:$112 sps:$4 sm:$0xff]  }
 0x4a5   : > { %10471 = vmatprep.subr.bf16.mxu1 %v18961_v6  ;;  %v19016_v6 = vld [vmem:[#allocation2 + $0x26c0] ss:$112 sps:$4 sm:$0xff]  }
 0x4a6   : > { %10335 = vmatpush1.bf16.msra.mxu0 %v18962_v20  ;;  %v19019_v20 = vld [vmem:[#allocation2 + $0x1fc8] ss:$112 sps:$4 sm:$0xff]  }
 0x4a7   : > { %10336 = vmatprep.subr.bf16.mxu0 %v18970_v24  ;;  %v19027_v24 = vld [vmem:[#allocation2 + $0x20ac] ss:$112 sps:$4 sm:$0xff]  }
 0x4a8   : > { %10472 = vmatpush1.bf16.msra.mxu1 %v18959_v16  ;;  %v19024_v16 = vld [vmem:[#allocation2 + $0x27a4] ss:$112 sps:$4 sm:$0xff]  }
 0x4a9   : > { %10473 = vmatprep.subr.bf16.mxu1 %v18967_v22  ;;  %v19022_v22 = vld [vmem:[#allocation2 + $0x27a0] ss:$112 sps:$4 sm:$0xff]  }
 0x4aa   : > { %10337 = vmatpush1.bf16.msra.mxu0 %v18968_v26  ;;  %v19025_v26 = vld [vmem:[#allocation2 + $0x20a8] ss:$112 sps:$4 sm:$0xff]  }
 0x4ab   : > { %10338 = vmatprep.subr.bf16.mxu0 %v18976_v30  ;;  %v19033_v30 = vld [vmem:[#allocation2 + $0x218c] ss:$112 sps:$4 sm:$0xff]  }
 0x4ac   : > { %10474 = vmatpush1.bf16.msra.mxu1 %v18965_v17  ;;  %v19030_v17 = vld [vmem:[#allocation2 + $0x2884] ss:$112 sps:$4 sm:$0xff]  }
 0x4ad   : > { %10475 = vmatprep.subr.bf16.mxu1 %v18973_v29  ;;  %v19028_v29 = vld [vmem:[#allocation2 + $0x2880] ss:$112 sps:$4 sm:$0xff]  }
 0x4ae   : > { %10339 = vmatpush1.bf16.msra.mxu0 %v18974_v32  ;;  %v19031_v32 = vld [vmem:[#allocation2 + $0x2188] ss:$112 sps:$4 sm:$0xff]  }
 0x4af   : > { %10340 = vmatprep.subr.bf16.mxu0 %v18982_v36  ;;  %v19039_v36 = vld [vmem:[#allocation2 + $0x226c] ss:$112 sps:$4 sm:$0xff]  }
 0x4b0   : > { %10476 = vmatpush1.bf16.msra.mxu1 %v18971_v31  ;;  %v19036_v31 = vld [vmem:[#allocation2 + $0x2964] ss:$112 sps:$4 sm:$0xff]  }
 0x4b1   : > { %10477 = vmatprep.subr.bf16.mxu1 %v18979_v33  ;;  %v19034_v33 = vld [vmem:[#allocation2 + $0x2960] ss:$112 sps:$4 sm:$0xff]  }
 0x4b2   : > { %10341 = vmatpush1.bf16.msra.mxu0 %v18980_v47  ;;  %v19037_v47 = vld [vmem:[#allocation2 + $0x2268] ss:$112 sps:$4 sm:$0xff]  }
 0x4b3   : > { %10342 = vmatprep.subr.bf16.mxu0 %v18988_v38  ;;  %v19045_v38 = vld [vmem:[#allocation2 + $0x234c] ss:$112 sps:$4 sm:$0xff]  }
 0x4b4   : > { %10478 = vmatpush1.bf16.msra.mxu1 %v18977_v37  ;;  %v19042_v37 = vld [vmem:[#allocation2 + $0x2a44] ss:$112 sps:$4 sm:$0xff]  }
 0x4b5   : > { %10479 = vmatprep.subr.bf16.mxu1 %v18985_v27  ;;  %v19040_v27 = vld [vmem:[#allocation2 + $0x2a40] ss:$112 sps:$4 sm:$0xff]  }
 0x4b6   : > { %10343 = vmatpush1.bf16.msra.mxu0 %v18986_v49  ;;  %v19043_v49 = vld [vmem:[#allocation2 + $0x2348] ss:$112 sps:$4 sm:$0xff]  }
 0x4b7   : > { %10344 = vmatprep.subr.bf16.mxu0 %v18994_v45  ;;  %v19046_v45 = vld [vmem:[#allocation2 + $0x2428] ss:$112 sps:$4 sm:$0xff]  }
 0x4b8   : > { %10480 = vmatpush1.bf16.msra.mxu1 %v18983_v39  ;;  %v19054_v39 = vld [vmem:[#allocation2 + $0x54] ss:$112 sps:$4 sm:$0xff]  }
 0x4b9   : > { %10481 = vmatprep.subr.bf16.mxu1 %v18991_v43  ;;  %v19048_v43 = vld [vmem:[#allocation2 + $0x242c] ss:$112 sps:$4 sm:$0xff]  }
 0x4ba   : > { %10345 = vmatpush1.bf16.msra.mxu0 %v18992_v44  ;;  %v19049_v44 = vld [vmem:[#allocation2 + $0x2508] ss:$112 sps:$4 sm:$0xff]  }
 0x4bb   : > { %10346 = vmatprep.subr.bf16.mxu0 %v19000_v34  ;;  %v19057_v34 = vld [vmem:[#allocation2 + $0x25ec] ss:$112 sps:$4 sm:$0xff]  }
 0x4bc   : > { %10482 = vmatpush1.bf16.msra.mxu1 %v18989_v48  ;;  %v19051_v48 = vld [vmem:[#allocation2 + $0x250c] ss:$112 sps:$4 sm:$0xff]  }
 0x4bd   : > { %10492 = vmatprep.subr.bf16.mxu1 %v18997_v50  ;;  %v19052_v50 = vld [vmem:[#allocation2 + $0x50] ss:$112 sps:$4 sm:$0xff]  }
 0x4be   : > { %10347 = vmatpush1.bf16.msra.mxu0 %v18998_v18  ;;  %v20589_v18 = vsub.s32 6, %v20445_v2  ;;  %v1957_v2 = vrot.slane %v20541_v7, %v20490_v21 }
 0x4bf   : > { %10484 = vmatmul.mubr.bf16.vlgmr.msra.gmra.mrb[24].mxu1 %v20405_v15  ;;  %10348 = vmatprep.subr.bf16.mxu0 %v19006_v58  ;;  %v19058_v58 = vld [vmem:[#allocation2 + $0x130] ss:$112 sps:$4 sm:$0xff]  }
 0x4c0   : > { %10493 = vmatpush1.bf16.msra.mxu1 %v18995_v53  ;;  %10524 = vmatprep.mubr.bf16.mxu1 %v20412_v19  ;;  %v19060_v53 = vld [vmem:[#allocation2 + $0x134] ss:$112 sps:$4 sm:$0xff]  }
 0x4c1   : > { %10494 = vmatprep.subr.bf16.mxu1 %v19003_v54  ;;  %v19055_v54 = vld [vmem:[#allocation2 + $0x25e8] ss:$112 sps:$4 sm:$0xff]  }
 0x4c2   : > { %10349 = vmatpush1.bf16.msra.mxu0 %v19004_v60  ;;  %v19066_v60 = vld [vmem:[#allocation2 + $0x214] ss:$112 sps:$4 sm:$0xff]  }
 0x4c3   : > { %10350 = vmatprep.subr.bf16.mxu0 %v19012_v61  ;;  %v19061_v61 = vld [vmem:[#allocation2 + $0x26c8] ss:$112 sps:$4 sm:$0xff]  }
 0x4c4   : > { %10495 = vmatpush1.bf16.msra.mxu1 %v19001_v55  ;;  %v19063_v55 = vld [vmem:[#allocation2 + $0x26cc] ss:$112 sps:$4 sm:$0xff]  }
 0x4c5   : > { %10496 = vmatprep.subr.bf16.mxu1 %v19009_v59  ;;  %v1933_v59 = vrot.slane %v20543_v13, %v20589_v18 }
 0x4c6   : > { %10351 = vmatpush1.bf16.msra.mxu0 %v19010_v63  ;;  %v19069_v63 = vld [vmem:[#allocation2 + $0x27ac] ss:$112 sps:$4 sm:$0xff]  }
 0x4c7   : > { %10352 = vmatprep.subr.bf16.mxu0 %v19018_v41  ;;  %v17236_v41 = vadd.f32 %v20518_v28, %v1933_v59  ;;  %v20609_v59 = vld [vmem:[%s20381_s19 + $0x18] ss:$0 sps:$4 sm:$0xff]  }
 0x4c8   : > { %10497 = vmatpush1.bf16.msra.mxu1 %v19007_v62  ;;  %v1961_v62 = vrot.slane %v20541_v7, %v20493_v25 }
 0x4c9   : > { %10498 = vmatprep.subr.bf16.mxu1 %v19015_v1  ;;  %v19072_v1 = vld [vmem:[#allocation2 + $0x2f4] ss:$112 sps:$4 sm:$0xff]  }
 0x4ca   : > { %10353 = vmatpush1.bf16.msra.mxu0 %v19016_v6 }
 0x4cb   : > { %10354 = vmatprep.subr.bf16.mxu0 %v19024_v16 }
 0x4cc   : > { %10499 = vmatpush1.bf16.msra.mxu1 %v19013_v5 }
 0x4cd   : > { %10500 = vmatprep.subr.bf16.mxu1 %v19021_v11  ;;  %v11235_v11 = vmax.f32 %v20506_v46, 0.0  ;;  %v19073_v46 = vld [vmem:[#allocation2 + $0x2888] ss:$112 sps:$4 sm:$0xff]  }
 0x4ce   : > { %10355 = vmatpush1.bf16.msra.mxu0 %v19022_v22  ;;  %v19067_v22 = vld [vmem:[#allocation2 + $0x27a8] ss:$112 sps:$4 sm:$0xff]  }
 0x4cf   : > { %10356 = vmatprep.subr.bf16.mxu0 %v19030_v17 }
 0x4d0   : > { %10501 = vmatpush1.bf16.msra.mxu1 %v19019_v20 }
 0x4d1   : > { %10502 = vmatprep.subr.bf16.mxu1 %v19027_v24  ;;  %v19070_v24 = vld [vmem:[#allocation2 + $0x2f0] ss:$112 sps:$4 sm:$0xff]  }
 0x4d2   : > { %10357 = vmatpush1.bf16.msra.mxu0 %v19028_v29  ;;  %v19078_v29 = vld [vmem:[#allocation2 + $0x3d4] ss:$112 sps:$4 sm:$0xff]  }
 0x4d3   : > { %10358 = vmatprep.subr.bf16.mxu0 %v19036_v31 }
 0x4d4   : > { %10503 = vmatpush1.bf16.msra.mxu1 %v19025_v26  ;;  %v19075_v26 = vld [vmem:[#allocation2 + $0x288c] ss:$112 sps:$4 sm:$0xff]  }
 0x4d5   : > { %10504 = vmatprep.subr.bf16.mxu1 %v19033_v30  ;;  %v11236_v30 = vmax.f32 %v17236_v41, 0.0  ;;  %v19117_v41 = vld [vmem:[#allocation2 + $0x2fc] ss:$112 sps:$4 sm:$0xff]  }
 0x4d6   : > { %10359 = vmatpush1.bf16.msra.mxu0 %v19034_v33  ;;  %v19076_v33 = vld [vmem:[#allocation2 + $0x3d0] ss:$112 sps:$4 sm:$0xff]  }
 0x4d7   : > { %10369 = vmatprep.subr.bf16.mxu0 %v19042_v37  ;;  %v19084_v37 = vld [vmem:[#allocation2 + $0x4b4] ss:$112 sps:$4 sm:$0xff]  }
 0x4d8   : > { %10505 = vmatpush1.bf16.msra.mxu1 %v19031_v32 }
 0x4d9   : > { %10506 = vmatprep.subr.bf16.mxu1 %v19039_v36  ;;  %10361 = vmatmul.mubr.bf16.vlgmr.msra.gmra.mrb[16].mxu0 %v20420_v23  ;;  %v19081_v36 = vld [vmem:[#allocation2 + $0x296c] ss:$112 sps:$4 sm:$0xff]  }
 0x4da   : > { %10370 = vmatpush1.bf16.msra.mxu0 %v19040_v27  ;;  %10401 = vmatprep.mubr.bf16.mxu0 %v20028_v0  ;;  %v19082_v27 = vld [vmem:[#allocation2 + $0x4b0] ss:$112 sps:$4 sm:$0xff]  }
 0x4db   : > { %10574 = vmatprep.subr.bf16.mxu0 %v19054_v39  ;;  %v19093_v39 = vld [vmem:[#allocation2 + $0x2a4c] ss:$112 sps:$4 sm:$0xff]  }
 0x4dc   : > { %10507 = vmatpush1.bf16.msra.mxu1 %v19037_v47  ;;  %v19079_v47 = vld [vmem:[#allocation2 + $0x2968] ss:$112 sps:$4 sm:$0xff]  }
 0x4dd   : > { %10508 = vmatprep.subr.bf16.mxu1 %v19045_v38  ;;  %v19087_v38 = vld [vmem:[#allocation2 + $0x594] ss:$112 sps:$4 sm:$0xff]  }
 0x4e0   : > { %10509 = vmatpush1.bf16.msra.mxu1 %v19043_v49  ;;  %v19085_v49 = vld [vmem:[#allocation2 + $0x590] ss:$112 sps:$4 sm:$0xff]  }
 0x4e1   : > { %10510 = vmatprep.subr.bf16.mxu1 %v19048_v43  ;;  %v19091_v43 = vld [vmem:[#allocation2 + $0x2a48] ss:$112 sps:$4 sm:$0xff]  }
 0x4e4   : > { %10511 = vmatpush1.bf16.msra.mxu1 %v19046_v45  ;;  %v19090_v45 = vld [vmem:[#allocation2 + $0x674] ss:$112 sps:$4 sm:$0xff]  }
 0x4e5   : > { %10512 = vmatprep.subr.bf16.mxu1 %v19051_v48  ;;  %16655 = vmatmul.mubr.msk.bf16.vlgmr.msra.gmra.mrb[16].mxu0 %vm8930_vm0, %v20537_v4  ;;  %v19064_v4 = vld [vmem:[#allocation2 + $0x210] ss:$112 sps:$4 sm:$0xff]   ;;  %v19099_v48 = vld [vmem:[#allocation2 + $0x5c] ss:$112 sps:$4 sm:$0xff]  }
 0x4e6   : > { %10575 = vmatpush1.bf16.msra.mxu0 %v19052_v50  ;;  %10606 = vmatprep.mubr.bf16.mxu0 %v20386_v52  ;;  %v19096_v50 = vld [vmem:[#allocation2 + $0x754] ss:$112 sps:$4 sm:$0xff]  }
 0x4e7   : > { %10576 = vmatprep.subr.bf16.mxu0 %v19060_v53  ;;  %v19102_v53 = vld [vmem:[#allocation2 + $0x834] ss:$112 sps:$4 sm:$0xff]  }
 0x4e8   : > { %10513 = vmatpush1.bf16.msra.mxu1 %v19049_v44  ;;  %v19088_v44 = vld [vmem:[#allocation2 + $0x670] ss:$112 sps:$4 sm:$0xff]  }
 0x4e9   : > { %10514 = vmatprep.subr.bf16.mxu1 %v19057_v34  ;;  %v19094_v34 = vld [vmem:[#allocation2 + $0x750] ss:$112 sps:$4 sm:$0xff]  }
 0x4ea   : > { %10577 = vmatpush1.bf16.msra.mxu0 %v19058_v58  ;;  %v19100_v58 = vld [vmem:[#allocation2 + $0x830] ss:$112 sps:$4 sm:$0xff]  }
 0x4eb   : > { %10578 = vmatprep.subr.bf16.mxu0 %v19066_v60  ;;  %v19108_v60 = vld [vmem:[#allocation2 + $0x914] ss:$112 sps:$4 sm:$0xff]  }
 0x4ec   : > { %10515 = vmatpush1.bf16.msra.mxu1 %v19055_v54  ;;  %v10075_v5 = vpop.f32.mrb[12].mxu0  ;;  %v19097_v54 = vld [vmem:[#allocation2 + $0x58] ss:$112 sps:$4 sm:$0xff]  }
 0x4ed   : > { %10516 = vmatprep.subr.bf16.mxu1 %v19063_v55  ;;  %v17242_v13 = vadd.f32 %v10075_v5, %v1957_v2  ;;  %v10077_v6 = vpop.f32.mrb[13].mxu0  ;;  %v19105_v55 = vld [vmem:[#allocation2 + $0x13c] ss:$112 sps:$4 sm:$0xff]   ;;  %v19103_v2 = vld [vmem:[#allocation2 + $0x138] ss:$112 sps:$4 sm:$0xff]  }
 0x4ee   : > { %10579 = vmatpush1.bf16.msra.mxu0 %v19064_v4  ;;  %v17243_v16 = vadd.f32 %v10077_v6, %v1961_v62  ;;  %v10079_v20 = vpop.f32.mrb[14].mxu0  ;;  %v19111_v4 = vld [vmem:[#allocation2 + $0x21c] ss:$112 sps:$4 sm:$0xff]   ;;  %v19114_v62 = vld [vmem:[#allocation2 + $0x9f4] ss:$112 sps:$4 sm:$0xff]  }
 0x4ef   : > { %v11242_v17 = vmax.f32 %v17242_v13, 0.0  ;;  %v10080_v7 = vpop.f32.mrb[15].mxu0  ;;  %10580 = vmatprep.subr.bf16.mxu0 %v19072_v1  ;;  %v19112_v1 = vld [vmem:[#allocation2 + $0x9f0] ss:$112 sps:$4 sm:$0xff]   ;;  %v19120_v5 = vld [vmem:[#allocation2 + $0xad4] ss:$112 sps:$4 sm:$0xff]  }
 0x4f0   : > { %10517 = vmatpush1.bf16.msra.mxu1 %v19061_v61  ;;  %v11243_v31 = vmax.f32 %v17243_v16, 0.0  ;;  %v19106_v61 = vld [vmem:[#allocation2 + $0x910] ss:$112 sps:$4 sm:$0xff]   ;;  %v19115_v16 = vld [vmem:[#allocation2 + $0x2f8] ss:$112 sps:$4 sm:$0xff]  }
 0x4f1   : > { %10518 = vmatprep.subr.bf16.mxu1 %v19069_v63  ;;  %v20602_v28 = vmax.f32 %v11235_v11, %v11242_v17  ;;  %v19109_v63 = vld [vmem:[#allocation2 + $0x218] ss:$112 sps:$4 sm:$0xff]   ;;  %v19118_v20 = vld [vmem:[#allocation2 + $0xad0] ss:$112 sps:$4 sm:$0xff]   ;;  %v19126_v17 = vld [vmem:[#allocation2 + $0xbb4] ss:$112 sps:$4 sm:$0xff]  }
 0x4f2   : > { %v20604_v32 = vmax.f32 %v11236_v30, %v11243_v31  ;;  %10581 = vmatpush1.bf16.msra.mxu0 %v19070_v24  ;;  %v19123_v24 = vld [vmem:[#allocation2 + $0x3dc] ss:$112 sps:$4 sm:$0xff]   ;;  %v19121_v7 = vld [vmem:[#allocation2 + $0x3d8] ss:$112 sps:$4 sm:$0xff]   ;;  %v19132_v30 = vld [vmem:[#allocation2 + $0xc94] ss:$112 sps:$4 sm:$0xff]  }
 0x4f3   : > { %10582 = vmatprep.subr.bf16.mxu0 %v19078_v29  ;;  %v19129_v29 = vld [vmem:[#allocation2 + $0x4bc] ss:$112 sps:$4 sm:$0xff]   ;;  %v19127_v31 = vld [vmem:[#allocation2 + $0x4b8] ss:$112 sps:$4 sm:$0xff]  }
 0x4f4   : > { %10519 = vmatpush1.bf16.msra.mxu1 %v19067_v22 }
 0x4f5   : > { %10520 = vmatprep.subr.bf16.mxu1 %v19075_v26  ;;  %v19124_v26 = vld [vmem:[#allocation2 + $0xbb0] ss:$112 sps:$4 sm:$0xff]  }
 0x4f6   : > { %10583 = vmatpush1.bf16.msra.mxu0 %v19076_v33  ;;  %v19135_v33 = vld [vmem:[#allocation2 + $0x59c] ss:$112 sps:$4 sm:$0xff]  }
 0x4f7   : > { %10584 = vmatprep.subr.bf16.mxu0 %v19084_v37  ;;  %v19133_v37 = vld [vmem:[#allocation2 + $0x598] ss:$112 sps:$4 sm:$0xff]  }
 0x4f8   : > { %10521 = vmatpush1.bf16.msra.mxu1 %v19073_v46  ;;  %v19130_v46 = vld [vmem:[#allocation2 + $0xc90] ss:$112 sps:$4 sm:$0xff]  }
 0x4f9   : > { %10522 = vmatprep.subr.bf16.mxu1 %v19081_v36  ;;  %v19138_v36 = vld [vmem:[#allocation2 + $0xd74] ss:$112 sps:$4 sm:$0xff]  }
 0x4fa   : > { %10585 = vmatpush1.bf16.msra.mxu0 %v19082_v27  ;;  %v19141_v27 = vld [vmem:[#allocation2 + $0x67c] ss:$112 sps:$4 sm:$0xff]  }
 0x4fb   : > { %10586 = vmatprep.subr.bf16.mxu0 %v19087_v38  ;;  %v19144_v38 = vld [vmem:[#allocation2 + $0xe54] ss:$112 sps:$4 sm:$0xff]  }
 0x4fc   : > { %10523 = vmatpush1.bf16.msra.mxu1 %v19079_v47  ;;  %v19136_v47 = vld [vmem:[#allocation2 + $0xd70] ss:$112 sps:$4 sm:$0xff]  }
 0x4fd   : > { %10533 = vmatprep.subr.bf16.mxu1 %v19093_v39  ;;  %v19139_v39 = vld [vmem:[#allocation2 + $0x678] ss:$112 sps:$4 sm:$0xff]  }
 0x4fe   : > { %10587 = vmatpush1.bf16.msra.mxu0 %v19085_v49  ;;  %v19142_v49 = vld [vmem:[#allocation2 + $0xe50] ss:$112 sps:$4 sm:$0xff]  }
 0x4ff   : > { %10525 = vmatmul.mubr.bf16.vlgmr.msra.gmra.mrb[24].mxu1 %v20420_v23  ;;  %10588 = vmatprep.subr.bf16.mxu0 %v19090_v45  ;;  %v19150_v45 = vld [vmem:[#allocation2 + $0xf34] ss:$112 sps:$4 sm:$0xff]  }
 0x500   : > { %10534 = vmatpush1.bf16.msra.mxu1 %v19091_v43  ;;  %10565 = vmatprep.mubr.bf16.mxu1 %v20028_v0  ;;  %v19147_v43 = vld [vmem:[#allocation2 + $0x75c] ss:$112 sps:$4 sm:$0xff]  }
 0x501   : > { %10738 = vmatprep.subr.bf16.mxu1 %v19099_v48  ;;  %v19145_v48 = vld [vmem:[#allocation2 + $0x758] ss:$112 sps:$4 sm:$0xff]  }
 0x502   : > { %10589 = vmatpush1.bf16.msra.mxu0 %v19088_v44  ;;  %v19148_v44 = vld [vmem:[#allocation2 + $0xf30] ss:$112 sps:$4 sm:$0xff]  }
 0x503   : > { %10590 = vmatprep.subr.bf16.mxu0 %v19096_v50  ;;  %v19153_v50 = vld [vmem:[#allocation2 + $0x83c] ss:$112 sps:$4 sm:$0xff]  }
 0x506   : > { %10591 = vmatpush1.bf16.msra.mxu0 %v19094_v34  ;;  %v19156_v34 = vld [vmem:[#allocation2 + $0x1014] ss:$112 sps:$4 sm:$0xff]  }
 0x507   : > { %10592 = vmatprep.subr.bf16.mxu0 %v19102_v53  ;;  %v19151_v53 = vld [vmem:[#allocation2 + $0x838] ss:$112 sps:$4 sm:$0xff]  }
 0x50a   : > { %10593 = vmatpush1.bf16.msra.mxu0 %v19100_v58  ;;  %v19159_v58 = vld [vmem:[#allocation2 + $0x91c] ss:$112 sps:$4 sm:$0xff]  }
 0x50b   : > { %16656 = vmatmul.mubr.msk.bf16.vlgmr.msra.gmra.mrb[24].mxu1 %vm8930_vm0, %v20609_v59  ;;  %10594 = vmatprep.subr.bf16.mxu0 %v19108_v60  ;;  %v19157_v60 = vld [vmem:[#allocation2 + $0x918] ss:$112 sps:$4 sm:$0xff]  }
 0x50c   : > { %10739 = vmatpush1.bf16.msra.mxu1 %v19097_v54  ;;  %10770 = vmatprep.mubr.bf16.mxu1 %v20386_v52  ;;  %v19154_v54 = vld [vmem:[#allocation2 + $0x1010] ss:$112 sps:$4 sm:$0xff]  }
 0x50d   : > { %10740 = vmatprep.subr.bf16.mxu1 %v19105_v55  ;;  %v19162_v55 = vld [vmem:[#allocation2 + $0x10f4] ss:$112 sps:$4 sm:$0xff]  }
 0x50e   : > { %10595 = vmatpush1.bf16.msra.mxu0 %v19106_v61  ;;  %v19165_v61 = vld [vmem:[#allocation2 + $0x9fc] ss:$112 sps:$4 sm:$0xff]  }
 0x50f   : > { %10596 = vmatprep.subr.bf16.mxu0 %v19114_v62  ;;  %v19163_v62 = vld [vmem:[#allocation2 + $0x9f8] ss:$112 sps:$4 sm:$0xff]  }
 0x510   : > { %10741 = vmatpush1.bf16.msra.mxu1 %v19103_v2  ;;  %v19160_v2 = vld [vmem:[#allocation2 + $0x10f0] ss:$112 sps:$4 sm:$0xff]  }
 0x511   : > { %10742 = vmatprep.subr.bf16.mxu1 %v19111_v4  ;;  %v19168_v4 = vld [vmem:[#allocation2 + $0x11d4] ss:$112 sps:$4 sm:$0xff]  }
 0x512   : > { %v20614_v13 = vpop.f32.mrb[20].mxu1  ;;  %10597 = vmatpush1.bf16.msra.mxu0 %v19112_v1  ;;  %v19171_v1 = vld [vmem:[#allocation2 + $0xadc] ss:$112 sps:$4 sm:$0xff]  }
 0x513   : > { %v20616_v6 = vpop.f32.mrb[21].mxu1  ;;  %10598 = vmatprep.subr.bf16.mxu0 %v19120_v5  ;;  %v19169_v5 = vld [vmem:[#allocation2 + $0xad8] ss:$112 sps:$4 sm:$0xff]  }
 0x514   : > { %10743 = vmatpush1.bf16.msra.mxu1 %v19109_v63  ;;  %v10243_v11 = vpop.f32.mrb[22].mxu1  ;;  %v19166_v63 = vld [vmem:[#allocation2 + $0x11d0] ss:$112 sps:$4 sm:$0xff]  }
 0x515   : > { %v10244_v22 = vpop.f32.mrb[23].mxu1  ;;  %10744 = vmatprep.subr.bf16.mxu1 %v19117_v41  ;;  %v19174_v41 = vld [vmem:[#allocation2 + $0x12b4] ss:$112 sps:$4 sm:$0xff]   ;;  %v19172_v11 = vld [vmem:[#allocation2 + $0x12b0] ss:$112 sps:$4 sm:$0xff]  }
 0x516   : > { %10599 = vmatpush1.bf16.msra.mxu0 %v19118_v20  ;;  %v19180_v20 = vld [vmem:[#allocation2 + $0x1394] ss:$112 sps:$4 sm:$0xff]   ;;  %v19175_v22 = vld [vmem:[#allocation2 + $0xbb8] ss:$112 sps:$4 sm:$0xff]  }
 0x517   : > { %10600 = vmatprep.subr.bf16.mxu0 %v19126_v17  ;;  %v19183_v17 = vld [vmem:[#allocation2 + $0xc9c] ss:$112 sps:$4 sm:$0xff]  }
 0x518   : > { %10745 = vmatpush1.bf16.msra.mxu1 %v19115_v16  ;;  %v19177_v16 = vld [vmem:[#allocation2 + $0xbbc] ss:$112 sps:$4 sm:$0xff]  }
 0x519   : > { %10746 = vmatprep.subr.bf16.mxu1 %v19123_v24  ;;  %v19178_v24 = vld [vmem:[#allocation2 + $0x1390] ss:$112 sps:$4 sm:$0xff]  }
 0x51a   : > { %10601 = vmatpush1.bf16.msra.mxu0 %v19124_v26  ;;  %v19181_v26 = vld [vmem:[#allocation2 + $0xc98] ss:$112 sps:$4 sm:$0xff]  }
 0x51b   : > { %10602 = vmatprep.subr.bf16.mxu0 %v19132_v30  ;;  %v19189_v30 = vld [vmem:[#allocation2 + $0xd7c] ss:$112 sps:$4 sm:$0xff]  }
 0x51c   : > { %10747 = vmatpush1.bf16.msra.mxu1 %v19121_v7  ;;  %v19186_v7 = vld [vmem:[#allocation2 + $0x1474] ss:$112 sps:$4 sm:$0xff]  }
 0x51d   : > { %10748 = vmatprep.subr.bf16.mxu1 %v19129_v29  ;;  %v19184_v29 = vld [vmem:[#allocation2 + $0x1470] ss:$112 sps:$4 sm:$0xff]  }
 0x51e   : > { %10603 = vmatpush1.bf16.msra.mxu0 %v19130_v46  ;;  %v19187_v46 = vld [vmem:[#allocation2 + $0xd78] ss:$112 sps:$4 sm:$0xff]  }
 0x51f   : > { %10604 = vmatprep.subr.bf16.mxu0 %v19138_v36  ;;  %v19195_v36 = vld [vmem:[#allocation2 + $0xe5c] ss:$112 sps:$4 sm:$0xff]  }
 0x520   : > { %10749 = vmatpush1.bf16.msra.mxu1 %v19127_v31  ;;  %v19192_v31 = vld [vmem:[#allocation2 + $0x1554] ss:$112 sps:$4 sm:$0xff]  }
 0x521   : > { %10750 = vmatprep.subr.bf16.mxu1 %v19135_v33  ;;  %v19190_v33 = vld [vmem:[#allocation2 + $0x1550] ss:$112 sps:$4 sm:$0xff]  }
 0x522   : > { %10605 = vmatpush1.bf16.msra.mxu0 %v19136_v47  ;;  %v19193_v47 = vld [vmem:[#allocation2 + $0xe58] ss:$112 sps:$4 sm:$0xff]  }
 0x523   : > { %10615 = vmatprep.subr.bf16.mxu0 %v19144_v38  ;;  %v19201_v38 = vld [vmem:[#allocation2 + $0xf3c] ss:$112 sps:$4 sm:$0xff]  }
 0x524   : > { %10751 = vmatpush1.bf16.msra.mxu1 %v19133_v37  ;;  %v19198_v37 = vld [vmem:[#allocation2 + $0x1634] ss:$112 sps:$4 sm:$0xff]  }
 0x525   : > { %10752 = vmatprep.subr.bf16.mxu1 %v19141_v27  ;;  %10607 = vmatmul.mubr.bf16.vlgmr.msra.gmra.mrb[20].mxu0 %v20390_v8  ;;  %v19196_v27 = vld [vmem:[#allocation2 + $0x1630] ss:$112 sps:$4 sm:$0xff]  }
 0x526   : > { %10616 = vmatpush1.bf16.msra.mxu0 %v19142_v49  ;;  %10647 = vmatprep.mubr.bf16.mxu0 %v20399_v35  ;;  %v19199_v49 = vld [vmem:[#allocation2 + $0xf38] ss:$112 sps:$4 sm:$0xff]  }
 0x527   : > { %10617 = vmatprep.subr.bf16.mxu0 %v19150_v45  ;;  %v19207_v45 = vld [vmem:[#allocation2 + $0x101c] ss:$112 sps:$4 sm:$0xff]  }
 0x528   : > { %10753 = vmatpush1.bf16.msra.mxu1 %v19139_v39  ;;  %v19204_v39 = vld [vmem:[#allocation2 + $0x1714] ss:$112 sps:$4 sm:$0xff]  }
 0x529   : > { %10754 = vmatprep.subr.bf16.mxu1 %v19147_v43  ;;  %v19202_v43 = vld [vmem:[#allocation2 + $0x1710] ss:$112 sps:$4 sm:$0xff]  }
 0x52a   : > { %10618 = vmatpush1.bf16.msra.mxu0 %v19148_v44  ;;  %v19205_v44 = vld [vmem:[#allocation2 + $0x1018] ss:$112 sps:$4 sm:$0xff]  }
 0x52b   : > { %10619 = vmatprep.subr.bf16.mxu0 %v19156_v34  ;;  %v19213_v34 = vld [vmem:[#allocation2 + $0x10fc] ss:$112 sps:$4 sm:$0xff]  }
 0x52c   : > { %10755 = vmatpush1.bf16.msra.mxu1 %v19145_v48  ;;  %v19210_v48 = vld [vmem:[#allocation2 + $0x17f4] ss:$112 sps:$4 sm:$0xff]  }
 0x52d   : > { %10756 = vmatprep.subr.bf16.mxu1 %v19153_v50  ;;  %v19208_v50 = vld [vmem:[#allocation2 + $0x17f0] ss:$112 sps:$4 sm:$0xff]  }
 0x52e   : > { %10620 = vmatpush1.bf16.msra.mxu0 %v19154_v54  ;;  %v19211_v54 = vld [vmem:[#allocation2 + $0x10f8] ss:$112 sps:$4 sm:$0xff]  }
 0x52f   : > { %10621 = vmatprep.subr.bf16.mxu0 %v19162_v55  ;;  %v19219_v55 = vld [vmem:[#allocation2 + $0x11dc] ss:$112 sps:$4 sm:$0xff]  }
 0x530   : > { %10757 = vmatpush1.bf16.msra.mxu1 %v19151_v53  ;;  %v19216_v53 = vld [vmem:[#allocation2 + $0x18d4] ss:$112 sps:$4 sm:$0xff]  }
 0x531   : > { %10758 = vmatprep.subr.bf16.mxu1 %v19159_v58  ;;  %v19214_v58 = vld [vmem:[#allocation2 + $0x18d0] ss:$112 sps:$4 sm:$0xff]  }
 0x532   : > { %10622 = vmatpush1.bf16.msra.mxu0 %v19160_v2  ;;  %v19217_v2 = vld [vmem:[#allocation2 + $0x11d8] ss:$112 sps:$4 sm:$0xff]  }
 0x533   : > { %10623 = vmatprep.subr.bf16.mxu0 %v19168_v4  ;;  %v19225_v4 = vld [vmem:[#allocation2 + $0x12bc] ss:$112 sps:$4 sm:$0xff]  }
 0x534   : > { %10759 = vmatpush1.bf16.msra.mxu1 %v19157_v60  ;;  %v19222_v60 = vld [vmem:[#allocation2 + $0x19b4] ss:$112 sps:$4 sm:$0xff]  }
 0x535   : > { %10760 = vmatprep.subr.bf16.mxu1 %v19165_v61  ;;  %v19220_v61 = vld [vmem:[#allocation2 + $0x19b0] ss:$112 sps:$4 sm:$0xff]  }
 0x536   : > { %10624 = vmatpush1.bf16.msra.mxu0 %v19166_v63  ;;  %v19223_v63 = vld [vmem:[#allocation2 + $0x12b8] ss:$112 sps:$4 sm:$0xff]  }
 0x537   : > { %10625 = vmatprep.subr.bf16.mxu0 %v19174_v41  ;;  %v19231_v41 = vld [vmem:[#allocation2 + $0x139c] ss:$112 sps:$4 sm:$0xff]  }
 0x538   : > { %10761 = vmatpush1.bf16.msra.mxu1 %v19163_v62  ;;  %v19228_v62 = vld [vmem:[#allocation2 + $0x1a94] ss:$112 sps:$4 sm:$0xff]  }
 0x539   : > { %10762 = vmatprep.subr.bf16.mxu1 %v19171_v1  ;;  %v19226_v1 = vld [vmem:[#allocation2 + $0x1a90] ss:$112 sps:$4 sm:$0xff]  }
 0x53a   : > { %10626 = vmatpush1.bf16.msra.mxu0 %v19172_v11  ;;  %v19229_v11 = vld [vmem:[#allocation2 + $0x1398] ss:$112 sps:$4 sm:$0xff]  }
 0x53b   : > { %10627 = vmatprep.subr.bf16.mxu0 %v19180_v20  ;;  %v19237_v20 = vld [vmem:[#allocation2 + $0x147c] ss:$112 sps:$4 sm:$0xff]  }
 0x53c   : > { %10763 = vmatpush1.bf16.msra.mxu1 %v19169_v5  ;;  %v19234_v5 = vld [vmem:[#allocation2 + $0x1b74] ss:$112 sps:$4 sm:$0xff]  }
 0x53d   : > { %10764 = vmatprep.subr.bf16.mxu1 %v19177_v16  ;;  %v19232_v16 = vld [vmem:[#allocation2 + $0x1b70] ss:$112 sps:$4 sm:$0xff]  }
 0x53e   : > { %10628 = vmatpush1.bf16.msra.mxu0 %v19178_v24  ;;  %v19235_v24 = vld [vmem:[#allocation2 + $0x1478] ss:$112 sps:$4 sm:$0xff]  }
 0x53f   : > { %10629 = vmatprep.subr.bf16.mxu0 %v19186_v7  ;;  %v19243_v7 = vld [vmem:[#allocation2 + $0x155c] ss:$112 sps:$4 sm:$0xff]  }
 0x540   : > { %10765 = vmatpush1.bf16.msra.mxu1 %v19175_v22  ;;  %v19240_v22 = vld [vmem:[#allocation2 + $0x1c54] ss:$112 sps:$4 sm:$0xff]  }
 0x541   : > { %10766 = vmatprep.subr.bf16.mxu1 %v19183_v17  ;;  %v19238_v17 = vld [vmem:[#allocation2 + $0x1c50] ss:$112 sps:$4 sm:$0xff]  }
 0x542   : > { %10630 = vmatpush1.bf16.msra.mxu0 %v19184_v29  ;;  %v19241_v29 = vld [vmem:[#allocation2 + $0x1558] ss:$112 sps:$4 sm:$0xff]  }
 0x543   : > { %10631 = vmatprep.subr.bf16.mxu0 %v19192_v31  ;;  %v19249_v31 = vld [vmem:[#allocation2 + $0x163c] ss:$112 sps:$4 sm:$0xff]  }
 0x544   : > { %10767 = vmatpush1.bf16.msra.mxu1 %v19181_v26  ;;  %v19246_v26 = vld [vmem:[#allocation2 + $0x1d34] ss:$112 sps:$4 sm:$0xff]  }
 0x545   : > { %10768 = vmatprep.subr.bf16.mxu1 %v19189_v30  ;;  %v19244_v30 = vld [vmem:[#allocation2 + $0x1d30] ss:$112 sps:$4 sm:$0xff]  }
 0x546   : > { %10632 = vmatpush1.bf16.msra.mxu0 %v19190_v33  ;;  %v19247_v33 = vld [vmem:[#allocation2 + $0x1638] ss:$112 sps:$4 sm:$0xff]  }
 0x547   : > { %10633 = vmatprep.subr.bf16.mxu0 %v19198_v37  ;;  %v19255_v37 = vld [vmem:[#allocation2 + $0x171c] ss:$112 sps:$4 sm:$0xff]  }
 0x548   : > { %10769 = vmatpush1.bf16.msra.mxu1 %v19187_v46  ;;  %v19252_v46 = vld [vmem:[#allocation2 + $0x1e14] ss:$112 sps:$4 sm:$0xff]  }
 0x549   : > { %10779 = vmatprep.subr.bf16.mxu1 %v19195_v36  ;;  %v19250_v36 = vld [vmem:[#allocation2 + $0x1e10] ss:$112 sps:$4 sm:$0xff]  }
 0x54a   : > { %10634 = vmatpush1.bf16.msra.mxu0 %v19196_v27  ;;  %v19253_v27 = vld [vmem:[#allocation2 + $0x1718] ss:$112 sps:$4 sm:$0xff]  }
 0x54b   : > { %10771 = vmatmul.mubr.bf16.vlgmr.msra.gmra.mrb[28].mxu1 %v20390_v8  ;;  %10635 = vmatprep.subr.bf16.mxu0 %v19204_v39  ;;  %v19261_v39 = vld [vmem:[#allocation2 + $0x17fc] ss:$112 sps:$4 sm:$0xff]  }
 0x54c   : > { %10780 = vmatpush1.bf16.msra.mxu1 %v19193_v47  ;;  %10811 = vmatprep.mubr.bf16.mxu1 %v20399_v35  ;;  %v19258_v47 = vld [vmem:[#allocation2 + $0x1ef4] ss:$112 sps:$4 sm:$0xff]  }
 0x54d   : > { %10781 = vmatprep.subr.bf16.mxu1 %v19201_v38  ;;  %v19256_v38 = vld [vmem:[#allocation2 + $0x1ef0] ss:$112 sps:$4 sm:$0xff]  }
 0x54e   : > { %10636 = vmatpush1.bf16.msra.mxu0 %v19202_v43  ;;  %v19259_v43 = vld [vmem:[#allocation2 + $0x17f8] ss:$112 sps:$4 sm:$0xff]  }
 0x54f   : > { %10637 = vmatprep.subr.bf16.mxu0 %v19210_v48  ;;  %v19267_v48 = vld [vmem:[#allocation2 + $0x18dc] ss:$112 sps:$4 sm:$0xff]  }
 0x550   : > { %10782 = vmatpush1.bf16.msra.mxu1 %v19199_v49  ;;  %v19264_v49 = vld [vmem:[#allocation2 + $0x1fd4] ss:$112 sps:$4 sm:$0xff]  }
 0x551   : > { %10783 = vmatprep.subr.bf16.mxu1 %v19207_v45  ;;  %v19262_v45 = vld [vmem:[#allocation2 + $0x1fd0] ss:$112 sps:$4 sm:$0xff]  }
 0x552   : > { %10638 = vmatpush1.bf16.msra.mxu0 %v19208_v50  ;;  %v19265_v50 = vld [vmem:[#allocation2 + $0x18d8] ss:$112 sps:$4 sm:$0xff]  }
 0x553   : > { %10639 = vmatprep.subr.bf16.mxu0 %v19216_v53  ;;  %v19273_v53 = vld [vmem:[#allocation2 + $0x19bc] ss:$112 sps:$4 sm:$0xff]  }
 0x554   : > { %10784 = vmatpush1.bf16.msra.mxu1 %v19205_v44  ;;  %v19270_v44 = vld [vmem:[#allocation2 + $0x20b4] ss:$112 sps:$4 sm:$0xff]  }
 0x555   : > { %10785 = vmatprep.subr.bf16.mxu1 %v19213_v34  ;;  %v19268_v34 = vld [vmem:[#allocation2 + $0x20b0] ss:$112 sps:$4 sm:$0xff]  }
 0x556   : > { %10640 = vmatpush1.bf16.msra.mxu0 %v19214_v58  ;;  %v19271_v58 = vld [vmem:[#allocation2 + $0x19b8] ss:$112 sps:$4 sm:$0xff]  }
 0x557   : > { %10641 = vmatprep.subr.bf16.mxu0 %v19222_v60  ;;  %v19279_v60 = vld [vmem:[#allocation2 + $0x1a9c] ss:$112 sps:$4 sm:$0xff]  }
 0x558   : > { %10786 = vmatpush1.bf16.msra.mxu1 %v19211_v54  ;;  %v19276_v54 = vld [vmem:[#allocation2 + $0x2194] ss:$112 sps:$4 sm:$0xff]  }
 0x559   : > { %10787 = vmatprep.subr.bf16.mxu1 %v19219_v55  ;;  %v19274_v55 = vld [vmem:[#allocation2 + $0x2190] ss:$112 sps:$4 sm:$0xff]  }
 0x55a   : > { %10642 = vmatpush1.bf16.msra.mxu0 %v19220_v61  ;;  %v19277_v61 = vld [vmem:[#allocation2 + $0x1a98] ss:$112 sps:$4 sm:$0xff]  }
 0x55b   : > { %10643 = vmatprep.subr.bf16.mxu0 %v19228_v62  ;;  %v19285_v62 = vld [vmem:[#allocation2 + $0x1b7c] ss:$112 sps:$4 sm:$0xff]  }
 0x55c   : > { %10788 = vmatpush1.bf16.msra.mxu1 %v19217_v2  ;;  %v19282_v2 = vld [vmem:[#allocation2 + $0x2274] ss:$112 sps:$4 sm:$0xff]  }
 0x55d   : > { %10789 = vmatprep.subr.bf16.mxu1 %v19225_v4  ;;  %v19280_v4 = vld [vmem:[#allocation2 + $0x2270] ss:$112 sps:$4 sm:$0xff]  }
 0x55e   : > { %10644 = vmatpush1.bf16.msra.mxu0 %v19226_v1  ;;  %v19283_v1 = vld [vmem:[#allocation2 + $0x1b78] ss:$112 sps:$4 sm:$0xff]  }
 0x55f   : > { %10645 = vmatprep.subr.bf16.mxu0 %v19234_v5  ;;  %v19291_v5 = vld [vmem:[#allocation2 + $0x1c5c] ss:$112 sps:$4 sm:$0xff]  }
 0x560   : > { %10790 = vmatpush1.bf16.msra.mxu1 %v19223_v63  ;;  %v19288_v63 = vld [vmem:[#allocation2 + $0x2354] ss:$112 sps:$4 sm:$0xff]  }
 0x561   : > { %10791 = vmatprep.subr.bf16.mxu1 %v19231_v41  ;;  %v19286_v41 = vld [vmem:[#allocation2 + $0x2350] ss:$112 sps:$4 sm:$0xff]  }
 0x562   : > { %10646 = vmatpush1.bf16.msra.mxu0 %v19232_v16  ;;  %v19289_v16 = vld [vmem:[#allocation2 + $0x1c58] ss:$112 sps:$4 sm:$0xff]  }
 0x563   : > { %10656 = vmatprep.subr.bf16.mxu0 %v19240_v22  ;;  %v19297_v22 = vld [vmem:[#allocation2 + $0x1d3c] ss:$112 sps:$4 sm:$0xff]  }
 0x564   : > { %10792 = vmatpush1.bf16.msra.mxu1 %v19229_v11  ;;  %v19294_v11 = vld [vmem:[#allocation2 + $0x2434] ss:$112 sps:$4 sm:$0xff]  }
 0x565   : > { %10793 = vmatprep.subr.bf16.mxu1 %v19237_v20  ;;  %10648 = vmatmul.mubr.bf16.vlgmr.msra.gmra.mrb[20].mxu0 %v20405_v15  ;;  %v19292_v20 = vld [vmem:[#allocation2 + $0x2430] ss:$112 sps:$4 sm:$0xff]  }
 0x566   : > { %10657 = vmatpush1.bf16.msra.mxu0 %v19238_v17  ;;  %10688 = vmatprep.mubr.bf16.mxu0 %v20412_v19  ;;  %v19295_v17 = vld [vmem:[#allocation2 + $0x1d38] ss:$112 sps:$4 sm:$0xff]  }
 0x567   : > { %10658 = vmatprep.subr.bf16.mxu0 %v19246_v26  ;;  %v19303_v26 = vld [vmem:[#allocation2 + $0x1e1c] ss:$112 sps:$4 sm:$0xff]  }
 0x568   : > { %10794 = vmatpush1.bf16.msra.mxu1 %v19235_v24  ;;  %v19300_v24 = vld [vmem:[#allocation2 + $0x2514] ss:$112 sps:$4 sm:$0xff]  }
 0x569   : > { %10795 = vmatprep.subr.bf16.mxu1 %v19243_v7  ;;  %v19298_v7 = vld [vmem:[#allocation2 + $0x2510] ss:$112 sps:$4 sm:$0xff]  }
 0x56a   : > { %10659 = vmatpush1.bf16.msra.mxu0 %v19244_v30  ;;  %v19301_v30 = vld [vmem:[#allocation2 + $0x1e18] ss:$112 sps:$4 sm:$0xff]  }
 0x56b   : > { %10660 = vmatprep.subr.bf16.mxu0 %v19252_v46  ;;  %v19309_v46 = vld [vmem:[#allocation2 + $0x1efc] ss:$112 sps:$4 sm:$0xff]  }
 0x56c   : > { %10796 = vmatpush1.bf16.msra.mxu1 %v19241_v29  ;;  %v19306_v29 = vld [vmem:[#allocation2 + $0x25f4] ss:$112 sps:$4 sm:$0xff]  }
 0x56d   : > { %10797 = vmatprep.subr.bf16.mxu1 %v19249_v31  ;;  %v19304_v31 = vld [vmem:[#allocation2 + $0x25f0] ss:$112 sps:$4 sm:$0xff]  }
 0x56e   : > { %10661 = vmatpush1.bf16.msra.mxu0 %v19250_v36  ;;  %v19307_v36 = vld [vmem:[#allocation2 + $0x1ef8] ss:$112 sps:$4 sm:$0xff]  }
 0x56f   : > { %10662 = vmatprep.subr.bf16.mxu0 %v19258_v47  ;;  %v19315_v47 = vld [vmem:[#allocation2 + $0x1fdc] ss:$112 sps:$4 sm:$0xff]  }
 0x570   : > { %10798 = vmatpush1.bf16.msra.mxu1 %v19247_v33  ;;  %v19312_v33 = vld [vmem:[#allocation2 + $0x26d4] ss:$112 sps:$4 sm:$0xff]  }
 0x571   : > { %10799 = vmatprep.subr.bf16.mxu1 %v19255_v37  ;;  %v19310_v37 = vld [vmem:[#allocation2 + $0x26d0] ss:$112 sps:$4 sm:$0xff]  }
 0x572   : > { %10663 = vmatpush1.bf16.msra.mxu0 %v19256_v38  ;;  %v19313_v38 = vld [vmem:[#allocation2 + $0x1fd8] ss:$112 sps:$4 sm:$0xff]  }
 0x573   : > { %10664 = vmatprep.subr.bf16.mxu0 %v19264_v49  ;;  %v19321_v49 = vld [vmem:[#allocation2 + $0x20bc] ss:$112 sps:$4 sm:$0xff]  }
 0x574   : > { %10800 = vmatpush1.bf16.msra.mxu1 %v19253_v27  ;;  %v19318_v27 = vld [vmem:[#allocation2 + $0x27b4] ss:$112 sps:$4 sm:$0xff]  }
 0x575   : > { %10801 = vmatprep.subr.bf16.mxu1 %v19261_v39  ;;  %v19316_v39 = vld [vmem:[#allocation2 + $0x27b0] ss:$112 sps:$4 sm:$0xff]  }
 0x576   : > { %10665 = vmatpush1.bf16.msra.mxu0 %v19262_v45  ;;  %v19319_v45 = vld [vmem:[#allocation2 + $0x20b8] ss:$112 sps:$4 sm:$0xff]  }
 0x577   : > { %10666 = vmatprep.subr.bf16.mxu0 %v19270_v44  ;;  %v19327_v44 = vld [vmem:[#allocation2 + $0x219c] ss:$112 sps:$4 sm:$0xff]  }
 0x578   : > { %10802 = vmatpush1.bf16.msra.mxu1 %v19259_v43  ;;  %v19324_v43 = vld [vmem:[#allocation2 + $0x2894] ss:$112 sps:$4 sm:$0xff]  }
 0x579   : > { %10803 = vmatprep.subr.bf16.mxu1 %v19267_v48  ;;  %v19322_v48 = vld [vmem:[#allocation2 + $0x2890] ss:$112 sps:$4 sm:$0xff]  }
 0x57a   : > { %10667 = vmatpush1.bf16.msra.mxu0 %v19268_v34  ;;  %v19325_v34 = vld [vmem:[#allocation2 + $0x2198] ss:$112 sps:$4 sm:$0xff]  }
 0x57b   : > { %10668 = vmatprep.subr.bf16.mxu0 %v19276_v54  ;;  %v19333_v54 = vld [vmem:[#allocation2 + $0x227c] ss:$112 sps:$4 sm:$0xff]  }
 0x57c   : > { %10804 = vmatpush1.bf16.msra.mxu1 %v19265_v50  ;;  %v19330_v50 = vld [vmem:[#allocation2 + $0x2974] ss:$112 sps:$4 sm:$0xff]  }
 0x57d   : > { %10805 = vmatprep.subr.bf16.mxu1 %v19273_v53  ;;  %v19328_v53 = vld [vmem:[#allocation2 + $0x2970] ss:$112 sps:$4 sm:$0xff]  }
 0x57e   : > { %10669 = vmatpush1.bf16.msra.mxu0 %v19274_v55  ;;  %v19331_v55 = vld [vmem:[#allocation2 + $0x2278] ss:$112 sps:$4 sm:$0xff]  }
 0x57f   : > { %10670 = vmatprep.subr.bf16.mxu0 %v19282_v2  ;;  %v19339_v2 = vld [vmem:[#allocation2 + $0x235c] ss:$112 sps:$4 sm:$0xff]  }
 0x580   : > { %10806 = vmatpush1.bf16.msra.mxu1 %v19271_v58  ;;  %v19336_v58 = vld [vmem:[#allocation2 + $0x2a54] ss:$112 sps:$4 sm:$0xff]  }
 0x581   : > { %10807 = vmatprep.subr.bf16.mxu1 %v19279_v60  ;;  %v19334_v60 = vld [vmem:[#allocation2 + $0x2a50] ss:$112 sps:$4 sm:$0xff]  }
 0x582   : > { %10671 = vmatpush1.bf16.msra.mxu0 %v19280_v4  ;;  %v19337_v4 = vld [vmem:[#allocation2 + $0x2358] ss:$112 sps:$4 sm:$0xff]  }
 0x583   : > { %10672 = vmatprep.subr.bf16.mxu0 %v19288_v63  ;;  %v19340_v63 = vld [vmem:[#allocation2 + $0x2438] ss:$112 sps:$4 sm:$0xff]  }
 0x584   : > { %10808 = vmatpush1.bf16.msra.mxu1 %v19277_v61  ;;  %v19348_v61 = vld [vmem:[#allocation2 + $0x64] ss:$112 sps:$4 sm:$0xff]  }
 0x585   : > { %10809 = vmatprep.subr.bf16.mxu1 %v19285_v62  ;;  %v19342_v62 = vld [vmem:[#allocation2 + $0x243c] ss:$112 sps:$4 sm:$0xff]  }
 0x586   : > { %10673 = vmatpush1.bf16.msra.mxu0 %v19286_v41  ;;  %v19343_v41 = vld [vmem:[#allocation2 + $0x2518] ss:$112 sps:$4 sm:$0xff]  }
 0x587   : > { %10674 = vmatprep.subr.bf16.mxu0 %v19294_v11  ;;  %v19351_v11 = vld [vmem:[#allocation2 + $0x25fc] ss:$112 sps:$4 sm:$0xff]  }
 0x588   : > { %10810 = vmatpush1.bf16.msra.mxu1 %v19283_v1  ;;  %v19345_v1 = vld [vmem:[#allocation2 + $0x251c] ss:$112 sps:$4 sm:$0xff]  }
 0x589   : > { %10820 = vmatprep.subr.bf16.mxu1 %v19291_v5  ;;  %v19346_v5 = vld [vmem:[#allocation2 + $0x60] ss:$112 sps:$4 sm:$0xff]  }
 0x58a   : > { %10675 = vmatpush1.bf16.msra.mxu0 %v19292_v20  ;;  %v19349_v20 = vld [vmem:[#allocation2 + $0x25f8] ss:$112 sps:$4 sm:$0xff]  }
 0x58b   : > { %10812 = vmatmul.mubr.bf16.vlgmr.msra.gmra.mrb[28].mxu1 %v20405_v15  ;;  %10676 = vmatprep.subr.bf16.mxu0 %v19300_v24  ;;  %v19357_v24 = vld [vmem:[#allocation2 + $0x26dc] ss:$112 sps:$4 sm:$0xff]  }
 0x58c   : > { %10821 = vmatpush1.bf16.msra.mxu1 %v19289_v16  ;;  %10852 = vmatprep.mubr.bf16.mxu1 %v20412_v19  ;;  %v19354_v16 = vld [vmem:[#allocation2 + $0x144] ss:$112 sps:$4 sm:$0xff]  }
 0x58d   : > { %10822 = vmatprep.subr.bf16.mxu1 %v19297_v22  ;;  %v19352_v22 = vld [vmem:[#allocation2 + $0x140] ss:$112 sps:$4 sm:$0xff]  }
 0x58e   : > { %10677 = vmatpush1.bf16.msra.mxu0 %v19298_v7  ;;  %v19355_v7 = vld [vmem:[#allocation2 + $0x26d8] ss:$112 sps:$4 sm:$0xff]  }
 0x58f   : > { %10678 = vmatprep.subr.bf16.mxu0 %v19306_v29  ;;  %v19363_v29 = vld [vmem:[#allocation2 + $0x27bc] ss:$112 sps:$4 sm:$0xff]  }
 0x590   : > { %10823 = vmatpush1.bf16.msra.mxu1 %v19295_v17  ;;  %v19360_v17 = vld [vmem:[#allocation2 + $0x224] ss:$112 sps:$4 sm:$0xff]  }
 0x591   : > { %10824 = vmatprep.subr.bf16.mxu1 %v19303_v26  ;;  %v19358_v26 = vld [vmem:[#allocation2 + $0x220] ss:$112 sps:$4 sm:$0xff]  }
 0x592   : > { %10679 = vmatpush1.bf16.msra.mxu0 %v19304_v31 }
 0x593   : > { %10680 = vmatprep.subr.bf16.mxu0 %v19312_v33 }
 0x594   : > { %10825 = vmatpush1.bf16.msra.mxu1 %v19301_v30  ;;  %v19366_v30 = vld [vmem:[#allocation2 + $0x304] ss:$112 sps:$4 sm:$0xff]  }
 0x595   : > { %10826 = vmatprep.subr.bf16.mxu1 %v19309_v46 }
 0x596   : > { %10681 = vmatpush1.bf16.msra.mxu0 %v19310_v37  ;;  %v19364_v37 = vld [vmem:[#allocation2 + $0x300] ss:$112 sps:$4 sm:$0xff]  }
 0x597   : > { %10682 = vmatprep.subr.bf16.mxu0 %v19318_v27  ;;  %v19369_v27 = vld [vmem:[#allocation2 + $0x289c] ss:$112 sps:$4 sm:$0xff]  }
 0x598   : > { %10827 = vmatpush1.bf16.msra.mxu1 %v19307_v36  ;;  %v19361_v36 = vld [vmem:[#allocation2 + $0x27b8] ss:$112 sps:$4 sm:$0xff]  }
 0x599   : > { %10828 = vmatprep.subr.bf16.mxu1 %v19315_v47 }
 0x59a   : > { %10683 = vmatpush1.bf16.msra.mxu0 %v19316_v39  ;;  %v19367_v39 = vld [vmem:[#allocation2 + $0x2898] ss:$112 sps:$4 sm:$0xff]  }
 0x59b   : > { %10684 = vmatprep.subr.bf16.mxu0 %v19324_v43  ;;  %v19375_v43 = vld [vmem:[#allocation2 + $0x297c] ss:$112 sps:$4 sm:$0xff]  }
 0x59c   : > { %10829 = vmatpush1.bf16.msra.mxu1 %v19313_v38  ;;  %v19372_v38 = vld [vmem:[#allocation2 + $0x3e4] ss:$112 sps:$4 sm:$0xff]  }
 0x59d   : > { %10830 = vmatprep.subr.bf16.mxu1 %v19321_v49  ;;  %v19370_v49 = vld [vmem:[#allocation2 + $0x3e0] ss:$112 sps:$4 sm:$0xff]  }
 0x59e   : > { %10685 = vmatpush1.bf16.msra.mxu0 %v19322_v48  ;;  %v19373_v48 = vld [vmem:[#allocation2 + $0x2978] ss:$112 sps:$4 sm:$0xff]  }
 0x59f   : > { %10686 = vmatprep.subr.bf16.mxu0 %v19330_v50  ;;  %v19381_v50 = vld [vmem:[#allocation2 + $0x5a4] ss:$112 sps:$4 sm:$0xff]  }
 0x5a0   : > { %10831 = vmatpush1.bf16.msra.mxu1 %v19319_v45  ;;  %v19378_v45 = vld [vmem:[#allocation2 + $0x4c4] ss:$112 sps:$4 sm:$0xff]  }
 0x5a1   : > { %10832 = vmatprep.subr.bf16.mxu1 %v19327_v44  ;;  %v19376_v44 = vld [vmem:[#allocation2 + $0x4c0] ss:$112 sps:$4 sm:$0xff]  }
 0x5a2   : > { %10687 = vmatpush1.bf16.msra.mxu0 %v19328_v53  ;;  %v19379_v53 = vld [vmem:[#allocation2 + $0x5a0] ss:$112 sps:$4 sm:$0xff]  }
 0x5a3   : > { %10697 = vmatprep.subr.bf16.mxu0 %v19336_v58  ;;  %v19384_v58 = vld [vmem:[#allocation2 + $0x684] ss:$112 sps:$4 sm:$0xff]  }
 0x5a4   : > { %10833 = vmatpush1.bf16.msra.mxu1 %v19325_v34  ;;  %v19387_v34 = vld [vmem:[#allocation2 + $0x2a5c] ss:$112 sps:$4 sm:$0xff]  }
 0x5a5   : > { %10834 = vmatprep.subr.bf16.mxu1 %v19333_v54  ;;  %10689 = vmatmul.mubr.bf16.vlgmr.msra.gmra.mrb[20].mxu0 %v20420_v23  ;;  %v19385_v54 = vld [vmem:[#allocation2 + $0x2a58] ss:$112 sps:$4 sm:$0xff]  }
 0x5a6   : > { %10698 = vmatpush1.bf16.msra.mxu0 %v19334_v60  ;;  %10729 = vmatprep.mubr.bf16.mxu0 %v20028_v0  ;;  %v19382_v60 = vld [vmem:[#allocation2 + $0x680] ss:$112 sps:$4 sm:$0xff]  }
 0x5a7   : > { %10902 = vmatprep.subr.bf16.mxu0 %v19348_v61  ;;  %v19388_v61 = vld [vmem:[#allocation2 + $0x760] ss:$112 sps:$4 sm:$0xff]  }
 0x5a8   : > { %10835 = vmatpush1.bf16.msra.mxu1 %v19331_v55  ;;  %v19393_v55 = vld [vmem:[#allocation2 + $0x6c] ss:$112 sps:$4 sm:$0xff]  }
 0x5a9   : > { %10836 = vmatprep.subr.bf16.mxu1 %v19339_v2  ;;  %v19390_v2 = vld [vmem:[#allocation2 + $0x764] ss:$112 sps:$4 sm:$0xff]  }
 0x5ac   : > { %10837 = vmatpush1.bf16.msra.mxu1 %v19337_v4  ;;  %v19396_v4 = vld [vmem:[#allocation2 + $0x844] ss:$112 sps:$4 sm:$0xff]  }
 0x5ad   : > { %10838 = vmatprep.subr.bf16.mxu1 %v19342_v62  ;;  %v19391_v62 = vld [vmem:[#allocation2 + $0x68] ss:$112 sps:$4 sm:$0xff]  }
 0x5b0   : > { %10839 = vmatpush1.bf16.msra.mxu1 %v19340_v63  ;;  %v19394_v63 = vld [vmem:[#allocation2 + $0x840] ss:$112 sps:$4 sm:$0xff]  }
 0x5b1   : > { %10840 = vmatprep.subr.bf16.mxu1 %v19345_v1  ;;  %16657 = vmatmul.mubr.msk.bf16.vlgmr.msra.gmra.mrb[20].mxu0 %vm8930_vm0, %v20609_v59  ;;  %v19399_v1 = vld [vmem:[#allocation2 + $0x14c] ss:$112 sps:$4 sm:$0xff]  }
 0x5b2   : > { %10903 = vmatpush1.bf16.msra.mxu0 %v19346_v5  ;;  %10934 = vmatprep.mubr.bf16.mxu0 %v20386_v52  ;;  %v19397_v5 = vld [vmem:[#allocation2 + $0x148] ss:$112 sps:$4 sm:$0xff]  }
 0x5b3   : > { %10904 = vmatprep.subr.bf16.mxu0 %v19354_v16  ;;  %v19405_v16 = vld [vmem:[#allocation2 + $0x22c] ss:$112 sps:$4 sm:$0xff]  }
 0x5b4   : > { %10841 = vmatpush1.bf16.msra.mxu1 %v19343_v41  ;;  %v19402_v41 = vld [vmem:[#allocation2 + $0x924] ss:$112 sps:$4 sm:$0xff]  }
 0x5b5   : > { %10842 = vmatprep.subr.bf16.mxu1 %v19351_v11  ;;  %v19400_v11 = vld [vmem:[#allocation2 + $0x920] ss:$112 sps:$4 sm:$0xff]  }
 0x5b6   : > { %10905 = vmatpush1.bf16.msra.mxu0 %v19352_v22  ;;  %v19403_v22 = vld [vmem:[#allocation2 + $0x228] ss:$112 sps:$4 sm:$0xff]  }
 0x5b7   : > { %10906 = vmatprep.subr.bf16.mxu0 %v19360_v17  ;;  %v19411_v17 = vld [vmem:[#allocation2 + $0x30c] ss:$112 sps:$4 sm:$0xff]  }
 0x5b8   : > { %10843 = vmatpush1.bf16.msra.mxu1 %v19349_v20  ;;  %v20631_v31 = vpop.f32.mrb[16].mxu0  ;;  %v19408_v20 = vld [vmem:[#allocation2 + $0xa04] ss:$112 sps:$4 sm:$0xff]  }
 0x5b9   : > { %10844 = vmatprep.subr.bf16.mxu1 %v19357_v24  ;;  %v20633_v46 = vpop.f32.mrb[17].mxu0  ;;  %v19406_v24 = vld [vmem:[#allocation2 + $0xa00] ss:$112 sps:$4 sm:$0xff]  }
 0x5ba   : > { %10907 = vmatpush1.bf16.msra.mxu0 %v19358_v26  ;;  %v10407_v33 = vpop.f32.mrb[18].mxu0 }
 0x5bb   : > { %v10408_v47 = vpop.f32.mrb[19].mxu0  ;;  %10908 = vmatprep.subr.bf16.mxu0 %v19366_v30  ;;  %v19409_v30 = vld [vmem:[#allocation2 + $0x308] ss:$112 sps:$4 sm:$0xff]   ;;  %v19412_v33 = vld [vmem:[#allocation2 + $0xae0] ss:$112 sps:$4 sm:$0xff]  }
 0x5bc   : > { %10845 = vmatpush1.bf16.msra.mxu1 %v19355_v7  ;;  %v19414_v7 = vld [vmem:[#allocation2 + $0xae4] ss:$112 sps:$4 sm:$0xff]   ;;  %v19415_v47 = vld [vmem:[#allocation2 + $0x3e8] ss:$112 sps:$4 sm:$0xff]  }
 0x5bd   : > { %10846 = vmatprep.subr.bf16.mxu1 %v19363_v29 }
 0x5be   : > { %10909 = vmatpush1.bf16.msra.mxu0 %v19364_v37  ;;  %v19420_v37 = vld [vmem:[#allocation2 + $0xbc4] ss:$112 sps:$4 sm:$0xff]  }
 0x5bf   : > { %10910 = vmatprep.subr.bf16.mxu0 %v19372_v38  ;;  %v19423_v38 = vld [vmem:[#allocation2 + $0x4cc] ss:$112 sps:$4 sm:$0xff]  }
 0x5c0   : > { %10847 = vmatpush1.bf16.msra.mxu1 %v19361_v36 }
 0x5c1   : > { %10848 = vmatprep.subr.bf16.mxu1 %v19369_v27  ;;  %v19418_v27 = vld [vmem:[#allocation2 + $0xbc0] ss:$112 sps:$4 sm:$0xff]  }
 0x5c2   : > { %10911 = vmatpush1.bf16.msra.mxu0 %v19370_v49  ;;  %v19421_v49 = vld [vmem:[#allocation2 + $0x4c8] ss:$112 sps:$4 sm:$0xff]  }
 0x5c3   : > { %10912 = vmatprep.subr.bf16.mxu0 %v19378_v45  ;;  %v19429_v45 = vld [vmem:[#allocation2 + $0x5ac] ss:$112 sps:$4 sm:$0xff]  }
 0x5c4   : > { %10849 = vmatpush1.bf16.msra.mxu1 %v19367_v39  ;;  %v19426_v39 = vld [vmem:[#allocation2 + $0xca4] ss:$112 sps:$4 sm:$0xff]  }
 0x5c5   : > { %10850 = vmatprep.subr.bf16.mxu1 %v19375_v43  ;;  %v19424_v43 = vld [vmem:[#allocation2 + $0xca0] ss:$112 sps:$4 sm:$0xff]  }
 0x5c6   : > { %10913 = vmatpush1.bf16.msra.mxu0 %v19376_v44  ;;  %v19427_v44 = vld [vmem:[#allocation2 + $0x5a8] ss:$112 sps:$4 sm:$0xff]  }
 0x5c7   : > { %10914 = vmatprep.subr.bf16.mxu0 %v19381_v50  ;;  %v19430_v50 = vld [vmem:[#allocation2 + $0xd80] ss:$112 sps:$4 sm:$0xff]  }
 0x5c8   : > { %10851 = vmatpush1.bf16.msra.mxu1 %v19373_v48  ;;  %v19432_v48 = vld [vmem:[#allocation2 + $0xd84] ss:$112 sps:$4 sm:$0xff]  }
 0x5c9   : > { %10861 = vmatprep.subr.bf16.mxu1 %v19387_v34  ;;  %v19435_v34 = vld [vmem:[#allocation2 + $0x68c] ss:$112 sps:$4 sm:$0xff]  }
 0x5ca   : > { %10915 = vmatpush1.bf16.msra.mxu0 %v19379_v53  ;;  %v19438_v53 = vld [vmem:[#allocation2 + $0xe64] ss:$112 sps:$4 sm:$0xff]  }
 0x5cb   : > { %10853 = vmatmul.mubr.bf16.vlgmr.msra.gmra.mrb[28].mxu1 %v20420_v23  ;;  %10916 = vmatprep.subr.bf16.mxu0 %v19384_v58  ;;  %v19436_v58 = vld [vmem:[#allocation2 + $0xe60] ss:$112 sps:$4 sm:$0xff]  }
 0x5cc   : > { %10862 = vmatpush1.bf16.msra.mxu1 %v19385_v54  ;;  %10893 = vmatprep.mubr.bf16.mxu1 %v20028_v0  ;;  %v19433_v54 = vld [vmem:[#allocation2 + $0x688] ss:$112 sps:$4 sm:$0xff]  }
 0x5cd   : > { %11066 = vmatprep.subr.bf16.mxu1 %v19393_v55  ;;  %v19441_v55 = vld [vmem:[#allocation2 + $0x76c] ss:$112 sps:$4 sm:$0xff]  }
 0x5ce   : > { %10917 = vmatpush1.bf16.msra.mxu0 %v19382_v60  ;;  %v19444_v60 = vld [vmem:[#allocation2 + $0xf44] ss:$112 sps:$4 sm:$0xff]  }
 0x5cf   : > { %10918 = vmatprep.subr.bf16.mxu0 %v19390_v2  ;;  %v19439_v2 = vld [vmem:[#allocation2 + $0x768] ss:$112 sps:$4 sm:$0xff]  }
 0x5d2   : > { %10919 = vmatpush1.bf16.msra.mxu0 %v19388_v61  ;;  %v19442_v61 = vld [vmem:[#allocation2 + $0xf40] ss:$112 sps:$4 sm:$0xff]  }
 0x5d3   : > { %10920 = vmatprep.subr.bf16.mxu0 %v19396_v4  ;;  %v19447_v4 = vld [vmem:[#allocation2 + $0x84c] ss:$112 sps:$4 sm:$0xff]  }
 0x5d6   : > { %10921 = vmatpush1.bf16.msra.mxu0 %v19394_v63  ;;  %v19445_v63 = vld [vmem:[#allocation2 + $0x848] ss:$112 sps:$4 sm:$0xff]  }
 0x5d7   : > { %16658 = vmatmul.mubr.msk.bf16.vlgmr.msra.gmra.mrb[28].mxu1 %vm8930_vm0, %v20609_v59  ;;  %10922 = vmatprep.subr.bf16.mxu0 %v19402_v41  ;;  %v19453_v41 = vld [vmem:[#allocation2 + $0x92c] ss:$112 sps:$4 sm:$0xff]  }
 0x5d8   : > { %11067 = vmatpush1.bf16.msra.mxu1 %v19391_v62  ;;  %11098 = vmatprep.mubr.bf16.mxu1 %v20386_v52  ;;  %v19417_v52 = vld [vmem:[#allocation2 + $0x3ec] ss:$112 sps:$4 sm:$0xff]   ;;  %v19450_v62 = vld [vmem:[#allocation2 + $0x1024] ss:$112 sps:$4 sm:$0xff]  }
 0x5d9   : > { %11068 = vmatprep.subr.bf16.mxu1 %v19399_v1  ;;  %v19448_v1 = vld [vmem:[#allocation2 + $0x1020] ss:$112 sps:$4 sm:$0xff]  }
 0x5da   : > { %10923 = vmatpush1.bf16.msra.mxu0 %v19400_v11  ;;  %v19451_v11 = vld [vmem:[#allocation2 + $0x928] ss:$112 sps:$4 sm:$0xff]  }
 0x5db   : > { %10924 = vmatprep.subr.bf16.mxu0 %v19408_v20  ;;  %v19459_v20 = vld [vmem:[#allocation2 + $0xa0c] ss:$112 sps:$4 sm:$0xff]  }
 0x5dc   : > { %11069 = vmatpush1.bf16.msra.mxu1 %v19397_v5  ;;  %v19456_v5 = vld [vmem:[#allocation2 + $0x1104] ss:$112 sps:$4 sm:$0xff]  }
 0x5dd   : > { %11070 = vmatprep.subr.bf16.mxu1 %v19405_v16  ;;  %v19454_v16 = vld [vmem:[#allocation2 + $0x1100] ss:$112 sps:$4 sm:$0xff]  }
 0x5de   : > { %v20640_v26 = vpop.f32.mrb[24].mxu1  ;;  %10925 = vmatpush1.bf16.msra.mxu0 %v19406_v24  ;;  %v19457_v24 = vld [vmem:[#allocation2 + $0xa08] ss:$112 sps:$4 sm:$0xff]  }
 0x5df   : > { %v20642_v59 = vpop.f32.mrb[25].mxu1  ;;  %10926 = vmatprep.subr.bf16.mxu0 %v19414_v7  ;;  %v19465_v7 = vld [vmem:[#allocation2 + $0xaec] ss:$112 sps:$4 sm:$0xff]  }
 0x5e0   : > { %11071 = vmatpush1.bf16.msra.mxu1 %v19403_v22  ;;  %v10571_v29 = vpop.f32.mrb[26].mxu1  ;;  %v19462_v22 = vld [vmem:[#allocation2 + $0x11e4] ss:$112 sps:$4 sm:$0xff]  }
 0x5e1   : > { %v10572_v36 = vpop.f32.mrb[27].mxu1  ;;  %11072 = vmatprep.subr.bf16.mxu1 %v19411_v17  ;;  %v19460_v17 = vld [vmem:[#allocation2 + $0x11e0] ss:$112 sps:$4 sm:$0xff]   ;;  %v19468_v29 = vld [vmem:[#allocation2 + $0x12c4] ss:$112 sps:$4 sm:$0xff]  }
 0x5e2   : > { %10927 = vmatpush1.bf16.msra.mxu0 %v19412_v33  ;;  %v19466_v33 = vld [vmem:[#allocation2 + $0x12c0] ss:$112 sps:$4 sm:$0xff]   ;;  %v19471_v36 = vld [vmem:[#allocation2 + $0xbcc] ss:$112 sps:$4 sm:$0xff]  }
 0x5e3   : > { %10928 = vmatprep.subr.bf16.mxu0 %v19420_v37  ;;  %v19469_v37 = vld [vmem:[#allocation2 + $0xbc8] ss:$112 sps:$4 sm:$0xff]  }
 0x5e4   : > { %11073 = vmatpush1.bf16.msra.mxu1 %v19409_v30  ;;  %v19463_v30 = vld [vmem:[#allocation2 + $0xae8] ss:$112 sps:$4 sm:$0xff]  }
 0x5e5   : > { %11074 = vmatprep.subr.bf16.mxu1 %v19417_v52  ;;  %v19474_v52 = vld [vmem:[#allocation2 + $0x13a4] ss:$112 sps:$4 sm:$0xff]  }
 0x5e6   : > { %10929 = vmatpush1.bf16.msra.mxu0 %v19418_v27  ;;  %v19477_v27 = vld [vmem:[#allocation2 + $0xcac] ss:$112 sps:$4 sm:$0xff]  }
 0x5e7   : > { %10930 = vmatprep.subr.bf16.mxu0 %v19426_v39  ;;  %v19475_v39 = vld [vmem:[#allocation2 + $0xca8] ss:$112 sps:$4 sm:$0xff]  }
 0x5e8   : > { %11075 = vmatpush1.bf16.msra.mxu1 %v19415_v47  ;;  %v19472_v47 = vld [vmem:[#allocation2 + $0x13a0] ss:$112 sps:$4 sm:$0xff]  }
 0x5e9   : > { %11076 = vmatprep.subr.bf16.mxu1 %v19423_v38  ;;  %v19480_v38 = vld [vmem:[#allocation2 + $0x1484] ss:$112 sps:$4 sm:$0xff]  }
 0x5ea   : > { %10931 = vmatpush1.bf16.msra.mxu0 %v19424_v43  ;;  %v19483_v43 = vld [vmem:[#allocation2 + $0xd8c] ss:$112 sps:$4 sm:$0xff]  }
 0x5eb   : > { %10932 = vmatprep.subr.bf16.mxu0 %v19432_v48  ;;  %v19481_v48 = vld [vmem:[#allocation2 + $0xd88] ss:$112 sps:$4 sm:$0xff]  }
 0x5ec   : > { %11077 = vmatpush1.bf16.msra.mxu1 %v19421_v49  ;;  %v19478_v49 = vld [vmem:[#allocation2 + $0x1480] ss:$112 sps:$4 sm:$0xff]  }
 0x5ed   : > { %11078 = vmatprep.subr.bf16.mxu1 %v19429_v45  ;;  %v19486_v45 = vld [vmem:[#allocation2 + $0x1564] ss:$112 sps:$4 sm:$0xff]  }
 0x5ee   : > { %10933 = vmatpush1.bf16.msra.mxu0 %v19430_v50  ;;  %v19489_v50 = vld [vmem:[#allocation2 + $0xe6c] ss:$112 sps:$4 sm:$0xff]  }
 0x5ef   : > { %10943 = vmatprep.subr.bf16.mxu0 %v19438_v53  ;;  %v19487_v53 = vld [vmem:[#allocation2 + $0xe68] ss:$112 sps:$4 sm:$0xff]  }
 0x5f0   : > { %11079 = vmatpush1.bf16.msra.mxu1 %v19427_v44  ;;  %v19484_v44 = vld [vmem:[#allocation2 + $0x1560] ss:$112 sps:$4 sm:$0xff]  }
 0x5f1   : > { %11080 = vmatprep.subr.bf16.mxu1 %v19435_v34  ;;  %10935 = vmatmul.mubr.bf16.vlgmr.msra.gmra.mrb[24].mxu0 %v20390_v8  ;;  %v19492_v34 = vld [vmem:[#allocation2 + $0x1644] ss:$112 sps:$4 sm:$0xff]  }
 0x5f2   : > { %10944 = vmatpush1.bf16.msra.mxu0 %v19436_v58  ;;  %10975 = vmatprep.mubr.bf16.mxu0 %v20399_v35  ;;  %v19495_v58 = vld [vmem:[#allocation2 + $0xf4c] ss:$112 sps:$4 sm:$0xff]  }
 0x5f3   : > { %10945 = vmatprep.subr.bf16.mxu0 %v19444_v60  ;;  %v19493_v60 = vld [vmem:[#allocation2 + $0xf48] ss:$112 sps:$4 sm:$0xff]  }
 0x5f4   : > { %11081 = vmatpush1.bf16.msra.mxu1 %v19433_v54  ;;  %v19490_v54 = vld [vmem:[#allocation2 + $0x1640] ss:$112 sps:$4 sm:$0xff]  }
 0x5f5   : > { %11082 = vmatprep.subr.bf16.mxu1 %v19441_v55  ;;  %v19498_v55 = vld [vmem:[#allocation2 + $0x1724] ss:$112 sps:$4 sm:$0xff]  }
 0x5f6   : > { %10946 = vmatpush1.bf16.msra.mxu0 %v19442_v61  ;;  %v19501_v61 = vld [vmem:[#allocation2 + $0x102c] ss:$112 sps:$4 sm:$0xff]  }
 0x5f7   : > { %10947 = vmatprep.subr.bf16.mxu0 %v19450_v62  ;;  %v19499_v62 = vld [vmem:[#allocation2 + $0x1028] ss:$112 sps:$4 sm:$0xff]  }
 0x5f8   : > { %11083 = vmatpush1.bf16.msra.mxu1 %v19439_v2  ;;  %v19496_v2 = vld [vmem:[#allocation2 + $0x1720] ss:$112 sps:$4 sm:$0xff]  }
 0x5f9   : > { %11084 = vmatprep.subr.bf16.mxu1 %v19447_v4  ;;  %v19504_v4 = vld [vmem:[#allocation2 + $0x1804] ss:$112 sps:$4 sm:$0xff]  }
 0x5fa   : > { %10948 = vmatpush1.bf16.msra.mxu0 %v19448_v1  ;;  %v19507_v1 = vld [vmem:[#allocation2 + $0x110c] ss:$112 sps:$4 sm:$0xff]  }
 0x5fb   : > { %10949 = vmatprep.subr.bf16.mxu0 %v19456_v5  ;;  %v19508_v5 = vld [vmem:[#allocation2 + $0x18e0] ss:$112 sps:$4 sm:$0xff]  }
 0x5fc   : > { %11085 = vmatpush1.bf16.msra.mxu1 %v19445_v63  ;;  %v19502_v63 = vld [vmem:[#allocation2 + $0x1800] ss:$112 sps:$4 sm:$0xff]  }
 0x5fd   : > { %11086 = vmatprep.subr.bf16.mxu1 %v19453_v41  ;;  %v19510_v41 = vld [vmem:[#allocation2 + $0x18e4] ss:$112 sps:$4 sm:$0xff]  }
 0x5fe   : > { %10950 = vmatpush1.bf16.msra.mxu0 %v19454_v16  ;;  %v19516_v16 = vld [vmem:[#allocation2 + $0x19c4] ss:$112 sps:$4 sm:$0xff]  }
 0x5ff   : > { %10951 = vmatprep.subr.bf16.mxu0 %v19462_v22  ;;  %v19519_v22 = vld [vmem:[#allocation2 + $0x12cc] ss:$112 sps:$4 sm:$0xff]  }
 0x600   : > { %11087 = vmatpush1.bf16.msra.mxu1 %v19451_v11  ;;  %v19513_v11 = vld [vmem:[#allocation2 + $0x11ec] ss:$112 sps:$4 sm:$0xff]  }
 0x601   : > { %11088 = vmatprep.subr.bf16.mxu1 %v19459_v20  ;;  %v19511_v20 = vld [vmem:[#allocation2 + $0x11e8] ss:$112 sps:$4 sm:$0xff]  }
 0x602   : > { %10952 = vmatpush1.bf16.msra.mxu0 %v19460_v17  ;;  %v19517_v17 = vld [vmem:[#allocation2 + $0x12c8] ss:$112 sps:$4 sm:$0xff]  }
 0x603   : > { %10953 = vmatprep.subr.bf16.mxu0 %v19468_v29  ;;  %v19525_v29 = vld [vmem:[#allocation2 + $0x13ac] ss:$112 sps:$4 sm:$0xff]  }
 0x604   : > { %11089 = vmatpush1.bf16.msra.mxu1 %v19457_v24  ;;  %v19522_v24 = vld [vmem:[#allocation2 + $0x1aa4] ss:$112 sps:$4 sm:$0xff]  }
 0x605   : > { %11090 = vmatprep.subr.bf16.mxu1 %v19465_v7  ;;  %v19520_v7 = vld [vmem:[#allocation2 + $0x1aa0] ss:$112 sps:$4 sm:$0xff]  }
 0x606   : > { %10954 = vmatpush1.bf16.msra.mxu0 %v19466_v33  ;;  %v19523_v33 = vld [vmem:[#allocation2 + $0x13a8] ss:$112 sps:$4 sm:$0xff]  }
 0x607   : > { %10955 = vmatprep.subr.bf16.mxu0 %v19474_v52  ;;  %v19531_v52 = vld [vmem:[#allocation2 + $0x148c] ss:$112 sps:$4 sm:$0xff]  }
 0x608   : > { %11091 = vmatpush1.bf16.msra.mxu1 %v19463_v30  ;;  %v19528_v30 = vld [vmem:[#allocation2 + $0x1b84] ss:$112 sps:$4 sm:$0xff]  }
 0x609   : > { %11092 = vmatprep.subr.bf16.mxu1 %v19471_v36  ;;  %v19526_v36 = vld [vmem:[#allocation2 + $0x1b80] ss:$112 sps:$4 sm:$0xff]  }
 0x60a   : > { %10956 = vmatpush1.bf16.msra.mxu0 %v19472_v47  ;;  %v19529_v47 = vld [vmem:[#allocation2 + $0x1488] ss:$112 sps:$4 sm:$0xff]  }
 0x60b   : > { %10957 = vmatprep.subr.bf16.mxu0 %v19480_v38  ;;  %v19537_v38 = vld [vmem:[#allocation2 + $0x156c] ss:$112 sps:$4 sm:$0xff]  }
 0x60c   : > { %11093 = vmatpush1.bf16.msra.mxu1 %v19469_v37  ;;  %v19534_v37 = vld [vmem:[#allocation2 + $0x1c64] ss:$112 sps:$4 sm:$0xff]  }
 0x60d   : > { %11094 = vmatprep.subr.bf16.mxu1 %v19477_v27  ;;  %v19532_v27 = vld [vmem:[#allocation2 + $0x1c60] ss:$112 sps:$4 sm:$0xff]  }
 0x60e   : > { %10958 = vmatpush1.bf16.msra.mxu0 %v19478_v49  ;;  %v19535_v49 = vld [vmem:[#allocation2 + $0x1568] ss:$112 sps:$4 sm:$0xff]  }
 0x60f   : > { %10959 = vmatprep.subr.bf16.mxu0 %v19486_v45  ;;  %v19543_v45 = vld [vmem:[#allocation2 + $0x164c] ss:$112 sps:$4 sm:$0xff]  }
 0x610   : > { %11095 = vmatpush1.bf16.msra.mxu1 %v19475_v39  ;;  %v19540_v39 = vld [vmem:[#allocation2 + $0x1d44] ss:$112 sps:$4 sm:$0xff]  }
 0x611   : > { %11096 = vmatprep.subr.bf16.mxu1 %v19483_v43  ;;  %v19538_v43 = vld [vmem:[#allocation2 + $0x1d40] ss:$112 sps:$4 sm:$0xff]  }
 0x612   : > { %10960 = vmatpush1.bf16.msra.mxu0 %v19484_v44  ;;  %v19541_v44 = vld [vmem:[#allocation2 + $0x1648] ss:$112 sps:$4 sm:$0xff]  }
 0x613   : > { %10961 = vmatprep.subr.bf16.mxu0 %v19492_v34  ;;  %v19549_v34 = vld [vmem:[#allocation2 + $0x172c] ss:$112 sps:$4 sm:$0xff]  }
 0x614   : > { %11097 = vmatpush1.bf16.msra.mxu1 %v19481_v48  ;;  %v19546_v48 = vld [vmem:[#allocation2 + $0x1e24] ss:$112 sps:$4 sm:$0xff]  }
 0x615   : > { %11107 = vmatprep.subr.bf16.mxu1 %v19489_v50  ;;  %v19544_v50 = vld [vmem:[#allocation2 + $0x1e20] ss:$112 sps:$4 sm:$0xff]  }
 0x616   : > { %10962 = vmatpush1.bf16.msra.mxu0 %v19490_v54  ;;  %v19547_v54 = vld [vmem:[#allocation2 + $0x1728] ss:$112 sps:$4 sm:$0xff]  }
 0x617   : > { %11099 = vmatmul.mubr.bf16.vlgmr.msra.gmra.mrb[32].mxu1 %v20390_v8  ;;  %10963 = vmatprep.subr.bf16.mxu0 %v19498_v55  ;;  %v19505_v8 = vld [vmem:[#allocation2 + $0x1108] ss:$112 sps:$4 sm:$0xff]   ;;  %v19555_v55 = vld [vmem:[#allocation2 + $0x180c] ss:$112 sps:$4 sm:$0xff]  }
 0x618   : > { %11108 = vmatpush1.bf16.msra.mxu1 %v19487_v53  ;;  %11139 = vmatprep.mubr.bf16.mxu1 %v20399_v35  ;;  %v19514_v35 = vld [vmem:[#allocation2 + $0x19c0] ss:$112 sps:$4 sm:$0xff]   ;;  %v19552_v53 = vld [vmem:[#allocation2 + $0x1f04] ss:$112 sps:$4 sm:$0xff]  }
 0x619   : > { %11109 = vmatprep.subr.bf16.mxu1 %v19495_v58  ;;  %v19550_v58 = vld [vmem:[#allocation2 + $0x1f00] ss:$112 sps:$4 sm:$0xff]  }
 0x61a   : > { %10964 = vmatpush1.bf16.msra.mxu0 %v19496_v2  ;;  %v19553_v2 = vld [vmem:[#allocation2 + $0x1808] ss:$112 sps:$4 sm:$0xff]  }
 0x61b   : > { %10965 = vmatprep.subr.bf16.mxu0 %v19504_v4  ;;  %v19561_v4 = vld [vmem:[#allocation2 + $0x18ec] ss:$112 sps:$4 sm:$0xff]  }
 0x61c   : > { %11110 = vmatpush1.bf16.msra.mxu1 %v19493_v60  ;;  %v19558_v60 = vld [vmem:[#allocation2 + $0x1fe4] ss:$112 sps:$4 sm:$0xff]  }
 0x61d   : > { %11111 = vmatprep.subr.bf16.mxu1 %v19501_v61  ;;  %v19556_v61 = vld [vmem:[#allocation2 + $0x1fe0] ss:$112 sps:$4 sm:$0xff]  }
 0x61e   : > { %10966 = vmatpush1.bf16.msra.mxu0 %v19502_v63  ;;  %v19559_v63 = vld [vmem:[#allocation2 + $0x18e8] ss:$112 sps:$4 sm:$0xff]  }
 0x61f   : > { %10967 = vmatprep.subr.bf16.mxu0 %v19510_v41  ;;  %v19567_v41 = vld [vmem:[#allocation2 + $0x19cc] ss:$112 sps:$4 sm:$0xff]  }
 0x620   : > { %11112 = vmatpush1.bf16.msra.mxu1 %v19499_v62  ;;  %v19564_v62 = vld [vmem:[#allocation2 + $0x20c4] ss:$112 sps:$4 sm:$0xff]  }
 0x621   : > { %11113 = vmatprep.subr.bf16.mxu1 %v19507_v1  ;;  %v19562_v1 = vld [vmem:[#allocation2 + $0x20c0] ss:$112 sps:$4 sm:$0xff]  }
 0x622   : > { %10968 = vmatpush1.bf16.msra.mxu0 %v19508_v5  ;;  %v19565_v5 = vld [vmem:[#allocation2 + $0x19c8] ss:$112 sps:$4 sm:$0xff]  }
 0x623   : > { %10969 = vmatprep.subr.bf16.mxu0 %v19516_v16  ;;  %v19573_v16 = vld [vmem:[#allocation2 + $0x1aac] ss:$112 sps:$4 sm:$0xff]  }
 0x624   : > { %11114 = vmatpush1.bf16.msra.mxu1 %v19505_v8  ;;  %v19570_v8 = vld [vmem:[#allocation2 + $0x21a4] ss:$112 sps:$4 sm:$0xff]  }
 0x625   : > { %11115 = vmatprep.subr.bf16.mxu1 %v19513_v11  ;;  %v19568_v11 = vld [vmem:[#allocation2 + $0x21a0] ss:$112 sps:$4 sm:$0xff]  }
 0x626   : > { %10970 = vmatpush1.bf16.msra.mxu0 %v19514_v35  ;;  %v19571_v35 = vld [vmem:[#allocation2 + $0x1aa8] ss:$112 sps:$4 sm:$0xff]  }
 0x627   : > { %10971 = vmatprep.subr.bf16.mxu0 %v19522_v24  ;;  %v19579_v24 = vld [vmem:[#allocation2 + $0x1b8c] ss:$112 sps:$4 sm:$0xff]  }
 0x628   : > { %11116 = vmatpush1.bf16.msra.mxu1 %v19511_v20  ;;  %v19576_v20 = vld [vmem:[#allocation2 + $0x2284] ss:$112 sps:$4 sm:$0xff]  }
 0x629   : > { %11117 = vmatprep.subr.bf16.mxu1 %v19519_v22  ;;  %v19574_v22 = vld [vmem:[#allocation2 + $0x2280] ss:$112 sps:$4 sm:$0xff]  }
 0x62a   : > { %10972 = vmatpush1.bf16.msra.mxu0 %v19520_v7  ;;  %v19577_v7 = vld [vmem:[#allocation2 + $0x1b88] ss:$112 sps:$4 sm:$0xff]  }
 0x62b   : > { %10973 = vmatprep.subr.bf16.mxu0 %v19528_v30  ;;  %v19585_v30 = vld [vmem:[#allocation2 + $0x1c6c] ss:$112 sps:$4 sm:$0xff]  }
 0x62c   : > { %11118 = vmatpush1.bf16.msra.mxu1 %v19517_v17  ;;  %v19582_v17 = vld [vmem:[#allocation2 + $0x2364] ss:$112 sps:$4 sm:$0xff]  }
 0x62d   : > { %11119 = vmatprep.subr.bf16.mxu1 %v19525_v29  ;;  %v19580_v29 = vld [vmem:[#allocation2 + $0x2360] ss:$112 sps:$4 sm:$0xff]  }
 0x62e   : > { %10974 = vmatpush1.bf16.msra.mxu0 %v19526_v36  ;;  %v19583_v36 = vld [vmem:[#allocation2 + $0x1c68] ss:$112 sps:$4 sm:$0xff]  }
 0x62f   : > { %10984 = vmatprep.subr.bf16.mxu0 %v19534_v37  ;;  %v19591_v37 = vld [vmem:[#allocation2 + $0x1d4c] ss:$112 sps:$4 sm:$0xff]  }
 0x630   : > { %11120 = vmatpush1.bf16.msra.mxu1 %v19523_v33  ;;  %v19588_v33 = vld [vmem:[#allocation2 + $0x2444] ss:$112 sps:$4 sm:$0xff]  }
 0x631   : > { %11121 = vmatprep.subr.bf16.mxu1 %v19531_v52  ;;  %10976 = vmatmul.mubr.bf16.vlgmr.msra.gmra.mrb[24].mxu0 %v20405_v15  ;;  %v19586_v52 = vld [vmem:[#allocation2 + $0x2440] ss:$112 sps:$4 sm:$0xff]  }
 0x632   : > { %10985 = vmatpush1.bf16.msra.mxu0 %v19532_v27  ;;  %11016 = vmatprep.mubr.bf16.mxu0 %v20412_v19  ;;  %v19589_v27 = vld [vmem:[#allocation2 + $0x1d48] ss:$112 sps:$4 sm:$0xff]  }
 0x633   : > { %10986 = vmatprep.subr.bf16.mxu0 %v19540_v39  ;;  %v19597_v39 = vld [vmem:[#allocation2 + $0x1e2c] ss:$112 sps:$4 sm:$0xff]  }
 0x634   : > { %11122 = vmatpush1.bf16.msra.mxu1 %v19529_v47  ;;  %v19594_v47 = vld [vmem:[#allocation2 + $0x2524] ss:$112 sps:$4 sm:$0xff]  }
 0x635   : > { %11123 = vmatprep.subr.bf16.mxu1 %v19537_v38  ;;  %v19592_v38 = vld [vmem:[#allocation2 + $0x2520] ss:$112 sps:$4 sm:$0xff]  }
 0x636   : > { %10987 = vmatpush1.bf16.msra.mxu0 %v19538_v43  ;;  %v19595_v43 = vld [vmem:[#allocation2 + $0x1e28] ss:$112 sps:$4 sm:$0xff]  }
 0x637   : > { %10988 = vmatprep.subr.bf16.mxu0 %v19546_v48  ;;  %v19603_v48 = vld [vmem:[#allocation2 + $0x1f0c] ss:$112 sps:$4 sm:$0xff]  }
 0x638   : > { %11124 = vmatpush1.bf16.msra.mxu1 %v19535_v49  ;;  %v19600_v49 = vld [vmem:[#allocation2 + $0x2604] ss:$112 sps:$4 sm:$0xff]  }
 0x639   : > { %11125 = vmatprep.subr.bf16.mxu1 %v19543_v45  ;;  %v19598_v45 = vld [vmem:[#allocation2 + $0x2600] ss:$112 sps:$4 sm:$0xff]  }
 0x63a   : > { %10989 = vmatpush1.bf16.msra.mxu0 %v19544_v50  ;;  %v19604_v50 = vld [vmem:[#allocation2 + $0x26e0] ss:$112 sps:$4 sm:$0xff]  }
 0x63b   : > { %10990 = vmatprep.subr.bf16.mxu0 %v19552_v53  ;;  %v19612_v53 = vld [vmem:[#allocation2 + $0x27c4] ss:$112 sps:$4 sm:$0xff]  }
 0x63c   : > { %11126 = vmatpush1.bf16.msra.mxu1 %v19541_v44  ;;  %v19606_v44 = vld [vmem:[#allocation2 + $0x26e4] ss:$112 sps:$4 sm:$0xff]  }
 0x63d   : > { %11127 = vmatprep.subr.bf16.mxu1 %v19549_v34  ;;  %v19609_v34 = vld [vmem:[#allocation2 + $0x1fec] ss:$112 sps:$4 sm:$0xff]  }
 0x63e   : > { %10991 = vmatpush1.bf16.msra.mxu0 %v19550_v58  ;;  %v19615_v58 = vld [vmem:[#allocation2 + $0x20cc] ss:$112 sps:$4 sm:$0xff]  }
 0x63f   : > { %10992 = vmatprep.subr.bf16.mxu0 %v19558_v60  ;;  %v19613_v60 = vld [vmem:[#allocation2 + $0x20c8] ss:$112 sps:$4 sm:$0xff]  }
 0x640   : > { %11128 = vmatpush1.bf16.msra.mxu1 %v19547_v54  ;;  %v19607_v54 = vld [vmem:[#allocation2 + $0x1fe8] ss:$112 sps:$4 sm:$0xff]  }
 0x641   : > { %11129 = vmatprep.subr.bf16.mxu1 %v19555_v55  ;;  %v19618_v55 = vld [vmem:[#allocation2 + $0x28a4] ss:$112 sps:$4 sm:$0xff]  }
 0x642   : > { %10993 = vmatpush1.bf16.msra.mxu0 %v19556_v61  ;;  %v19621_v61 = vld [vmem:[#allocation2 + $0x21ac] ss:$112 sps:$4 sm:$0xff]  }
 0x643   : > { %10994 = vmatprep.subr.bf16.mxu0 %v19564_v62  ;;  %v19619_v62 = vld [vmem:[#allocation2 + $0x21a8] ss:$112 sps:$4 sm:$0xff]  }
 0x644   : > { %11130 = vmatpush1.bf16.msra.mxu1 %v19553_v2  ;;  %v19616_v2 = vld [vmem:[#allocation2 + $0x28a0] ss:$112 sps:$4 sm:$0xff]  }
 0x645   : > { %11131 = vmatprep.subr.bf16.mxu1 %v19561_v4  ;;  %v19624_v4 = vld [vmem:[#allocation2 + $0x2984] ss:$112 sps:$4 sm:$0xff]  }
 0x646   : > { %10995 = vmatpush1.bf16.msra.mxu0 %v19562_v1  ;;  %v19627_v1 = vld [vmem:[#allocation2 + $0x228c] ss:$112 sps:$4 sm:$0xff]  }
 0x647   : > { %10996 = vmatprep.subr.bf16.mxu0 %v19570_v8  ;;  %v11286_v8 = vld [vmem:[#allocation6] sm:$0xff] }
 0x648   : > { %11132 = vmatpush1.bf16.msra.mxu1 %v19559_v63  ;;  %v19622_v63 = vld [vmem:[#allocation2 + $0x2980] ss:$112 sps:$4 sm:$0xff]  }
 0x649   : > { %11133 = vmatprep.subr.bf16.mxu1 %v19567_v41  ;;  %v19630_v41 = vld [vmem:[#allocation2 + $0x2a64] ss:$112 sps:$4 sm:$0xff]  }
 0x64a   : > { %10997 = vmatpush1.bf16.msra.mxu0 %v19568_v11  ;;  %v19625_v11 = vld [vmem:[#allocation2 + $0x2288] ss:$112 sps:$4 sm:$0xff]  }
 0x64b   : > { %10998 = vmatprep.subr.bf16.mxu0 %v19576_v20  ;;  %v19633_v20 = vld [vmem:[#allocation2 + $0x236c] ss:$112 sps:$4 sm:$0xff]  }
 0x64c   : > { %11134 = vmatpush1.bf16.msra.mxu1 %v19565_v5  ;;  %v11290_v5 = vld [vmem:[#allocation6 + $0x20] sm:$0xff] }
 0x64d   : > { %11135 = vmatprep.subr.bf16.mxu1 %v19573_v16  ;;  %v19628_v16 = vld [vmem:[#allocation2 + $0x2a60] ss:$112 sps:$4 sm:$0xff]  }
 0x64e   : > { %10999 = vmatpush1.bf16.msra.mxu0 %v19574_v22  ;;  %v19631_v22 = vld [vmem:[#allocation2 + $0x2368] ss:$112 sps:$4 sm:$0xff]  }
 0x64f   : > { %11000 = vmatprep.subr.bf16.mxu0 %v19582_v17  ;;  %v19634_v17 = vld [vmem:[#allocation2 + $0x2448] ss:$112 sps:$4 sm:$0xff]  }
 0x650   : > { %11136 = vmatpush1.bf16.msra.mxu1 %v19571_v35  ;;  %v16662_v35 = vcombine.high %v11286_v8, %v11290_v5 }
 0x651   : > { %11137 = vmatprep.subr.bf16.mxu1 %v19579_v24  ;;  %v19636_v24 = vld [vmem:[#allocation2 + $0x244c] ss:$112 sps:$4 sm:$0xff]  }
 0x652   : > { %11001 = vmatpush1.bf16.msra.mxu0 %v19580_v29  ;;  %v11294_v29 = vld [vmem:[#allocation6 + $0x40] sm:$0xff] }
 0x653   : > { %11002 = vmatprep.subr.bf16.mxu0 %v19588_v33  ;;  %v19637_v33 = vld [vmem:[#allocation2 + $0x2528] ss:$112 sps:$4 sm:$0xff]  }
 0x654   : > { %11138 = vmatpush1.bf16.msra.mxu1 %v19577_v7  ;;  %v19639_v7 = vld [vmem:[#allocation2 + $0x252c] ss:$112 sps:$4 sm:$0xff]  }
 0x655   : > { %11148 = vmatprep.subr.bf16.mxu1 %v19585_v30  ;;  %v11298_v30 = vld [vmem:[#allocation6 + $0x60] sm:$0xff] }
 0x656   : > { %11003 = vmatpush1.bf16.msra.mxu0 %v19586_v52  ;;  %v19642_v52 = vld [vmem:[#allocation2 + $0x260c] ss:$112 sps:$4 sm:$0xff]  }
 0x657   : > { %11140 = vmatmul.mubr.bf16.vlgmr.msra.gmra.mrb[32].mxu1 %v20405_v15  ;;  %11004 = vmatprep.subr.bf16.mxu0 %v19594_v47  ;;  %v19601_v15 = vld [vmem:[#allocation2 + $0x1f08] ss:$112 sps:$4 sm:$0xff]   ;;  %v11302_v47 = vld [vmem:[#allocation6 + $0x80] sm:$0xff] }
 0x658   : > { %11149 = vmatpush1.bf16.msra.mxu1 %v19583_v36  ;;  %11180 = vmatprep.mubr.bf16.mxu1 %v20412_v19  ;;  %v19610_v19 = vld [vmem:[#allocation2 + $0x27c0] ss:$112 sps:$4 sm:$0xff]   ;;  %v16661_v36 = vcombine.low %v11286_v8, %v11290_v5 }
 0x659   : > { %11150 = vmatprep.subr.bf16.mxu1 %v19591_v37  ;;  %v16670_v37 = vcombine.high %v11294_v29, %v11298_v30 }
 0x65a   : > { %11005 = vmatpush1.bf16.msra.mxu0 %v19592_v38  ;;  %v20655_v38 = vld [vmem:[%s20381_s19 + $0x18] ss:$0 sps:$4 sm:$0xff]  }
 0x65b   : > { %11006 = vmatprep.subr.bf16.mxu0 %v19600_v49  ;;  %v16669_v49 = vcombine.low %v11294_v29, %v11298_v30  ;;  %v19654_v29 = vld [vmem:[#allocation2 + $0x298c] ss:$112 sps:$4 sm:$0xff]  }
 0x65c   : > { %11151 = vmatpush1.bf16.msra.mxu1 %v19589_v27  ;;  %v11306_v27 = vld [vmem:[#allocation6 + $0xa0] sm:$0xff] }
 0x65d   : > { %11152 = vmatprep.subr.bf16.mxu1 %v19597_v39  ;;  %v19640_v39 = vld [vmem:[#allocation2 + $0x2608] ss:$112 sps:$4 sm:$0xff]  }
 0x65e   : > { %11007 = vmatpush1.bf16.msra.mxu0 %v19598_v45  ;;  %v16678_v45 = vcombine.high %v11302_v47, %v11306_v27 }
 0x65f   : > { %11008 = vmatprep.subr.bf16.mxu0 %v19606_v44 }
 0x660   : > { %11153 = vmatpush1.bf16.msra.mxu1 %v19595_v43  ;;  %v19645_v43 = vld [vmem:[#allocation2 + $0x26ec] ss:$112 sps:$4 sm:$0xff]  }
 0x661   : > { %11154 = vmatprep.subr.bf16.mxu1 %v19603_v48  ;;  %v20659_v48 = vld [vmem:[#allocation4 + $0x8] sm:$0xff] }
 0x662   : > { %11009 = vmatpush1.bf16.msra.mxu0 %v19604_v50  ;;  %v1965_v44 = vrot.slane %v20659_v48, %v20589_v18  ;;  %v11314_v50 = vld [vmem:[#allocation6 + $0xe0] sm:$0xff] }
 0x663   : > { %11010 = vmatprep.subr.bf16.mxu0 %v19612_v53  ;;  %v19643_v53 = vld [vmem:[#allocation2 + $0x26e8] ss:$112 sps:$4 sm:$0xff]  }
 0x664   : > { %11155 = vmatpush1.bf16.msra.mxu1 %v19601_v15  ;;  %v11310_v15 = vld [vmem:[#allocation6 + $0xc0] sm:$0xff] }
 0x665   : > { %11156 = vmatprep.subr.bf16.mxu1 %v19609_v34  ;;  %v20663_v34 = vld [vmem:[#allocation4 + $0x10] sm:$0xff]  ;;  %v16685_v8 = vcombine.low %v11310_v15, %v11314_v50 }
 0x666   : > { %11011 = vmatpush1.bf16.msra.mxu0 %v19610_v19  ;;  %v1993_v19 = vrot.slane %v20663_v34, %v20493_v25 }
 0x667   : > { %11012 = vmatprep.subr.bf16.mxu0 %v19618_v55  ;;  %v16686_v55 = vcombine.high %v11310_v15, %v11314_v50  ;;  %v19655_v50 = vld [vmem:[#allocation2 + $0x2a68] ss:$112 sps:$4 sm:$0xff]  }
 0x668   : > { %11157 = vmatpush1.bf16.msra.mxu1 %v19607_v54  ;;  %v16677_v54 = vcombine.low %v11302_v47, %v11306_v27 }
 0x669   : > { %11158 = vmatprep.subr.bf16.mxu1 %v19615_v58  ;;  %v19648_v58 = vld [vmem:[#allocation2 + $0x27cc] ss:$112 sps:$4 sm:$0xff]  }
 0x66a   : > { %11013 = vmatpush1.bf16.msra.mxu0 %v19616_v2 }
 0x66b   : > { %11014 = vmatprep.subr.bf16.mxu0 %v19624_v4  ;;  %v11322_v4 = vld [vmem:[#allocation6 + $0x120] sm:$0xff] }
 0x66c   : > { %11159 = vmatpush1.bf16.msra.mxu1 %v19613_v60  ;;  %v17244_v60 = vadd.f32 %v20614_v13, %v1965_v44  ;;  %v11330_v13 = vld [vmem:[#allocation6 + $0x160] sm:$0xff]  ;;  %v11291_v44 = vld [vmem:[#allocation6 + $0x28] sm:$0xff] }
 0x66d   : > { %11160 = vmatprep.subr.bf16.mxu1 %v19621_v61  ;;  %v11318_v61 = vld [vmem:[#allocation6 + $0x100] sm:$0xff] }
 0x66e   : > { %11015 = vmatpush1.bf16.msra.mxu0 %v19622_v63 }
 0x66f   : > { %11025 = vmatprep.subr.bf16.mxu0 %v19630_v41  ;;  %v19646_v41 = vld [vmem:[#allocation2 + $0x27c8] ss:$112 sps:$4 sm:$0xff]  }
 0x670   : > { %11161 = vmatpush1.bf16.msra.mxu1 %v19619_v62 }
 0x671   : > { %11162 = vmatprep.subr.bf16.mxu1 %v19627_v1  ;;  %11017 = vmatmul.mubr.bf16.vlgmr.msra.gmra.mrb[24].mxu0 %v20420_v23 }
 0x672   : > { %11026 = vmatpush1.bf16.msra.mxu0 %v19628_v16  ;;  %11057 = vmatprep.mubr.bf16.mxu0 %v20028_v0  ;;  %v16694_v16 = vcombine.high %v11318_v61, %v11322_v4 }
 0x673   : > { %14016 = vmatprep.subr.bf16.mxu0 %v16662_v35 }
 0x674   : > { %11163 = vmatpush1.bf16.msra.mxu1 %v19625_v11  ;;  %v19651_v11 = vld [vmem:[#allocation2 + $0x28ac] ss:$112 sps:$4 sm:$0xff]  }
 0x675   : > { %11164 = vmatprep.subr.bf16.mxu1 %v19633_v20  ;;  %v11244_v20 = vmax.f32 %v17244_v60, 0.0  ;;  %v11358_v60 = vld [vmem:[#allocation6 + $0x240] sm:$0xff] }
 0x678   : > { %11165 = vmatpush1.bf16.msra.mxu1 %v19631_v22  ;;  %v11326_v22 = vld [vmem:[#allocation6 + $0x140] sm:$0xff] }
 0x679   : > { %11166 = vmatprep.subr.bf16.mxu1 %v19636_v24  ;;  %v16702_v30 = vcombine.high %v11326_v22, %v11330_v13  ;;  %v16701_v47 = vcombine.low %v11326_v22, %v11330_v13  ;;  %v11374_v22 = vld [vmem:[#allocation6 + $0x2c0] sm:$0xff] }
 0x67a   : > { %v11378_v13 = vld [vmem:[#allocation6 + $0x2e0] sm:$0xff] }
 0x67c   : > { %11167 = vmatpush1.bf16.msra.mxu1 %v19634_v17  ;;  %v19649_v17 = vld [vmem:[#allocation2 + $0x28a8] ss:$112 sps:$4 sm:$0xff]  }
 0x67d   : > { %11168 = vmatprep.subr.bf16.mxu1 %v19639_v7  ;;  %16659 = vmatmul.mubr.msk.bf16.vlgmr.msra.gmra.mrb[24].mxu0 %vm8930_vm0, %v20655_v38  ;;  %v16693_v7 = vcombine.low %v11318_v61, %v11322_v4  ;;  %v11362_v61 = vld [vmem:[#allocation6 + $0x260] sm:$0xff] }
 0x67e   : > { %14017 = vmatpush1.bf16.msra.mxu0 %v16661_v36  ;;  %v11334_v36 = vld [vmem:[#allocation6 + $0x180] sm:$0xff] }
 0x67f   : > { %14018 = vmatprep.subr.bf16.mxu0 %v16670_v37  ;;  %v19652_v37 = vld [vmem:[#allocation2 + $0x2988] ss:$112 sps:$4 sm:$0xff]  }
 0x680   : > { %11169 = vmatpush1.bf16.msra.mxu1 %v19637_v33 }
 0x681   : > { %11170 = vmatprep.subr.bf16.mxu1 %v19642_v52  ;;  %v11338_v52 = vld [vmem:[#allocation6 + $0x1a0] sm:$0xff] }
 0x682   : > { %14019 = vmatpush1.bf16.msra.mxu0 %v16669_v49  ;;  %v16710_v27 = vcombine.high %v11334_v36, %v11338_v52  ;;  %v11342_v49 = vld [vmem:[#allocation6 + $0x1c0] sm:$0xff]  ;;  %v16709_v15 = vcombine.low %v11334_v36, %v11338_v52  ;;  %v11311_v36 = vld [vmem:[#allocation6 + $0xc8] sm:$0xff]  ;;  %v1973_v52 = vrot.slane %v20663_v34, %v20448_v9 }
 0x683   : > { %14020 = vmatprep.subr.bf16.mxu0 %v16678_v45  ;;  %v11287_v45 = vld [vmem:[#allocation6 + $0x8] sm:$0xff] }
 0x684   : > { %11171 = vmatpush1.bf16.msra.mxu1 %v19640_v39  ;;  %v20668_v2 = vpop.f32.mrb[20].mxu0  ;;  %v19657_v39 = vld [vmem:[#allocation2 + $0x2a6c] ss:$112 sps:$4 sm:$0xff]  }
 0x685   : > { %11172 = vmatprep.subr.bf16.mxu1 %v19645_v43  ;;  %v10733_v62 = vpop.f32.mrb[21].mxu0  ;;  %v11346_v43 = vld [vmem:[#allocation6 + $0x1e0] sm:$0xff] }
 0x686   : > { %14021 = vmatpush1.bf16.msra.mxu0 %v16677_v54  ;;  %v17251_v63 = vadd.f32 %v10733_v62, %v1993_v19  ;;  %v10735_v1 = vpop.f32.mrb[22].mxu0  ;;  %v11354_v54 = vld [vmem:[#allocation6 + $0x220] sm:$0xff]  ;;  %v16664_v19 = vcombine.high %v11287_v45, %v11291_v44  ;;  %v16734_v62 = vcombine.high %v11358_v60, %v11362_v61 }
 0x687   : > { %v10736_v5 = vpop.f32.mrb[23].mxu0  ;;  %14022 = vmatprep.subr.bf16.mxu0 %v16686_v55  ;;  %v11299_v1 = vld [vmem:[#allocation6 + $0x68] sm:$0xff] }
 0x688   : > { %11173 = vmatpush1.bf16.msra.mxu1 %v19643_v53  ;;  %v11251_v35 = vmax.f32 %v17251_v63, 0.0  ;;  %v11350_v53 = vld [vmem:[#allocation6 + $0x200] sm:$0xff]  ;;  %v11295_v63 = vld [vmem:[#allocation6 + $0x48] sm:$0xff]  ;;  %v16733_v5 = vcombine.low %v11358_v60, %v11362_v61 }
 0x689   : > { %11174 = vmatprep.subr.bf16.mxu1 %v19648_v58  ;;  %v16717_v58 = vcombine.low %v11342_v49, %v11346_v43  ;;  %v16726_v55 = vcombine.high %v11350_v53, %v11354_v54  ;;  %v16725_v4 = vcombine.low %v11350_v53, %v11354_v54  ;;  %v11323_v53 = vld [vmem:[#allocation6 + $0x128] sm:$0xff]  ;;  %v11390_v54 = vld [vmem:[#allocation6 + $0x340] sm:$0xff] }
 0x68a   : > { %v11265_v24 = vmax.f32 %v11244_v20, %v11251_v35  ;;  %14023 = vmatpush1.bf16.msra.mxu0 %v16685_v8  ;;  %v11370_v8 = vld [vmem:[#allocation6 + $0x2a0] sm:$0xff]  ;;  %v11303_v20 = vld [vmem:[#allocation6 + $0x88] sm:$0xff] }
 0x68b   : > { %14024 = vmatprep.subr.bf16.mxu0 %v16694_v16  ;;  %v11307_v35 = vld [vmem:[#allocation6 + $0xa8] sm:$0xff] }
 0x68c   : > { %11175 = vmatpush1.bf16.msra.mxu1 %v19646_v41  ;;  %v20671_v33 = vmax.f32 %v20521_v40, %v11265_v24  ;;  %v16718_v40 = vcombine.high %v11342_v49, %v11346_v43  ;;  %v11366_v41 = vld [vmem:[#allocation6 + $0x280] sm:$0xff]  ;;  %v16671_v24 = vcombine.low %v11295_v63, %v11299_v1  ;;  %v16749_v49 = vcombine.low %v11374_v22, %v11378_v13 }
 0x68d   : > { %11176 = vmatprep.subr.bf16.mxu1 %v19651_v11  ;;  %v16672_v11 = vcombine.high %v11295_v63, %v11299_v1  ;;  %v16742_v16 = vcombine.high %v11366_v41, %v11370_v8 }
 0x68e   : > { %14025 = vmatpush1.bf16.msra.mxu0 %v16693_v7  ;;  %v1969_v7 = vrot.slane %v20659_v48, %v20513_v14  ;;  %v2001_v48 = vrot.slane %v20663_v34, %v20513_v14 }
 0x68f   : > { %14026 = vmatprep.subr.bf16.mxu0 %v16702_v30  ;;  %v16750_v30 = vcombine.high %v11374_v22, %v11378_v13 }
 0x690   : > { %11177 = vmatpush1.bf16.msra.mxu1 %v19649_v17  ;;  %v16741_v17 = vcombine.low %v11366_v41, %v11370_v8  ;;  %v17245_v43 = vadd.f32 %v20616_v6, %v1969_v7 }
 0x691   : > { %11178 = vmatprep.subr.bf16.mxu1 %v19654_v29  ;;  %v16680_v29 = vcombine.high %v11303_v20, %v11307_v35 }
 0x692   : > { %14027 = vmatpush1.bf16.msra.mxu0 %v16701_v47  ;;  %v11382_v47 = vld [vmem:[#allocation6 + $0x300] sm:$0xff]  ;;  %v11245_v6 = vmax.f32 %v17245_v43, 0.0 }
 0x693   : > { %14028 = vmatprep.subr.bf16.mxu0 %v16710_v27  ;;  %v11386_v27 = vld [vmem:[#allocation6 + $0x320] sm:$0xff] }
 0x694   : > { %11179 = vmatpush1.bf16.msra.mxu1 %v19652_v37  ;;  %v11315_v37 = vld [vmem:[#allocation6 + $0xe8] sm:$0xff]  ;;  %v11414_v43 = vld [vmem:[#allocation6 + $0x400] sm:$0xff] }
 0x695   : > { %11189 = vmatprep.subr.bf16.mxu1 %v19657_v39  ;;  %v16679_v39 = vcombine.low %v11303_v20, %v11307_v35  ;;  %v11398_v20 = vld [vmem:[#allocation6 + $0x380] sm:$0xff] }
 0x696   : > { %14029 = vmatpush1.bf16.msra.mxu0 %v16709_v15  ;;  %v11319_v15 = vld [vmem:[#allocation6 + $0x108] sm:$0xff]  ;;  %v11402_v35 = vld [vmem:[#allocation6 + $0x3a0] sm:$0xff] }
 0x697   : > { %11181 = vmatmul.mubr.bf16.vlgmr.msra.gmra.mrb[32].mxu1 %v20420_v23  ;;  %14030 = vmatprep.subr.bf16.mxu0 %v16718_v40  ;;  %v16663_v23 = vcombine.low %v11287_v45, %v11291_v44  ;;  %v16688_v45 = vcombine.high %v11311_v36, %v11315_v37  ;;  %v16758_v44 = vcombine.high %v11382_v47, %v11386_v27 }
 0x698   : > { %11190 = vmatpush1.bf16.msra.mxu1 %v19655_v50  ;;  %11221 = vmatprep.mubr.bf16.mxu1 %v20028_v0  ;;  %v17246_v50 = vadd.f32 %v20631_v31, %v1973_v52  ;;  %v16696_v41 = vcombine.high %v11319_v15, %v11323_v53  ;;  %v16695_v13 = vcombine.low %v11319_v15, %v11323_v53  ;;  %v11339_v52 = vld [vmem:[#allocation6 + $0x1a8] sm:$0xff] }
 0x699   : > { %14180 = vmatprep.subr.bf16.mxu1 %v16664_v19  ;;  %v11394_v19 = vld [vmem:[#allocation6 + $0x360] sm:$0xff] }
 0x69a   : > { %14031 = vmatpush1.bf16.msra.mxu0 %v16717_v58  ;;  %v16766_v8 = vcombine.high %v11390_v54, %v11394_v19  ;;  %v11246_v31 = vmax.f32 %v17246_v50, 0.0 }
 0x69b   : > { %14032 = vmatprep.subr.bf16.mxu0 %v16726_v55 }
 0x69e   : > { %14033 = vmatpush1.bf16.msra.mxu0 %v16725_v4  ;;  %v16687_v4 = vcombine.low %v11311_v36, %v11315_v37  ;;  %v16774_v36 = vcombine.high %v11398_v20, %v11402_v35  ;;  %v11406_v37 = vld [vmem:[#allocation6 + $0x3c0] sm:$0xff] }
 0x69f   : > { %14034 = vmatprep.subr.bf16.mxu0 %v16734_v62  ;;  %v16757_v62 = vcombine.low %v11382_v47, %v11386_v27  ;;  %v11410_v47 = vld [vmem:[#allocation6 + $0x3e0] sm:$0xff] }
 0x6a0   : > { %v16781_v15 = vcombine.low %v11406_v37, %v11410_v47 }
 0x6a2   : > { %14035 = vmatpush1.bf16.msra.mxu0 %v16733_v5  ;;  %v11327_v5 = vld [vmem:[#allocation6 + $0x148] sm:$0xff] }
 0x6a3   : > { %16660 = vmatmul.mubr.msk.bf16.vlgmr.msra.gmra.mrb[32].mxu1 %vm8930_vm0, %v20655_v38  ;;  %14036 = vmatprep.subr.bf16.mxu0 %v16742_v16  ;;  %v1997_v38 = vrot.slane %v20663_v34, %v20589_v18 }
 0x6a4   : > { %14181 = vmatpush1.bf16.msra.mxu1 %v16663_v23 }
 0x6a5   : > { %14182 = vmatprep.subr.bf16.mxu1 %v16672_v11  ;;  %v11331_v11 = vld [vmem:[#allocation6 + $0x168] sm:$0xff] }
 0x6a6   : > { %14037 = vmatpush1.bf16.msra.mxu0 %v16741_v17  ;;  %v16704_v7 = vcombine.high %v11327_v5, %v11331_v11 }
 0x6a7   : > { %14038 = vmatprep.subr.bf16.mxu0 %v16750_v30 }
 0x6a8   : > { %14183 = vmatpush1.bf16.msra.mxu1 %v16671_v24  ;;  %v16765_v24 = vcombine.low %v11390_v54, %v11394_v19  ;;  %v11355_v54 = vld [vmem:[#allocation6 + $0x228] sm:$0xff]  ;;  %v11422_v19 = vld [vmem:[#allocation6 + $0x440] sm:$0xff] }
 0x6a9   : > { %14184 = vmatprep.subr.bf16.mxu1 %v16680_v29  ;;  %v11335_v29 = vld [vmem:[#allocation6 + $0x188] sm:$0xff] }
 0x6aa   : > { %v10895_v40 = vpop.f32.mrb[28].mxu1  ;;  %14039 = vmatpush1.bf16.msra.mxu0 %v16749_v49  ;;  %v11343_v49 = vld [vmem:[#allocation6 + $0x1c8] sm:$0xff] }
 0x6ab   : > { %v17252_v58 = vadd.f32 %v10895_v40, %v1997_v38  ;;  %v10897_v55 = vpop.f32.mrb[29].mxu1  ;;  %14040 = vmatprep.subr.bf16.mxu0 %v16758_v44  ;;  %v16703_v38 = vcombine.low %v11327_v5, %v11331_v11  ;;  %v16711_v44 = vcombine.low %v11335_v29, %v11339_v52  ;;  %v11351_v40 = vld [vmem:[#allocation6 + $0x208] sm:$0xff] }
 0x6ac   : > { %14185 = vmatpush1.bf16.msra.mxu1 %v16679_v39  ;;  %v17253_v60 = vadd.f32 %v10897_v55, %v2001_v48  ;;  %v10899_v61 = vpop.f32.mrb[30].mxu1  ;;  %v16773_v39 = vcombine.low %v11398_v20, %v11402_v35  ;;  %v16782_v48 = vcombine.high %v11406_v37, %v11410_v47  ;;  %v11367_v5 = vld [vmem:[#allocation6 + $0x288] sm:$0xff]  ;;  %v11442_v20 = vld [vmem:[#allocation6 + $0x4e0] sm:$0xff] }
 0x6ad   : > { %v11252_v63 = vmax.f32 %v17252_v58, 0.0  ;;  %v10900_v1 = vpop.f32.mrb[31].mxu1  ;;  %14186 = vmatprep.subr.bf16.mxu1 %v16688_v45  ;;  %v11418_v45 = vld [vmem:[#allocation6 + $0x420] sm:$0xff]  ;;  %v20697_v61 = vpack.c.bf16 %v20671_v33, %v20671_v33  ;;  %v11371_v11 = vld [vmem:[#allocation6 + $0x2a8] sm:$0xff] }
 0x6ae   : > { %v11253_v23 = vmax.f32 %v17253_v60, 0.0  ;;  %14041 = vmatpush1.bf16.msra.mxu0 %v16757_v62  ;;  %v16790_v53 = vcombine.high %v11414_v43, %v11418_v45  ;;  %v11426_v58 = vld [vmem:[#allocation6 + $0x460] sm:$0xff]  ;;  %v16789_v60 = vcombine.low %v11414_v43, %v11418_v45  ;;  %v11359_v62 = vld [vmem:[#allocation6 + $0x248] sm:$0xff] }
 0x6af   : > { %v11266_v16 = vmax.f32 %v11245_v6, %v11252_v63  ;;  %14042 = vmatprep.subr.bf16.mxu0 %v16766_v8  ;;  %v16798_v6 = vcombine.high %v11422_v19, %v11426_v58  ;;  %v11363_v63 = vld [vmem:[#allocation6 + $0x268] sm:$0xff]  ;;  %v11430_v1 = vld [vmem:[#allocation6 + $0x480] sm:$0xff]  ;;  %v16727_v8 = vcombine.low %v11351_v40, %v11355_v54 }
 0x6b0   : > { %v11267_v22 = vmax.f32 %v11246_v31, %v11253_v23  ;;  %14187 = vmatpush1.bf16.msra.mxu1 %v16687_v4  ;;  %v16728_v4 = vcombine.high %v11351_v40, %v11355_v54  ;;  %v16797_v31 = vcombine.low %v11422_v19, %v11426_v58  ;;  %v16736_v23 = vcombine.high %v11359_v62, %v11363_v63  ;;  %v11462_v40 = vld [vmem:[#allocation6 + $0x580] sm:$0xff] }
 0x6b1   : > { %v11273_v17 = vmax.f32 %v20554_v42, %v11266_v16  ;;  %14188 = vmatprep.subr.bf16.mxu1 %v16696_v41  ;;  %v16712_v42 = vcombine.high %v11335_v29, %v11339_v52  ;;  %v11434_v41 = vld [vmem:[#allocation6 + $0x4a0] sm:$0xff]  ;;  %v16735_v35 = vcombine.low %v11359_v62, %v11363_v63  ;;  %v16743_v52 = vcombine.low %v11367_v5, %v11371_v11 }
 0x6b2   : > { %v20689_v30 = vmax.f32 %v20556_v51, %v11267_v22  ;;  %14043 = vmatpush1.bf16.msra.mxu0 %v16765_v24  ;;  %v11347_v51 = vld [vmem:[#allocation6 + $0x1e8] sm:$0xff]  ;;  %v16806_v33 = vcombine.high %v11430_v1, %v11434_v41  ;;  %v11438_v16 = vld [vmem:[#allocation6 + $0x4c0] sm:$0xff]  ;;  %v16805_v22 = vcombine.low %v11430_v1, %v11434_v41 }
 0x6b3   : > { %v20691_v27 = vpack.c.bf16 %v11273_v17, %v11273_v17  ;;  %14044 = vmatprep.subr.bf16.mxu0 %v16774_v36  ;;  %v16720_v50 = vcombine.high %v11343_v49, %v11347_v51  ;;  %v16719_v55 = vcombine.low %v11343_v49, %v11347_v51  ;;  %v11375_v24 = vld [vmem:[#allocation6 + $0x2c8] sm:$0xff]  ;;  %v16814_v17 = vcombine.high %v11438_v16, %v11442_v20  ;;  %v11446_v29 = vld [vmem:[#allocation6 + $0x500] sm:$0xff] }
 0x6b4   : > { %14189 = vmatpush1.bf16.msra.mxu1 %v16695_v13  ;;  %v16744_v13 = vcombine.high %v11367_v5, %v11371_v11  ;;  %v11450_v36 = vld [vmem:[#allocation6 + $0x520] sm:$0xff]  ;;  %v16813_v37 = vcombine.low %v11438_v16, %v11442_v20 }
 0x6b5   : > { %14048 = vmatprep.mubr.bf16.mxu0 %v20691_v27  ;;  %14190 = vmatprep.subr.bf16.mxu1 %v16704_v7  ;;  %v11379_v7 = vld [vmem:[#allocation6 + $0x2e8] sm:$0xff]  ;;  %v11458_v49 = vld [vmem:[#allocation6 + $0x560] sm:$0xff]  ;;  %v16821_v43 = vcombine.low %v11446_v29, %v11450_v36 }
 0x6b6   : > { %14212 = vmatprep.mubr.bf16.mxu1 %v20691_v27  ;;  %14045 = vmatpush1.bf16.msra.mxu0 %v16773_v39  ;;  %v16752_v47 = vcombine.high %v11375_v24, %v11379_v7  ;;  %v16822_v39 = vcombine.high %v11446_v29, %v11450_v36  ;;  %v16751_v51 = vcombine.low %v11375_v24, %v11379_v7  ;;  %v11470_v62 = vld [vmem:[#allocation6 + $0x5c0] sm:$0xff] }
 0x6b7   : > { %14046 = vmatprep.subr.bf16.mxu0 %v16782_v48  ;;  %v11454_v48 = vld [vmem:[#allocation6 + $0x540] sm:$0xff] }
 0x6b8   : > { %14191 = vmatpush1.bf16.msra.mxu1 %v16703_v38  ;;  %v11383_v38 = vld [vmem:[#allocation6 + $0x308] sm:$0xff]  ;;  %v16829_v19 = vcombine.low %v11454_v48, %v11458_v49  ;;  %v11478_v5 = vld [vmem:[#allocation6 + $0x600] sm:$0xff] }
 0x6b9   : > { %14192 = vmatprep.subr.bf16.mxu1 %v16712_v42  ;;  %v11387_v42 = vld [vmem:[#allocation6 + $0x328] sm:$0xff]  ;;  %v11486_v24 = vld [vmem:[#allocation6 + $0x640] sm:$0xff] }
 0x6ba   : > { %14047 = vmatpush1.bf16.msra.mxu0 %v16781_v15  ;;  %v16760_v45 = vcombine.high %v11383_v38, %v11387_v42  ;;  %v16830_v15 = vcombine.high %v11454_v48, %v11458_v49  ;;  %v16759_v54 = vcombine.low %v11383_v38, %v11387_v42  ;;  %v20702_v38 = vld [vmem:[#allocation6 + $0x820] sm:$0xff] }
 0x6bb   : > { %14057 = vmatprep.subr.bf16.mxu0 %v16790_v53  ;;  %v11466_v53 = vld [vmem:[#allocation6 + $0x5a0] sm:$0xff] }
 0x6bc   : > { %14193 = vmatpush1.bf16.msra.mxu1 %v16711_v44  ;;  %v11391_v44 = vld [vmem:[#allocation6 + $0x348] sm:$0xff]  ;;  %v16837_v1 = vcombine.low %v11462_v40, %v11466_v53  ;;  %v11494_v42 = vld [vmem:[#allocation6 + $0x680] sm:$0xff] }
 0x6bd   : > { %14194 = vmatprep.subr.bf16.mxu1 %v16720_v50  ;;  %14049 = vmatmul.mubr.bf16.vlgmr.msra.gmra.mrb[28].mxu0 %v20697_v61  ;;  %v11395_v50 = vld [vmem:[#allocation6 + $0x368] sm:$0xff]  ;;  %v11498_v48 = vld [vmem:[#allocation6 + $0x6a0] sm:$0xff] }
 0x6be   : > { %14058 = vmatpush1.bf16.msra.mxu0 %v16789_v60  ;;  %v16768_v58 = vcombine.high %v11391_v44, %v11395_v50  ;;  %v16838_v60 = vcombine.high %v11462_v40, %v11466_v53  ;;  %v16767_v63 = vcombine.low %v11391_v44, %v11395_v50  ;;  %v11431_v44 = vld [vmem:[#allocation6 + $0x488] sm:$0xff]  ;;  %v11502_v40 = vld [vmem:[#allocation6 + $0x6c0] sm:$0xff] }
 0x6bf   : > { %14059 = vmatprep.subr.bf16.mxu0 %v16798_v6  ;;  %v11474_v6 = vld [vmem:[#allocation6 + $0x5e0] sm:$0xff]  ;;  %v11435_v50 = vld [vmem:[#allocation6 + $0x4a8] sm:$0xff] }
 0x6c0   : > { %14195 = vmatpush1.bf16.msra.mxu1 %v16719_v55  ;;  %v11399_v55 = vld [vmem:[#allocation6 + $0x388] sm:$0xff]  ;;  %v16845_v16 = vcombine.low %v11470_v62, %v11474_v6  ;;  %v11506_v53 = vld [vmem:[#allocation6 + $0x6e0] sm:$0xff] }
 0x6c1   : > { %14196 = vmatprep.subr.bf16.mxu1 %v16728_v4  ;;  %v11403_v4 = vld [vmem:[#allocation6 + $0x3a8] sm:$0xff] }
 0x6c2   : > { %14060 = vmatpush1.bf16.msra.mxu0 %v16797_v31  ;;  %v16776_v41 = vcombine.high %v11399_v55, %v11403_v4  ;;  %v16846_v31 = vcombine.high %v11470_v62, %v11474_v6  ;;  %v16775_v11 = vcombine.low %v11399_v55, %v11403_v4  ;;  %v11439_v55 = vld [vmem:[#allocation6 + $0x4c8] sm:$0xff]  ;;  %v11510_v62 = vld [vmem:[#allocation6 + $0x700] sm:$0xff] }
 0x6c3   : > { %14061 = vmatprep.subr.bf16.mxu0 %v16806_v33  ;;  %v11482_v33 = vld [vmem:[#allocation6 + $0x620] sm:$0xff]  ;;  %v11443_v4 = vld [vmem:[#allocation6 + $0x4e8] sm:$0xff] }
 0x6c4   : > { %14197 = vmatpush1.bf16.msra.mxu1 %v16727_v8  ;;  %v11407_v8 = vld [vmem:[#allocation6 + $0x3c8] sm:$0xff]  ;;  %v16853_v29 = vcombine.low %v11478_v5, %v11482_v33  ;;  %v11514_v6 = vld [vmem:[#allocation6 + $0x720] sm:$0xff] }
 0x6c5   : > { %14198 = vmatprep.subr.bf16.mxu1 %v16736_v23  ;;  %v11411_v23 = vld [vmem:[#allocation6 + $0x3e8] sm:$0xff] }
 0x6c6   : > { %14062 = vmatpush1.bf16.msra.mxu0 %v16805_v22  ;;  %v16784_v20 = vcombine.high %v11407_v8, %v11411_v23  ;;  %v16854_v22 = vcombine.high %v11478_v5, %v11482_v33  ;;  %v16783_v7 = vcombine.low %v11407_v8, %v11411_v23  ;;  %v11447_v8 = vld [vmem:[#allocation6 + $0x508] sm:$0xff]  ;;  %v11518_v5 = vld [vmem:[#allocation6 + $0x740] sm:$0xff] }
 0x6c7   : > { %14063 = vmatprep.subr.bf16.mxu0 %v16814_v17  ;;  %v11490_v17 = vld [vmem:[#allocation6 + $0x660] sm:$0xff]  ;;  %v11451_v23 = vld [vmem:[#allocation6 + $0x528] sm:$0xff] }
 0x6c8   : > { %14199 = vmatpush1.bf16.msra.mxu1 %v16735_v35  ;;  %v11415_v35 = vld [vmem:[#allocation6 + $0x408] sm:$0xff]  ;;  %v11522_v33 = vld [vmem:[#allocation6 + $0x760] sm:$0xff] }
 0x6c9   : > { %14200 = vmatprep.subr.bf16.mxu1 %v16744_v13  ;;  %v11419_v13 = vld [vmem:[#allocation6 + $0x428] sm:$0xff] }
 0x6ca   : > { %14064 = vmatpush1.bf16.msra.mxu0 %v16813_v37  ;;  %v16792_v36 = vcombine.high %v11415_v35, %v11419_v13  ;;  %v16862_v37 = vcombine.high %v11486_v24, %v11490_v17 }
 0x6cb   : > { %14065 = vmatprep.subr.bf16.mxu0 %v16822_v39  ;;  %v11427_v39 = vld [vmem:[#allocation6 + $0x468] sm:$0xff] }
 0x6cc   : > { %14201 = vmatpush1.bf16.msra.mxu1 %v16743_v52  ;;  %v11423_v52 = vld [vmem:[#allocation6 + $0x448] sm:$0xff] }
 0x6cd   : > { %14202 = vmatprep.subr.bf16.mxu1 %v16752_v47  ;;  %v20700_v47 = vld [vmem:[#allocation6 + $0x800] sm:$0xff] }
 0x6ce   : > { %14066 = vmatpush1.bf16.msra.mxu0 %v16821_v43  ;;  %v16917_v49 = vcombine.low %v20700_v47, %v20702_v38  ;;  %v16861_v43 = vcombine.low %v11486_v24, %v11490_v17  ;;  %v11526_v24 = vld [vmem:[#allocation6 + $0x780] sm:$0xff] }
 0x6cf   : > { %14067 = vmatprep.subr.bf16.mxu0 %v16830_v15  ;;  %v16870_v15 = vcombine.high %v11494_v42, %v11498_v48  ;;  %v11530_v17 = vld [vmem:[#allocation6 + $0x7a0] sm:$0xff] }
 0x6d0   : > { %14203 = vmatpush1.bf16.msra.mxu1 %v16751_v51  ;;  %v16791_v51 = vcombine.low %v11415_v35, %v11419_v13  ;;  %v11455_v35 = vld [vmem:[#allocation6 + $0x548] sm:$0xff] }
 0x6d1   : > { %14204 = vmatprep.subr.bf16.mxu1 %v16760_v45  ;;  %v16800_v45 = vcombine.high %v11423_v52, %v11427_v39  ;;  %v11459_v13 = vld [vmem:[#allocation6 + $0x568] sm:$0xff] }
 0x6d2   : > { %14068 = vmatpush1.bf16.msra.mxu0 %v16829_v19  ;;  %v16869_v19 = vcombine.low %v11494_v42, %v11498_v48  ;;  %v11534_v42 = vld [vmem:[#allocation6 + $0x7c0] sm:$0xff] }
 0x6d3   : > { %14069 = vmatprep.subr.bf16.mxu0 %v16838_v60  ;;  %v16878_v60 = vcombine.high %v11502_v40, %v11506_v53  ;;  %v11538_v48 = vld [vmem:[#allocation6 + $0x7e0] sm:$0xff] }
 0x6d4   : > { %14205 = vmatpush1.bf16.msra.mxu1 %v16759_v54  ;;  %v16799_v54 = vcombine.low %v11423_v52, %v11427_v39  ;;  %v11463_v52 = vld [vmem:[#allocation6 + $0x588] sm:$0xff] }
 0x6d5   : > { %14206 = vmatprep.subr.bf16.mxu1 %v16768_v58  ;;  %v16808_v58 = vcombine.high %v11431_v44, %v11435_v50  ;;  %v11467_v39 = vld [vmem:[#allocation6 + $0x5a8] sm:$0xff] }
 0x6d6   : > { %14070 = vmatpush1.bf16.msra.mxu0 %v16837_v1  ;;  %v16877_v1 = vcombine.low %v11502_v40, %v11506_v53  ;;  %v16839_v40 = vcombine.low %v11463_v52, %v11467_v39  ;;  %v16909_v53 = vcombine.low %v11534_v42, %v11538_v48 }
 0x6d7   : > { %14071 = vmatprep.subr.bf16.mxu0 %v16846_v31  ;;  %v16886_v31 = vcombine.high %v11510_v62, %v11514_v6 }
 0x6d8   : > { %14207 = vmatpush1.bf16.msra.mxu1 %v16767_v63  ;;  %v16807_v63 = vcombine.low %v11431_v44, %v11435_v50  ;;  %v16910_v44 = vcombine.high %v11534_v42, %v11538_v48  ;;  %v11475_v50 = vld [vmem:[#allocation6 + $0x5e8] sm:$0xff] }
 0x6d9   : > { %14208 = vmatprep.subr.bf16.mxu1 %v16776_v41  ;;  %v16816_v41 = vcombine.high %v11439_v55, %v11443_v4  ;;  %v11535_v42 = vld [vmem:[#allocation6 + $0x7c8] sm:$0xff] }
 0x6da   : > { %14072 = vmatpush1.bf16.msra.mxu0 %v16845_v16  ;;  %v16885_v16 = vcombine.low %v11510_v62, %v11514_v6  ;;  %v11487_v62 = vld [vmem:[#allocation6 + $0x648] sm:$0xff] }
 0x6db   : > { %14073 = vmatprep.subr.bf16.mxu0 %v16854_v22  ;;  %v16894_v22 = vcombine.high %v11518_v5, %v11522_v33  ;;  %v11491_v6 = vld [vmem:[#allocation6 + $0x668] sm:$0xff] }
 0x6dc   : > { %14209 = vmatpush1.bf16.msra.mxu1 %v16775_v11  ;;  %v16815_v11 = vcombine.low %v11439_v55, %v11443_v4  ;;  %v11483_v55 = vld [vmem:[#allocation6 + $0x628] sm:$0xff] }
 0x6dd   : > { %14210 = vmatprep.subr.bf16.mxu1 %v16784_v20  ;;  %v16824_v20 = vcombine.high %v11447_v8, %v11451_v23  ;;  %v11539_v48 = vld [vmem:[#allocation6 + $0x7e8] sm:$0xff] }
 0x6de   : > { %14074 = vmatpush1.bf16.msra.mxu0 %v16853_v29  ;;  %v16893_v29 = vcombine.low %v11518_v5, %v11522_v33  ;;  %v11503_v5 = vld [vmem:[#allocation6 + $0x6c8] sm:$0xff] }
 0x6df   : > { %14075 = vmatprep.subr.bf16.mxu0 %v16862_v37  ;;  %v16902_v37 = vcombine.high %v11526_v24, %v11530_v17  ;;  %v11507_v33 = vld [vmem:[#allocation6 + $0x6e8] sm:$0xff] }
 0x6e0   : > { %14211 = vmatpush1.bf16.msra.mxu1 %v16783_v7  ;;  %v16823_v7 = vcombine.low %v11447_v8, %v11451_v23  ;;  %v11499_v8 = vld [vmem:[#allocation6 + $0x6a8] sm:$0xff] }
 0x6e1   : > { %14221 = vmatprep.subr.bf16.mxu1 %v16792_v36  ;;  %v16832_v36 = vcombine.high %v11455_v35, %v11459_v13 }
 0x6e2   : > { %14076 = vmatpush1.bf16.msra.mxu0 %v16861_v43  ;;  %v16901_v43 = vcombine.low %v11526_v24, %v11530_v17  ;;  %v11519_v24 = vld [vmem:[#allocation6 + $0x748] sm:$0xff] }
 0x6e3   : > { %14213 = vmatmul.mubr.bf16.vlgmr.msra.gmra.mrb[36].mxu1 %v20697_v61  ;;  %14077 = vmatprep.subr.bf16.mxu0 %v16870_v15  ;;  %v11471_v15 = vld [vmem:[#allocation6 + $0x5c8] sm:$0xff] }
 0x6e4   : > { %14222 = vmatpush1.bf16.msra.mxu1 %v16791_v51  ;;  %v16831_v51 = vcombine.low %v11455_v35, %v11459_v13  ;;  %v11515_v35 = vld [vmem:[#allocation6 + $0x728] sm:$0xff] }
 0x6e5   : > { %14223 = vmatprep.subr.bf16.mxu1 %v16800_v45  ;;  %v16840_v45 = vcombine.high %v11463_v52, %v11467_v39  ;;  %v11523_v17 = vld [vmem:[#allocation6 + $0x768] sm:$0xff] }
 0x6e6   : > { %14078 = vmatpush1.bf16.msra.mxu0 %v16869_v19  ;;  %v16918_v19 = vcombine.high %v20700_v47, %v20702_v38  ;;  %v11531_v52 = vld [vmem:[#allocation6 + $0x7a8] sm:$0xff]  ;;  %v11574_v38 = vld [vmem:[#allocation6 + $0x900] sm:$0xff] }
 0x6e7   : > { %14079 = vmatprep.subr.bf16.mxu0 %v16878_v60  ;;  %v16847_v60 = vcombine.low %v11471_v15, %v11475_v50 }
 0x6e8   : > { %14224 = vmatpush1.bf16.msra.mxu1 %v16799_v54  ;;  %v16848_v54 = vcombine.high %v11471_v15, %v11475_v50  ;;  %v16911_v15 = vcombine.low %v11535_v42, %v11539_v48 }
 0x6e9   : > { %14225 = vmatprep.subr.bf16.mxu1 %v16808_v58  ;;  %v11479_v58 = vld [vmem:[#allocation6 + $0x608] sm:$0xff] }
 0x6ea   : > { %14080 = vmatpush1.bf16.msra.mxu0 %v16877_v1  ;;  %v16856_v4 = vcombine.high %v11479_v58, %v11483_v55  ;;  %v16864_v1 = vcombine.high %v11487_v62, %v11491_v6 }
 0x6eb   : > { %14081 = vmatprep.subr.bf16.mxu0 %v16886_v31  ;;  %v16863_v31 = vcombine.low %v11487_v62, %v11491_v6 }
 0x6ec   : > { %14226 = vmatpush1.bf16.msra.mxu1 %v16807_v63  ;;  %v16855_v63 = vcombine.low %v11479_v58, %v11483_v55 }
 0x6ed   : > { %14227 = vmatprep.subr.bf16.mxu1 %v16816_v41  ;;  %v11495_v41 = vld [vmem:[#allocation6 + $0x688] sm:$0xff] }
 0x6ee   : > { %14082 = vmatpush1.bf16.msra.mxu0 %v16885_v16  ;;  %v16872_v23 = vcombine.high %v11495_v41, %v11499_v8  ;;  %v16880_v16 = vcombine.high %v11503_v5, %v11507_v33 }
 0x6ef   : > { %14083 = vmatprep.subr.bf16.mxu0 %v16894_v22  ;;  %v16879_v22 = vcombine.low %v11503_v5, %v11507_v33 }
 0x6f0   : > { %14228 = vmatpush1.bf16.msra.mxu1 %v16815_v11  ;;  %v16871_v11 = vcombine.low %v11495_v41, %v11499_v8 }
 0x6f1   : > { %14229 = vmatprep.subr.bf16.mxu1 %v16824_v20  ;;  %v11511_v20 = vld [vmem:[#allocation6 + $0x708] sm:$0xff] }
 0x6f2   : > { %14084 = vmatpush1.bf16.msra.mxu0 %v16893_v29  ;;  %v16888_v13 = vcombine.high %v11511_v20, %v11515_v35  ;;  %v16896_v29 = vcombine.high %v11519_v24, %v11523_v17 }
 0x6f3   : > { %14085 = vmatprep.subr.bf16.mxu0 %v16902_v37  ;;  %v16895_v37 = vcombine.low %v11519_v24, %v11523_v17  ;;  %v20729_v24 = vpack.c.bf16 %v20689_v30, %v20689_v30 }
 0x6f4   : > { %14230 = vmatpush1.bf16.msra.mxu1 %v16823_v7  ;;  %v16887_v7 = vcombine.low %v11511_v20, %v11515_v35  ;;  %v11554_v20 = vld [vmem:[#allocation6 + $0x860] sm:$0xff]  ;;  %v11551_v35 = vld [vmem:[#allocation6 + $0x848] sm:$0xff] }
 0x6f5   : > { %14231 = vmatprep.subr.bf16.mxu1 %v16832_v36  ;;  %v11527_v36 = vld [vmem:[#allocation6 + $0x788] sm:$0xff] }
 0x6f6   : > { %14086 = vmatpush1.bf16.msra.mxu0 %v16901_v43  ;;  %v16904_v39 = vcombine.high %v11527_v36, %v11531_v52  ;;  %v16912_v43 = vcombine.high %v11535_v42, %v11539_v48  ;;  %v11566_v42 = vld [vmem:[#allocation6 + $0x8c0] sm:$0xff] }
 0x6f7   : > { %14087 = vmatprep.subr.bf16.mxu0 %v16910_v44  ;;  %v11547_v44 = vld [vmem:[#allocation6 + $0x828] sm:$0xff]  ;;  %v11570_v48 = vld [vmem:[#allocation6 + $0x8e0] sm:$0xff] }
 0x6f8   : > { %14232 = vmatpush1.bf16.msra.mxu1 %v16831_v51  ;;  %v16903_v51 = vcombine.low %v11527_v36, %v11531_v52  ;;  %v11559_v36 = vld [vmem:[#allocation6 + $0x888] sm:$0xff] }
 0x6f9   : > { %14233 = vmatprep.subr.bf16.mxu1 %v16840_v45  ;;  %v11543_v45 = vld [vmem:[#allocation6 + $0x808] sm:$0xff] }
 0x6fa   : > { %14088 = vmatpush1.bf16.msra.mxu0 %v16909_v53  ;;  %v16920_v50 = vcombine.high %v11543_v45, %v11547_v44  ;;  %v1977_v53 = vrot.slane %v20663_v34, %v20451_v12  ;;  %v11563_v52 = vld [vmem:[#allocation6 + $0x8a8] sm:$0xff] }
 0x6fb   : > { %14098 = vmatprep.subr.bf16.mxu0 %v16918_v19 }
 0x6fc   : > { %14234 = vmatpush1.bf16.msra.mxu1 %v16839_v40  ;;  %v20709_v40 = vld [vmem:[#allocation4 + $0x18] sm:$0xf]  ;;  %v17247_v55 = vadd.f32 %v20633_v46, %v1977_v53  ;;  %v11555_v46 = vld [vmem:[#allocation6 + $0x868] sm:$0xff] }
 0x6fd   : > { %14235 = vmatprep.subr.bf16.mxu1 %v16848_v54  ;;  %v1981_v54 = vrot.slane %v20663_v34, %v20534_v3  ;;  %v2005_v19 = vrot.slane %v20709_v40, %v20448_v9  ;;  %v2009_v58 = vrot.slane %v20709_v40, %v20451_v12  ;;  %v16927_v30 = vcombine.low %v11551_v35, %v11555_v46  ;;  %v11579_v53 = vld [vmem:[#allocation6 + $0x928] sm:$0xff] }
 0x6fe   : > { %v11247_v41 = vmax.f32 %v17247_v55, 0.0 }
 0x700   : > { %14236 = vmatpush1.bf16.msra.mxu1 %v16847_v60  ;;  %v17248_v60 = vadd.f32 %v20640_v26, %v1981_v54  ;;  %v16941_v54 = vcombine.low %v11566_v42, %v11570_v48 }
 0x701   : > { %14237 = vmatprep.subr.bf16.mxu1 %v16856_v4 }
 0x704   : > { %14238 = vmatpush1.bf16.msra.mxu1 %v16855_v63 }
 0x705   : > { %14239 = vmatprep.subr.bf16.mxu1 %v16864_v1 }
 0x708   : > { %14240 = vmatpush1.bf16.msra.mxu1 %v16863_v31 }
 0x709   : > { %14241 = vmatprep.subr.bf16.mxu1 %v16872_v23  ;;  %v11248_v23 = vmax.f32 %v17248_v60, 0.0  ;;  %v11582_v60 = vld [vmem:[#allocation6 + $0x940] sm:$0xff] }
 0x70c   : > { %14242 = vmatpush1.bf16.msra.mxu1 %v16871_v11  ;;  %v11550_v11 = vld [vmem:[#allocation6 + $0x840] sm:$0xff] }
 0x70d   : > { %14243 = vmatprep.subr.bf16.mxu1 %v16880_v16  ;;  %v16926_v17 = vcombine.high %v11550_v11, %v11554_v20 }
 0x710   : > { %14244 = vmatpush1.bf16.msra.mxu1 %v16879_v22 }
 0x711   : > { %14245 = vmatprep.subr.bf16.mxu1 %v16888_v13  ;;  %v16919_v13 = vcombine.low %v11543_v45, %v11547_v44  ;;  %v16935_v44 = vcombine.low %v11559_v36, %v11563_v52 }
 0x714   : > { %14246 = vmatpush1.bf16.msra.mxu1 %v16887_v7  ;;  %v16928_v7 = vcombine.high %v11551_v35, %v11555_v46  ;;  %v11598_v35 = vld [vmem:[#allocation6 + $0x9c0] sm:$0xff]  ;;  %v19699_v46 = vld [vmem:[#allocation4 + $0x10] sm:$0xff] }
 0x715   : > { %14247 = vmatprep.subr.bf16.mxu1 %v16896_v29  ;;  %v11558_v29 = vld [vmem:[#allocation6 + $0x880] sm:$0xff] }
 0x718   : > { %14248 = vmatpush1.bf16.msra.mxu1 %v16895_v37 }
 0x719   : > { %14249 = vmatprep.subr.bf16.mxu1 %v16904_v39  ;;  %v16936_v39 = vcombine.high %v11559_v36, %v11563_v52  ;;  %v2013_v36 = vrot.slane %v20709_v40, %v20534_v3 }
 0x71c   : > { %14250 = vmatpush1.bf16.msra.mxu1 %v16903_v51  ;;  %v11567_v51 = vld [vmem:[#allocation6 + $0x8c8] sm:$0xff] }
 0x71d   : > { %14251 = vmatprep.subr.bf16.mxu1 %v16912_v43  ;;  %v11571_v43 = vld [vmem:[#allocation6 + $0x8e8] sm:$0xff] }
 0x71e   : > { %v16944_v47 = vcombine.high %v11567_v51, %v11571_v43 }
 0x720   : > { %14252 = vmatpush1.bf16.msra.mxu1 %v16911_v15  ;;  %v16942_v15 = vcombine.high %v11566_v42, %v11570_v48  ;;  %v11606_v42 = vld [vmem:[#allocation6 + $0xa00] sm:$0xff] }
 0x721   : > { %14262 = vmatprep.subr.bf16.mxu1 %v16920_v50  ;;  %v11575_v50 = vld [vmem:[#allocation6 + $0x908] sm:$0xff] }
 0x722   : > { %v16952_v55 = vcombine.high %v11575_v50, %v11579_v53 }
 0x750   : > { %v11059_v4 = vpop.f32.mrb[24].mxu0 }
 0x751   : > { %v17254_v62 = vadd.f32 %v11059_v4, %v2005_v19  ;;  %v11061_v6 = vpop.f32.mrb[25].mxu0  ;;  %v16943_v19 = vcombine.low %v11567_v51, %v11571_v43  ;;  %v11586_v4 = vld [vmem:[#allocation6 + $0x960] sm:$0xff]  ;;  %v11607_v43 = vld [vmem:[#allocation6 + $0xa08] sm:$0xff] }
 0x752   : > { %v17255_v63 = vadd.f32 %v11061_v6, %v2009_v58  ;;  %v11063_v1 = vpop.f32.mrb[26].mxu0  ;;  %v11587_v6 = vld [vmem:[#allocation6 + $0x968] sm:$0xff]  ;;  %v11610_v51 = vld [vmem:[#allocation6 + $0xa20] sm:$0xff] }
 0x753   : > { %v11254_v8 = vmax.f32 %v17254_v62, 0.0  ;;  %v11064_v31 = vpop.f32.mrb[27].mxu0  ;;  %v11583_v62 = vld [vmem:[#allocation6 + $0x948] sm:$0xff]  ;;  %v16951_v1 = vcombine.low %v11575_v50, %v11579_v53 }
 0x754   : > { %v11255_v34 = vmax.f32 %v17255_v63, 0.0  ;;  %v11590_v31 = vld [vmem:[#allocation6 + $0x980] sm:$0xff] }
 0x755   : > { %v11268_v5 = vmax.f32 %v11247_v41, %v11254_v8  ;;  %v16958_v41 = vcombine.high %v11582_v60, %v11586_v4  ;;  %v16960_v8 = vcombine.high %v11583_v62, %v11587_v6 }
 0x756   : > { %v11269_v33 = vmax.f32 %v11248_v23, %v11255_v34  ;;  %v11594_v23 = vld [vmem:[#allocation6 + $0x9a0] sm:$0xff]  ;;  %v11591_v34 = vld [vmem:[#allocation6 + $0x988] sm:$0xff] }
 0x757   : > { %v11275_v16 = vmax.f32 %v20574_v56, %v11268_v5  ;;  %v11562_v56 = vld [vmem:[#allocation6 + $0x8a0] sm:$0xff]  ;;  %v11595_v5 = vld [vmem:[#allocation6 + $0x9a8] sm:$0xff]  ;;  %v16965_v52 = vcombine.low %v11590_v31, %v11594_v23 }
 0x758   : > { %v20723_v26 = vmax.f32 %v20576_v57, %v11269_v33  ;;  %v16925_v57 = vcombine.low %v11550_v11, %v11554_v20  ;;  %v16934_v37 = vcombine.high %v11558_v29, %v11562_v56  ;;  %v16933_v45 = vcombine.low %v11558_v29, %v11562_v56  ;;  %v11603_v29 = vld [vmem:[#allocation6 + $0x9e8] sm:$0xff] }
 0x759   : > { %v20725_v22 = vpack.c.bf16 %v11275_v16, %v11275_v16  ;;  %v16957_v33 = vcombine.low %v11582_v60, %v11586_v4  ;;  %v16959_v11 = vcombine.low %v11583_v62, %v11587_v6  ;;  %v16966_v16 = vcombine.high %v11590_v31, %v11594_v23  ;;  %v11618_v4 = vld [vmem:[#allocation6 + $0xa60] sm:$0xff]  ;;  %v11615_v62 = vld [vmem:[#allocation6 + $0xa48] sm:$0xff] }
 0x75a   : > { %v16968_v20 = vcombine.high %v11591_v34, %v11595_v5  ;;  %v1989_v56 = vrot.slane %v19699_v46, %v20490_v21 }
 0x75b   : > { %14089 = vmatprep.mubr.bf16.mxu0 %v20725_v22  ;;  %14253 = vmatprep.mubr.bf16.mxu1 %v20725_v22 }
 0x75c   : > { %14090 = vmatmul.mubr.bf16.vlgmr.msra.gmra.mrb[28].mxu0 %v20729_v24  ;;  %14254 = vmatmul.mubr.bf16.vlgmr.msra.gmra.mrb[36].mxu1 %v20729_v24 }
 0x75d   : > { %14099 = vmatpush1.bf16.msra.mxu0 %v16917_v49  ;;  %14263 = vmatpush1.bf16.msra.mxu1 %v16919_v13  ;;  %v11578_v49 = vld [vmem:[#allocation6 + $0x920] sm:$0xff]  ;;  %v1985_v13 = vrot.slane %v19699_v46, %v20561_v10 }
 0x75e   : > { %14100 = vmatprep.subr.bf16.mxu0 %v16926_v17  ;;  %14264 = vmatprep.subr.bf16.mxu1 %v16928_v7  ;;  %v16950_v58 = vcombine.high %v11574_v38, %v11578_v49  ;;  %v16949_v63 = vcombine.low %v11574_v38, %v11578_v49  ;;  %v11602_v17 = vld [vmem:[#allocation6 + $0x9e0] sm:$0xff]  ;;  %v11599_v7 = vld [vmem:[#allocation6 + $0x9c8] sm:$0xff] }
 0x75f   : > { %v17249_v48 = vadd.f32 %v20642_v59, %v1985_v13  ;;  %v16973_v49 = vcombine.low %v11598_v35, %v11602_v17  ;;  %v16975_v50 = vcombine.low %v11599_v7, %v11603_v29 }
 0x761   : > { %14101 = vmatpush1.bf16.msra.mxu0 %v16925_v57  ;;  %14265 = vmatpush1.bf16.msra.mxu1 %v16927_v30  ;;  %v16967_v57 = vcombine.low %v11591_v34, %v11595_v5  ;;  %v2017_v30 = vrot.slane %v20709_v40, %v20561_v10  ;;  %v11249_v59 = vmax.f32 %v17249_v48, 0.0  ;;  %v11622_v5 = vld [vmem:[#allocation6 + $0xa80] sm:$0xff]  ;;  %v11639_v48 = vld [vmem:[#allocation6 + $0xb08] sm:$0xff] }
 0x762   : > { %14102 = vmatprep.subr.bf16.mxu0 %v16934_v37  ;;  %14266 = vmatprep.subr.bf16.mxu1 %v16936_v39  ;;  %v16974_v37 = vcombine.high %v11598_v35, %v11602_v17  ;;  %v16976_v39 = vcombine.high %v11599_v7, %v11603_v29 }
 0x765   : > { %14103 = vmatpush1.bf16.msra.mxu0 %v16933_v45  ;;  %14267 = vmatpush1.bf16.msra.mxu1 %v16935_v44  ;;  %v11611_v45 = vld [vmem:[#allocation6 + $0xa28] sm:$0xff]  ;;  %v17250_v44 = vadd.f32 %v20668_v2, %v1989_v56  ;;  %v11630_v56 = vld [vmem:[#allocation6 + $0xac0] sm:$0xff] }
 0x766   : > { %14104 = vmatprep.subr.bf16.mxu0 %v16942_v15  ;;  %14268 = vmatprep.subr.bf16.mxu1 %v16944_v47  ;;  %v11619_v2 = vld [vmem:[#allocation6 + $0xa68] sm:$0xff] }
 0x767   : > { %v11250_v6 = vmax.f32 %v17250_v44, 0.0  ;;  %v16992_v34 = vcombine.high %v11615_v62, %v11619_v2  ;;  %v16991_v17 = vcombine.low %v11615_v62, %v11619_v2 }
 0x769   : > { %14105 = vmatpush1.bf16.msra.mxu0 %v16941_v54  ;;  %14269 = vmatpush1.bf16.msra.mxu1 %v16943_v19  ;;  %v16982_v54 = vcombine.high %v11606_v42, %v11610_v51  ;;  %v16984_v19 = vcombine.high %v11607_v43, %v11611_v45 }
 0x76a   : > { %14106 = vmatprep.subr.bf16.mxu0 %v16950_v58  ;;  %14270 = vmatprep.subr.bf16.mxu1 %v16952_v55  ;;  %v11614_v58 = vld [vmem:[#allocation6 + $0xa40] sm:$0xff] }
 0x76b   : > { %v16990_v23 = vcombine.high %v11614_v58, %v11618_v4  ;;  %v16989_v13 = vcombine.low %v11614_v58, %v11618_v4  ;;  %v11654_v58 = vld [vmem:[#allocation6 + $0xb80] sm:$0xff] }
 0x76d   : > { %14107 = vmatpush1.bf16.msra.mxu0 %v16949_v63  ;;  %14271 = vmatpush1.bf16.msra.mxu1 %v16951_v1 }
 0x76e   : > { %14108 = vmatprep.subr.bf16.mxu0 %v16958_v41  ;;  %14272 = vmatprep.subr.bf16.mxu1 %v16960_v8  ;;  %v16981_v41 = vcombine.low %v11606_v42, %v11610_v51  ;;  %v16983_v8 = vcombine.low %v11607_v43, %v11611_v45  ;;  %v11642_v42 = vld [vmem:[#allocation6 + $0xb20] sm:$0xff]  ;;  %v11643_v51 = vld [vmem:[#allocation6 + $0xb28] sm:$0xff] }
 0x771   : > { %14109 = vmatpush1.bf16.msra.mxu0 %v16957_v33  ;;  %14273 = vmatpush1.bf16.msra.mxu1 %v16959_v11  ;;  %v11626_v11 = vld [vmem:[#allocation6 + $0xaa0] sm:$0xff] }
 0x772   : > { %14110 = vmatprep.subr.bf16.mxu0 %v16966_v16  ;;  %14274 = vmatprep.subr.bf16.mxu1 %v16968_v20  ;;  %v11623_v16 = vld [vmem:[#allocation6 + $0xa88] sm:$0xff]  ;;  %v16998_v7 = vcombine.high %v11622_v5, %v11626_v11 }
 0x773   : > { %v11627_v20 = vld [vmem:[#allocation6 + $0xaa8] sm:$0xff] }
 0x774   : > { %v17000_v29 = vcombine.high %v11623_v16, %v11627_v20 }
 0x775   : > { %14111 = vmatpush1.bf16.msra.mxu0 %v16965_v52  ;;  %14275 = vmatpush1.bf16.msra.mxu1 %v16967_v57  ;;  %v11635_v52 = vld [vmem:[#allocation6 + $0xae8] sm:$0xff]  ;;  %v16999_v57 = vcombine.low %v11623_v16, %v11627_v20 }
 0x776   : > { %v11223_v15 = vpop.f32.mrb[32].mxu1  ;;  %14112 = vmatprep.subr.bf16.mxu0 %v16974_v37  ;;  %14276 = vmatprep.subr.bf16.mxu1 %v16976_v39  ;;  %v11638_v39 = vld [vmem:[#allocation6 + $0xb00] sm:$0xff]  ;;  %v11671_v16 = vld [vmem:[#allocation6 + $0xc08] sm:$0xff] }
 0x777   : > { %v17256_v47 = vadd.f32 %v11223_v15, %v2013_v36  ;;  %v11225_v38 = vpop.f32.mrb[33].mxu1  ;;  %v11631_v36 = vld [vmem:[#allocation6 + $0xac8] sm:$0xff]  ;;  %v17014_v44 = vcombine.high %v11638_v39, %v11642_v42  ;;  %v17016_v15 = vcombine.high %v11639_v48, %v11643_v51 }
 0x778   : > { %v17257_v40 = vadd.f32 %v11225_v38, %v2017_v30  ;;  %v11227_v53 = vpop.f32.mrb[34].mxu1  ;;  %v17008_v37 = vcombine.high %v11631_v36, %v11635_v52  ;;  %v17007_v45 = vcombine.low %v11631_v36, %v11635_v52  ;;  %v11650_v38 = vld [vmem:[#allocation6 + $0xb60] sm:$0xff]  ;;  %v11675_v20 = vld [vmem:[#allocation6 + $0xc28] sm:$0xff] }
 0x779   : > { %v11256_v55 = vmax.f32 %v17256_v47, 0.0  ;;  %v11228_v60 = vpop.f32.mrb[35].mxu1  ;;  %14113 = vmatpush1.bf16.msra.mxu0 %v16973_v49  ;;  %14277 = vmatpush1.bf16.msra.mxu1 %v16975_v50  ;;  %v11646_v47 = vld [vmem:[#allocation6 + $0xb40] sm:$0xff]  ;;  %v11647_v49 = vld [vmem:[#allocation6 + $0xb48] sm:$0xff]  ;;  %v17015_v53 = vcombine.low %v11639_v48, %v11643_v51 }
 0x77a   : > { %v11257_v63 = vmax.f32 %v17257_v40, 0.0  ;;  %14114 = vmatprep.subr.bf16.mxu0 %v16982_v54  ;;  %14278 = vmatprep.subr.bf16.mxu1 %v16984_v19  ;;  %v11651_v50 = vld [vmem:[#allocation6 + $0xb68] sm:$0xff]  ;;  %v17013_v40 = vcombine.low %v11638_v39, %v11642_v42  ;;  %v17022_v54 = vcombine.high %v11646_v47, %v11650_v38  ;;  %v17021_v4 = vcombine.low %v11646_v47, %v11650_v38  ;;  %v11686_v42 = vld [vmem:[#allocation6 + $0xc80] sm:$0xff] }
 0x77b   : > { %v11270_v1 = vmax.f32 %v11249_v59, %v11256_v55  ;;  %v17024_v19 = vcombine.high %v11647_v49, %v11651_v50  ;;  %v11658_v59 = vld [vmem:[#allocation6 + $0xba0] sm:$0xff]  ;;  %v11655_v55 = vld [vmem:[#allocation6 + $0xb88] sm:$0xff]  ;;  %v17023_v62 = vcombine.low %v11647_v49, %v11651_v50 }
 0x77c   : > { %v11271_v31 = vmax.f32 %v11250_v6, %v11257_v63  ;;  %v11659_v60 = vld [vmem:[#allocation6 + $0xba8] sm:$0xff]  ;;  %v17030_v2 = vcombine.high %v11654_v58, %v11658_v59  ;;  %v11662_v63 = vld [vmem:[#allocation6 + $0xbc0] sm:$0xff] }
 0x77d   : > { %v11277_v33 = vmax.f32 %v20602_v28, %v11270_v1  ;;  %14115 = vmatpush1.bf16.msra.mxu0 %v16981_v41  ;;  %14279 = vmatpush1.bf16.msra.mxu1 %v16983_v8  ;;  %v11634_v28 = vld [vmem:[#allocation6 + $0xae0] sm:$0xff]  ;;  %v17032_v6 = vcombine.high %v11655_v55, %v11659_v60  ;;  %v11663_v41 = vld [vmem:[#allocation6 + $0xbc8] sm:$0xff] }
 0x77e   : > { %v20748_v35 = vmax.f32 %v20604_v32, %v11271_v31  ;;  %14116 = vmatprep.subr.bf16.mxu0 %v16990_v23  ;;  %14280 = vmatprep.subr.bf16.mxu1 %v16992_v34  ;;  %v16997_v32 = vcombine.low %v11622_v5, %v11626_v11  ;;  %v17006_v30 = vcombine.high %v11630_v56, %v11634_v28  ;;  %v11666_v1 = vld [vmem:[#allocation6 + $0xbe0] sm:$0xff]  ;;  %v11667_v8 = vld [vmem:[#allocation6 + $0xbe8] sm:$0xff] }
 0x77f   : > { %v20750_v46 = vpack.c.bf16 %v11277_v33, %v11277_v33  ;;  %v17005_v43 = vcombine.low %v11630_v56, %v11634_v28  ;;  %v17029_v31 = vcombine.low %v11654_v58, %v11658_v59  ;;  %v17031_v23 = vcombine.low %v11655_v55, %v11659_v60  ;;  %v11670_v33 = vld [vmem:[#allocation6 + $0xc00] sm:$0xff]  ;;  %v11679_v36 = vld [vmem:[#allocation6 + $0xc48] sm:$0xff] }
 0x780   : > { %v17038_v34 = vcombine.high %v11662_v63, %v11666_v1  ;;  %v17040_v5 = vcombine.high %v11663_v41, %v11667_v8  ;;  %v11674_v11 = vld [vmem:[#allocation6 + $0xc20] sm:$0xff]  ;;  %v11683_v52 = vld [vmem:[#allocation6 + $0xc68] sm:$0xff] }
 0x781   : > { %14130 = vmatprep.mubr.bf16.mxu0 %v20750_v46  ;;  %14294 = vmatprep.mubr.bf16.mxu1 %v20750_v46  ;;  %v11678_v56 = vld [vmem:[#allocation6 + $0xc40] sm:$0xff]  ;;  %v17056_v39 = vcombine.high %v11679_v36, %v11683_v52  ;;  %v11687_v51 = vld [vmem:[#allocation6 + $0xc88] sm:$0xff] }
 0x782   : > { %14117 = vmatpush1.bf16.msra.mxu0 %v16989_v13  ;;  %14281 = vmatpush1.bf16.msra.mxu1 %v16991_v17  ;;  %v17037_v13 = vcombine.low %v11662_v63, %v11666_v1  ;;  %v17039_v17 = vcombine.low %v11663_v41, %v11667_v8  ;;  %v11682_v28 = vld [vmem:[#allocation6 + $0xc60] sm:$0xff]  ;;  %v11695_v49 = vld [vmem:[#allocation6 + $0xcc8] sm:$0xff] }
 0x783   : > { %14118 = vmatprep.subr.bf16.mxu0 %v16998_v7  ;;  %14282 = vmatprep.subr.bf16.mxu1 %v17000_v29  ;;  %v17046_v7 = vcombine.high %v11670_v33, %v11674_v11  ;;  %v17048_v29 = vcombine.high %v11671_v16, %v11675_v20  ;;  %v11690_v48 = vld [vmem:[#allocation6 + $0xca0] sm:$0xff]  ;;  %v11699_v50 = vld [vmem:[#allocation6 + $0xce8] sm:$0xff] }
 0x784   : > { %v11694_v47 = vld [vmem:[#allocation6 + $0xcc0] sm:$0xff]  ;;  %v11703_v55 = vld [vmem:[#allocation6 + $0xd08] sm:$0xff] }
 0x785   : > { %v11698_v38 = vld [vmem:[#allocation6 + $0xce0] sm:$0xff]  ;;  %v11707_v60 = vld [vmem:[#allocation6 + $0xd28] sm:$0xff] }
 0x786   : > { %14119 = vmatpush1.bf16.msra.mxu0 %v16997_v32  ;;  %14283 = vmatpush1.bf16.msra.mxu1 %v16999_v57  ;;  %v17045_v32 = vcombine.low %v11670_v33, %v11674_v11  ;;  %v17047_v57 = vcombine.low %v11671_v16, %v11675_v20  ;;  %v11702_v58 = vld [vmem:[#allocation6 + $0xd00] sm:$0xff]  ;;  %v11711_v41 = vld [vmem:[#allocation6 + $0xd48] sm:$0xff] }
 0x787   : > { %14120 = vmatprep.subr.bf16.mxu0 %v17006_v30  ;;  %14284 = vmatprep.subr.bf16.mxu1 %v17008_v37  ;;  %v20756_v30 = vpack.c.bf16 %v20723_v26, %v20723_v26  ;;  %v17054_v37 = vcombine.high %v11678_v56, %v11682_v28  ;;  %v17062_v26 = vcombine.high %v11686_v42, %v11690_v48  ;;  %v11706_v59 = vld [vmem:[#allocation6 + $0xd20] sm:$0xff]  ;;  %v11715_v8 = vld [vmem:[#allocation6 + $0xd68] sm:$0xff] }
 0x788   : > { %v11710_v63 = vld [vmem:[#allocation6 + $0xd40] sm:$0xff]  ;;  %v11719_v16 = vld [vmem:[#allocation6 + $0xd88] sm:$0xff] }
 0x789   : > { %v11714_v1 = vld [vmem:[#allocation6 + $0xd60] sm:$0xff]  ;;  %v11723_v20 = vld [vmem:[#allocation6 + $0xda8] sm:$0xff] }
 0x78a   : > { %14121 = vmatpush1.bf16.msra.mxu0 %v17005_v43  ;;  %14285 = vmatpush1.bf16.msra.mxu1 %v17007_v45  ;;  %v11691_v43 = vld [vmem:[#allocation6 + $0xca8] sm:$0xff]  ;;  %v17053_v45 = vcombine.low %v11678_v56, %v11682_v28  ;;  %v11718_v33 = vld [vmem:[#allocation6 + $0xd80] sm:$0xff] }
 0x78b   : > { %14122 = vmatprep.subr.bf16.mxu0 %v17014_v44  ;;  %14286 = vmatprep.subr.bf16.mxu1 %v17016_v15  ;;  %v17055_v44 = vcombine.low %v11679_v36, %v11683_v52  ;;  %v17064_v15 = vcombine.high %v11687_v51, %v11691_v43  ;;  %v11722_v11 = vld [vmem:[#allocation6 + $0xda0] sm:$0xff]  ;;  %v11727_v36 = vld [vmem:[#allocation6 + $0xdc8] sm:$0xff] }
 0x78c   : > { %v11726_v56 = vld [vmem:[#allocation6 + $0xdc0] sm:$0xff]  ;;  %v11731_v52 = vld [vmem:[#allocation6 + $0xde8] sm:$0xff] }
 0x78d   : > { %v11730_v28 = vld [vmem:[#allocation6 + $0xde0] sm:$0xff] }
 0x78e   : > { %14123 = vmatpush1.bf16.msra.mxu0 %v17013_v40  ;;  %14287 = vmatpush1.bf16.msra.mxu1 %v17015_v53  ;;  %v17061_v40 = vcombine.low %v11686_v42, %v11690_v48  ;;  %v17063_v53 = vcombine.low %v11687_v51, %v11691_v43  ;;  %v11288_v42 = vld [vmem:[#allocation6 + $0x10] sm:$0xff]  ;;  %v11289_v51 = vld [vmem:[#allocation6 + $0x18] sm:$0xff] }
 0x78f   : > { %14124 = vmatprep.subr.bf16.mxu0 %v17022_v54  ;;  %14288 = vmatprep.subr.bf16.mxu1 %v17024_v19  ;;  %v17070_v54 = vcombine.high %v11694_v47, %v11698_v38  ;;  %v17072_v19 = vcombine.high %v11695_v49, %v11699_v50  ;;  %v11292_v48 = vld [vmem:[#allocation6 + $0x30] sm:$0xff]  ;;  %v11293_v43 = vld [vmem:[#allocation6 + $0x38] sm:$0xff] }
 0x792   : > { %14125 = vmatpush1.bf16.msra.mxu0 %v17021_v4  ;;  %14289 = vmatpush1.bf16.msra.mxu1 %v17023_v62  ;;  %v17069_v4 = vcombine.low %v11694_v47, %v11698_v38  ;;  %v17071_v62 = vcombine.low %v11695_v49, %v11699_v50  ;;  %v11296_v47 = vld [vmem:[#allocation6 + $0x50] sm:$0xff]  ;;  %v11297_v49 = vld [vmem:[#allocation6 + $0x58] sm:$0xff] }
 0x793   : > { %14126 = vmatprep.subr.bf16.mxu0 %v17030_v2  ;;  %14290 = vmatprep.subr.bf16.mxu1 %v17032_v6  ;;  %v17078_v2 = vcombine.high %v11702_v58, %v11706_v59  ;;  %v17080_v6 = vcombine.high %v11703_v55, %v11707_v60  ;;  %v11300_v38 = vld [vmem:[#allocation6 + $0x70] sm:$0xff]  ;;  %v11301_v50 = vld [vmem:[#allocation6 + $0x78] sm:$0xff] }
 0x796   : > { %14127 = vmatpush1.bf16.msra.mxu0 %v17029_v31  ;;  %14291 = vmatpush1.bf16.msra.mxu1 %v17031_v23  ;;  %v17077_v31 = vcombine.low %v11702_v58, %v11706_v59  ;;  %v17079_v23 = vcombine.low %v11703_v55, %v11707_v60  ;;  %v16676_v58 = vcombine.high %v11297_v49, %v11301_v50  ;;  %v11304_v59 = vld [vmem:[#allocation6 + $0x90] sm:$0xff]  ;;  %v11305_v60 = vld [vmem:[#allocation6 + $0x98] sm:$0xff] }
 0x797   : > { %14128 = vmatprep.subr.bf16.mxu0 %v17038_v34  ;;  %14292 = vmatprep.subr.bf16.mxu1 %v17040_v5  ;;  %v17086_v34 = vcombine.high %v11710_v63, %v11714_v1  ;;  %v17088_v5 = vcombine.high %v11711_v41, %v11715_v8  ;;  %v11308_v55 = vld [vmem:[#allocation6 + $0xb0] sm:$0xff] }
 0x79a   : > { %14129 = vmatpush1.bf16.msra.mxu0 %v17037_v13  ;;  %14293 = vmatpush1.bf16.msra.mxu1 %v17039_v17  ;;  %v17085_v13 = vcombine.low %v11710_v63, %v11714_v1  ;;  %v17087_v17 = vcombine.low %v11711_v41, %v11715_v8  ;;  %v11312_v63 = vld [vmem:[#allocation6 + $0xd0] sm:$0xff]  ;;  %v11313_v41 = vld [vmem:[#allocation6 + $0xd8] sm:$0xff] }
 0x79b   : > { %14139 = vmatprep.subr.bf16.mxu0 %v17046_v7  ;;  %14303 = vmatprep.subr.bf16.mxu1 %v17048_v29  ;;  %v17094_v7 = vcombine.high %v11718_v33, %v11722_v11  ;;  %v17096_v29 = vcombine.high %v11719_v16, %v11723_v20  ;;  %v11316_v1 = vld [vmem:[#allocation6 + $0xf0] sm:$0xff]  ;;  %v11317_v8 = vld [vmem:[#allocation6 + $0xf8] sm:$0xff] }
 0x79d   : > { %14131 = vmatmul.mubr.bf16.vlgmr.msra.gmra.mrb[28].mxu0 %v20756_v30  ;;  %14295 = vmatmul.mubr.bf16.vlgmr.msra.gmra.mrb[36].mxu1 %v20756_v30 }
 0x79e   : > { %14140 = vmatpush1.bf16.msra.mxu0 %v17045_v32  ;;  %14304 = vmatpush1.bf16.msra.mxu1 %v17047_v57  ;;  %v17093_v32 = vcombine.low %v11718_v33, %v11722_v11  ;;  %v17095_v57 = vcombine.low %v11719_v16, %v11723_v20  ;;  %v11320_v33 = vld [vmem:[#allocation6 + $0x110] sm:$0xff]  ;;  %v11325_v16 = vld [vmem:[#allocation6 + $0x138] sm:$0xff]  ;;  %v16689_v20 = vcombine.low %v11312_v63, %v11316_v1 }
 0x79f   : > { %14141 = vmatprep.subr.bf16.mxu0 %v17054_v37  ;;  %14305 = vmatprep.subr.bf16.mxu1 %v17056_v39  ;;  %v17102_v37 = vcombine.high %v11726_v56, %v11730_v28  ;;  %v17104_v39 = vcombine.high %v11727_v36, %v11731_v52  ;;  %v11324_v11 = vld [vmem:[#allocation6 + $0x130] sm:$0xff] }
 0x7a0   : > { %14171 = vmatprep.mubr.bf16.mxu0 %v20028_v0  ;;  %14335 = vmatprep.mubr.bf16.mxu1 %v20028_v0 }
 0x7a2   : > { %14142 = vmatpush1.bf16.msra.mxu0 %v17053_v45  ;;  %14306 = vmatpush1.bf16.msra.mxu1 %v17055_v44  ;;  %v17101_v45 = vcombine.low %v11726_v56, %v11730_v28  ;;  %v17103_v44 = vcombine.low %v11727_v36, %v11731_v52  ;;  %v11332_v56 = vld [vmem:[#allocation6 + $0x170] sm:$0xff]  ;;  %v11329_v28 = vld [vmem:[#allocation6 + $0x158] sm:$0xff]  ;;  %v16697_v52 = vcombine.low %v11320_v33, %v11324_v11 }
 0x7a3   : > { %14143 = vmatprep.subr.bf16.mxu0 %v17062_v26  ;;  %14307 = vmatprep.subr.bf16.mxu1 %v17064_v15  ;;  %v16666_v26 = vcombine.high %v11288_v42, %v11292_v48  ;;  %v16668_v15 = vcombine.high %v11289_v51, %v11293_v43  ;;  %v11333_v36 = vld [vmem:[#allocation6 + $0x178] sm:$0xff] }
 0x7a6   : > { %14144 = vmatpush1.bf16.msra.mxu0 %v17061_v40  ;;  %14308 = vmatpush1.bf16.msra.mxu1 %v17063_v53  ;;  %v16665_v40 = vcombine.low %v11288_v42, %v11292_v48  ;;  %v20764_v53 = vpack.c.bf16 %v20748_v35, %v20748_v35  ;;  %v16675_v35 = vcombine.low %v11297_v49, %v11301_v50  ;;  %v11340_v42 = vld [vmem:[#allocation6 + $0x1b0] sm:$0xff]  ;;  %v11337_v48 = vld [vmem:[#allocation6 + $0x198] sm:$0xff] }
 0x7a7   : > { %14145 = vmatprep.subr.bf16.mxu0 %v17070_v54  ;;  %14309 = vmatprep.subr.bf16.mxu1 %v17072_v19  ;;  %v16667_v54 = vcombine.low %v11289_v51, %v11293_v43  ;;  %v16674_v19 = vcombine.high %v11296_v47, %v11300_v38  ;;  %v11341_v51 = vld [vmem:[#allocation6 + $0x1b8] sm:$0xff] }
 0x7a8   : > { %v11349_v49 = vld [vmem:[#allocation6 + $0x1f8] sm:$0xff] }
 0x7aa   : > { %14146 = vmatpush1.bf16.msra.mxu0 %v17069_v4  ;;  %14310 = vmatpush1.bf16.msra.mxu1 %v17071_v62  ;;  %v11309_v4 = vld [vmem:[#allocation6 + $0xb8] sm:$0xff]  ;;  %v16673_v62 = vcombine.low %v11296_v47, %v11300_v38  ;;  %v11348_v47 = vld [vmem:[#allocation6 + $0x1f0] sm:$0xff] }
 0x7ab   : > { %14147 = vmatprep.subr.bf16.mxu0 %v17078_v2  ;;  %14311 = vmatprep.subr.bf16.mxu1 %v17080_v6  ;;  %v16682_v2 = vcombine.high %v11304_v59, %v11308_v55  ;;  %v16684_v6 = vcombine.high %v11305_v60, %v11309_v4  ;;  %v11345_v38 = vld [vmem:[#allocation6 + $0x1d8] sm:$0xff] }
 0x7ae   : > { %14148 = vmatpush1.bf16.msra.mxu0 %v17077_v31  ;;  %14312 = vmatpush1.bf16.msra.mxu1 %v17079_v23  ;;  %v16681_v31 = vcombine.low %v11304_v59, %v11308_v55  ;;  %v16683_v23 = vcombine.low %v11305_v60, %v11309_v4  ;;  %v11356_v59 = vld [vmem:[#allocation6 + $0x230] sm:$0xff]  ;;  %v11353_v55 = vld [vmem:[#allocation6 + $0x218] sm:$0xff] }
 0x7af   : > { %14149 = vmatprep.subr.bf16.mxu0 %v17086_v34  ;;  %14313 = vmatprep.subr.bf16.mxu1 %v17088_v5  ;;  %v16690_v34 = vcombine.high %v11312_v63, %v11316_v1  ;;  %v16692_v5 = vcombine.high %v11313_v41, %v11317_v8  ;;  %v11357_v60 = vld [vmem:[#allocation6 + $0x238] sm:$0xff]  ;;  %v11364_v63 = vld [vmem:[#allocation6 + $0x270] sm:$0xff] }
 0x7b0   : > { %v11361_v1 = vld [vmem:[#allocation6 + $0x258] sm:$0xff] }
 0x7b2   : > { %14150 = vmatpush1.bf16.msra.mxu0 %v17085_v13  ;;  %14314 = vmatpush1.bf16.msra.mxu1 %v17087_v17  ;;  %v16691_v13 = vcombine.low %v11313_v41, %v11317_v8  ;;  %v16698_v17 = vcombine.high %v11320_v33, %v11324_v11  ;;  %v11365_v41 = vld [vmem:[#allocation6 + $0x278] sm:$0xff]  ;;  %v11372_v33 = vld [vmem:[#allocation6 + $0x2b0] sm:$0xff] }
 0x7b3   : > { %14151 = vmatprep.subr.bf16.mxu0 %v17094_v7  ;;  %14315 = vmatprep.subr.bf16.mxu1 %v17096_v29  ;;  %v11328_v29 = vld [vmem:[#allocation6 + $0x150] sm:$0xff]  ;;  %v11369_v11 = vld [vmem:[#allocation6 + $0x298] sm:$0xff] }
 0x7b4   : > { %v16705_v43 = vcombine.low %v11328_v29, %v11332_v56 }
 0x7b6   : > { %14152 = vmatpush1.bf16.msra.mxu0 %v17093_v32  ;;  %14316 = vmatpush1.bf16.msra.mxu1 %v17095_v57  ;;  %v16706_v57 = vcombine.high %v11328_v29, %v11332_v56  ;;  %v11380_v29 = vld [vmem:[#allocation6 + $0x2f0] sm:$0xff]  ;;  %v11377_v56 = vld [vmem:[#allocation6 + $0x2d8] sm:$0xff] }
 0x7b7   : > { %14153 = vmatprep.subr.bf16.mxu0 %v17102_v37  ;;  %14317 = vmatprep.subr.bf16.mxu1 %v17104_v39  ;;  %v16708_v37 = vcombine.high %v11329_v28, %v11333_v36  ;;  %v11336_v39 = vld [vmem:[#allocation6 + $0x190] sm:$0xff] }
 0x7b8   : > { %v16713_v50 = vcombine.low %v11336_v39, %v11340_v42 }
 0x7ba   : > { %14154 = vmatpush1.bf16.msra.mxu0 %v17101_v45  ;;  %14318 = vmatpush1.bf16.msra.mxu1 %v17103_v44  ;;  %v16707_v45 = vcombine.low %v11329_v28, %v11333_v36  ;;  %v16714_v44 = vcombine.high %v11336_v39, %v11340_v42  ;;  %v11381_v28 = vld [vmem:[#allocation6 + $0x2f8] sm:$0xff]  ;;  %v11388_v39 = vld [vmem:[#allocation6 + $0x330] sm:$0xff] }
 0x7bb   : > { %14344 = vmatprep.subr.bf16.mxu0 %v16666_v26  ;;  %14508 = vmatprep.subr.bf16.mxu1 %v16668_v15  ;;  %v16716_v26 = vcombine.high %v11337_v48, %v11341_v51  ;;  %v11344_v15 = vld [vmem:[#allocation6 + $0x1d0] sm:$0xff]  ;;  %v11385_v42 = vld [vmem:[#allocation6 + $0x318] sm:$0xff] }
 0x7bc   : > { %v16721_v4 = vcombine.low %v11344_v15, %v11348_v47 }
 0x7bd   : > { %14172 = vmatmul.mubr.bf16.vlgmr.msra.gmra.mrb[28].mxu0 %v20764_v53  ;;  %14336 = vmatmul.mubr.bf16.vlgmr.msra.gmra.mrb[36].mxu1 %v20764_v53 }
 0x7be   : > { %14345 = vmatpush1.bf16.msra.mxu0 %v16665_v40  ;;  %14376 = vmatprep.mubr.bf16.mxu0 %v20691_v27  ;;  %v16715_v40 = vcombine.low %v11337_v48, %v11341_v51  ;;  %v11389_v48 = vld [vmem:[#allocation6 + $0x338] sm:$0xff] }
 0x7bf   : > { %14509 = vmatpush1.bf16.msra.mxu1 %v16667_v54  ;;  %14540 = vmatprep.mubr.bf16.mxu1 %v20691_v27  ;;  %v11321_v27 = vld [vmem:[#allocation6 + $0x118] sm:$0xff]  ;;  %v16722_v54 = vcombine.high %v11344_v15, %v11348_v47  ;;  %v11396_v15 = vld [vmem:[#allocation6 + $0x370] sm:$0xff] }
 0x7c0   : > { %14346 = vmatprep.subr.bf16.mxu0 %v16674_v19  ;;  %14510 = vmatprep.subr.bf16.mxu1 %v16676_v58  ;;  %v16700_v7 = vcombine.high %v11321_v27, %v11325_v16  ;;  %v16699_v32 = vcombine.low %v11321_v27, %v11325_v16  ;;  %v16724_v19 = vcombine.high %v11345_v38, %v11349_v49  ;;  %v11352_v58 = vld [vmem:[#allocation6 + $0x210] sm:$0xff]  ;;  %v11373_v27 = vld [vmem:[#allocation6 + $0x2b8] sm:$0xff] }
 0x7c1   : > { %v16729_v8 = vcombine.low %v11352_v58, %v11356_v59  ;;  %v11393_v47 = vld [vmem:[#allocation6 + $0x358] sm:$0xff] }
 0x7c2   : > { %14347 = vmatpush1.bf16.msra.mxu0 %v16673_v62  ;;  %v16723_v62 = vcombine.low %v11345_v38, %v11349_v49  ;;  %v11397_v38 = vld [vmem:[#allocation6 + $0x378] sm:$0xff] }
 0x7c3   : > { %14511 = vmatpush1.bf16.msra.mxu1 %v16675_v35  ;;  %14348 = vmatprep.subr.bf16.mxu0 %v16682_v2  ;;  %v16730_v35 = vcombine.high %v11352_v58, %v11356_v59  ;;  %v16732_v2 = vcombine.high %v11353_v55, %v11357_v60  ;;  %v11404_v58 = vld [vmem:[#allocation6 + $0x3b0] sm:$0xff]  ;;  %v11401_v59 = vld [vmem:[#allocation6 + $0x398] sm:$0xff] }
 0x7c4   : > { %14512 = vmatprep.subr.bf16.mxu1 %v16684_v6  ;;  %v11360_v6 = vld [vmem:[#allocation6 + $0x250] sm:$0xff] }
 0x7c5   : > { %v16737_v16 = vcombine.low %v11360_v6, %v11364_v63 }
 0x7c6   : > { %14349 = vmatpush1.bf16.msra.mxu0 %v16681_v31  ;;  %v16731_v31 = vcombine.low %v11353_v55, %v11357_v60  ;;  %v11405_v55 = vld [vmem:[#allocation6 + $0x3b8] sm:$0xff] }
 0x7c7   : > { %14513 = vmatpush1.bf16.msra.mxu1 %v16683_v23  ;;  %14350 = vmatprep.subr.bf16.mxu0 %v16690_v34  ;;  %v16738_v23 = vcombine.high %v11360_v6, %v11364_v63  ;;  %v16740_v34 = vcombine.high %v11361_v1, %v11365_v41  ;;  %v11412_v6 = vld [vmem:[#allocation6 + $0x3f0] sm:$0xff]  ;;  %v11409_v63 = vld [vmem:[#allocation6 + $0x3d8] sm:$0xff] }
 0x7c8   : > { %14514 = vmatprep.subr.bf16.mxu1 %v16692_v5  ;;  %v11368_v5 = vld [vmem:[#allocation6 + $0x290] sm:$0xff] }
 0x7c9   : > { %v16745_v36 = vcombine.low %v11368_v5, %v11372_v33 }
 0x7ca   : > { %14351 = vmatpush1.bf16.msra.mxu0 %v16689_v20  ;;  %v16739_v20 = vcombine.low %v11361_v1, %v11365_v41  ;;  %v11413_v1 = vld [vmem:[#allocation6 + $0x3f8] sm:$0xff] }
 0x7cb   : > { %14515 = vmatpush1.bf16.msra.mxu1 %v16691_v13  ;;  %14352 = vmatprep.subr.bf16.mxu0 %v16698_v17  ;;  %v16746_v13 = vcombine.high %v11368_v5, %v11372_v33  ;;  %v16748_v17 = vcombine.high %v11369_v11, %v11373_v27  ;;  %v11420_v5 = vld [vmem:[#allocation6 + $0x430] sm:$0xff]  ;;  %v11417_v33 = vld [vmem:[#allocation6 + $0x418] sm:$0xff] }
 0x7cc   : > { %14516 = vmatprep.subr.bf16.mxu1 %v16700_v7  ;;  %v11376_v7 = vld [vmem:[#allocation6 + $0x2d0] sm:$0xff] }
 0x7cd   : > { %v16753_v51 = vcombine.low %v11376_v7, %v11380_v29 }
 0x7ce   : > { %14353 = vmatpush1.bf16.msra.mxu0 %v16697_v52  ;;  %v16747_v52 = vcombine.low %v11369_v11, %v11373_v27  ;;  %v11421_v11 = vld [vmem:[#allocation6 + $0x438] sm:$0xff] }
 0x7cf   : > { %14517 = vmatpush1.bf16.msra.mxu1 %v16699_v32  ;;  %14354 = vmatprep.subr.bf16.mxu0 %v16706_v57  ;;  %v16754_v32 = vcombine.high %v11376_v7, %v11380_v29  ;;  %v16756_v57 = vcombine.high %v11377_v56, %v11381_v28  ;;  %v11428_v7 = vld [vmem:[#allocation6 + $0x470] sm:$0xff] }
 0x7d0   : > { %14518 = vmatprep.subr.bf16.mxu1 %v16708_v37  ;;  %v11384_v37 = vld [vmem:[#allocation6 + $0x310] sm:$0xff] }
 0x7d1   : > { %v16761_v49 = vcombine.low %v11384_v37, %v11388_v39 }
 0x7d2   : > { %14355 = vmatpush1.bf16.msra.mxu0 %v16705_v43  ;;  %v16755_v43 = vcombine.low %v11377_v56, %v11381_v28  ;;  %v11425_v56 = vld [vmem:[#allocation6 + $0x458] sm:$0xff] }
 0x7d3   : > { %14519 = vmatpush1.bf16.msra.mxu1 %v16707_v45  ;;  %14356 = vmatprep.subr.bf16.mxu0 %v16714_v44  ;;  %v16762_v45 = vcombine.high %v11384_v37, %v11388_v39  ;;  %v16764_v44 = vcombine.high %v11385_v42, %v11389_v48  ;;  %v11429_v28 = vld [vmem:[#allocation6 + $0x478] sm:$0xff] }
 0x7d4   : > { %14520 = vmatprep.subr.bf16.mxu1 %v16716_v26  ;;  %v11392_v26 = vld [vmem:[#allocation6 + $0x350] sm:$0xff]  ;;  %v16804_v37 = vcombine.high %v11425_v56, %v11429_v28  ;;  %v11433_v39 = vld [vmem:[#allocation6 + $0x498] sm:$0xff] }
 0x7d5   : > { %v16769_v60 = vcombine.low %v11392_v26, %v11396_v15 }
 0x7d6   : > { %14357 = vmatpush1.bf16.msra.mxu0 %v16713_v50  ;;  %v16763_v50 = vcombine.low %v11385_v42, %v11389_v48  ;;  %v11437_v42 = vld [vmem:[#allocation6 + $0x4b8] sm:$0xff] }
 0x7d7   : > { %14521 = vmatpush1.bf16.msra.mxu1 %v16715_v40  ;;  %14358 = vmatprep.subr.bf16.mxu0 %v16722_v54  ;;  %v16770_v40 = vcombine.high %v11392_v26, %v11396_v15  ;;  %v16772_v54 = vcombine.high %v11393_v47, %v11397_v38  ;;  %v11444_v26 = vld [vmem:[#allocation6 + $0x4f0] sm:$0xff]  ;;  %v11441_v15 = vld [vmem:[#allocation6 + $0x4d8] sm:$0xff] }
 0x7d8   : > { %14522 = vmatprep.subr.bf16.mxu1 %v16724_v19  ;;  %v11400_v19 = vld [vmem:[#allocation6 + $0x390] sm:$0xff] }
 0x7d9   : > { %v16777_v41 = vcombine.low %v11400_v19, %v11404_v58 }
 0x7da   : > { %14359 = vmatpush1.bf16.msra.mxu0 %v16721_v4  ;;  %v16771_v4 = vcombine.low %v11393_v47, %v11397_v38  ;;  %v11445_v47 = vld [vmem:[#allocation6 + $0x4f8] sm:$0xff] }
 0x7db   : > { %14523 = vmatpush1.bf16.msra.mxu1 %v16723_v62  ;;  %14360 = vmatprep.subr.bf16.mxu0 %v16730_v35  ;;  %v16778_v62 = vcombine.high %v11400_v19, %v11404_v58  ;;  %v16780_v35 = vcombine.high %v11401_v59, %v11405_v55  ;;  %v11449_v19 = vld [vmem:[#allocation6 + $0x518] sm:$0xff] }
 0x7dc   : > { %14524 = vmatprep.subr.bf16.mxu1 %v16732_v2  ;;  %v11408_v2 = vld [vmem:[#allocation6 + $0x3d0] sm:$0xff]  ;;  %v11453_v58 = vld [vmem:[#allocation6 + $0x538] sm:$0xff] }
 0x7dd   : > { %v16785_v27 = vcombine.low %v11408_v2, %v11412_v6 }
 0x7de   : > { %14361 = vmatpush1.bf16.msra.mxu0 %v16729_v8  ;;  %v16779_v8 = vcombine.low %v11401_v59, %v11405_v55  ;;  %v16819_v59 = vcombine.low %v11441_v15, %v11445_v47 }
 0x7df   : > { %14525 = vmatpush1.bf16.msra.mxu1 %v16731_v31  ;;  %14362 = vmatprep.subr.bf16.mxu0 %v16738_v23  ;;  %v16786_v31 = vcombine.high %v11408_v2, %v11412_v6  ;;  %v16788_v23 = vcombine.high %v11409_v63, %v11413_v1  ;;  %v11461_v2 = vld [vmem:[#allocation6 + $0x578] sm:$0xff] }
 0x7e0   : > { %14526 = vmatprep.subr.bf16.mxu1 %v16740_v34  ;;  %v11416_v34 = vld [vmem:[#allocation6 + $0x410] sm:$0xff] }
 0x7e1   : > { %v16793_v29 = vcombine.low %v11416_v34, %v11420_v5 }
 0x7e2   : > { %14363 = vmatpush1.bf16.msra.mxu0 %v16737_v16  ;;  %v16787_v16 = vcombine.low %v11409_v63, %v11413_v1  ;;  %v16827_v63 = vcombine.low %v11449_v19, %v11453_v58 }
 0x7e3   : > { %14527 = vmatpush1.bf16.msra.mxu1 %v16739_v20  ;;  %14364 = vmatprep.subr.bf16.mxu0 %v16746_v13  ;;  %v16794_v20 = vcombine.high %v11416_v34, %v11420_v5  ;;  %v16796_v13 = vcombine.high %v11417_v33, %v11421_v11  ;;  %v11469_v34 = vld [vmem:[#allocation6 + $0x5b8] sm:$0xff] }
 0x7e4   : > { %14528 = vmatprep.subr.bf16.mxu1 %v16748_v17  ;;  %v11424_v17 = vld [vmem:[#allocation6 + $0x450] sm:$0xff] }
 0x7e5   : > { %v16801_v48 = vcombine.low %v11424_v17, %v11428_v7 }
 0x7e6   : > { %14365 = vmatpush1.bf16.msra.mxu0 %v16745_v36  ;;  %v16795_v36 = vcombine.low %v11417_v33, %v11421_v11 }
 0x7e7   : > { %14529 = vmatpush1.bf16.msra.mxu1 %v16747_v52  ;;  %14366 = vmatprep.subr.bf16.mxu0 %v16754_v32  ;;  %v16802_v52 = vcombine.high %v11424_v17, %v11428_v7  ;;  %v11432_v32 = vld [vmem:[#allocation6 + $0x490] sm:$0xff]  ;;  %v11477_v17 = vld [vmem:[#allocation6 + $0x5f8] sm:$0xff] }
 0x7e8   : > { %14530 = vmatprep.subr.bf16.mxu1 %v16756_v57  ;;  %v11436_v57 = vld [vmem:[#allocation6 + $0x4b0] sm:$0xff] }
 0x7e9   : > { %v16809_v38 = vcombine.low %v11432_v32, %v11436_v57 }
 0x7ea   : > { %14367 = vmatpush1.bf16.msra.mxu0 %v16753_v51  ;;  %v16803_v51 = vcombine.low %v11425_v56, %v11429_v28 }
 0x7eb   : > { %14531 = vmatpush1.bf16.msra.mxu1 %v16755_v43  ;;  %14368 = vmatprep.subr.bf16.mxu0 %v16762_v45  ;;  %v16810_v43 = vcombine.high %v11432_v32, %v11436_v57  ;;  %v16812_v45 = vcombine.high %v11433_v39, %v11437_v42  ;;  %v11481_v32 = vld [vmem:[#allocation6 + $0x618] sm:$0xff] }
 0x7ec   : > { %14532 = vmatprep.subr.bf16.mxu1 %v16764_v44  ;;  %v11440_v44 = vld [vmem:[#allocation6 + $0x4d0] sm:$0xff]  ;;  %v11485_v57 = vld [vmem:[#allocation6 + $0x638] sm:$0xff] }
 0x7ee   : > { %14369 = vmatpush1.bf16.msra.mxu0 %v16761_v49  ;;  %v16818_v49 = vcombine.high %v11440_v44, %v11444_v26 }
 0x7ef   : > { %14533 = vmatpush1.bf16.msra.mxu1 %v16763_v50  ;;  %14370 = vmatprep.subr.bf16.mxu0 %v16770_v40  ;;  %v16820_v50 = vcombine.high %v11441_v15, %v11445_v47  ;;  %v11448_v40 = vld [vmem:[#allocation6 + $0x510] sm:$0xff]  ;;  %v16859_v15 = vcombine.low %v11481_v32, %v11485_v57 }
 0x7f0   : > { %14534 = vmatprep.subr.bf16.mxu1 %v16772_v54  ;;  %v11452_v54 = vld [vmem:[#allocation6 + $0x530] sm:$0xff] }
 0x7f1   : > { %v16826_v55 = vcombine.high %v11448_v40, %v11452_v54  ;;  %v16825_v6 = vcombine.low %v11448_v40, %v11452_v54  ;;  %v11501_v40 = vld [vmem:[#allocation6 + $0x6b8] sm:$0xff] }
 0x7f2   : > { %14371 = vmatpush1.bf16.msra.mxu0 %v16769_v60  ;;  %v16828_v60 = vcombine.high %v11449_v19, %v11453_v58 }
 0x7f3   : > { %14535 = vmatpush1.bf16.msra.mxu1 %v16771_v4  ;;  %14372 = vmatprep.subr.bf16.mxu0 %v16778_v62  ;;  %v11456_v4 = vld [vmem:[#allocation6 + $0x550] sm:$0xff] }
 0x7f4   : > { %14536 = vmatprep.subr.bf16.mxu1 %v16780_v35  ;;  %v11460_v62 = vld [vmem:[#allocation6 + $0x570] sm:$0xff]  ;;  %v11457_v35 = vld [vmem:[#allocation6 + $0x558] sm:$0xff] }
 0x7f5   : > { %v16834_v1 = vcombine.high %v11456_v4, %v11460_v62  ;;  %v16833_v5 = vcombine.low %v11456_v4, %v11460_v62  ;;  %v16835_v33 = vcombine.low %v11457_v35, %v11461_v2  ;;  %v11509_v4 = vld [vmem:[#allocation6 + $0x6f8] sm:$0xff] }
 0x7f6   : > { %14373 = vmatpush1.bf16.msra.mxu0 %v16777_v41  ;;  %v16836_v41 = vcombine.high %v11457_v35, %v11461_v2 }
 0x7f7   : > { %14537 = vmatpush1.bf16.msra.mxu1 %v16779_v8  ;;  %14374 = vmatprep.subr.bf16.mxu0 %v16786_v31  ;;  %v11464_v8 = vld [vmem:[#allocation6 + $0x590] sm:$0xff] }
 0x7f8   : > { %14538 = vmatprep.subr.bf16.mxu1 %v16788_v23  ;;  %v11468_v31 = vld [vmem:[#allocation6 + $0x5b0] sm:$0xff]  ;;  %v11465_v23 = vld [vmem:[#allocation6 + $0x598] sm:$0xff] }
 0x7f9   : > { %v16842_v11 = vcombine.high %v11464_v8, %v11468_v31  ;;  %v16841_v7 = vcombine.low %v11464_v8, %v11468_v31  ;;  %v11517_v8 = vld [vmem:[#allocation6 + $0x738] sm:$0xff] }
 0x7fa   : > { %14375 = vmatpush1.bf16.msra.mxu0 %v16785_v27  ;;  %v16844_v27 = vcombine.high %v11465_v23, %v11469_v34 }
 0x7fb   : > { %14539 = vmatpush1.bf16.msra.mxu1 %v16787_v16  ;;  %14385 = vmatprep.subr.bf16.mxu0 %v16794_v20  ;;  %v11472_v16 = vld [vmem:[#allocation6 + $0x5d0] sm:$0xff] }
 0x7fc   : > { %14549 = vmatprep.subr.bf16.mxu1 %v16796_v13  ;;  %v11476_v20 = vld [vmem:[#allocation6 + $0x5f0] sm:$0xff]  ;;  %v11473_v13 = vld [vmem:[#allocation6 + $0x5d8] sm:$0xff] }
 0x7fd   : > { %14377 = vmatmul.mubr.bf16.vlgmr.msra.gmra.mrb[32].mxu0 %v20697_v61  ;;  %v16850_v56 = vcombine.high %v11472_v16, %v11476_v20  ;;  %v16852_v28 = vcombine.high %v11473_v13, %v11477_v17 }
 0x7fe   : > { %14541 = vmatmul.mubr.bf16.vlgmr.msra.gmra.mrb[40].mxu1 %v20697_v61  ;;  %14386 = vmatpush1.bf16.msra.mxu0 %v16793_v29  ;;  %v16811_v61 = vcombine.low %v11433_v39, %v11437_v42  ;;  %v16843_v29 = vcombine.low %v11465_v23, %v11469_v34  ;;  %v16851_v39 = vcombine.low %v11473_v13, %v11477_v17 }
 0x7ff   : > { %14417 = vmatprep.mubr.bf16.mxu0 %v20725_v22  ;;  %14550 = vmatpush1.bf16.msra.mxu1 %v16795_v36  ;;  %v11480_v36 = vld [vmem:[#allocation6 + $0x610] sm:$0xff] }
 0x800   : > { %14581 = vmatprep.mubr.bf16.mxu1 %v20725_v22  ;;  %14387 = vmatprep.subr.bf16.mxu0 %v16802_v52  ;;  %v16817_v22 = vcombine.low %v11440_v44, %v11444_v26  ;;  %v11484_v52 = vld [vmem:[#allocation6 + $0x630] sm:$0xff]  ;;  %v11493_v44 = vld [vmem:[#allocation6 + $0x678] sm:$0xff] }
 0x801   : > { %14551 = vmatprep.subr.bf16.mxu1 %v16804_v37  ;;  %v16849_v37 = vcombine.low %v11472_v16, %v11476_v20  ;;  %v16858_v42 = vcombine.high %v11480_v36, %v11484_v52  ;;  %v16857_v26 = vcombine.low %v11480_v36, %v11484_v52  ;;  %v11525_v16 = vld [vmem:[#allocation6 + $0x778] sm:$0xff] }
 0x802   : > { %14388 = vmatpush1.bf16.msra.mxu0 %v16801_v48  ;;  %v16860_v48 = vcombine.high %v11481_v32, %v11485_v57  ;;  %v11533_v36 = vld [vmem:[#allocation6 + $0x7b8] sm:$0xff] }
 0x803   : > { %14552 = vmatpush1.bf16.msra.mxu1 %v16803_v51  ;;  %14389 = vmatprep.subr.bf16.mxu0 %v16810_v43  ;;  %v11488_v51 = vld [vmem:[#allocation6 + $0x650] sm:$0xff] }
 0x804   : > { %14553 = vmatprep.subr.bf16.mxu1 %v16812_v45  ;;  %v11492_v43 = vld [vmem:[#allocation6 + $0x670] sm:$0xff]  ;;  %v11489_v45 = vld [vmem:[#allocation6 + $0x658] sm:$0xff] }
 0x805   : > { %v16866_v47 = vcombine.high %v11488_v51, %v11492_v43  ;;  %v16865_v54 = vcombine.low %v11488_v51, %v11492_v43  ;;  %v16867_v19 = vcombine.low %v11489_v45, %v11493_v44  ;;  %v11541_v51 = vld [vmem:[#allocation6 + $0x7f8] sm:$0xff] }
 0x806   : > { %14390 = vmatpush1.bf16.msra.mxu0 %v16809_v38  ;;  %v16868_v38 = vcombine.high %v11489_v45, %v11493_v44 }
 0x807   : > { %14554 = vmatpush1.bf16.msra.mxu1 %v16811_v61  ;;  %14391 = vmatprep.subr.bf16.mxu0 %v16818_v49  ;;  %v11496_v61 = vld [vmem:[#allocation6 + $0x690] sm:$0xff] }
 0x808   : > { %14555 = vmatprep.subr.bf16.mxu1 %v16820_v50  ;;  %v11500_v49 = vld [vmem:[#allocation6 + $0x6b0] sm:$0xff]  ;;  %v11497_v50 = vld [vmem:[#allocation6 + $0x698] sm:$0xff] }
 0x809   : > { %v16874_v58 = vcombine.high %v11496_v61, %v11500_v49  ;;  %v16873_v62 = vcombine.low %v11496_v61, %v11500_v49  ;;  %v16875_v35 = vcombine.low %v11497_v50, %v11501_v40  ;;  %v11549_v61 = vld [vmem:[#allocation6 + $0x838] sm:$0xff] }
 0x80a   : > { %14392 = vmatpush1.bf16.msra.mxu0 %v16817_v22  ;;  %v16876_v22 = vcombine.high %v11497_v50, %v11501_v40 }
 0x80b   : > { %14556 = vmatpush1.bf16.msra.mxu1 %v16819_v59  ;;  %14393 = vmatprep.subr.bf16.mxu0 %v16826_v55  ;;  %v11504_v59 = vld [vmem:[#allocation6 + $0x6d0] sm:$0xff] }
 0x80c   : > { %14557 = vmatprep.subr.bf16.mxu1 %v16828_v60  ;;  %v11508_v55 = vld [vmem:[#allocation6 + $0x6f0] sm:$0xff]  ;;  %v11505_v60 = vld [vmem:[#allocation6 + $0x6d8] sm:$0xff] }
 0x80d   : > { %v16882_v2 = vcombine.high %v11504_v59, %v11508_v55  ;;  %v16881_v31 = vcombine.low %v11504_v59, %v11508_v55  ;;  %v16883_v23 = vcombine.low %v11505_v60, %v11509_v4  ;;  %v11553_v59 = vld [vmem:[#allocation6 + $0x858] sm:$0xff] }
 0x80e   : > { %14394 = vmatpush1.bf16.msra.mxu0 %v16825_v6  ;;  %v16884_v6 = vcombine.high %v11505_v60, %v11509_v4  ;;  %v11557_v55 = vld [vmem:[#allocation6 + $0x878] sm:$0xff] }
 0x80f   : > { %14558 = vmatpush1.bf16.msra.mxu1 %v16827_v63  ;;  %14395 = vmatprep.subr.bf16.mxu0 %v16834_v1  ;;  %v11512_v63 = vld [vmem:[#allocation6 + $0x710] sm:$0xff] }
 0x810   : > { %14559 = vmatprep.subr.bf16.mxu1 %v16836_v41  ;;  %v11516_v1 = vld [vmem:[#allocation6 + $0x730] sm:$0xff]  ;;  %v11513_v41 = vld [vmem:[#allocation6 + $0x718] sm:$0xff] }
 0x811   : > { %v16890_v34 = vcombine.high %v11512_v63, %v11516_v1  ;;  %v16889_v20 = vcombine.low %v11512_v63, %v11516_v1  ;;  %v16891_v13 = vcombine.low %v11513_v41, %v11517_v8  ;;  %v11565_v63 = vld [vmem:[#allocation6 + $0x8b8] sm:$0xff] }
 0x812   : > { %14396 = vmatpush1.bf16.msra.mxu0 %v16833_v5  ;;  %v16892_v5 = vcombine.high %v11513_v41, %v11517_v8  ;;  %v16931_v41 = vcombine.low %v11553_v59, %v11557_v55 }
 0x813   : > { %14560 = vmatpush1.bf16.msra.mxu1 %v16835_v33  ;;  %14397 = vmatprep.subr.bf16.mxu0 %v16842_v11  ;;  %v11520_v33 = vld [vmem:[#allocation6 + $0x750] sm:$0xff] }
 0x814   : > { %14561 = vmatprep.subr.bf16.mxu1 %v16844_v27  ;;  %v11524_v11 = vld [vmem:[#allocation6 + $0x770] sm:$0xff]  ;;  %v11521_v27 = vld [vmem:[#allocation6 + $0x758] sm:$0xff] }
 0x815   : > { %v16898_v17 = vcombine.high %v11520_v33, %v11524_v11  ;;  %v16897_v52 = vcombine.low %v11520_v33, %v11524_v11  ;;  %v16899_v32 = vcombine.low %v11521_v27, %v11525_v16  ;;  %v11573_v33 = vld [vmem:[#allocation6 + $0x8f8] sm:$0xff] }
 0x816   : > { %14398 = vmatpush1.bf16.msra.mxu0 %v16841_v7  ;;  %v16900_v7 = vcombine.high %v11521_v27, %v11525_v16 }
 0x817   : > { %14562 = vmatpush1.bf16.msra.mxu1 %v16843_v29  ;;  %14399 = vmatprep.subr.bf16.mxu0 %v16850_v56  ;;  %v11528_v29 = vld [vmem:[#allocation6 + $0x790] sm:$0xff] }
 0x818   : > { %14563 = vmatprep.subr.bf16.mxu1 %v16852_v28  ;;  %v11532_v56 = vld [vmem:[#allocation6 + $0x7b0] sm:$0xff]  ;;  %v11529_v28 = vld [vmem:[#allocation6 + $0x798] sm:$0xff] }
 0x819   : > { %v16906_v57 = vcombine.high %v11528_v29, %v11532_v56  ;;  %v16905_v43 = vcombine.low %v11528_v29, %v11532_v56  ;;  %v16907_v45 = vcombine.low %v11529_v28, %v11533_v36 }
 0x81a   : > { %14400 = vmatpush1.bf16.msra.mxu0 %v16849_v37  ;;  %v16908_v37 = vcombine.high %v11529_v28, %v11533_v36  ;;  %v11584_v36 = vld [vmem:[#allocation6 + $0x950] sm:$0xff] }
 0x81b   : > { %14564 = vmatpush1.bf16.msra.mxu1 %v16851_v39  ;;  %14401 = vmatprep.subr.bf16.mxu0 %v16858_v42  ;;  %v11536_v39 = vld [vmem:[#allocation6 + $0x7d0] sm:$0xff] }
 0x81c   : > { %14565 = vmatprep.subr.bf16.mxu1 %v16860_v48  ;;  %v11540_v42 = vld [vmem:[#allocation6 + $0x7f0] sm:$0xff]  ;;  %v11537_v48 = vld [vmem:[#allocation6 + $0x7d8] sm:$0xff] }
 0x81d   : > { %v16914_v44 = vcombine.high %v11536_v39, %v11540_v42  ;;  %v16913_v49 = vcombine.low %v11536_v39, %v11540_v42  ;;  %v16915_v50 = vcombine.low %v11537_v48, %v11541_v51 }
 0x81e   : > { %14402 = vmatpush1.bf16.msra.mxu0 %v16857_v26  ;;  %v16916_v26 = vcombine.high %v11537_v48, %v11541_v51  ;;  %v11592_v51 = vld [vmem:[#allocation6 + $0x990] sm:$0xff] }
 0x81f   : > { %14566 = vmatpush1.bf16.msra.mxu1 %v16859_v15  ;;  %14403 = vmatprep.subr.bf16.mxu0 %v16866_v47  ;;  %v11544_v15 = vld [vmem:[#allocation6 + $0x810] sm:$0xff] }
 0x820   : > { %14567 = vmatprep.subr.bf16.mxu1 %v16868_v38  ;;  %v11548_v47 = vld [vmem:[#allocation6 + $0x830] sm:$0xff]  ;;  %v11545_v38 = vld [vmem:[#allocation6 + $0x818] sm:$0xff] }
 0x821   : > { %v16922_v40 = vcombine.high %v11544_v15, %v11548_v47  ;;  %v16923_v60 = vcombine.low %v11545_v38, %v11549_v61 }
 0x822   : > { %14404 = vmatpush1.bf16.msra.mxu0 %v16865_v54  ;;  %v16924_v54 = vcombine.high %v11545_v38, %v11549_v61  ;;  %v11600_v61 = vld [vmem:[#allocation6 + $0x9d0] sm:$0xff] }
 0x823   : > { %14568 = vmatpush1.bf16.msra.mxu1 %v16867_v19  ;;  %14405 = vmatprep.subr.bf16.mxu0 %v16874_v58  ;;  %v11552_v19 = vld [vmem:[#allocation6 + $0x850] sm:$0xff] }
 0x824   : > { %14569 = vmatprep.subr.bf16.mxu1 %v16876_v22  ;;  %v11556_v58 = vld [vmem:[#allocation6 + $0x870] sm:$0xff]  ;;  %v16921_v22 = vcombine.low %v11544_v15, %v11548_v47 }
 0x825   : > { %v16930_v4 = vcombine.high %v11552_v19, %v11556_v58  ;;  %v16929_v1 = vcombine.low %v11552_v19, %v11556_v58 }
 0x826   : > { %14406 = vmatpush1.bf16.msra.mxu0 %v16873_v62  ;;  %v11560_v62 = vld [vmem:[#allocation6 + $0x890] sm:$0xff] }
 0x827   : > { %14570 = vmatpush1.bf16.msra.mxu1 %v16875_v35  ;;  %14407 = vmatprep.subr.bf16.mxu0 %v16882_v2  ;;  %v11564_v35 = vld [vmem:[#allocation6 + $0x8b0] sm:$0xff]  ;;  %v16932_v2 = vcombine.high %v11553_v59, %v11557_v55 }
 0x828   : > { %14571 = vmatprep.subr.bf16.mxu1 %v16884_v6  ;;  %v11561_v6 = vld [vmem:[#allocation6 + $0x898] sm:$0xff]  ;;  %v16938_v8 = vcombine.high %v11560_v62, %v11564_v35  ;;  %v16937_v11 = vcombine.low %v11560_v62, %v11564_v35  ;;  %v11608_v59 = vld [vmem:[#allocation6 + $0xa10] sm:$0xff] }
 0x829   : > { %v11612_v55 = vld [vmem:[#allocation6 + $0xa30] sm:$0xff] }
 0x82a   : > { %14408 = vmatpush1.bf16.msra.mxu0 %v16881_v31  ;;  %v16940_v31 = vcombine.high %v11561_v6, %v11565_v63 }
 0x82b   : > { %14572 = vmatpush1.bf16.msra.mxu1 %v16883_v23  ;;  %14409 = vmatprep.subr.bf16.mxu0 %v16890_v34  ;;  %v11568_v23 = vld [vmem:[#allocation6 + $0x8d0] sm:$0xff] }
 0x82c   : > { %14573 = vmatprep.subr.bf16.mxu1 %v16892_v5  ;;  %v11572_v34 = vld [vmem:[#allocation6 + $0x8f0] sm:$0xff]  ;;  %v11569_v5 = vld [vmem:[#allocation6 + $0x8d8] sm:$0xff] }
 0x82d   : > { %v16946_v27 = vcombine.high %v11568_v23, %v11572_v34  ;;  %v16948_v16 = vcombine.high %v11569_v5, %v11573_v33  ;;  %v16947_v29 = vcombine.low %v11569_v5, %v11573_v33  ;;  %v11624_v33 = vld [vmem:[#allocation6 + $0xa90] sm:$0xff] }
 0x82e   : > { %14410 = vmatpush1.bf16.msra.mxu0 %v16889_v20  ;;  %v11576_v20 = vld [vmem:[#allocation6 + $0x910] sm:$0xff] }
 0x82f   : > { %14574 = vmatpush1.bf16.msra.mxu1 %v16891_v13  ;;  %14411 = vmatprep.subr.bf16.mxu0 %v16898_v17  ;;  %v11580_v13 = vld [vmem:[#allocation6 + $0x930] sm:$0xff]  ;;  %v11577_v17 = vld [vmem:[#allocation6 + $0x918] sm:$0xff] }
 0x830   : > { %14575 = vmatprep.subr.bf16.mxu1 %v16900_v7  ;;  %v11581_v7 = vld [vmem:[#allocation6 + $0x938] sm:$0xff]  ;;  %v16954_v56 = vcombine.high %v11576_v20, %v11580_v13 }
 0x831   : > { %v16956_v28 = vcombine.high %v11577_v17, %v11581_v7  ;;  %v16955_v39 = vcombine.low %v11577_v17, %v11581_v7  ;;  %v11632_v7 = vld [vmem:[#allocation6 + $0xad0] sm:$0xff] }
 0x832   : > { %14412 = vmatpush1.bf16.msra.mxu0 %v16897_v52  ;;  %v11588_v52 = vld [vmem:[#allocation6 + $0x970] sm:$0xff] }
 0x833   : > { %14576 = vmatpush1.bf16.msra.mxu1 %v16899_v32  ;;  %14413 = vmatprep.subr.bf16.mxu0 %v16906_v57  ;;  %v11585_v32 = vld [vmem:[#allocation6 + $0x958] sm:$0xff]  ;;  %v16962_v42 = vcombine.high %v11584_v36, %v11588_v52 }
 0x834   : > { %14577 = vmatprep.subr.bf16.mxu1 %v16908_v37  ;;  %v11589_v57 = vld [vmem:[#allocation6 + $0x978] sm:$0xff]  ;;  %v16953_v37 = vcombine.low %v11576_v20, %v11580_v13 }
 0x835   : > { %v16964_v48 = vcombine.high %v11585_v32, %v11589_v57  ;;  %v16963_v15 = vcombine.low %v11585_v32, %v11589_v57  ;;  %v11640_v57 = vld [vmem:[#allocation6 + $0xb10] sm:$0xff] }
 0x836   : > { %14414 = vmatpush1.bf16.msra.mxu0 %v16905_v43  ;;  %v11596_v43 = vld [vmem:[#allocation6 + $0x9b0] sm:$0xff] }
 0x837   : > { %14578 = vmatpush1.bf16.msra.mxu1 %v16907_v45  ;;  %14415 = vmatprep.subr.bf16.mxu0 %v16914_v44  ;;  %v11593_v45 = vld [vmem:[#allocation6 + $0x998] sm:$0xff]  ;;  %v16970_v47 = vcombine.high %v11592_v51, %v11596_v43 }
 0x838   : > { %14579 = vmatprep.subr.bf16.mxu1 %v16916_v26  ;;  %v11597_v44 = vld [vmem:[#allocation6 + $0x9b8] sm:$0xff]  ;;  %v16961_v26 = vcombine.low %v11584_v36, %v11588_v52 }
 0x839   : > { %v16972_v38 = vcombine.high %v11593_v45, %v11597_v44  ;;  %v16971_v19 = vcombine.low %v11593_v45, %v11597_v44  ;;  %v11648_v44 = vld [vmem:[#allocation6 + $0xb50] sm:$0xff] }
 0x83a   : > { %14416 = vmatpush1.bf16.msra.mxu0 %v16913_v49  ;;  %v11604_v49 = vld [vmem:[#allocation6 + $0x9f0] sm:$0xff] }
 0x83b   : > { %14580 = vmatpush1.bf16.msra.mxu1 %v16915_v50  ;;  %14426 = vmatprep.subr.bf16.mxu0 %v16922_v40  ;;  %v11601_v50 = vld [vmem:[#allocation6 + $0x9d8] sm:$0xff]  ;;  %v16978_v58 = vcombine.high %v11600_v61, %v11604_v49  ;;  %v16977_v62 = vcombine.low %v11600_v61, %v11604_v49 }
 0x83c   : > { %14590 = vmatprep.subr.bf16.mxu1 %v16924_v54  ;;  %v11605_v40 = vld [vmem:[#allocation6 + $0x9f8] sm:$0xff]  ;;  %v16969_v54 = vcombine.low %v11592_v51, %v11596_v43 }
 0x83d   : > { %14418 = vmatmul.mubr.bf16.vlgmr.msra.gmra.mrb[32].mxu0 %v20729_v24  ;;  %v16979_v35 = vcombine.low %v11601_v50, %v11605_v40 }
 0x83e   : > { %14582 = vmatmul.mubr.bf16.vlgmr.msra.gmra.mrb[40].mxu1 %v20729_v24  ;;  %14427 = vmatpush1.bf16.msra.mxu0 %v16921_v22  ;;  %v16939_v24 = vcombine.low %v11561_v6, %v11565_v63  ;;  %v16980_v22 = vcombine.high %v11601_v50, %v11605_v40  ;;  %v11616_v63 = vld [vmem:[#allocation6 + $0xa50] sm:$0xff] }
 0x83f   : > { %14458 = vmatprep.mubr.bf16.mxu0 %v20750_v46  ;;  %14591 = vmatpush1.bf16.msra.mxu1 %v16923_v60  ;;  %v11609_v60 = vld [vmem:[#allocation6 + $0xa18] sm:$0xff]  ;;  %v11656_v40 = vld [vmem:[#allocation6 + $0xb90] sm:$0xff] }
 0x840   : > { %14622 = vmatprep.mubr.bf16.mxu1 %v20750_v46  ;;  %14428 = vmatprep.subr.bf16.mxu0 %v16930_v4  ;;  %v16945_v46 = vcombine.low %v11568_v23, %v11572_v34  ;;  %v11613_v4 = vld [vmem:[#allocation6 + $0xa38] sm:$0xff] }
 0x841   : > { %14592 = vmatprep.subr.bf16.mxu1 %v16932_v2  ;;  %v16986_v2 = vcombine.high %v11608_v59, %v11612_v55  ;;  %v16988_v6 = vcombine.high %v11609_v60, %v11613_v4  ;;  %v16987_v23 = vcombine.low %v11609_v60, %v11613_v4  ;;  %v11664_v4 = vld [vmem:[#allocation6 + $0xbd0] sm:$0xff] }
 0x842   : > { %14429 = vmatpush1.bf16.msra.mxu0 %v16929_v1  ;;  %v11620_v1 = vld [vmem:[#allocation6 + $0xa70] sm:$0xff] }
 0x843   : > { %14593 = vmatpush1.bf16.msra.mxu1 %v16931_v41  ;;  %14430 = vmatprep.subr.bf16.mxu0 %v16938_v8  ;;  %v11617_v41 = vld [vmem:[#allocation6 + $0xa58] sm:$0xff]  ;;  %v16994_v34 = vcombine.high %v11616_v63, %v11620_v1 }
 0x844   : > { %14594 = vmatprep.subr.bf16.mxu1 %v16940_v31  ;;  %v11621_v8 = vld [vmem:[#allocation6 + $0xa78] sm:$0xff]  ;;  %v16985_v31 = vcombine.low %v11608_v59, %v11612_v55 }
 0x845   : > { %v16996_v5 = vcombine.high %v11617_v41, %v11621_v8  ;;  %v16995_v20 = vcombine.low %v11617_v41, %v11621_v8  ;;  %v11672_v8 = vld [vmem:[#allocation6 + $0xc10] sm:$0xff] }
 0x846   : > { %14431 = vmatpush1.bf16.msra.mxu0 %v16937_v11  ;;  %v11628_v11 = vld [vmem:[#allocation6 + $0xab0] sm:$0xff] }
 0x847   : > { %14595 = vmatpush1.bf16.msra.mxu1 %v16939_v24  ;;  %14432 = vmatprep.subr.bf16.mxu0 %v16946_v27  ;;  %v11625_v24 = vld [vmem:[#allocation6 + $0xa98] sm:$0xff]  ;;  %v17002_v13 = vcombine.high %v11624_v33, %v11628_v11 }
 0x848   : > { %14596 = vmatprep.subr.bf16.mxu1 %v16948_v16  ;;  %v11629_v27 = vld [vmem:[#allocation6 + $0xab8] sm:$0xff]  ;;  %v16993_v16 = vcombine.low %v11616_v63, %v11620_v1 }
 0x849   : > { %v17004_v17 = vcombine.high %v11625_v24, %v11629_v27  ;;  %v17003_v36 = vcombine.low %v11625_v24, %v11629_v27  ;;  %v11680_v27 = vld [vmem:[#allocation6 + $0xc50] sm:$0xff] }
 0x84a   : > { %14433 = vmatpush1.bf16.msra.mxu0 %v16945_v46  ;;  %v11636_v46 = vld [vmem:[#allocation6 + $0xaf0] sm:$0xff] }
 0x84b   : > { %14597 = vmatpush1.bf16.msra.mxu1 %v16947_v29  ;;  %14434 = vmatprep.subr.bf16.mxu0 %v16954_v56  ;;  %v11633_v29 = vld [vmem:[#allocation6 + $0xad8] sm:$0xff]  ;;  %v17010_v52 = vcombine.high %v11632_v7, %v11636_v46 }
 0x84c   : > { %14598 = vmatprep.subr.bf16.mxu1 %v16956_v28  ;;  %v11637_v56 = vld [vmem:[#allocation6 + $0xaf8] sm:$0xff]  ;;  %v17001_v28 = vcombine.low %v11624_v33, %v11628_v11 }
 0x84d   : > { %v17012_v32 = vcombine.high %v11633_v29, %v11637_v56  ;;  %v17011_v51 = vcombine.low %v11633_v29, %v11637_v56  ;;  %v11688_v56 = vld [vmem:[#allocation6 + $0xc90] sm:$0xff] }
 0x84e   : > { %14435 = vmatpush1.bf16.msra.mxu0 %v16953_v37  ;;  %v11644_v37 = vld [vmem:[#allocation6 + $0xb30] sm:$0xff] }
 0x84f   : > { %14599 = vmatpush1.bf16.msra.mxu1 %v16955_v39  ;;  %14436 = vmatprep.subr.bf16.mxu0 %v16962_v42  ;;  %v11641_v39 = vld [vmem:[#allocation6 + $0xb18] sm:$0xff]  ;;  %v17018_v43 = vcombine.high %v11640_v57, %v11644_v37 }
 0x850   : > { %14600 = vmatprep.subr.bf16.mxu1 %v16964_v48  ;;  %v11645_v42 = vld [vmem:[#allocation6 + $0xb38] sm:$0xff]  ;;  %v17009_v48 = vcombine.low %v11632_v7, %v11636_v46 }
 0x851   : > { %v17020_v45 = vcombine.high %v11641_v39, %v11645_v42  ;;  %v17019_v61 = vcombine.low %v11641_v39, %v11645_v42  ;;  %v11696_v42 = vld [vmem:[#allocation6 + $0xcd0] sm:$0xff] }
 0x852   : > { %14437 = vmatpush1.bf16.msra.mxu0 %v16961_v26  ;;  %v11652_v26 = vld [vmem:[#allocation6 + $0xb70] sm:$0xff] }
 0x853   : > { %14601 = vmatpush1.bf16.msra.mxu1 %v16963_v15  ;;  %14438 = vmatprep.subr.bf16.mxu0 %v16970_v47  ;;  %v11649_v15 = vld [vmem:[#allocation6 + $0xb58] sm:$0xff]  ;;  %v17026_v49 = vcombine.high %v11648_v44, %v11652_v26 }
 0x854   : > { %14602 = vmatprep.subr.bf16.mxu1 %v16972_v38  ;;  %v11653_v47 = vld [vmem:[#allocation6 + $0xb78] sm:$0xff]  ;;  %v17017_v38 = vcombine.low %v11640_v57, %v11644_v37 }
 0x855   : > { %v17028_v50 = vcombine.high %v11649_v15, %v11653_v47  ;;  %v17027_v59 = vcombine.low %v11649_v15, %v11653_v47  ;;  %v11704_v15 = vld [vmem:[#allocation6 + $0xd10] sm:$0xff] }
 0x856   : > { %14439 = vmatpush1.bf16.msra.mxu0 %v16969_v54  ;;  %v11660_v54 = vld [vmem:[#allocation6 + $0xbb0] sm:$0xff] }
 0x857   : > { %14603 = vmatpush1.bf16.msra.mxu1 %v16971_v19  ;;  %14440 = vmatprep.subr.bf16.mxu0 %v16978_v58  ;;  %v11657_v19 = vld [vmem:[#allocation6 + $0xb98] sm:$0xff]  ;;  %v17034_v55 = vcombine.high %v11656_v40, %v11660_v54  ;;  %v11708_v47 = vld [vmem:[#allocation6 + $0xd30] sm:$0xff] }
 0x858   : > { %14604 = vmatprep.subr.bf16.mxu1 %v16980_v22  ;;  %v11661_v58 = vld [vmem:[#allocation6 + $0xbb8] sm:$0xff]  ;;  %v17025_v22 = vcombine.low %v11648_v44, %v11652_v26 }
 0x859   : > { %v17036_v60 = vcombine.high %v11657_v19, %v11661_v58  ;;  %v17035_v63 = vcombine.low %v11657_v19, %v11661_v58  ;;  %v11716_v19 = vld [vmem:[#allocation6 + $0xd70] sm:$0xff]  ;;  %v11713_v58 = vld [vmem:[#allocation6 + $0xd58] sm:$0xff] }
 0x85a   : > { %14441 = vmatpush1.bf16.msra.mxu0 %v16977_v62  ;;  %v11668_v62 = vld [vmem:[#allocation6 + $0xbf0] sm:$0xff] }
 0x85b   : > { %14605 = vmatpush1.bf16.msra.mxu1 %v16979_v35  ;;  %14442 = vmatprep.subr.bf16.mxu0 %v16986_v2  ;;  %v11665_v35 = vld [vmem:[#allocation6 + $0xbd8] sm:$0xff]  ;;  %v17042_v1 = vcombine.high %v11664_v4, %v11668_v62 }
 0x85c   : > { %14606 = vmatprep.subr.bf16.mxu1 %v16988_v6  ;;  %v11669_v2 = vld [vmem:[#allocation6 + $0xbf8] sm:$0xff]  ;;  %v17033_v6 = vcombine.low %v11656_v40, %v11660_v54  ;;  %v17082_v40 = vcombine.high %v11704_v15, %v11708_v47  ;;  %v11712_v54 = vld [vmem:[#allocation6 + $0xd50] sm:$0xff] }
 0x85d   : > { %v17044_v41 = vcombine.high %v11665_v35, %v11669_v2  ;;  %v17043_v33 = vcombine.low %v11665_v35, %v11669_v2  ;;  %v11720_v35 = vld [vmem:[#allocation6 + $0xd90] sm:$0xff] }
 0x85e   : > { %14443 = vmatpush1.bf16.msra.mxu0 %v16985_v31  ;;  %v11676_v31 = vld [vmem:[#allocation6 + $0xc30] sm:$0xff] }
 0x85f   : > { %14607 = vmatpush1.bf16.msra.mxu1 %v16987_v23  ;;  %14444 = vmatprep.subr.bf16.mxu0 %v16994_v34  ;;  %v11673_v23 = vld [vmem:[#allocation6 + $0xc18] sm:$0xff]  ;;  %v17050_v11 = vcombine.high %v11672_v8, %v11676_v31  ;;  %v11724_v2 = vld [vmem:[#allocation6 + $0xdb0] sm:$0xff] }
 0x860   : > { %14608 = vmatprep.subr.bf16.mxu1 %v16996_v5  ;;  %v11677_v34 = vld [vmem:[#allocation6 + $0xc38] sm:$0xff]  ;;  %v17041_v5 = vcombine.low %v11664_v4, %v11668_v62  ;;  %v17090_v4 = vcombine.high %v11712_v54, %v11716_v19 }
 0x861   : > { %v17052_v24 = vcombine.high %v11673_v23, %v11677_v34  ;;  %v17051_v7 = vcombine.low %v11673_v23, %v11677_v34  ;;  %v17089_v23 = vcombine.low %v11712_v54, %v11716_v19  ;;  %v19668_v54 = vld [vmem:[#allocation9 + $0x68] sm:$0xff]  }
 0x862   : > { %14445 = vmatpush1.bf16.msra.mxu0 %v16993_v16  ;;  %v11684_v16 = vld [vmem:[#allocation6 + $0xc70] sm:$0xff] }
 0x863   : > { %14609 = vmatpush1.bf16.msra.mxu1 %v16995_v20  ;;  %14446 = vmatprep.subr.bf16.mxu0 %v17002_v13  ;;  %v11681_v20 = vld [vmem:[#allocation6 + $0xc58] sm:$0xff]  ;;  %v17058_v46 = vcombine.high %v11680_v27, %v11684_v16  ;;  %v19669_v19 = vld [vmem:[#allocation9 + $0x28] sm:$0xff]  }
 0x864   : > { %14610 = vmatprep.subr.bf16.mxu1 %v17004_v17  ;;  %v11685_v13 = vld [vmem:[#allocation6 + $0xc78] sm:$0xff]  ;;  %v17049_v17 = vcombine.low %v11672_v8, %v11676_v31 }
 0x865   : > { %v17060_v29 = vcombine.high %v11681_v20, %v11685_v13  ;;  %v17059_v57 = vcombine.low %v11681_v20, %v11685_v13 }
 0x866   : > { %14447 = vmatpush1.bf16.msra.mxu0 %v17001_v28  ;;  %v11692_v28 = vld [vmem:[#allocation6 + $0xcb0] sm:$0xff] }
 0x867   : > { %14611 = vmatpush1.bf16.msra.mxu1 %v17003_v36  ;;  %14448 = vmatprep.subr.bf16.mxu0 %v17010_v52  ;;  %v11689_v36 = vld [vmem:[#allocation6 + $0xc98] sm:$0xff]  ;;  %v17066_v37 = vcombine.high %v11688_v56, %v11692_v28 }
 0x868   : > { %14612 = vmatprep.subr.bf16.mxu1 %v17012_v32  ;;  %v11693_v52 = vld [vmem:[#allocation6 + $0xcb8] sm:$0xff]  ;;  %v17057_v32 = vcombine.low %v11680_v27, %v11684_v16 }
 0x869   : > { %v17068_v39 = vcombine.high %v11689_v36, %v11693_v52 }
 0x86a   : > { %14449 = vmatpush1.bf16.msra.mxu0 %v17009_v48  ;;  %v11700_v48 = vld [vmem:[#allocation6 + $0xcf0] sm:$0xff] }
 0x86b   : > { %14613 = vmatpush1.bf16.msra.mxu1 %v17011_v51  ;;  %14450 = vmatprep.subr.bf16.mxu0 %v17018_v43  ;;  %v11697_v51 = vld [vmem:[#allocation6 + $0xcd8] sm:$0xff]  ;;  %v17074_v44 = vcombine.high %v11696_v42, %v11700_v48 }
 0x86c   : > { %14614 = vmatprep.subr.bf16.mxu1 %v17020_v45  ;;  %v11701_v43 = vld [vmem:[#allocation6 + $0xcf8] sm:$0xff]  ;;  %v17065_v45 = vcombine.low %v11688_v56, %v11692_v28  ;;  %v17097_v56 = vcombine.low %v11720_v35, %v11724_v2 }
 0x86d   : > { %v17076_v26 = vcombine.high %v11697_v51, %v11701_v43 }
 0x86e   : > { %14451 = vmatpush1.bf16.msra.mxu0 %v17017_v38  ;;  %v11705_v38 = vld [vmem:[#allocation6 + $0xd18] sm:$0xff] }
 0x86f   : > { %14615 = vmatpush1.bf16.msra.mxu1 %v17019_v61  ;;  %14452 = vmatprep.subr.bf16.mxu0 %v17026_v49  ;;  %v11709_v61 = vld [vmem:[#allocation6 + $0xd38] sm:$0xff]  ;;  %v17073_v49 = vcombine.low %v11696_v42, %v11700_v48 }
 0x870   : > { %14616 = vmatprep.subr.bf16.mxu1 %v17028_v50  ;;  %v17075_v50 = vcombine.low %v11697_v51, %v11701_v43 }
 0x872   : > { %14453 = vmatpush1.bf16.msra.mxu0 %v17025_v22  ;;  %v11717_v22 = vld [vmem:[#allocation6 + $0xd78] sm:$0xff] }
 0x873   : > { %14617 = vmatpush1.bf16.msra.mxu1 %v17027_v59  ;;  %14454 = vmatprep.subr.bf16.mxu0 %v17034_v55  ;;  %v17081_v59 = vcombine.low %v11704_v15, %v11708_v47  ;;  %v20782_v55 = vld [vmem:[#allocation7] sm:$0xff]  ;;  %v17092_v62 = vcombine.high %v11713_v58, %v11717_v22  ;;  %v17091_v34 = vcombine.low %v11713_v58, %v11717_v22  ;;  %v19660_v15 = vld [vmem:[#allocation9 + $0x48] sm:$0xff]   ;;  %v19671_v58 = vld [vmem:[#allocation9 + $0x30] sm:$0xff]  }
 0x874   : > { %14618 = vmatprep.subr.bf16.mxu1 %v17036_v60  ;;  %v17083_v60 = vcombine.low %v11705_v38, %v11709_v61  ;;  %v11743_v8 = vrot.slane %v20782_v55, %v20451_v12  ;;  %v11751_v31 = vrot.slane %v20782_v55, %v20561_v10  ;;  %v11733_v12 = vld [vmem:[#allocation6 + $0xdf8] sm:$0xff]  ;;  %v19661_v47 = vld [vmem:[#allocation9 + $0x8] sm:$0xff]   ;;  %v19672_v22 = vld [vmem:[#allocation9 + $0x78] sm:$0xff]  }
 0x876   : > { %14455 = vmatpush1.bf16.msra.mxu0 %v17033_v6  ;;  %v11739_v6 = vrot.slane %v20782_v55, %v20448_v9 }
 0x877   : > { %14619 = vmatpush1.bf16.msra.mxu1 %v17035_v63  ;;  %14456 = vmatprep.subr.bf16.mxu0 %v17042_v1  ;;  %v11747_v63 = vrot.slane %v20782_v55, %v20534_v3  ;;  %v11721_v1 = vld [vmem:[#allocation6 + $0xd98] sm:$0xff]  ;;  %v11732_v3 = vld [vmem:[#allocation6 + $0xdf0] sm:$0xff] }
 0x878   : > { %14620 = vmatprep.subr.bf16.mxu1 %v17044_v41  ;;  %v11725_v41 = vld [vmem:[#allocation6 + $0xdb8] sm:$0xff] }
 0x879   : > { %v17100_v9 = vcombine.high %v11721_v1, %v11725_v41 }
 0x87a   : > { %14457 = vmatpush1.bf16.msra.mxu0 %v17041_v5  ;;  %v17098_v5 = vcombine.high %v11720_v35, %v11724_v2  ;;  %v19676_v35 = vld [vmem:[#allocation12 + $0x10] sm:$0xff]   ;;  %v19677_v2 = vld [vmem:[#allocation12 + $0x18] sm:$0xff]  }
 0x87b   : > { %14621 = vmatpush1.bf16.msra.mxu1 %v17043_v33  ;;  %14467 = vmatprep.subr.bf16.mxu0 %v17050_v11 }
 0x87c   : > { %14631 = vmatprep.subr.bf16.mxu1 %v17052_v24  ;;  %v11728_v24 = vld [vmem:[#allocation6 + $0xdd0] sm:$0xff] }
 0x87d   : > { %14459 = vmatmul.mubr.bf16.vlgmr.msra.gmra.mrb[32].mxu0 %v20756_v30 }
 0x87e   : > { %14623 = vmatmul.mubr.bf16.vlgmr.msra.gmra.mrb[40].mxu1 %v20756_v30  ;;  %14468 = vmatpush1.bf16.msra.mxu0 %v17049_v17  ;;  %v17067_v30 = vcombine.low %v11689_v36, %v11693_v52  ;;  %v11729_v17 = vld [vmem:[#allocation6 + $0xdd8] sm:$0xff] }
 0x87f   : > { %14632 = vmatpush1.bf16.msra.mxu1 %v17051_v7  ;;  %14469 = vmatprep.subr.bf16.mxu0 %v17058_v46  ;;  %v17108_v48 = vcombine.high %v11729_v17, %v11733_v12 }
 0x880   : > { %14633 = vmatprep.subr.bf16.mxu1 %v17060_v29  ;;  %14499 = vmatprep.mubr.bf16.mxu0 %v20028_v0 }
 0x881   : > { %14663 = vmatprep.mubr.bf16.mxu1 %v20028_v0  ;;  %v17084_v0 = vcombine.high %v11705_v38, %v11709_v61  ;;  %v19662_v38 = vld [vmem:[#allocation9 + $0x50] sm:$0xff]  }
 0x882   : > { %14470 = vmatpush1.bf16.msra.mxu0 %v17057_v32  ;;  %v19663_v61 = vld [vmem:[#allocation9 + $0x10] sm:$0xff]  }
 0x883   : > { %14634 = vmatpush1.bf16.msra.mxu1 %v17059_v57  ;;  %14471 = vmatprep.subr.bf16.mxu0 %v17066_v37  ;;  %v17099_v57 = vcombine.low %v11721_v1, %v11725_v41  ;;  %v17106_v37 = vcombine.high %v11728_v24, %v11732_v3  ;;  %v11755_v1 = vrot.slane %v20782_v55, %v20490_v21 }
 0x884   : > { %14635 = vmatprep.subr.bf16.mxu1 %v17068_v39  ;;  %v11763_v41 = vrot.slane %v20782_v55, %v20589_v18 }
 0x886   : > { %14472 = vmatpush1.bf16.msra.mxu0 %v17065_v45  ;;  %v17105_v45 = vcombine.low %v11728_v24, %v11732_v3 }
 0x887   : > { %14636 = vmatpush1.bf16.msra.mxu1 %v17067_v30  ;;  %14473 = vmatprep.subr.bf16.mxu0 %v17074_v44  ;;  %v17107_v30 = vcombine.low %v11729_v17, %v11733_v12  ;;  %v19658_v44 = vld [vmem:[#allocation9 + $0x40] sm:$0xff]  }
 0x888   : > { %14637 = vmatprep.subr.bf16.mxu1 %v17076_v26  ;;  %v19659_v26 = vld [vmem:[#allocation9] sm:$0xff]  }
 0x88a   : > { %14474 = vmatpush1.bf16.msra.mxu0 %v17073_v49  ;;  %v19664_v49 = vld [vmem:[#allocation9 + $0x58] sm:$0xff]  }
 0x88b   : > { %14638 = vmatpush1.bf16.msra.mxu1 %v17075_v50  ;;  %14475 = vmatprep.subr.bf16.mxu0 %v17082_v40  ;;  %v19665_v50 = vld [vmem:[#allocation9 + $0x18] sm:$0xff]   ;;  %v19666_v40 = vld [vmem:[#allocation9 + $0x60] sm:$0xff]  }
 0x88c   : > { %14639 = vmatprep.subr.bf16.mxu1 %v17084_v0  ;;  %v19667_v0 = vld [vmem:[#allocation9 + $0x20] sm:$0xff]  }
 0x88e   : > { %14476 = vmatpush1.bf16.msra.mxu0 %v17081_v59  ;;  %v19673_v59 = vld [vmem:[#allocation9 + $0x38] sm:$0xff]  }
 0x88f   : > { %14640 = vmatpush1.bf16.msra.mxu1 %v17083_v60  ;;  %14477 = vmatprep.subr.bf16.mxu0 %v17090_v4  ;;  %v19674_v60 = vld [vmem:[#allocation12] sm:$0xff]   ;;  %v20029_v4 = vmov 0.0  }
 0x890   : > { %v14173_v33 = vpop.f32.mrb[28].mxu0  ;;  %v14337_v11 = vpop.f32.mrb[36].mxu1  ;;  %14641 = vmatprep.subr.bf16.mxu1 %v17092_v62  ;;  %v19675_v62 = vld [vmem:[#allocation12 + $0x8] sm:$0xff]  }
 0x891   : > { %v17258_v27 = vadd.f32 %v14173_v33, %v11739_v6  ;;  %v17260_v16 = vadd.f32 %v14337_v11, %v11747_v63  ;;  %v14175_v20 = vpop.f32.mrb[29].mxu0  ;;  %v14339_v13 = vpop.f32.mrb[37].mxu1  ;;  %v19678_v6 = vld [vmem:[#allocation12 + $0x20] sm:$0xff]   ;;  %v19679_v63 = vld [vmem:[#allocation12 + $0x28] sm:$0xff]  }
 0x892   : > { %v17259_v7 = vadd.f32 %v14175_v20, %v11743_v8  ;;  %v17261_v46 = vadd.f32 %v14339_v13, %v11751_v31  ;;  %v14177_v10 = vpop.f32.mrb[30].mxu0  ;;  %v14341_v29 = vpop.f32.mrb[38].mxu1  ;;  %14478 = vmatpush1.bf16.msra.mxu0 %v17089_v23  ;;  %v11759_v8 = vrot.slane %v20782_v55, %v20493_v25  ;;  %v11767_v31 = vrot.slane %v20782_v55, %v20513_v14 }
 0x893   : > { %v14672_v28 = vmax.f32 %v17258_v27, 0.0  ;;  %v14674_v36 = vmax.f32 %v17260_v16, 0.0  ;;  %14642 = vmatpush1.bf16.msra.mxu1 %v17091_v34  ;;  %v14178_v52 = vpop.f32.mrb[31].mxu0  ;;  %v14342_v32 = vpop.f32.mrb[39].mxu1  ;;  %14479 = vmatprep.subr.bf16.mxu0 %v17098_v5  ;;  %v19680_v29 = vld [vmem:[#allocation12 + $0x30] sm:$0xff]  }
 0x894   : > { %v14673_v39 = vmax.f32 %v17259_v7, 0.0  ;;  %v14675_v42 = vmax.f32 %v17261_v46, 0.0  ;;  %14643 = vmatprep.subr.bf16.mxu1 %v17100_v9  ;;  %v19684_v52 = vld [vmem:[#allocation15 + $0x10] sm:$0xff]   ;;  %v19685_v32 = vld [vmem:[#allocation15 + $0x18] sm:$0xff]  }
 0x895   : > { %v20792_v51 = vmax.f32 %v14672_v28, %v14674_v36  ;;  %v19682_v28 = vld [vmem:[#allocation15] sm:$0xff]   ;;  %v19683_v36 = vld [vmem:[#allocation15 + $0x8] sm:$0xff]  }
 0x896   : > { %v20794_v43 = vmax.f32 %v14673_v39, %v14675_v42  ;;  %14480 = vmatpush1.bf16.msra.mxu0 %v17097_v56  ;;  %v19681_v56 = vld [vmem:[#allocation12 + $0x38] sm:$0xff]  }
 0x897   : > { %14644 = vmatpush1.bf16.msra.mxu1 %v17099_v57  ;;  %14481 = vmatprep.subr.bf16.mxu0 %v17106_v37  ;;  %v19686_v57 = vld [vmem:[#allocation15 + $0x20] sm:$0xff]   ;;  %v19687_v37 = vld [vmem:[#allocation15 + $0x28] sm:$0xff]   ;;  %v17109_v42 = vld [vmem:[#allocation10] ss:$0 sm:$0xff] }
 0x898   : > { %14645 = vmatprep.subr.bf16.mxu1 %v17108_v48 }
 0x89a   : > { %14482 = vmatpush1.bf16.msra.mxu0 %v17105_v45 }
 0x89b   : > { %14646 = vmatpush1.bf16.msra.mxu1 %v17107_v30  ;;  %17146 = vmatprep.subr.bf16.mxu0 %v19658_v44 }
 0x89c   : > { %17186 = vmatprep.subr.bf16.mxu1 %v20029_v4 }
 0x89d   : > { %14500 = vmatmul.mubr.bf16.vlgmr.msra.gmra.mrb[32].mxu0 %v20764_v53 }
 0x89e   : > { %14664 = vmatmul.mubr.bf16.vlgmr.msra.gmra.mrb[40].mxu1 %v20764_v53  ;;  %17147 = vmatpush3.bf16.msra.mxu0 %v19659_v26  ;;  %v19670_v53 = vld [vmem:[#allocation9 + $0x70] sm:$0xff]  }
 0x89f   : > { %17148 = vmatprep.subr.bf16.mxu0 %v19660_v15  ;;  %17187 = vmatpush3.bf16.msra.mxu1 %v19674_v60  ;;  %v19688_v15 = vld [vmem:[#allocation15 + $0x30] sm:$0xff]  }
 0x8a0   : > { %17188 = vmatprep.subr.bf16.mxu1 %v20029_v4  ;;  %17202 = vmatprep.mubr.msk.bf16.mxu1 %vm20030_vm1, %v20029_v4 }
 0x8a2   : > { %17149 = vmatpush3.bf16.msra.mxu0 %v19661_v47  ;;  %v19689_v47 = vld [vmem:[#allocation15 + $0x38] sm:$0xff]  }
 0x8a3   : > { %17150 = vmatprep.subr.bf16.mxu0 %v19662_v38  ;;  %17189 = vmatpush3.bf16.msra.mxu1 %v19675_v62  ;;  %v17126_v38 = vld [vmem:[#allocation13] ss:$0 sm:$0xff] }
 0x8a4   : > { %17190 = vmatprep.subr.bf16.mxu1 %v20029_v4 }
 0x8a6   : > { %17151 = vmatpush3.bf16.msra.mxu0 %v19663_v61 }
 0x8a7   : > { %17152 = vmatprep.subr.bf16.mxu0 %v19664_v49  ;;  %17191 = vmatpush3.bf16.msra.mxu1 %v19676_v35 }
 0x8a8   : > { %17192 = vmatprep.subr.bf16.mxu1 %v20029_v4 }
 0x8aa   : > { %17153 = vmatpush3.bf16.msra.mxu0 %v19665_v50 }
 0x8ab   : > { %17154 = vmatprep.subr.bf16.mxu0 %v19666_v40  ;;  %17193 = vmatpush3.bf16.msra.mxu1 %v19677_v2 }
 0x8ac   : > { %17194 = vmatprep.subr.bf16.mxu1 %v20029_v4 }
 0x8ae   : > { %17155 = vmatpush3.bf16.msra.mxu0 %v19667_v0 }
 0x8af   : > { %17156 = vmatprep.subr.bf16.mxu0 %v19668_v54  ;;  %17195 = vmatpush3.bf16.msra.mxu1 %v19678_v6 }
 0x8b0   : > { %17196 = vmatprep.subr.bf16.mxu1 %v20029_v4 }
 0x8b2   : > { %17157 = vmatpush3.bf16.msra.mxu0 %v19669_v19 }
 0x8b3   : > { %17158 = vmatprep.subr.bf16.mxu0 %v19670_v53  ;;  %17197 = vmatpush3.bf16.msra.mxu1 %v19679_v63  ;;  %v17135_v53 = vld [vmem:[#allocation16] ss:$0 sm:$0xff] }
 0x8b4   : > { %17198 = vmatprep.subr.bf16.mxu1 %v20029_v4 }
 0x8b6   : > { %17159 = vmatpush3.bf16.msra.mxu0 %v19671_v58 }
 0x8b7   : > { %17160 = vmatprep.subr.bf16.mxu0 %v19672_v22  ;;  %17199 = vmatpush3.bf16.msra.mxu1 %v19680_v29 }
 0x8b8   : > { %17200 = vmatprep.subr.bf16.mxu1 %v20029_v4 }
 0x8ba   : > { %17161 = vmatpush3.bf16.msra.mxu0 %v19673_v59 }
 0x8bb   : > { %17206 = vmatprep.subr.bf16.mxu0 %v20029_v4  ;;  %17201 = vmatpush3.bf16.msra.mxu1 %v19681_v56 }
 0x970   : > { %v14501_v23 = vpop.f32.mrb[32].mxu0 }
 0x971   : > { %v17262_v34 = vadd.f32 %v14501_v23, %v11755_v1  ;;  %v14665_v5 = vpop.f32.mrb[40].mxu1  ;;  %v14503_v33 = vpop.f32.mrb[33].mxu0 }
 0x972   : > { %v17264_v11 = vadd.f32 %v14665_v5, %v11763_v41  ;;  %v17263_v9 = vadd.f32 %v14503_v33, %v11759_v8  ;;  %v14667_v24 = vpop.f32.mrb[41].mxu1  ;;  %v14505_v3 = vpop.f32.mrb[34].mxu0 }
 0x973   : > { %v14676_v27 = vmax.f32 %v17262_v34, 0.0  ;;  %v17265_v16 = vadd.f32 %v14667_v24, %v11767_v31  ;;  %v14669_v21 = vpop.f32.mrb[42].mxu1  ;;  %v14506_v20 = vpop.f32.mrb[35].mxu0 }
 0x974   : > { %v14678_v13 = vmax.f32 %v17264_v11, 0.0  ;;  %v14677_v18 = vmax.f32 %v17263_v9, 0.0  ;;  %v14670_v17 = vpop.f32.mrb[43].mxu1 }
 0x975   : > { %v14679_v12 = vmax.f32 %v17265_v16, 0.0 }
 0x976   : > { %v14682_v25 = vmax.f32 %v14676_v27, %v14678_v13 }
 0x977   : > { %v14683_v7 = vmax.f32 %v14677_v18, %v14679_v12 }
 0x978   : > { %v14684_v14 = vmax.f32 %v20792_v51, %v14682_v25 }
 0x979   : > { %v14685_v55 = vmax.f32 %v20794_v43, %v14683_v7 }
 0x97a   : > { %v14686_v10 = vpack.c.bf16 %v14684_v14, %v14684_v14 }
 0x97b   : > { %v14687_v46 = vpack.c.bf16 %v14685_v55, %v14685_v55 }
 0x97d   : > { %14855 = vmatprep.mubr.bf16.mxu0 %v14687_v46 }
 0x97e   : > { %14856 = vmatmul.mubr.bf16.vlgmr.msra.gmra.mrb[36].mxu0 %v14686_v10 }
 0x97f   : > { %17222 = vmatprep.mubr.msk.bf16.mxu0 %vm20030_vm1, %v20029_v4  ;;  %17207 = vmatpush3.bf16.msra.mxu0 %v19682_v28 }
 0x980   : > { %17208 = vmatprep.subr.bf16.mxu0 %v20029_v4 }
 0x983   : > { %17209 = vmatpush3.bf16.msra.mxu0 %v19683_v36 }
 0x984   : > { %17210 = vmatprep.subr.bf16.mxu0 %v20029_v4 }
 0x987   : > { %17211 = vmatpush3.bf16.msra.mxu0 %v19684_v52 }
 0x988   : > { %17212 = vmatprep.subr.bf16.mxu0 %v20029_v4 }
 0x98b   : > { %17213 = vmatpush3.bf16.msra.mxu0 %v19685_v32 }
 0x98c   : > { %17214 = vmatprep.subr.bf16.mxu0 %v20029_v4 }
 0x98f   : > { %17215 = vmatpush3.bf16.msra.mxu0 %v19686_v57 }
 0x990   : > { %17216 = vmatprep.subr.bf16.mxu0 %v20029_v4 }
 0x993   : > { %17217 = vmatpush3.bf16.msra.mxu0 %v19687_v37 }
 0x994   : > { %17218 = vmatprep.subr.bf16.mxu0 %v20029_v4 }
 0x997   : > { %17219 = vmatpush3.bf16.msra.mxu0 %v19688_v15 }
 0x998   : > { %17220 = vmatprep.subr.bf16.mxu0 %v20029_v4 }
 0x99b   : > { %17221 = vmatpush3.bf16.msra.mxu0 %v19689_v47 }
 0xa51   : > { %v17162_v39 = vpop.f32.mrb[36].mxu0 }
 0xa52   : > { %v17163_v48 = vpop.f32.mrb[37].mxu0 }
 0xa53   : > { %v17164_v51 = vadd.f32 %v17163_v48, %v17162_v39  ;;  %v17165_v43 = vpop.f32.mrb[38].mxu0 }
 0xa54   : > { %v17166_v45 = vpop.f32.mrb[39].mxu0 }
 0xa55   : > { %v14858_v30 = vadd.f32 %v17164_v51, %v17109_v42 }
 0xa57   : > { %v14863_v44 = vmax.f32 %v14858_v30, 0.0 }
 0xa59   : > { %v14864_v26 = vpack.c.bf16 %v14863_v44, %v14863_v44 }
 0xa5b   : > { %17203 = vmatmul.mubr.bf16.vlgmr.msra.gmra.mrb[44].mxu1 %v14864_v26 }
 0xb2e   : > { %v14970_v61 = vpop.f32.mrb[44].mxu1 }
 0xb2f   : > { %v14971_v49 = vadd.f32 %v17126_v38, %v14970_v61  ;;  %v17204_v50 = vpop.f32.mrb[45].mxu1 }
 0xb30   : > { %v14973_v40 = vpop.f32.mrb[46].mxu1 }
 0xb31   : > { %v14976_v0 = vmax.f32 %v14971_v49, 0.0  ;;  %v17205_v54 = vpop.f32.mrb[47].mxu1 }
 0xb33   : > { %v14977_v19 = vpack.c.bf16 %v14976_v0, %v14976_v0 }
 0xb35   : > { %17223 = vmatmul.mubr.bf16.vlgmr.msra.gmra.mrb[40].mxu0 %v14977_v19 }
 0xc08   : > { %v15083_v58 = vpop.f32.mrb[40].mxu0 }
 0xc09   : > { %v15084_v22 = vadd.f32 %v17135_v53, %v15083_v58  ;;  %v17224_v59 = vpop.f32.mrb[41].mxu0 }
 0xc0a   : > { %v15086_v60 = vpop.f32.mrb[42].mxu0 }
 0xc0b   : > { %15089 = vst [vmem:[%s520_s28] sm:$0xff] %v15084_v22  ;;  %v17225_v4 = vpop.f32.mrb[43].mxu0 }
 0xc0c PF: > { %s27_s17 = sadd.s32 1, %s20010_s17  }
 0xc0d   : > { %p24_p2 = scmp.ge.s32.totalorder %s27_s17, 4  }
 0xc0f   :  { %26 = sbr.rel (!%p24_p2) target bundleno = 6 (0x6), region = 135 }
 0xc16   :  { %15109 = vsyncpa [#allocation3], 1 }
 0xc17   :  { %15111 = vsyncpa [#allocation3 + $0x1], 1 }
 0xc18   :  { %15112 = vsyncpa [#allocation5], 1 }
 0xc19   :  { %15113 = vsyncpa [#allocation8], 1 }
 0xc1a   :  { %15114 = vsyncpa [#allocation11], 1 }
 0xc1b   :  { %15115 = vsyncpa [#allocation14], 1 }
 0xc1c   :  { %15116 = vsyncpa [#allocation17], 1 }

</bundles_post_ra>
